<compile_context>
chip_gen: v7x
topology: tpu7x:2x2x1
jax: 0.10.0
libtpu: 0.0.40
codegen_flags: <defaults>
</compile_context>

<pallas_src>
import functools

import jax
import jax.numpy as jnp
from jax.experimental import pallas as pl
from jax.experimental.pallas import tpu as pltpu

BN_EPS = 1e-5


def _rup(x, m):
    return (x + m - 1) // m * m


def _pick_tk(kp):
    # kp is always a multiple of 128; above 1536 we step K in 512-chunks.
    return kp if kp <= 1536 else 512


# ----------------------------------------------------------------------------
# Pallas kernels
# ----------------------------------------------------------------------------
def _mm_kernel(relu, has_res, a_ref, b_ref, t_ref, *rest):
    """o += A @ B over the K grid axis (accumulate in the f32 output block);
    epilogue on last K step: y = acc + shift (+ residual) (+ ReLU)."""
    if has_res:
        r_ref, o_ref = rest
    else:
        (o_ref,) = rest

    k = pl.program_id(1)

    @pl.when(k == 0)
    def _():
        o_ref[...] = jnp.zeros_like(o_ref)

    o_ref[...] += jnp.dot(a_ref[...], b_ref[...],
                          preferred_element_type=jnp.float32)

    @pl.when(k == pl.num_programs(1) - 1)
    def _():
        y = o_ref[...] + t_ref[...]
        if has_res:
            y = y + r_ref[...]
        if relu:
            y = jnp.maximum(y, 0.0)
        o_ref[...] = y


def matmul_fused(a, b_p, t_p, n_out, relu=False, residual=None):
    """a:(M,K) f32  x  b_p:(Kp,Np) bf16 (BN-scale folded, padded), + shift
    t_p:(1,Np) f32, optional fused residual (M,n_out) f32 and ReLU.
    Returns (M, n_out) f32."""
    M, K = a.shape
    Kp, Np = b_p.shape
    assert Kp >= K and Np >= n_out
    tk = _pick_tk(Kp)
    assert Kp % tk == 0

    Mp = _rup(M, 8)
    if Mp <= 512:
        tm = Mp
    else:
        tm = 256                      # parallel M tiles (dual-TC on v7x)
        Mp = _rup(M, tm)

    a_p = jnp.pad(a.astype(jnp.bfloat16), ((0, Mp - M), (0, Kp - K)))

    in_arrays = [a_p, b_p, t_p]
    in_specs = [
        pl.BlockSpec((tm, tk), lambda m, k: (m, k)),
        pl.BlockSpec((tk, Np), lambda m, k: (k, 0)),
        pl.BlockSpec((1, Np), lambda m, k: (0, 0)),
    ]
    has_res = residual is not None
    if has_res:
        r_p = jnp.pad(residual.astype(jnp.float32),
                      ((0, Mp - M), (0, Np - n_out)))
        in_arrays.append(r_p)
        in_specs.append(pl.BlockSpec((tm, Np), lambda m, k: (m, 0)))

    out = pl.pallas_call(
        functools.partial(_mm_kernel, relu, has_res),
        out_shape=jax.ShapeDtypeStruct((Mp, Np), jnp.float32),
        grid_spec=pltpu.PrefetchScalarGridSpec(
            num_scalar_prefetch=0,
            grid=(Mp // tm, Kp // tk),
            in_specs=in_specs,
            out_specs=pl.BlockSpec((tm, Np), lambda m, k: (m, 0)),
        ),
        compiler_params=pltpu.CompilerParams(
            dimension_semantics=("parallel", "arbitrary"),
            vmem_limit_bytes=48 * 1024 * 1024,
        ),
    )(*in_arrays)
    return out[:M, :n_out]


def _max_over_taps_kernel(x_ref, o_ref):
    o_ref[...] = jnp.max(x_ref[...], axis=0)


def _mean_over_hw_kernel(x_ref, o_ref):
    o_ref[...] = jnp.mean(x_ref[...], axis=1)


# ----------------------------------------------------------------------------
# JAX glue: im2col, conv driver, pooling, blocks
# ----------------------------------------------------------------------------
def _im2col(x, kh, kw, stride, pad):
    # x: (N, H, W, C) -> (N*Ho*Wo, kh*kw*C), patch element order (kh, kw, C)
    N, H, W, C = x.shape
    xp = jnp.pad(x, ((0, 0), (pad, pad), (pad, pad), (0, 0)))
    Ho = (H + 2 * pad - kh) // stride + 1
    Wo = (W + 2 * pad - kw) // stride + 1
    cols = []
    for i in range(kh):
        for j in range(kw):
            cols.append(xp[:, i:i + stride * Ho:stride, j:j + stride * Wo:stride, :])
    p = jnp.stack(cols, axis=3)  # (N, Ho, Wo, kh*kw, C)
    return p.reshape(N * Ho * Wo, kh * kw * C), (N, Ho, Wo)


def conv_prepped(x, w_p, t_p, *, cout, kh, kw, stride, pad, relu,
                 residual=None):
    """Conv2d(bias=False)+BN(eval) with pre-folded/padded weights.
    Optionally fuses residual-add + ReLU into the matmul epilogue."""
    patches, (N, Ho, Wo) = _im2col(x, kh, kw, stride, pad)
    res2d = None
    if residual is not None:
        res2d = residual.reshape(N * Ho * Wo, cout)
    out = matmul_fused(patches, w_p, t_p, n_out=cout, relu=relu,
                       residual=res2d)
    return out.reshape(N, Ho, Wo, cout)


def maxpool_3x3_s2(x):
    # MaxPool2d(kernel_size=3, stride=2, padding=1), NHWC, row-tiled kernel.
    N, H, W, C = x.shape
    k, s, pad = 3, 2, 1
    xp = jnp.pad(x, ((0, 0), (pad, pad), (pad, pad), (0, 0)),
                 constant_values=-jnp.inf)
    Ho = (H + 2 * pad - k) // s + 1
    Wo = (W + 2 * pad - k) // s + 1
    parts = []
    for i in range(k):
        for j in range(k):
            parts.append(xp[:, i:i + s * Ho:s, j:j + s * Wo:s, :])
    M = N * Ho * Wo
    stacked = jnp.stack(parts, axis=0).reshape(k * k, M, C)
    tm = M if M <= 1024 else 1024
    out = pl.pallas_call(
        _max_over_taps_kernel,
        out_shape=jax.ShapeDtypeStruct((M, C), x.dtype),
        grid=(pl.cdiv(M, tm),),
        in_specs=[pl.BlockSpec((k * k, tm, C), lambda m: (0, m, 0))],
        out_specs=pl.BlockSpec((tm, C), lambda m: (m, 0)),
    )(stacked)
    return out.reshape(N, Ho, Wo, C)


def global_avg_pool(x):
    # F.adaptive_avg_pool2d(x, 1).reshape(N, -1); tiny at the final 512-ch map.
    N, H, W, C = x.shape
    return pl.pallas_call(
        _mean_over_hw_kernel,
        out_shape=jax.ShapeDtypeStruct((N, C), x.dtype),
    )(x.reshape(N, H * W, C))


def basic_block(x, q, cout, stride):
    identity = x
    out = conv_prepped(x, *q['conv1'], cout=cout, kh=3, kw=3, stride=stride,
                       pad=1, relu=True)
    if 'down' in q:
        identity = conv_prepped(x, *q['down'], cout=cout, kh=1, kw=1,
                                stride=stride, pad=0, relu=False)
    # second conv: BN shift + residual add + ReLU fused into the epilogue
    out = conv_prepped(out, *q['conv2'], cout=cout, kh=3, kw=3, stride=1,
                       pad=1, relu=True, residual=identity)
    return out


STAGE_CFG = [(64, 3, 1), (128, 4, 2), (256, 6, 2), (512, 3, 2)]  # (ch, blocks, stride)

HEAD_DIMS = (168, 11, 7)


def resnet34_forward(x_nchw, prepared):
    x = jnp.transpose(x_nchw, (0, 2, 3, 1)).astype(jnp.float32)  # NCHW -> NHWC
    x = conv_prepped(x, *prepared['conv1'], cout=64, kh=7, kw=7, stride=2,
                     pad=3, relu=True)
    x = maxpool_3x3_s2(x)
    for si, (c, n, s) in enumerate(STAGE_CFG):
        for bi in range(n):
            stride = s if bi == 0 else 1
            x = basic_block(x, prepared[f'layer{si + 1}_{bi}'], c, stride)
    feat = global_avg_pool(x)  # (N, 512)
    # all three heads in a single matmul, then slice
    total = sum(HEAD_DIMS)
    logits = matmul_fused(feat, *prepared['heads'], n_out=total, relu=False)
    o0 = logits[:, :HEAD_DIMS[0]]
    o1 = logits[:, HEAD_DIMS[0]:HEAD_DIMS[0] + HEAD_DIMS[1]]
    o2 = logits[:, HEAD_DIMS[0] + HEAD_DIMS[1]:total]
    return (o0, o1, o2)


# ----------------------------------------------------------------------------
# One-time (outside jit) weight preparation: BN fold, OIHW->(K,Cout), padding,
# bf16 cast.  The prepared pytree contains only arrays.
# ----------------------------------------------------------------------------
def _prep_matmul_weights(wm, shift):
    K, N = wm.shape
    Kp0 = _rup(K, 128)
    tk = _pick_tk(Kp0)
    Kp = _rup(K, tk)
    Np = _rup(N, 128)
    w_p = jnp.pad(wm, ((0, Kp - K), (0, Np - N))).astype(jnp.bfloat16)
    t_p = jnp.pad(shift, (0, Np - N)).reshape(1, Np).astype(jnp.float32)
    return (w_p, t_p)


def _prep_conv(w, bn):
    Cout, Cin, kh, kw = w.shape
    K = kh * kw * Cin
    wm = jnp.transpose(w, (2, 3, 1, 0)).reshape(K, Cout)
    gamma, beta, mean, var = bn
    scale = gamma * jax.lax.rsqrt(var + BN_EPS)
    shift = beta - mean * scale
    return _prep_matmul_weights(wm * scale[None, :], shift)


def prepare_params(params):
    prepared = {'conv1': _prep_conv(params['conv1_w'], params['bn1'])}
    for si, (c, n, s) in enumerate(STAGE_CFG):
        for bi in range(n):
            p = params[f'layer{si + 1}_{bi}']
            q = {
                'conv1': _prep_conv(p['conv1_w'], p['bn1']),
                'conv2': _prep_conv(p['conv2_w'], p['bn2']),
            }
            if 'down_w' in p:
                q['down'] = _prep_conv(p['down_w'], p['down_bn'])
            prepared[f'layer{si + 1}_{bi}'] = q
    # merge the three heads: concat along output dim
    ws, bs = [], []
    for name in ('head0', 'head1', 'head2'):
        w, b = params[name]      # w: (out_dim, 512) PyTorch Linear layout
        ws.append(w.T)
        bs.append(b)
    prepared['heads'] = _prep_matmul_weights(jnp.concatenate(ws, axis=1),
                                             jnp.concatenate(bs))
    return prepared


# ----------------------------------------------------------------------------
# Deterministic synthetic parameters (shapes match resnet34 + the 3 heads)
# ----------------------------------------------------------------------------
def init_params(key):
    keys = iter(jax.random.split(key, 1024))

    def nk():
        return next(keys)

    def conv_w(k, cout, cin, kh, kw):
        fan_in = cin * kh * kw
        return jax.random.normal(k, (cout, cin, kh, kw), jnp.float32) * (2.0 / fan_in) ** 0.5

    def bn_p(k, c):
        k1, k2, k3, k4 = jax.random.split(k, 4)
        gamma = 1.0 + 0.1 * jax.random.normal(k1, (c,), jnp.float32)
        beta = 0.1 * jax.random.normal(k2, (c,), jnp.float32)
        mean = 0.1 * jax.random.normal(k3, (c,), jnp.float32)
        var = 1.0 + 0.1 * jax.random.uniform(k4, (c,), jnp.float32)
        return (gamma, beta, mean, var)

    params = {'conv1_w': conv_w(nk(), 64, 3, 7, 7), 'bn1': bn_p(nk(), 64)}
    in_c = 64
    for si, (c, n, s) in enumerate(STAGE_CFG):
        for bi in range(n):
            stride = s if bi == 0 else 1
            p = {
                'conv1_w': conv_w(nk(), c, in_c, 3, 3), 'bn1': bn_p(nk(), c),
                'conv2_w': conv_w(nk(), c, c, 3, 3), 'bn2': bn_p(nk(), c),
            }
            if stride != 1 or in_c != c:
                p['down_w'] = conv_w(nk(), c, in_c, 1, 1)
                p['down_bn'] = bn_p(nk(), c)
            params[f'layer{si + 1}_{bi}'] = p
            in_c = c
    for name, dim in (('head0', 168), ('head1', 11), ('head2', 7)):
        w = 0.02 * jax.random.normal(nk(), (dim, 512), jnp.float32)
        b = 0.01 * jax.random.normal(nk(), (dim,), jnp.float32)
        params[name] = (w, b)
    return params


if __name__ == "__main__":
    key = jax.random.PRNGKey(0)
    pkey, xkey = jax.random.split(key)
    params = init_params(pkey)
    prepared = prepare_params(params)   # one-time weight fold/reshape/pad

    # Small input consistent with the module: NCHW, 3 channels (ImageNet-style).
    x = jax.random.normal(xkey, (2, 3, 32, 32), jnp.float32)

    fwd = jax.jit(resnet34_forward)
    l0, l1, l2 = fwd(x, prepared)
    jax.block_until_ready((l0, l1, l2))

    assert l0.shape == (2, 168) and l0.dtype == jnp.float32
    assert l1.shape == (2, 11) and l1.dtype == jnp.float32
    assert l2.shape == (2, 7) and l2.dtype == jnp.float32
    assert all(bool(jnp.all(jnp.isfinite(t))) for t in (l0, l1, l2))
    print("KERNEL_OK")
</pallas_src>

<mosaic_0001>
module attributes {stable_mosaic.version = 11 : i64} {
  func.func @_mm_kernel(%arg0: i32, %arg1: i32, %arg2: memref<512x256xbf16, #tpu.memory_space<vmem>>, %arg3: memref<256x128xbf16, #tpu.memory_space<vmem>>, %arg4: memref<1x128xf32, #tpu.memory_space<vmem>>, %arg5: memref<512x128xf32, #tpu.memory_space<vmem>>) attributes {dimension_semantics = [#tpu.dimension_semantics<parallel>, #tpu.dimension_semantics<arbitrary>], iteration_bounds = array<i64: 1, 1>, scalar_prefetch = 0 : i64, scratch_operands = 0 : i64, tpu.core_type = #tpu.core_type<tc>, window_params = [{transform_indices = @transform_0, window_bounds = array<i64: 512, 256>}, {transform_indices = @transform_1, window_bounds = array<i64: 256, 128>}, {pipeline_mode = #tpu.pipeline_mode<synchronous>, transform_indices = @transform_2, window_bounds = array<i64: 1, 128>}, {transform_indices = @transform_3, window_bounds = array<i64: 512, 128>}]} {
    %c0_i32 = arith.constant 0 : i32
    %0 = arith.cmpi eq, %arg1, %c0_i32 : i32
    %1 = arith.extui %0 : i1 to i32
    %c0_i32_0 = arith.constant 0 : i32
    %2 = arith.cmpi ne, %1, %c0_i32_0 : i32
    scf.if %2 {
      %cst_10 = arith.constant 0.000000e+00 : f32
      %12 = vector.broadcast %cst_10 : f32 to vector<512x128xf32>
      %c0_11 = arith.constant 0 : index
      %c0_12 = arith.constant 0 : index
      %13 = vector.load %arg5[%c0_11, %c0_12] : memref<512x128xf32, #tpu.memory_space<vmem>>, vector<512x128xf32>
      tpu.vector_store %arg5[%c0_11, %c0_12], %12 {strides = array<i32>} : memref<512x128xf32, #tpu.memory_space<vmem>>, vector<512x128xf32>,
    } else {
    }
    %c0 = arith.constant 0 : index
    %c0_1 = arith.constant 0 : index
    %3 = vector.load %arg5[%c0, %c0_1] : memref<512x128xf32, #tpu.memory_space<vmem>>, vector<512x128xf32>
    %c0_2 = arith.constant 0 : index
    %c0_3 = arith.constant 0 : index
    %4 = vector.load %arg2[%c0_2, %c0_3] : memref<512x256xbf16, #tpu.memory_space<vmem>>, vector<512x256xbf16>
    %c0_4 = arith.constant 0 : index
    %c0_5 = arith.constant 0 : index
    %5 = vector.load %arg3[%c0_4, %c0_5] : memref<256x128xbf16, #tpu.memory_space<vmem>>, vector<256x128xbf16>
    %cst = arith.constant dense<0.000000e+00> : vector<512x128xf32>
    %6 = tpu.matmul %4, %5, %cst {dimension_numbers = #tpu.dot_dimension_numbers<[1], [0], [0], [1], [0, 0, 1, 1], [], []>} : vector<512x256xbf16>, vector<256x128xbf16>, vector<512x128xf32> -> vector<512x128xf32>
    %7 = arith.addf %3, %6 : vector<512x128xf32>
    %c0_6 = arith.constant 0 : index
    %c0_7 = arith.constant 0 : index
    %8 = vector.load %arg5[%c0_6, %c0_7] : memref<512x128xf32, #tpu.memory_space<vmem>>, vector<512x128xf32>
    tpu.vector_store %arg5[%c0_6, %c0_7], %7 {strides = array<i32>} : memref<512x128xf32, #tpu.memory_space<vmem>>, vector<512x128xf32>,
    %c0_i32_8 = arith.constant 0 : i32
    %9 = arith.cmpi eq, %arg1, %c0_i32_8 : i32
    %10 = arith.extui %9 : i1 to i32
    %c0_i32_9 = arith.constant 0 : i32
    %11 = arith.cmpi ne, %10, %c0_i32_9 : i32
    scf.if %11 {
      %c0_10 = arith.constant 0 : index
      %c0_11 = arith.constant 0 : index
      %12 = vector.load %arg5[%c0_10, %c0_11] : memref<512x128xf32, #tpu.memory_space<vmem>>, vector<512x128xf32>
      %c0_12 = arith.constant 0 : index
      %c0_13 = arith.constant 0 : index
      %13 = vector.load %arg4[%c0_12, %c0_13] : memref<1x128xf32, #tpu.memory_space<vmem>>, vector<1x128xf32>
      %14 = vector.broadcast %13 : vector<1x128xf32> to vector<512x128xf32>
      %15 = arith.addf %12, %14 : vector<512x128xf32>
      %cst_14 = arith.constant 0.000000e+00 : f32
      %16 = vector.broadcast %cst_14 : f32 to vector<512x128xf32>
      %17 = arith.maximumf %15, %16 : vector<512x128xf32>
      %c0_15 = arith.constant 0 : index
      %c0_16 = arith.constant 0 : index
      %18 = vector.load %arg5[%c0_15, %c0_16] : memref<512x128xf32, #tpu.memory_space<vmem>>, vector<512x128xf32>
      tpu.vector_store %arg5[%c0_15, %c0_16], %17 {strides = array<i32>} : memref<512x128xf32, #tpu.memory_space<vmem>>, vector<512x128xf32>,
    } else {
    }
    return
  }
  func.func @transform_0(%arg0: i32, %arg1: i32) -> (i32, i32) {
    %c0_i32 = arith.constant 0 : i32
    return %arg0, %arg1 : i32, i32
  }
  func.func @transform_1(%arg0: i32, %arg1: i32) -> (i32, i32) {
    %c0_i32 = arith.constant 0 : i32
    %c0_i32_0 = arith.constant 0 : i32
    return %arg1, %c0_i32 : i32, i32
  }
  func.func @transform_2(%arg0: i32, %arg1: i32) -> (i32, i32) {
    %c0_i32 = arith.constant 0 : i32
    %c0_i32_0 = arith.constant 0 : i32
    %c0_i32_1 = arith.constant 0 : i32
    return %c0_i32, %c0_i32_0 : i32, i32
  }
  func.func @transform_3(%arg0: i32, %arg1: i32) -> (i32, i32) {
    %c0_i32 = arith.constant 0 : i32
    %c0_i32_0 = arith.constant 0 : i32
    return %arg0, %c0_i32 : i32, i32
  }
}

module attributes {stable_mosaic.version = 11 : i64} {
  func.func @_max_over_taps_kernel(%arg0: i32, %arg1: memref<9x128x64xf32, #tpu.memory_space<vmem>>, %arg2: memref<128x64xf32, #tpu.memory_space<vmem>>) attributes {dimension_semantics = [#tpu.dimension_semantics<arbitrary>], iteration_bounds = array<i64: 1>, scalar_prefetch = 0 : i64, scratch_operands = 0 : i64, tpu.core_type = #tpu.core_type<tc>, window_params = [{transform_indices = @transform_0, window_bounds = array<i64: 9, 128, 64>}, {transform_indices = @transform_1, window_bounds = array<i64: 128, 64>}]} {
    %c0 = arith.constant 0 : index
    %c0_0 = arith.constant 0 : index
    %c0_1 = arith.constant 0 : index
    %0 = vector.load %arg1[%c0, %c0_0, %c0_1] : memref<9x128x64xf32, #tpu.memory_space<vmem>>, vector<9x128x64xf32>
    %cst = arith.constant dense<0xFF800000> : vector<128x64xf32>
    %1 = vector.multi_reduction <maximumf>, %0, %cst [0] : vector<9x128x64xf32> to vector<128x64xf32>
    %c0_2 = arith.constant 0 : index
    %c0_3 = arith.constant 0 : index
    %2 = vector.load %arg2[%c0_2, %c0_3] : memref<128x64xf32, #tpu.memory_space<vmem>>, vector<128x64xf32>
    tpu.vector_store %arg2[%c0_2, %c0_3], %1 {strides = array<i32>} : memref<128x64xf32, #tpu.memory_space<vmem>>, vector<128x64xf32>,
    return
  }
  func.func @transform_0(%arg0: i32) -> (i32, i32, i32) {
    %c0_i32 = arith.constant 0 : i32
    %c0_i32_0 = arith.constant 0 : i32
    %c0_i32_1 = arith.constant 0 : i32
    return %c0_i32, %arg0, %c0_i32_0 : i32, i32, i32
  }
  func.func @transform_1(%arg0: i32) -> (i32, i32) {
    %c0_i32 = arith.constant 0 : i32
    %c0_i32_0 = arith.constant 0 : i32
    return %arg0, %c0_i32 : i32, i32
  }
}

module attributes {stable_mosaic.version = 11 : i64} {
  func.func @_mm_kernel(%arg0: i32, %arg1: i32, %arg2: memref<128x640xbf16, #tpu.memory_space<vmem>>, %arg3: memref<640x128xbf16, #tpu.memory_space<vmem>>, %arg4: memref<1x128xf32, #tpu.memory_space<vmem>>, %arg5: memref<128x128xf32, #tpu.memory_space<vmem>>) attributes {dimension_semantics = [#tpu.dimension_semantics<parallel>, #tpu.dimension_semantics<arbitrary>], iteration_bounds = array<i64: 1, 1>, scalar_prefetch = 0 : i64, scratch_operands = 0 : i64, tpu.core_type = #tpu.core_type<tc>, window_params = [{transform_indices = @transform_0, window_bounds = array<i64: 128, 640>}, {transform_indices = @transform_1, window_bounds = array<i64: 640, 128>}, {pipeline_mode = #tpu.pipeline_mode<synchronous>, transform_indices = @transform_2, window_bounds = array<i64: 1, 128>}, {transform_indices = @transform_3, window_bounds = array<i64: 128, 128>}]} {
    %c0_i32 = arith.constant 0 : i32
    %0 = arith.cmpi eq, %arg1, %c0_i32 : i32
    %1 = arith.extui %0 : i1 to i32
    %c0_i32_0 = arith.constant 0 : i32
    %2 = arith.cmpi ne, %1, %c0_i32_0 : i32
    scf.if %2 {
      %cst_10 = arith.constant 0.000000e+00 : f32
      %12 = vector.broadcast %cst_10 : f32 to vector<128x128xf32>
      %c0_11 = arith.constant 0 : index
      %c0_12 = arith.constant 0 : index
      %13 = vector.load %arg5[%c0_11, %c0_12] : memref<128x128xf32, #tpu.memory_space<vmem>>, vector<128x128xf32>
      tpu.vector_store %arg5[%c0_11, %c0_12], %12 {strides = array<i32>} : memref<128x128xf32, #tpu.memory_space<vmem>>, vector<128x128xf32>,
    } else {
    }
    %c0 = arith.constant 0 : index
    %c0_1 = arith.constant 0 : index
    %3 = vector.load %arg5[%c0, %c0_1] : memref<128x128xf32, #tpu.memory_space<vmem>>, vector<128x128xf32>
    %c0_2 = arith.constant 0 : index
    %c0_3 = arith.constant 0 : index
    %4 = vector.load %arg2[%c0_2, %c0_3] : memref<128x640xbf16, #tpu.memory_space<vmem>>, vector<128x640xbf16>
    %c0_4 = arith.constant 0 : index
    %c0_5 = arith.constant 0 : index
    %5 = vector.load %arg3[%c0_4, %c0_5] : memref<640x128xbf16, #tpu.memory_space<vmem>>, vector<640x128xbf16>
    %cst = arith.constant dense<0.000000e+00> : vector<128x128xf32>
    %6 = tpu.matmul %4, %5, %cst {dimension_numbers = #tpu.dot_dimension_numbers<[1], [0], [0], [1], [0, 0, 1, 1], [], []>} : vector<128x640xbf16>, vector<640x128xbf16>, vector<128x128xf32> -> vector<128x128xf32>
    %7 = arith.addf %3, %6 : vector<128x128xf32>
    %c0_6 = arith.constant 0 : index
    %c0_7 = arith.constant 0 : index
    %8 = vector.load %arg5[%c0_6, %c0_7] : memref<128x128xf32, #tpu.memory_space<vmem>>, vector<128x128xf32>
    tpu.vector_store %arg5[%c0_6, %c0_7], %7 {strides = array<i32>} : memref<128x128xf32, #tpu.memory_space<vmem>>, vector<128x128xf32>,
    %c0_i32_8 = arith.constant 0 : i32
    %9 = arith.cmpi eq, %arg1, %c0_i32_8 : i32
    %10 = arith.extui %9 : i1 to i32
    %c0_i32_9 = arith.constant 0 : i32
    %11 = arith.cmpi ne, %10, %c0_i32_9 : i32
    scf.if %11 {
      %c0_10 = arith.constant 0 : index
      %c0_11 = arith.constant 0 : index
      %12 = vector.load %arg5[%c0_10, %c0_11] : memref<128x128xf32, #tpu.memory_space<vmem>>, vector<128x128xf32>
      %c0_12 = arith.constant 0 : index
      %c0_13 = arith.constant 0 : index
      %13 = vector.load %arg4[%c0_12, %c0_13] : memref<1x128xf32, #tpu.memory_space<vmem>>, vector<1x128xf32>
      %14 = vector.broadcast %13 : vector<1x128xf32> to vector<128x128xf32>
      %15 = arith.addf %12, %14 : vector<128x128xf32>
      %cst_14 = arith.constant 0.000000e+00 : f32
      %16 = vector.broadcast %cst_14 : f32 to vector<128x128xf32>
      %17 = arith.maximumf %15, %16 : vector<128x128xf32>
      %c0_15 = arith.constant 0 : index
      %c0_16 = arith.constant 0 : index
      %18 = vector.load %arg5[%c0_15, %c0_16] : memref<128x128xf32, #tpu.memory_space<vmem>>, vector<128x128xf32>
      tpu.vector_store %arg5[%c0_15, %c0_16], %17 {strides = array<i32>} : memref<128x128xf32, #tpu.memory_space<vmem>>, vector<128x128xf32>,
    } else {
    }
    return
  }
  func.func @transform_0(%arg0: i32, %arg1: i32) -> (i32, i32) {
    %c0_i32 = arith.constant 0 : i32
    return %arg0, %arg1 : i32, i32
  }
  func.func @transform_1(%arg0: i32, %arg1: i32) -> (i32, i32) {
    %c0_i32 = arith.constant 0 : i32
    %c0_i32_0 = arith.constant 0 : i32
    return %arg1, %c0_i32 : i32, i32
  }
  func.func @transform_2(%arg0: i32, %arg1: i32) -> (i32, i32) {
    %c0_i32 = arith.constant 0 : i32
    %c0_i32_0 = arith.constant 0 : i32
    %c0_i32_1 = arith.constant 0 : i32
    return %c0_i32, %c0_i32_0 : i32, i32
  }
  func.func @transform_3(%arg0: i32, %arg1: i32) -> (i32, i32) {
    %c0_i32 = arith.constant 0 : i32
    %c0_i32_0 = arith.constant 0 : i32
    return %arg0, %c0_i32 : i32, i32
  }
}

module attributes {stable_mosaic.version = 11 : i64} {
  func.func @_mm_kernel(%arg0: i32, %arg1: i32, %arg2: memref<128x640xbf16, #tpu.memory_space<vmem>>, %arg3: memref<640x128xbf16, #tpu.memory_space<vmem>>, %arg4: memref<1x128xf32, #tpu.memory_space<vmem>>, %arg5: memref<128x128xf32, #tpu.memory_space<vmem>>, %arg6: memref<128x128xf32, #tpu.memory_space<vmem>>) attributes {dimension_semantics = [#tpu.dimension_semantics<parallel>, #tpu.dimension_semantics<arbitrary>], iteration_bounds = array<i64: 1, 1>, scalar_prefetch = 0 : i64, scratch_operands = 0 : i64, tpu.core_type = #tpu.core_type<tc>, window_params = [{transform_indices = @transform_0, window_bounds = array<i64: 128, 640>}, {transform_indices = @transform_1, window_bounds = array<i64: 640, 128>}, {pipeline_mode = #tpu.pipeline_mode<synchronous>, transform_indices = @transform_2, window_bounds = array<i64: 1, 128>}, {transform_indices = @transform_3, window_bounds = array<i64: 128, 128>}, {transform_indices = @transform_4, window_bounds = array<i64: 128, 128>}]} {
    %c0_i32 = arith.constant 0 : i32
    %0 = arith.cmpi eq, %arg1, %c0_i32 : i32
    %1 = arith.extui %0 : i1 to i32
    %c0_i32_0 = arith.constant 0 : i32
    %2 = arith.cmpi ne, %1, %c0_i32_0 : i32
    scf.if %2 {
      %cst_10 = arith.constant 0.000000e+00 : f32
      %12 = vector.broadcast %cst_10 : f32 to vector<128x128xf32>
      %c0_11 = arith.constant 0 : index
      %c0_12 = arith.constant 0 : index
      %13 = vector.load %arg6[%c0_11, %c0_12] : memref<128x128xf32, #tpu.memory_space<vmem>>, vector<128x128xf32>
      tpu.vector_store %arg6[%c0_11, %c0_12], %12 {strides = array<i32>} : memref<128x128xf32, #tpu.memory_space<vmem>>, vector<128x128xf32>,
    } else {
    }
    %c0 = arith.constant 0 : index
    %c0_1 = arith.constant 0 : index
    %3 = vector.load %arg6[%c0, %c0_1] : memref<128x128xf32, #tpu.memory_space<vmem>>, vector<128x128xf32>
    %c0_2 = arith.constant 0 : index
    %c0_3 = arith.constant 0 : index
    %4 = vector.load %arg2[%c0_2, %c0_3] : memref<128x640xbf16, #tpu.memory_space<vmem>>, vector<128x640xbf16>
    %c0_4 = arith.constant 0 : index
    %c0_5 = arith.constant 0 : index
    %5 = vector.load %arg3[%c0_4, %c0_5] : memref<640x128xbf16, #tpu.memory_space<vmem>>, vector<640x128xbf16>
    %cst = arith.constant dense<0.000000e+00> : vector<128x128xf32>
    %6 = tpu.matmul %4, %5, %cst {dimension_numbers = #tpu.dot_dimension_numbers<[1], [0], [0], [1], [0, 0, 1, 1], [], []>} : vector<128x640xbf16>, vector<640x128xbf16>, vector<128x128xf32> -> vector<128x128xf32>
    %7 = arith.addf %3, %6 : vector<128x128xf32>
    %c0_6 = arith.constant 0 : index
    %c0_7 = arith.constant 0 : index
    %8 = vector.load %arg6[%c0_6, %c0_7] : memref<128x128xf32, #tpu.memory_space<vmem>>, vector<128x128xf32>
    tpu.vector_store %arg6[%c0_6, %c0_7], %7 {strides = array<i32>} : memref<128x128xf32, #tpu.memory_space<vmem>>, vector<128x128xf32>,
    %c0_i32_8 = arith.constant 0 : i32
    %9 = arith.cmpi eq, %arg1, %c0_i32_8 : i32
    %10 = arith.extui %9 : i1 to i32
    %c0_i32_9 = arith.constant 0 : i32
    %11 = arith.cmpi ne, %10, %c0_i32_9 : i32
    scf.if %11 {
      %c0_10 = arith.constant 0 : index
      %c0_11 = arith.constant 0 : index
      %12 = vector.load %arg6[%c0_10, %c0_11] : memref<128x128xf32, #tpu.memory_space<vmem>>, vector<128x128xf32>
      %c0_12 = arith.constant 0 : index
      %c0_13 = arith.constant 0 : index
      %13 = vector.load %arg4[%c0_12, %c0_13] : memref<1x128xf32, #tpu.memory_space<vmem>>, vector<1x128xf32>
      %14 = vector.broadcast %13 : vector<1x128xf32> to vector<128x128xf32>
      %15 = arith.addf %12, %14 : vector<128x128xf32>
      %c0_14 = arith.constant 0 : index
      %c0_15 = arith.constant 0 : index
      %16 = vector.load %arg5[%c0_14, %c0_15] : memref<128x128xf32, #tpu.memory_space<vmem>>, vector<128x128xf32>
      %17 = arith.addf %15, %16 : vector<128x128xf32>
      %cst_16 = arith.constant 0.000000e+00 : f32
      %18 = vector.broadcast %cst_16 : f32 to vector<128x128xf32>
      %19 = arith.maximumf %17, %18 : vector<128x128xf32>
      %c0_17 = arith.constant 0 : index
      %c0_18 = arith.constant 0 : index
      %20 = vector.load %arg6[%c0_17, %c0_18] : memref<128x128xf32, #tpu.memory_space<vmem>>, vector<128x128xf32>
      tpu.vector_store %arg6[%c0_17, %c0_18], %19 {strides = array<i32>} : memref<128x128xf32, #tpu.memory_space<vmem>>, vector<128x128xf32>,
    } else {
    }
    return
  }
  func.func @transform_0(%arg0: i32, %arg1: i32) -> (i32, i32) {
    %c0_i32 = arith.constant 0 : i32
    return %arg0, %arg1 : i32, i32
  }
  func.func @transform_1(%arg0: i32, %arg1: i32) -> (i32, i32) {
    %c0_i32 = arith.constant 0 : i32
    %c0_i32_0 = arith.constant 0 : i32
    return %arg1, %c0_i32 : i32, i32
  }
  func.func @transform_2(%arg0: i32, %arg1: i32) -> (i32, i32) {
    %c0_i32 = arith.constant 0 : i32
    %c0_i32_0 = arith.constant 0 : i32
    %c0_i32_1 = arith.constant 0 : i32
    return %c0_i32, %c0_i32_0 : i32, i32
  }
  func.func @transform_3(%arg0: i32, %arg1: i32) -> (i32, i32) {
    %c0_i32 = arith.constant 0 : i32
    %c0_i32_0 = arith.constant 0 : i32
    return %arg0, %c0_i32 : i32, i32
  }
  func.func @transform_4(%arg0: i32, %arg1: i32) -> (i32, i32) {
    %c0_i32 = arith.constant 0 : i32
    %c0_i32_0 = arith.constant 0 : i32
    return %arg0, %c0_i32 : i32, i32
  }
}

module attributes {stable_mosaic.version = 11 : i64} {
  func.func @_mm_kernel(%arg0: i32, %arg1: i32, %arg2: memref<32x640xbf16, #tpu.memory_space<vmem>>, %arg3: memref<640x128xbf16, #tpu.memory_space<vmem>>, %arg4: memref<1x128xf32, #tpu.memory_space<vmem>>, %arg5: memref<32x128xf32, #tpu.memory_space<vmem>>) attributes {dimension_semantics = [#tpu.dimension_semantics<parallel>, #tpu.dimension_semantics<arbitrary>], iteration_bounds = array<i64: 1, 1>, scalar_prefetch = 0 : i64, scratch_operands = 0 : i64, tpu.core_type = #tpu.core_type<tc>, window_params = [{transform_indices = @transform_0, window_bounds = array<i64: 32, 640>}, {transform_indices = @transform_1, window_bounds = array<i64: 640, 128>}, {pipeline_mode = #tpu.pipeline_mode<synchronous>, transform_indices = @transform_2, window_bounds = array<i64: 1, 128>}, {transform_indices = @transform_3, window_bounds = array<i64: 32, 128>}]} {
    %c0_i32 = arith.constant 0 : i32
    %0 = arith.cmpi eq, %arg1, %c0_i32 : i32
    %1 = arith.extui %0 : i1 to i32
    %c0_i32_0 = arith.constant 0 : i32
    %2 = arith.cmpi ne, %1, %c0_i32_0 : i32
    scf.if %2 {
      %cst_10 = arith.constant 0.000000e+00 : f32
      %12 = vector.broadcast %cst_10 : f32 to vector<32x128xf32>
      %c0_11 = arith.constant 0 : index
      %c0_12 = arith.constant 0 : index
      %13 = vector.load %arg5[%c0_11, %c0_12] : memref<32x128xf32, #tpu.memory_space<vmem>>, vector<32x128xf32>
      tpu.vector_store %arg5[%c0_11, %c0_12], %12 {strides = array<i32>} : memref<32x128xf32, #tpu.memory_space<vmem>>, vector<32x128xf32>,
    } else {
    }
    %c0 = arith.constant 0 : index
    %c0_1 = arith.constant 0 : index
    %3 = vector.load %arg5[%c0, %c0_1] : memref<32x128xf32, #tpu.memory_space<vmem>>, vector<32x128xf32>
    %c0_2 = arith.constant 0 : index
    %c0_3 = arith.constant 0 : index
    %4 = vector.load %arg2[%c0_2, %c0_3] : memref<32x640xbf16, #tpu.memory_space<vmem>>, vector<32x640xbf16>
    %c0_4 = arith.constant 0 : index
    %c0_5 = arith.constant 0 : index
    %5 = vector.load %arg3[%c0_4, %c0_5] : memref<640x128xbf16, #tpu.memory_space<vmem>>, vector<640x128xbf16>
    %cst = arith.constant dense<0.000000e+00> : vector<32x128xf32>
    %6 = tpu.matmul %4, %5, %cst {dimension_numbers = #tpu.dot_dimension_numbers<[1], [0], [0], [1], [0, 0, 1, 1], [], []>} : vector<32x640xbf16>, vector<640x128xbf16>, vector<32x128xf32> -> vector<32x128xf32>
    %7 = arith.addf %3, %6 : vector<32x128xf32>
    %c0_6 = arith.constant 0 : index
    %c0_7 = arith.constant 0 : index
    %8 = vector.load %arg5[%c0_6, %c0_7] : memref<32x128xf32, #tpu.memory_space<vmem>>, vector<32x128xf32>
    tpu.vector_store %arg5[%c0_6, %c0_7], %7 {strides = array<i32>} : memref<32x128xf32, #tpu.memory_space<vmem>>, vector<32x128xf32>,
    %c0_i32_8 = arith.constant 0 : i32
    %9 = arith.cmpi eq, %arg1, %c0_i32_8 : i32
    %10 = arith.extui %9 : i1 to i32
    %c0_i32_9 = arith.constant 0 : i32
    %11 = arith.cmpi ne, %10, %c0_i32_9 : i32
    scf.if %11 {
      %c0_10 = arith.constant 0 : index
      %c0_11 = arith.constant 0 : index
      %12 = vector.load %arg5[%c0_10, %c0_11] : memref<32x128xf32, #tpu.memory_space<vmem>>, vector<32x128xf32>
      %c0_12 = arith.constant 0 : index
      %c0_13 = arith.constant 0 : index
      %13 = vector.load %arg4[%c0_12, %c0_13] : memref<1x128xf32, #tpu.memory_space<vmem>>, vector<1x128xf32>
      %14 = vector.broadcast %13 : vector<1x128xf32> to vector<32x128xf32>
      %15 = arith.addf %12, %14 : vector<32x128xf32>
      %cst_14 = arith.constant 0.000000e+00 : f32
      %16 = vector.broadcast %cst_14 : f32 to vector<32x128xf32>
      %17 = arith.maximumf %15, %16 : vector<32x128xf32>
      %c0_15 = arith.constant 0 : index
      %c0_16 = arith.constant 0 : index
      %18 = vector.load %arg5[%c0_15, %c0_16] : memref<32x128xf32, #tpu.memory_space<vmem>>, vector<32x128xf32>
      tpu.vector_store %arg5[%c0_15, %c0_16], %17 {strides = array<i32>} : memref<32x128xf32, #tpu.memory_space<vmem>>, vector<32x128xf32>,
    } else {
    }
    return
  }
  func.func @transform_0(%arg0: i32, %arg1: i32) -> (i32, i32) {
    %c0_i32 = arith.constant 0 : i32
    return %arg0, %arg1 : i32, i32
  }
  func.func @transform_1(%arg0: i32, %arg1: i32) -> (i32, i32) {
    %c0_i32 = arith.constant 0 : i32
    %c0_i32_0 = arith.constant 0 : i32
    return %arg1, %c0_i32 : i32, i32
  }
  func.func @transform_2(%arg0: i32, %arg1: i32) -> (i32, i32) {
    %c0_i32 = arith.constant 0 : i32
    %c0_i32_0 = arith.constant 0 : i32
    %c0_i32_1 = arith.constant 0 : i32
    return %c0_i32, %c0_i32_0 : i32, i32
  }
  func.func @transform_3(%arg0: i32, %arg1: i32) -> (i32, i32) {
    %c0_i32 = arith.constant 0 : i32
    %c0_i32_0 = arith.constant 0 : i32
    return %arg0, %c0_i32 : i32, i32
  }
}

module attributes {stable_mosaic.version = 11 : i64} {
  func.func @_mm_kernel(%arg0: i32, %arg1: i32, %arg2: memref<32x128xbf16, #tpu.memory_space<vmem>>, %arg3: memref<128x128xbf16, #tpu.memory_space<vmem>>, %arg4: memref<1x128xf32, #tpu.memory_space<vmem>>, %arg5: memref<32x128xf32, #tpu.memory_space<vmem>>) attributes {dimension_semantics = [#tpu.dimension_semantics<parallel>, #tpu.dimension_semantics<arbitrary>], iteration_bounds = array<i64: 1, 1>, scalar_prefetch = 0 : i64, scratch_operands = 0 : i64, tpu.core_type = #tpu.core_type<tc>, window_params = [{transform_indices = @transform_0, window_bounds = array<i64: 32, 128>}, {transform_indices = @transform_1, window_bounds = array<i64: 128, 128>}, {pipeline_mode = #tpu.pipeline_mode<synchronous>, transform_indices = @transform_2, window_bounds = array<i64: 1, 128>}, {transform_indices = @transform_3, window_bounds = array<i64: 32, 128>}]} {
    %c0_i32 = arith.constant 0 : i32
    %0 = arith.cmpi eq, %arg1, %c0_i32 : i32
    %1 = arith.extui %0 : i1 to i32
    %c0_i32_0 = arith.constant 0 : i32
    %2 = arith.cmpi ne, %1, %c0_i32_0 : i32
    scf.if %2 {
      %cst_10 = arith.constant 0.000000e+00 : f32
      %12 = vector.broadcast %cst_10 : f32 to vector<32x128xf32>
      %c0_11 = arith.constant 0 : index
      %c0_12 = arith.constant 0 : index
      %13 = vector.load %arg5[%c0_11, %c0_12] : memref<32x128xf32, #tpu.memory_space<vmem>>, vector<32x128xf32>
      tpu.vector_store %arg5[%c0_11, %c0_12], %12 {strides = array<i32>} : memref<32x128xf32, #tpu.memory_space<vmem>>, vector<32x128xf32>,
    } else {
    }
    %c0 = arith.constant 0 : index
    %c0_1 = arith.constant 0 : index
    %3 = vector.load %arg5[%c0, %c0_1] : memref<32x128xf32, #tpu.memory_space<vmem>>, vector<32x128xf32>
    %c0_2 = arith.constant 0 : index
    %c0_3 = arith.constant 0 : index
    %4 = vector.load %arg2[%c0_2, %c0_3] : memref<32x128xbf16, #tpu.memory_space<vmem>>, vector<32x128xbf16>
    %c0_4 = arith.constant 0 : index
    %c0_5 = arith.constant 0 : index
    %5 = vector.load %arg3[%c0_4, %c0_5] : memref<128x128xbf16, #tpu.memory_space<vmem>>, vector<128x128xbf16>
    %cst = arith.constant dense<0.000000e+00> : vector<32x128xf32>
    %6 = tpu.matmul %4, %5, %cst {dimension_numbers = #tpu.dot_dimension_numbers<[1], [0], [0], [1], [0, 0, 1, 1], [], []>} : vector<32x128xbf16>, vector<128x128xbf16>, vector<32x128xf32> -> vector<32x128xf32>
    %7 = arith.addf %3, %6 : vector<32x128xf32>
    %c0_6 = arith.constant 0 : index
    %c0_7 = arith.constant 0 : index
    %8 = vector.load %arg5[%c0_6, %c0_7] : memref<32x128xf32, #tpu.memory_space<vmem>>, vector<32x128xf32>
    tpu.vector_store %arg5[%c0_6, %c0_7], %7 {strides = array<i32>} : memref<32x128xf32, #tpu.memory_space<vmem>>, vector<32x128xf32>,
    %c0_i32_8 = arith.constant 0 : i32
    %9 = arith.cmpi eq, %arg1, %c0_i32_8 : i32
    %10 = arith.extui %9 : i1 to i32
    %c0_i32_9 = arith.constant 0 : i32
    %11 = arith.cmpi ne, %10, %c0_i32_9 : i32
    scf.if %11 {
      %c0_10 = arith.constant 0 : index
      %c0_11 = arith.constant 0 : index
      %12 = vector.load %arg5[%c0_10, %c0_11] : memref<32x128xf32, #tpu.memory_space<vmem>>, vector<32x128xf32>
      %c0_12 = arith.constant 0 : index
      %c0_13 = arith.constant 0 : index
      %13 = vector.load %arg4[%c0_12, %c0_13] : memref<1x128xf32, #tpu.memory_space<vmem>>, vector<1x128xf32>
      %14 = vector.broadcast %13 : vector<1x128xf32> to vector<32x128xf32>
      %15 = arith.addf %12, %14 : vector<32x128xf32>
      %c0_14 = arith.constant 0 : index
      %c0_15 = arith.constant 0 : index
      %16 = vector.load %arg5[%c0_14, %c0_15] : memref<32x128xf32, #tpu.memory_space<vmem>>, vector<32x128xf32>
      tpu.vector_store %arg5[%c0_14, %c0_15], %15 {strides = array<i32>} : memref<32x128xf32, #tpu.memory_space<vmem>>, vector<32x128xf32>,
    } else {
    }
    return
  }
  func.func @transform_0(%arg0: i32, %arg1: i32) -> (i32, i32) {
    %c0_i32 = arith.constant 0 : i32
    return %arg0, %arg1 : i32, i32
  }
  func.func @transform_1(%arg0: i32, %arg1: i32) -> (i32, i32) {
    %c0_i32 = arith.constant 0 : i32
    %c0_i32_0 = arith.constant 0 : i32
    return %arg1, %c0_i32 : i32, i32
  }
  func.func @transform_2(%arg0: i32, %arg1: i32) -> (i32, i32) {
    %c0_i32 = arith.constant 0 : i32
    %c0_i32_0 = arith.constant 0 : i32
    %c0_i32_1 = arith.constant 0 : i32
    return %c0_i32, %c0_i32_0 : i32, i32
  }
  func.func @transform_3(%arg0: i32, %arg1: i32) -> (i32, i32) {
    %c0_i32 = arith.constant 0 : i32
    %c0_i32_0 = arith.constant 0 : i32
    return %arg0, %c0_i32 : i32, i32
  }
}

module attributes {stable_mosaic.version = 11 : i64} {
  func.func @_mm_kernel(%arg0: i32, %arg1: i32, %arg2: memref<32x1152xbf16, #tpu.memory_space<vmem>>, %arg3: memref<1152x128xbf16, #tpu.memory_space<vmem>>, %arg4: memref<1x128xf32, #tpu.memory_space<vmem>>, %arg5: memref<32x128xf32, #tpu.memory_space<vmem>>, %arg6: memref<32x128xf32, #tpu.memory_space<vmem>>) attributes {dimension_semantics = [#tpu.dimension_semantics<parallel>, #tpu.dimension_semantics<arbitrary>], iteration_bounds = array<i64: 1, 1>, scalar_prefetch = 0 : i64, scratch_operands = 0 : i64, tpu.core_type = #tpu.core_type<tc>, window_params = [{transform_indices = @transform_0, window_bounds = array<i64: 32, 1152>}, {transform_indices = @transform_1, window_bounds = array<i64: 1152, 128>}, {pipeline_mode = #tpu.pipeline_mode<synchronous>, transform_indices = @transform_2, window_bounds = array<i64: 1, 128>}, {transform_indices = @transform_3, window_bounds = array<i64: 32, 128>}, {transform_indices = @transform_4, window_bounds = array<i64: 32, 128>}]} {
    %c0_i32 = arith.constant 0 : i32
    %0 = arith.cmpi eq, %arg1, %c0_i32 : i32
    %1 = arith.extui %0 : i1 to i32
    %c0_i32_0 = arith.constant 0 : i32
    %2 = arith.cmpi ne, %1, %c0_i32_0 : i32
    scf.if %2 {
      %cst_10 = arith.constant 0.000000e+00 : f32
      %12 = vector.broadcast %cst_10 : f32 to vector<32x128xf32>
      %c0_11 = arith.constant 0 : index
      %c0_12 = arith.constant 0 : index
      %13 = vector.load %arg6[%c0_11, %c0_12] : memref<32x128xf32, #tpu.memory_space<vmem>>, vector<32x128xf32>
      tpu.vector_store %arg6[%c0_11, %c0_12], %12 {strides = array<i32>} : memref<32x128xf32, #tpu.memory_space<vmem>>, vector<32x128xf32>,
    } else {
    }
    %c0 = arith.constant 0 : index
    %c0_1 = arith.constant 0 : index
    %3 = vector.load %arg6[%c0, %c0_1] : memref<32x128xf32, #tpu.memory_space<vmem>>, vector<32x128xf32>
    %c0_2 = arith.constant 0 : index
    %c0_3 = arith.constant 0 : index
    %4 = vector.load %arg2[%c0_2, %c0_3] : memref<32x1152xbf16, #tpu.memory_space<vmem>>, vector<32x1152xbf16>
    %c0_4 = arith.constant 0 : index
    %c0_5 = arith.constant 0 : index
    %5 = vector.load %arg3[%c0_4, %c0_5] : memref<1152x128xbf16, #tpu.memory_space<vmem>>, vector<1152x128xbf16>
    %cst = arith.constant dense<0.000000e+00> : vector<32x128xf32>
    %6 = tpu.matmul %4, %5, %cst {dimension_numbers = #tpu.dot_dimension_numbers<[1], [0], [0], [1], [0, 0, 1, 1], [], []>} : vector<32x1152xbf16>, vector<1152x128xbf16>, vector<32x128xf32> -> vector<32x128xf32>
    %7 = arith.addf %3, %6 : vector<32x128xf32>
    %c0_6 = arith.constant 0 : index
    %c0_7 = arith.constant 0 : index
    %8 = vector.load %arg6[%c0_6, %c0_7] : memref<32x128xf32, #tpu.memory_space<vmem>>, vector<32x128xf32>
    tpu.vector_store %arg6[%c0_6, %c0_7], %7 {strides = array<i32>} : memref<32x128xf32, #tpu.memory_space<vmem>>, vector<32x128xf32>,
    %c0_i32_8 = arith.constant 0 : i32
    %9 = arith.cmpi eq, %arg1, %c0_i32_8 : i32
    %10 = arith.extui %9 : i1 to i32
    %c0_i32_9 = arith.constant 0 : i32
    %11 = arith.cmpi ne, %10, %c0_i32_9 : i32
    scf.if %11 {
      %c0_10 = arith.constant 0 : index
      %c0_11 = arith.constant 0 : index
      %12 = vector.load %arg6[%c0_10, %c0_11] : memref<32x128xf32, #tpu.memory_space<vmem>>, vector<32x128xf32>
      %c0_12 = arith.constant 0 : index
      %c0_13 = arith.constant 0 : index
      %13 = vector.load %arg4[%c0_12, %c0_13] : memref<1x128xf32, #tpu.memory_space<vmem>>, vector<1x128xf32>
      %14 = vector.broadcast %13 : vector<1x128xf32> to vector<32x128xf32>
      %15 = arith.addf %12, %14 : vector<32x128xf32>
      %c0_14 = arith.constant 0 : index
      %c0_15 = arith.constant 0 : index
      %16 = vector.load %arg5[%c0_14, %c0_15] : memref<32x128xf32, #tpu.memory_space<vmem>>, vector<32x128xf32>
      %17 = arith.addf %15, %16 : vector<32x128xf32>
      %cst_16 = arith.constant 0.000000e+00 : f32
      %18 = vector.broadcast %cst_16 : f32 to vector<32x128xf32>
      %19 = arith.maximumf %17, %18 : vector<32x128xf32>
      %c0_17 = arith.constant 0 : index
      %c0_18 = arith.constant 0 : index
      %20 = vector.load %arg6[%c0_17, %c0_18] : memref<32x128xf32, #tpu.memory_space<vmem>>, vector<32x128xf32>
      tpu.vector_store %arg6[%c0_17, %c0_18], %19 {strides = array<i32>} : memref<32x128xf32, #tpu.memory_space<vmem>>, vector<32x128xf32>,
    } else {
    }
    return
  }
  func.func @transform_0(%arg0: i32, %arg1: i32) -> (i32, i32) {
    %c0_i32 = arith.constant 0 : i32
    return %arg0, %arg1 : i32, i32
  }
  func.func @transform_1(%arg0: i32, %arg1: i32) -> (i32, i32) {
    %c0_i32 = arith.constant 0 : i32
    %c0_i32_0 = arith.constant 0 : i32
    return %arg1, %c0_i32 : i32, i32
  }
  func.func @transform_2(%arg0: i32, %arg1: i32) -> (i32, i32) {
    %c0_i32 = arith.constant 0 : i32
    %c0_i32_0 = arith.constant 0 : i32
    %c0_i32_1 = arith.constant 0 : i32
    return %c0_i32, %c0_i32_0 : i32, i32
  }
  func.func @transform_3(%arg0: i32, %arg1: i32) -> (i32, i32) {
    %c0_i32 = arith.constant 0 : i32
    %c0_i32_0 = arith.constant 0 : i32
    return %arg0, %c0_i32 : i32, i32
  }
  func.func @transform_4(%arg0: i32, %arg1: i32) -> (i32, i32) {
    %c0_i32 = arith.constant 0 : i32
    %c0_i32_0 = arith.constant 0 : i32
    return %arg0, %c0_i32 : i32, i32
  }
}

module attributes {stable_mosaic.version = 11 : i64} {
  func.func @_mm_kernel(%arg0: i32, %arg1: i32, %arg2: memref<32x1152xbf16, #tpu.memory_space<vmem>>, %arg3: memref<1152x128xbf16, #tpu.memory_space<vmem>>, %arg4: memref<1x128xf32, #tpu.memory_space<vmem>>, %arg5: memref<32x128xf32, #tpu.memory_space<vmem>>) attributes {dimension_semantics = [#tpu.dimension_semantics<parallel>, #tpu.dimension_semantics<arbitrary>], iteration_bounds = array<i64: 1, 1>, scalar_prefetch = 0 : i64, scratch_operands = 0 : i64, tpu.core_type = #tpu.core_type<tc>, window_params = [{transform_indices = @transform_0, window_bounds = array<i64: 32, 1152>}, {transform_indices = @transform_1, window_bounds = array<i64: 1152, 128>}, {pipeline_mode = #tpu.pipeline_mode<synchronous>, transform_indices = @transform_2, window_bounds = array<i64: 1, 128>}, {transform_indices = @transform_3, window_bounds = array<i64: 32, 128>}]} {
    %c0_i32 = arith.constant 0 : i32
    %0 = arith.cmpi eq, %arg1, %c0_i32 : i32
    %1 = arith.extui %0 : i1 to i32
    %c0_i32_0 = arith.constant 0 : i32
    %2 = arith.cmpi ne, %1, %c0_i32_0 : i32
    scf.if %2 {
      %cst_10 = arith.constant 0.000000e+00 : f32
      %12 = vector.broadcast %cst_10 : f32 to vector<32x128xf32>
      %c0_11 = arith.constant 0 : index
      %c0_12 = arith.constant 0 : index
      %13 = vector.load %arg5[%c0_11, %c0_12] : memref<32x128xf32, #tpu.memory_space<vmem>>, vector<32x128xf32>
      tpu.vector_store %arg5[%c0_11, %c0_12], %12 {strides = array<i32>} : memref<32x128xf32, #tpu.memory_space<vmem>>, vector<32x128xf32>,
    } else {
    }
    %c0 = arith.constant 0 : index
    %c0_1 = arith.constant 0 : index
    %3 = vector.load %arg5[%c0, %c0_1] : memref<32x128xf32, #tpu.memory_space<vmem>>, vector<32x128xf32>
    %c0_2 = arith.constant 0 : index
    %c0_3 = arith.constant 0 : index
    %4 = vector.load %arg2[%c0_2, %c0_3] : memref<32x1152xbf16, #tpu.memory_space<vmem>>, vector<32x1152xbf16>
    %c0_4 = arith.constant 0 : index
    %c0_5 = arith.constant 0 : index
    %5 = vector.load %arg3[%c0_4, %c0_5] : memref<1152x128xbf16, #tpu.memory_space<vmem>>, vector<1152x128xbf16>
    %cst = arith.constant dense<0.000000e+00> : vector<32x128xf32>
    %6 = tpu.matmul %4, %5, %cst {dimension_numbers = #tpu.dot_dimension_numbers<[1], [0], [0], [1], [0, 0, 1, 1], [], []>} : vector<32x1152xbf16>, vector<1152x128xbf16>, vector<32x128xf32> -> vector<32x128xf32>
    %7 = arith.addf %3, %6 : vector<32x128xf32>
    %c0_6 = arith.constant 0 : index
    %c0_7 = arith.constant 0 : index
    %8 = vector.load %arg5[%c0_6, %c0_7] : memref<32x128xf32, #tpu.memory_space<vmem>>, vector<32x128xf32>
    tpu.vector_store %arg5[%c0_6, %c0_7], %7 {strides = array<i32>} : memref<32x128xf32, #tpu.memory_space<vmem>>, vector<32x128xf32>,
    %c0_i32_8 = arith.constant 0 : i32
    %9 = arith.cmpi eq, %arg1, %c0_i32_8 : i32
    %10 = arith.extui %9 : i1 to i32
    %c0_i32_9 = arith.constant 0 : i32
    %11 = arith.cmpi ne, %10, %c0_i32_9 : i32
    scf.if %11 {
      %c0_10 = arith.constant 0 : index
      %c0_11 = arith.constant 0 : index
      %12 = vector.load %arg5[%c0_10, %c0_11] : memref<32x128xf32, #tpu.memory_space<vmem>>, vector<32x128xf32>
      %c0_12 = arith.constant 0 : index
      %c0_13 = arith.constant 0 : index
      %13 = vector.load %arg4[%c0_12, %c0_13] : memref<1x128xf32, #tpu.memory_space<vmem>>, vector<1x128xf32>
      %14 = vector.broadcast %13 : vector<1x128xf32> to vector<32x128xf32>
      %15 = arith.addf %12, %14 : vector<32x128xf32>
      %cst_14 = arith.constant 0.000000e+00 : f32
      %16 = vector.broadcast %cst_14 : f32 to vector<32x128xf32>
      %17 = arith.maximumf %15, %16 : vector<32x128xf32>
      %c0_15 = arith.constant 0 : index
      %c0_16 = arith.constant 0 : index
      %18 = vector.load %arg5[%c0_15, %c0_16] : memref<32x128xf32, #tpu.memory_space<vmem>>, vector<32x128xf32>
      tpu.vector_store %arg5[%c0_15, %c0_16], %17 {strides = array<i32>} : memref<32x128xf32, #tpu.memory_space<vmem>>, vector<32x128xf32>,
    } else {
    }
    return
  }
  func.func @transform_0(%arg0: i32, %arg1: i32) -> (i32, i32) {
    %c0_i32 = arith.constant 0 : i32
    return %arg0, %arg1 : i32, i32
  }
  func.func @transform_1(%arg0: i32, %arg1: i32) -> (i32, i32) {
    %c0_i32 = arith.constant 0 : i32
    %c0_i32_0 = arith.constant 0 : i32
    return %arg1, %c0_i32 : i32, i32
  }
  func.func @transform_2(%arg0: i32, %arg1: i32) -> (i32, i32) {
    %c0_i32 = arith.constant 0 : i32
    %c0_i32_0 = arith.constant 0 : i32
    %c0_i32_1 = arith.constant 0 : i32
    return %c0_i32, %c0_i32_0 : i32, i32
  }
  func.func @transform_3(%arg0: i32, %arg1: i32) -> (i32, i32) {
    %c0_i32 = arith.constant 0 : i32
    %c0_i32_0 = arith.constant 0 : i32
    return %arg0, %c0_i32 : i32, i32
  }
}

module attributes {stable_mosaic.version = 11 : i64} {
  func.func @_mm_kernel(%arg0: i32, %arg1: i32, %arg2: memref<8x1152xbf16, #tpu.memory_space<vmem>>, %arg3: memref<1152x256xbf16, #tpu.memory_space<vmem>>, %arg4: memref<1x256xf32, #tpu.memory_space<vmem>>, %arg5: memref<8x256xf32, #tpu.memory_space<vmem>>) attributes {dimension_semantics = [#tpu.dimension_semantics<parallel>, #tpu.dimension_semantics<arbitrary>], iteration_bounds = array<i64: 1, 1>, scalar_prefetch = 0 : i64, scratch_operands = 0 : i64, tpu.core_type = #tpu.core_type<tc>, window_params = [{transform_indices = @transform_0, window_bounds = array<i64: 8, 1152>}, {transform_indices = @transform_1, window_bounds = array<i64: 1152, 256>}, {pipeline_mode = #tpu.pipeline_mode<synchronous>, transform_indices = @transform_2, window_bounds = array<i64: 1, 256>}, {transform_indices = @transform_3, window_bounds = array<i64: 8, 256>}]} {
    %c0_i32 = arith.constant 0 : i32
    %0 = arith.cmpi eq, %arg1, %c0_i32 : i32
    %1 = arith.extui %0 : i1 to i32
    %c0_i32_0 = arith.constant 0 : i32
    %2 = arith.cmpi ne, %1, %c0_i32_0 : i32
    scf.if %2 {
      %cst_10 = arith.constant 0.000000e+00 : f32
      %12 = vector.broadcast %cst_10 : f32 to vector<8x256xf32>
      %c0_11 = arith.constant 0 : index
      %c0_12 = arith.constant 0 : index
      %13 = vector.load %arg5[%c0_11, %c0_12] : memref<8x256xf32, #tpu.memory_space<vmem>>, vector<8x256xf32>
      tpu.vector_store %arg5[%c0_11, %c0_12], %12 {strides = array<i32>} : memref<8x256xf32, #tpu.memory_space<vmem>>, vector<8x256xf32>,
    } else {
    }
    %c0 = arith.constant 0 : index
    %c0_1 = arith.constant 0 : index
    %3 = vector.load %arg5[%c0, %c0_1] : memref<8x256xf32, #tpu.memory_space<vmem>>, vector<8x256xf32>
    %c0_2 = arith.constant 0 : index
    %c0_3 = arith.constant 0 : index
    %4 = vector.load %arg2[%c0_2, %c0_3] : memref<8x1152xbf16, #tpu.memory_space<vmem>>, vector<8x1152xbf16>
    %c0_4 = arith.constant 0 : index
    %c0_5 = arith.constant 0 : index
    %5 = vector.load %arg3[%c0_4, %c0_5] : memref<1152x256xbf16, #tpu.memory_space<vmem>>, vector<1152x256xbf16>
    %cst = arith.constant dense<0.000000e+00> : vector<8x256xf32>
    %6 = tpu.matmul %4, %5, %cst {dimension_numbers = #tpu.dot_dimension_numbers<[1], [0], [0], [1], [0, 0, 1, 1], [], []>} : vector<8x1152xbf16>, vector<1152x256xbf16>, vector<8x256xf32> -> vector<8x256xf32>
    %7 = arith.addf %3, %6 : vector<8x256xf32>
    %c0_6 = arith.constant 0 : index
    %c0_7 = arith.constant 0 : index
    %8 = vector.load %arg5[%c0_6, %c0_7] : memref<8x256xf32, #tpu.memory_space<vmem>>, vector<8x256xf32>
    tpu.vector_store %arg5[%c0_6, %c0_7], %7 {strides = array<i32>} : memref<8x256xf32, #tpu.memory_space<vmem>>, vector<8x256xf32>,
    %c0_i32_8 = arith.constant 0 : i32
    %9 = arith.cmpi eq, %arg1, %c0_i32_8 : i32
    %10 = arith.extui %9 : i1 to i32
    %c0_i32_9 = arith.constant 0 : i32
    %11 = arith.cmpi ne, %10, %c0_i32_9 : i32
    scf.if %11 {
      %c0_10 = arith.constant 0 : index
      %c0_11 = arith.constant 0 : index
      %12 = vector.load %arg5[%c0_10, %c0_11] : memref<8x256xf32, #tpu.memory_space<vmem>>, vector<8x256xf32>
      %c0_12 = arith.constant 0 : index
      %c0_13 = arith.constant 0 : index
      %13 = vector.load %arg4[%c0_12, %c0_13] : memref<1x256xf32, #tpu.memory_space<vmem>>, vector<1x256xf32>
      %14 = vector.broadcast %13 : vector<1x256xf32> to vector<8x256xf32>
      %15 = arith.addf %12, %14 : vector<8x256xf32>
      %cst_14 = arith.constant 0.000000e+00 : f32
      %16 = vector.broadcast %cst_14 : f32 to vector<8x256xf32>
      %17 = arith.maximumf %15, %16 : vector<8x256xf32>
      %c0_15 = arith.constant 0 : index
      %c0_16 = arith.constant 0 : index
      %18 = vector.load %arg5[%c0_15, %c0_16] : memref<8x256xf32, #tpu.memory_space<vmem>>, vector<8x256xf32>
      tpu.vector_store %arg5[%c0_15, %c0_16], %17 {strides = array<i32>} : memref<8x256xf32, #tpu.memory_space<vmem>>, vector<8x256xf32>,
    } else {
    }
    return
  }
  func.func @transform_0(%arg0: i32, %arg1: i32) -> (i32, i32) {
    %c0_i32 = arith.constant 0 : i32
    return %arg0, %arg1 : i32, i32
  }
  func.func @transform_1(%arg0: i32, %arg1: i32) -> (i32, i32) {
    %c0_i32 = arith.constant 0 : i32
    %c0_i32_0 = arith.constant 0 : i32
    return %arg1, %c0_i32 : i32, i32
  }
  func.func @transform_2(%arg0: i32, %arg1: i32) -> (i32, i32) {
    %c0_i32 = arith.constant 0 : i32
    %c0_i32_0 = arith.constant 0 : i32
    %c0_i32_1 = arith.constant 0 : i32
    return %c0_i32, %c0_i32_0 : i32, i32
  }
  func.func @transform_3(%arg0: i32, %arg1: i32) -> (i32, i32) {
    %c0_i32 = arith.constant 0 : i32
    %c0_i32_0 = arith.constant 0 : i32
    return %arg0, %c0_i32 : i32, i32
  }
}

module attributes {stable_mosaic.version = 11 : i64} {
  func.func @_mm_kernel(%arg0: i32, %arg1: i32, %arg2: memref<8x128xbf16, #tpu.memory_space<vmem>>, %arg3: memref<128x256xbf16, #tpu.memory_space<vmem>>, %arg4: memref<1x256xf32, #tpu.memory_space<vmem>>, %arg5: memref<8x256xf32, #tpu.memory_space<vmem>>) attributes {dimension_semantics = [#tpu.dimension_semantics<parallel>, #tpu.dimension_semantics<arbitrary>], iteration_bounds = array<i64: 1, 1>, scalar_prefetch = 0 : i64, scratch_operands = 0 : i64, tpu.core_type = #tpu.core_type<tc>, window_params = [{transform_indices = @transform_0, window_bounds = array<i64: 8, 128>}, {transform_indices = @transform_1, window_bounds = array<i64: 128, 256>}, {pipeline_mode = #tpu.pipeline_mode<synchronous>, transform_indices = @transform_2, window_bounds = array<i64: 1, 256>}, {transform_indices = @transform_3, window_bounds = array<i64: 8, 256>}]} {
    %c0_i32 = arith.constant 0 : i32
    %0 = arith.cmpi eq, %arg1, %c0_i32 : i32
    %1 = arith.extui %0 : i1 to i32
    %c0_i32_0 = arith.constant 0 : i32
    %2 = arith.cmpi ne, %1, %c0_i32_0 : i32
    scf.if %2 {
      %cst_10 = arith.constant 0.000000e+00 : f32
      %12 = vector.broadcast %cst_10 : f32 to vector<8x256xf32>
      %c0_11 = arith.constant 0 : index
      %c0_12 = arith.constant 0 : index
      %13 = vector.load %arg5[%c0_11, %c0_12] : memref<8x256xf32, #tpu.memory_space<vmem>>, vector<8x256xf32>
      tpu.vector_store %arg5[%c0_11, %c0_12], %12 {strides = array<i32>} : memref<8x256xf32, #tpu.memory_space<vmem>>, vector<8x256xf32>,
    } else {
    }
    %c0 = arith.constant 0 : index
    %c0_1 = arith.constant 0 : index
    %3 = vector.load %arg5[%c0, %c0_1] : memref<8x256xf32, #tpu.memory_space<vmem>>, vector<8x256xf32>
    %c0_2 = arith.constant 0 : index
    %c0_3 = arith.constant 0 : index
    %4 = vector.load %arg2[%c0_2, %c0_3] : memref<8x128xbf16, #tpu.memory_space<vmem>>, vector<8x128xbf16>
    %c0_4 = arith.constant 0 : index
    %c0_5 = arith.constant 0 : index
    %5 = vector.load %arg3[%c0_4, %c0_5] : memref<128x256xbf16, #tpu.memory_space<vmem>>, vector<128x256xbf16>
    %cst = arith.constant dense<0.000000e+00> : vector<8x256xf32>
    %6 = tpu.matmul %4, %5, %cst {dimension_numbers = #tpu.dot_dimension_numbers<[1], [0], [0], [1], [0, 0, 1, 1], [], []>} : vector<8x128xbf16>, vector<128x256xbf16>, vector<8x256xf32> -> vector<8x256xf32>
    %7 = arith.addf %3, %6 : vector<8x256xf32>
    %c0_6 = arith.constant 0 : index
    %c0_7 = arith.constant 0 : index
    %8 = vector.load %arg5[%c0_6, %c0_7] : memref<8x256xf32, #tpu.memory_space<vmem>>, vector<8x256xf32>
    tpu.vector_store %arg5[%c0_6, %c0_7], %7 {strides = array<i32>} : memref<8x256xf32, #tpu.memory_space<vmem>>, vector<8x256xf32>,
    %c0_i32_8 = arith.constant 0 : i32
    %9 = arith.cmpi eq, %arg1, %c0_i32_8 : i32
    %10 = arith.extui %9 : i1 to i32
    %c0_i32_9 = arith.constant 0 : i32
    %11 = arith.cmpi ne, %10, %c0_i32_9 : i32
    scf.if %11 {
      %c0_10 = arith.constant 0 : index
      %c0_11 = arith.constant 0 : index
      %12 = vector.load %arg5[%c0_10, %c0_11] : memref<8x256xf32, #tpu.memory_space<vmem>>, vector<8x256xf32>
      %c0_12 = arith.constant 0 : index
      %c0_13 = arith.constant 0 : index
      %13 = vector.load %arg4[%c0_12, %c0_13] : memref<1x256xf32, #tpu.memory_space<vmem>>, vector<1x256xf32>
      %14 = vector.broadcast %13 : vector<1x256xf32> to vector<8x256xf32>
      %15 = arith.addf %12, %14 : vector<8x256xf32>
      %c0_14 = arith.constant 0 : index
      %c0_15 = arith.constant 0 : index
      %16 = vector.load %arg5[%c0_14, %c0_15] : memref<8x256xf32, #tpu.memory_space<vmem>>, vector<8x256xf32>
      tpu.vector_store %arg5[%c0_14, %c0_15], %15 {strides = array<i32>} : memref<8x256xf32, #tpu.memory_space<vmem>>, vector<8x256xf32>,
    } else {
    }
    return
  }
  func.func @transform_0(%arg0: i32, %arg1: i32) -> (i32, i32) {
    %c0_i32 = arith.constant 0 : i32
    return %arg0, %arg1 : i32, i32
  }
  func.func @transform_1(%arg0: i32, %arg1: i32) -> (i32, i32) {
    %c0_i32 = arith.constant 0 : i32
    %c0_i32_0 = arith.constant 0 : i32
    return %arg1, %c0_i32 : i32, i32
  }
  func.func @transform_2(%arg0: i32, %arg1: i32) -> (i32, i32) {
    %c0_i32 = arith.constant 0 : i32
    %c0_i32_0 = arith.constant 0 : i32
    %c0_i32_1 = arith.constant 0 : i32
    return %c0_i32, %c0_i32_0 : i32, i32
  }
  func.func @transform_3(%arg0: i32, %arg1: i32) -> (i32, i32) {
    %c0_i32 = arith.constant 0 : i32
    %c0_i32_0 = arith.constant 0 : i32
    return %arg0, %c0_i32 : i32, i32
  }
}

module attributes {stable_mosaic.version = 11 : i64} {
  func.func @_mm_kernel(%arg0: i32, %arg1: i32, %arg2: memref<8x512xbf16, #tpu.memory_space<vmem>>, %arg3: memref<512x256xbf16, #tpu.memory_space<vmem>>, %arg4: memref<1x256xf32, #tpu.memory_space<vmem>>, %arg5: memref<8x256xf32, #tpu.memory_space<vmem>>, %arg6: memref<8x256xf32, #tpu.memory_space<vmem>>) attributes {dimension_semantics = [#tpu.dimension_semantics<parallel>, #tpu.dimension_semantics<arbitrary>], iteration_bounds = array<i64: 1, 5>, scalar_prefetch = 0 : i64, scratch_operands = 0 : i64, tpu.core_type = #tpu.core_type<tc>, window_params = [{transform_indices = @transform_0, window_bounds = array<i64: 8, 512>}, {transform_indices = @transform_1, window_bounds = array<i64: 512, 256>}, {pipeline_mode = #tpu.pipeline_mode<synchronous>, transform_indices = @transform_2, window_bounds = array<i64: 1, 256>}, {transform_indices = @transform_3, window_bounds = array<i64: 8, 256>}, {transform_indices = @transform_4, window_bounds = array<i64: 8, 256>}]} {
    %c0_i32 = arith.constant 0 : i32
    %0 = arith.cmpi eq, %arg1, %c0_i32 : i32
    %1 = arith.extui %0 : i1 to i32
    %c0_i32_0 = arith.constant 0 : i32
    %2 = arith.cmpi ne, %1, %c0_i32_0 : i32
    scf.if %2 {
      %cst_9 = arith.constant 0.000000e+00 : f32
      %12 = vector.broadcast %cst_9 : f32 to vector<8x256xf32>
      %c0_10 = arith.constant 0 : index
      %c0_11 = arith.constant 0 : index
      %13 = vector.load %arg6[%c0_10, %c0_11] : memref<8x256xf32, #tpu.memory_space<vmem>>, vector<8x256xf32>
      tpu.vector_store %arg6[%c0_10, %c0_11], %12 {strides = array<i32>} : memref<8x256xf32, #tpu.memory_space<vmem>>, vector<8x256xf32>,
    } else {
    }
    %c0 = arith.constant 0 : index
    %c0_1 = arith.constant 0 : index
    %3 = vector.load %arg6[%c0, %c0_1] : memref<8x256xf32, #tpu.memory_space<vmem>>, vector<8x256xf32>
    %c0_2 = arith.constant 0 : index
    %c0_3 = arith.constant 0 : index
    %4 = vector.load %arg2[%c0_2, %c0_3] : memref<8x512xbf16, #tpu.memory_space<vmem>>, vector<8x512xbf16>
    %c0_4 = arith.constant 0 : index
    %c0_5 = arith.constant 0 : index
    %5 = vector.load %arg3[%c0_4, %c0_5] : memref<512x256xbf16, #tpu.memory_space<vmem>>, vector<512x256xbf16>
    %cst = arith.constant dense<0.000000e+00> : vector<8x256xf32>
    %6 = tpu.matmul %4, %5, %cst {dimension_numbers = #tpu.dot_dimension_numbers<[1], [0], [0], [1], [0, 0, 1, 1], [], []>} : vector<8x512xbf16>, vector<512x256xbf16>, vector<8x256xf32> -> vector<8x256xf32>
    %7 = arith.addf %3, %6 : vector<8x256xf32>
    %c0_6 = arith.constant 0 : index
    %c0_7 = arith.constant 0 : index
    %8 = vector.load %arg6[%c0_6, %c0_7] : memref<8x256xf32, #tpu.memory_space<vmem>>, vector<8x256xf32>
    tpu.vector_store %arg6[%c0_6, %c0_7], %7 {strides = array<i32>} : memref<8x256xf32, #tpu.memory_space<vmem>>, vector<8x256xf32>,
    %c4_i32 = arith.constant 4 : i32
    %9 = arith.cmpi eq, %arg1, %c4_i32 : i32
    %10 = arith.extui %9 : i1 to i32
    %c0_i32_8 = arith.constant 0 : i32
    %11 = arith.cmpi ne, %10, %c0_i32_8 : i32
    scf.if %11 {
      %c0_9 = arith.constant 0 : index
      %c0_10 = arith.constant 0 : index
      %12 = vector.load %arg6[%c0_9, %c0_10] : memref<8x256xf32, #tpu.memory_space<vmem>>, vector<8x256xf32>
      %c0_11 = arith.constant 0 : index
      %c0_12 = arith.constant 0 : index
      %13 = vector.load %arg4[%c0_11, %c0_12] : memref<1x256xf32, #tpu.memory_space<vmem>>, vector<1x256xf32>
      %14 = vector.broadcast %13 : vector<1x256xf32> to vector<8x256xf32>
      %15 = arith.addf %12, %14 : vector<8x256xf32>
      %c0_13 = arith.constant 0 : index
      %c0_14 = arith.constant 0 : index
      %16 = vector.load %arg5[%c0_13, %c0_14] : memref<8x256xf32, #tpu.memory_space<vmem>>, vector<8x256xf32>
      %17 = arith.addf %15, %16 : vector<8x256xf32>
      %cst_15 = arith.constant 0.000000e+00 : f32
      %18 = vector.broadcast %cst_15 : f32 to vector<8x256xf32>
      %19 = arith.maximumf %17, %18 : vector<8x256xf32>
      %c0_16 = arith.constant 0 : index
      %c0_17 = arith.constant 0 : index
      %20 = vector.load %arg6[%c0_16, %c0_17] : memref<8x256xf32, #tpu.memory_space<vmem>>, vector<8x256xf32>
      tpu.vector_store %arg6[%c0_16, %c0_17], %19 {strides = array<i32>} : memref<8x256xf32, #tpu.memory_space<vmem>>, vector<8x256xf32>,
    } else {
    }
    return
  }
  func.func @transform_0(%arg0: i32, %arg1: i32) -> (i32, i32) {
    %c0_i32 = arith.constant 0 : i32
    return %arg0, %arg1 : i32, i32
  }
  func.func @transform_1(%arg0: i32, %arg1: i32) -> (i32, i32) {
    %c0_i32 = arith.constant 0 : i32
    %c0_i32_0 = arith.constant 0 : i32
    return %arg1, %c0_i32 : i32, i32
  }
  func.func @transform_2(%arg0: i32, %arg1: i32) -> (i32, i32) {
    %c0_i32 = arith.constant 0 : i32
    %c0_i32_0 = arith.constant 0 : i32
    %c0_i32_1 = arith.constant 0 : i32
    return %c0_i32, %c0_i32_0 : i32, i32
  }
  func.func @transform_3(%arg0: i32, %arg1: i32) -> (i32, i32) {
    %c0_i32 = arith.constant 0 : i32
    %c0_i32_0 = arith.constant 0 : i32
    return %arg0, %c0_i32 : i32, i32
  }
  func.func @transform_4(%arg0: i32, %arg1: i32) -> (i32, i32) {
    %c0_i32 = arith.constant 0 : i32
    %c0_i32_0 = arith.constant 0 : i32
    return %arg0, %c0_i32 : i32, i32
  }
}

module attributes {stable_mosaic.version = 11 : i64} {
  func.func @_mm_kernel(%arg0: i32, %arg1: i32, %arg2: memref<8x512xbf16, #tpu.memory_space<vmem>>, %arg3: memref<512x256xbf16, #tpu.memory_space<vmem>>, %arg4: memref<1x256xf32, #tpu.memory_space<vmem>>, %arg5: memref<8x256xf32, #tpu.memory_space<vmem>>) attributes {dimension_semantics = [#tpu.dimension_semantics<parallel>, #tpu.dimension_semantics<arbitrary>], iteration_bounds = array<i64: 1, 5>, scalar_prefetch = 0 : i64, scratch_operands = 0 : i64, tpu.core_type = #tpu.core_type<tc>, window_params = [{transform_indices = @transform_0, window_bounds = array<i64: 8, 512>}, {transform_indices = @transform_1, window_bounds = array<i64: 512, 256>}, {pipeline_mode = #tpu.pipeline_mode<synchronous>, transform_indices = @transform_2, window_bounds = array<i64: 1, 256>}, {transform_indices = @transform_3, window_bounds = array<i64: 8, 256>}]} {
    %c0_i32 = arith.constant 0 : i32
    %0 = arith.cmpi eq, %arg1, %c0_i32 : i32
    %1 = arith.extui %0 : i1 to i32
    %c0_i32_0 = arith.constant 0 : i32
    %2 = arith.cmpi ne, %1, %c0_i32_0 : i32
    scf.if %2 {
      %cst_9 = arith.constant 0.000000e+00 : f32
      %12 = vector.broadcast %cst_9 : f32 to vector<8x256xf32>
      %c0_10 = arith.constant 0 : index
      %c0_11 = arith.constant 0 : index
      %13 = vector.load %arg5[%c0_10, %c0_11] : memref<8x256xf32, #tpu.memory_space<vmem>>, vector<8x256xf32>
      tpu.vector_store %arg5[%c0_10, %c0_11], %12 {strides = array<i32>} : memref<8x256xf32, #tpu.memory_space<vmem>>, vector<8x256xf32>,
    } else {
    }
    %c0 = arith.constant 0 : index
    %c0_1 = arith.constant 0 : index
    %3 = vector.load %arg5[%c0, %c0_1] : memref<8x256xf32, #tpu.memory_space<vmem>>, vector<8x256xf32>
    %c0_2 = arith.constant 0 : index
    %c0_3 = arith.constant 0 : index
    %4 = vector.load %arg2[%c0_2, %c0_3] : memref<8x512xbf16, #tpu.memory_space<vmem>>, vector<8x512xbf16>
    %c0_4 = arith.constant 0 : index
    %c0_5 = arith.constant 0 : index
    %5 = vector.load %arg3[%c0_4, %c0_5] : memref<512x256xbf16, #tpu.memory_space<vmem>>, vector<512x256xbf16>
    %cst = arith.constant dense<0.000000e+00> : vector<8x256xf32>
    %6 = tpu.matmul %4, %5, %cst {dimension_numbers = #tpu.dot_dimension_numbers<[1], [0], [0], [1], [0, 0, 1, 1], [], []>} : vector<8x512xbf16>, vector<512x256xbf16>, vector<8x256xf32> -> vector<8x256xf32>
    %7 = arith.addf %3, %6 : vector<8x256xf32>
    %c0_6 = arith.constant 0 : index
    %c0_7 = arith.constant 0 : index
    %8 = vector.load %arg5[%c0_6, %c0_7] : memref<8x256xf32, #tpu.memory_space<vmem>>, vector<8x256xf32>
    tpu.vector_store %arg5[%c0_6, %c0_7], %7 {strides = array<i32>} : memref<8x256xf32, #tpu.memory_space<vmem>>, vector<8x256xf32>,
    %c4_i32 = arith.constant 4 : i32
    %9 = arith.cmpi eq, %arg1, %c4_i32 : i32
    %10 = arith.extui %9 : i1 to i32
    %c0_i32_8 = arith.constant 0 : i32
    %11 = arith.cmpi ne, %10, %c0_i32_8 : i32
    scf.if %11 {
      %c0_9 = arith.constant 0 : index
      %c0_10 = arith.constant 0 : index
      %12 = vector.load %arg5[%c0_9, %c0_10] : memref<8x256xf32, #tpu.memory_space<vmem>>, vector<8x256xf32>
      %c0_11 = arith.constant 0 : index
      %c0_12 = arith.constant 0 : index
      %13 = vector.load %arg4[%c0_11, %c0_12] : memref<1x256xf32, #tpu.memory_space<vmem>>, vector<1x256xf32>
      %14 = vector.broadcast %13 : vector<1x256xf32> to vector<8x256xf32>
      %15 = arith.addf %12, %14 : vector<8x256xf32>
      %cst_13 = arith.constant 0.000000e+00 : f32
      %16 = vector.broadcast %cst_13 : f32 to vector<8x256xf32>
      %17 = arith.maximumf %15, %16 : vector<8x256xf32>
      %c0_14 = arith.constant 0 : index
      %c0_15 = arith.constant 0 : index
      %18 = vector.load %arg5[%c0_14, %c0_15] : memref<8x256xf32, #tpu.memory_space<vmem>>, vector<8x256xf32>
      tpu.vector_store %arg5[%c0_14, %c0_15], %17 {strides = array<i32>} : memref<8x256xf32, #tpu.memory_space<vmem>>, vector<8x256xf32>,
    } else {
    }
    return
  }
  func.func @transform_0(%arg0: i32, %arg1: i32) -> (i32, i32) {
    %c0_i32 = arith.constant 0 : i32
    return %arg0, %arg1 : i32, i32
  }
  func.func @transform_1(%arg0: i32, %arg1: i32) -> (i32, i32) {
    %c0_i32 = arith.constant 0 : i32
    %c0_i32_0 = arith.constant 0 : i32
    return %arg1, %c0_i32 : i32, i32
  }
  func.func @transform_2(%arg0: i32, %arg1: i32) -> (i32, i32) {
    %c0_i32 = arith.constant 0 : i32
    %c0_i32_0 = arith.constant 0 : i32
    %c0_i32_1 = arith.constant 0 : i32
    return %c0_i32, %c0_i32_0 : i32, i32
  }
  func.func @transform_3(%arg0: i32, %arg1: i32) -> (i32, i32) {
    %c0_i32 = arith.constant 0 : i32
    %c0_i32_0 = arith.constant 0 : i32
    return %arg0, %c0_i32 : i32, i32
  }
}

module attributes {stable_mosaic.version = 11 : i64} {
  func.func @_mm_kernel(%arg0: i32, %arg1: i32, %arg2: memref<8x512xbf16, #tpu.memory_space<vmem>>, %arg3: memref<512x512xbf16, #tpu.memory_space<vmem>>, %arg4: memref<1x512xf32, #tpu.memory_space<vmem>>, %arg5: memref<8x512xf32, #tpu.memory_space<vmem>>) attributes {dimension_semantics = [#tpu.dimension_semantics<parallel>, #tpu.dimension_semantics<arbitrary>], iteration_bounds = array<i64: 1, 5>, scalar_prefetch = 0 : i64, scratch_operands = 0 : i64, tpu.core_type = #tpu.core_type<tc>, window_params = [{transform_indices = @transform_0, window_bounds = array<i64: 8, 512>}, {transform_indices = @transform_1, window_bounds = array<i64: 512, 512>}, {pipeline_mode = #tpu.pipeline_mode<synchronous>, transform_indices = @transform_2, window_bounds = array<i64: 1, 512>}, {transform_indices = @transform_3, window_bounds = array<i64: 8, 512>}]} {
    %c0_i32 = arith.constant 0 : i32
    %0 = arith.cmpi eq, %arg1, %c0_i32 : i32
    %1 = arith.extui %0 : i1 to i32
    %c0_i32_0 = arith.constant 0 : i32
    %2 = arith.cmpi ne, %1, %c0_i32_0 : i32
    scf.if %2 {
      %cst_9 = arith.constant 0.000000e+00 : f32
      %12 = vector.broadcast %cst_9 : f32 to vector<8x512xf32>
      %c0_10 = arith.constant 0 : index
      %c0_11 = arith.constant 0 : index
      %13 = vector.load %arg5[%c0_10, %c0_11] : memref<8x512xf32, #tpu.memory_space<vmem>>, vector<8x512xf32>
      tpu.vector_store %arg5[%c0_10, %c0_11], %12 {strides = array<i32>} : memref<8x512xf32, #tpu.memory_space<vmem>>, vector<8x512xf32>,
    } else {
    }
    %c0 = arith.constant 0 : index
    %c0_1 = arith.constant 0 : index
    %3 = vector.load %arg5[%c0, %c0_1] : memref<8x512xf32, #tpu.memory_space<vmem>>, vector<8x512xf32>
    %c0_2 = arith.constant 0 : index
    %c0_3 = arith.constant 0 : index
    %4 = vector.load %arg2[%c0_2, %c0_3] : memref<8x512xbf16, #tpu.memory_space<vmem>>, vector<8x512xbf16>
    %c0_4 = arith.constant 0 : index
    %c0_5 = arith.constant 0 : index
    %5 = vector.load %arg3[%c0_4, %c0_5] : memref<512x512xbf16, #tpu.memory_space<vmem>>, vector<512x512xbf16>
    %cst = arith.constant dense<0.000000e+00> : vector<8x512xf32>
    %6 = tpu.matmul %4, %5, %cst {dimension_numbers = #tpu.dot_dimension_numbers<[1], [0], [0], [1], [0, 0, 1, 1], [], []>} : vector<8x512xbf16>, vector<512x512xbf16>, vector<8x512xf32> -> vector<8x512xf32>
    %7 = arith.addf %3, %6 : vector<8x512xf32>
    %c0_6 = arith.constant 0 : index
    %c0_7 = arith.constant 0 : index
    %8 = vector.load %arg5[%c0_6, %c0_7] : memref<8x512xf32, #tpu.memory_space<vmem>>, vector<8x512xf32>
    tpu.vector_store %arg5[%c0_6, %c0_7], %7 {strides = array<i32>} : memref<8x512xf32, #tpu.memory_space<vmem>>, vector<8x512xf32>,
    %c4_i32 = arith.constant 4 : i32
    %9 = arith.cmpi eq, %arg1, %c4_i32 : i32
    %10 = arith.extui %9 : i1 to i32
    %c0_i32_8 = arith.constant 0 : i32
    %11 = arith.cmpi ne, %10, %c0_i32_8 : i32
    scf.if %11 {
      %c0_9 = arith.constant 0 : index
      %c0_10 = arith.constant 0 : index
      %12 = vector.load %arg5[%c0_9, %c0_10] : memref<8x512xf32, #tpu.memory_space<vmem>>, vector<8x512xf32>
      %c0_11 = arith.constant 0 : index
      %c0_12 = arith.constant 0 : index
      %13 = vector.load %arg4[%c0_11, %c0_12] : memref<1x512xf32, #tpu.memory_space<vmem>>, vector<1x512xf32>
      %14 = vector.broadcast %13 : vector<1x512xf32> to vector<8x512xf32>
      %15 = arith.addf %12, %14 : vector<8x512xf32>
      %cst_13 = arith.constant 0.000000e+00 : f32
      %16 = vector.broadcast %cst_13 : f32 to vector<8x512xf32>
      %17 = arith.maximumf %15, %16 : vector<8x512xf32>
      %c0_14 = arith.constant 0 : index
      %c0_15 = arith.constant 0 : index
      %18 = vector.load %arg5[%c0_14, %c0_15] : memref<8x512xf32, #tpu.memory_space<vmem>>, vector<8x512xf32>
      tpu.vector_store %arg5[%c0_14, %c0_15], %17 {strides = array<i32>} : memref<8x512xf32, #tpu.memory_space<vmem>>, vector<8x512xf32>,
    } else {
    }
    return
  }
  func.func @transform_0(%arg0: i32, %arg1: i32) -> (i32, i32) {
    %c0_i32 = arith.constant 0 : i32
    return %arg0, %arg1 : i32, i32
  }
  func.func @transform_1(%arg0: i32, %arg1: i32) -> (i32, i32) {
    %c0_i32 = arith.constant 0 : i32
    %c0_i32_0 = arith.constant 0 : i32
    return %arg1, %c0_i32 : i32, i32
  }
  func.func @transform_2(%arg0: i32, %arg1: i32) -> (i32, i32) {
    %c0_i32 = arith.constant 0 : i32
    %c0_i32_0 = arith.constant 0 : i32
    %c0_i32_1 = arith.constant 0 : i32
    return %c0_i32, %c0_i32_0 : i32, i32
  }
  func.func @transform_3(%arg0: i32, %arg1: i32) -> (i32, i32) {
    %c0_i32 = arith.constant 0 : i32
    %c0_i32_0 = arith.constant 0 : i32
    return %arg0, %c0_i32 : i32, i32
  }
}

module attributes {stable_mosaic.version = 11 : i64} {
  func.func @_mm_kernel(%arg0: i32, %arg1: i32, %arg2: memref<8x256xbf16, #tpu.memory_space<vmem>>, %arg3: memref<256x512xbf16, #tpu.memory_space<vmem>>, %arg4: memref<1x512xf32, #tpu.memory_space<vmem>>, %arg5: memref<8x512xf32, #tpu.memory_space<vmem>>) attributes {dimension_semantics = [#tpu.dimension_semantics<parallel>, #tpu.dimension_semantics<arbitrary>], iteration_bounds = array<i64: 1, 1>, scalar_prefetch = 0 : i64, scratch_operands = 0 : i64, tpu.core_type = #tpu.core_type<tc>, window_params = [{transform_indices = @transform_0, window_bounds = array<i64: 8, 256>}, {transform_indices = @transform_1, window_bounds = array<i64: 256, 512>}, {pipeline_mode = #tpu.pipeline_mode<synchronous>, transform_indices = @transform_2, window_bounds = array<i64: 1, 512>}, {transform_indices = @transform_3, window_bounds = array<i64: 8, 512>}]} {
    %c0_i32 = arith.constant 0 : i32
    %0 = arith.cmpi eq, %arg1, %c0_i32 : i32
    %1 = arith.extui %0 : i1 to i32
    %c0_i32_0 = arith.constant 0 : i32
    %2 = arith.cmpi ne, %1, %c0_i32_0 : i32
    scf.if %2 {
      %cst_10 = arith.constant 0.000000e+00 : f32
      %12 = vector.broadcast %cst_10 : f32 to vector<8x512xf32>
      %c0_11 = arith.constant 0 : index
      %c0_12 = arith.constant 0 : index
      %13 = vector.load %arg5[%c0_11, %c0_12] : memref<8x512xf32, #tpu.memory_space<vmem>>, vector<8x512xf32>
      tpu.vector_store %arg5[%c0_11, %c0_12], %12 {strides = array<i32>} : memref<8x512xf32, #tpu.memory_space<vmem>>, vector<8x512xf32>,
    } else {
    }
    %c0 = arith.constant 0 : index
    %c0_1 = arith.constant 0 : index
    %3 = vector.load %arg5[%c0, %c0_1] : memref<8x512xf32, #tpu.memory_space<vmem>>, vector<8x512xf32>
    %c0_2 = arith.constant 0 : index
    %c0_3 = arith.constant 0 : index
    %4 = vector.load %arg2[%c0_2, %c0_3] : memref<8x256xbf16, #tpu.memory_space<vmem>>, vector<8x256xbf16>
    %c0_4 = arith.constant 0 : index
    %c0_5 = arith.constant 0 : index
    %5 = vector.load %arg3[%c0_4, %c0_5] : memref<256x512xbf16, #tpu.memory_space<vmem>>, vector<256x512xbf16>
    %cst = arith.constant dense<0.000000e+00> : vector<8x512xf32>
    %6 = tpu.matmul %4, %5, %cst {dimension_numbers = #tpu.dot_dimension_numbers<[1], [0], [0], [1], [0, 0, 1, 1], [], []>} : vector<8x256xbf16>, vector<256x512xbf16>, vector<8x512xf32> -> vector<8x512xf32>
    %7 = arith.addf %3, %6 : vector<8x512xf32>
    %c0_6 = arith.constant 0 : index
    %c0_7 = arith.constant 0 : index
    %8 = vector.load %arg5[%c0_6, %c0_7] : memref<8x512xf32, #tpu.memory_space<vmem>>, vector<8x512xf32>
    tpu.vector_store %arg5[%c0_6, %c0_7], %7 {strides = array<i32>} : memref<8x512xf32, #tpu.memory_space<vmem>>, vector<8x512xf32>,
    %c0_i32_8 = arith.constant 0 : i32
    %9 = arith.cmpi eq, %arg1, %c0_i32_8 : i32
    %10 = arith.extui %9 : i1 to i32
    %c0_i32_9 = arith.constant 0 : i32
    %11 = arith.cmpi ne, %10, %c0_i32_9 : i32
    scf.if %11 {
      %c0_10 = arith.constant 0 : index
      %c0_11 = arith.constant 0 : index
      %12 = vector.load %arg5[%c0_10, %c0_11] : memref<8x512xf32, #tpu.memory_space<vmem>>, vector<8x512xf32>
      %c0_12 = arith.constant 0 : index
      %c0_13 = arith.constant 0 : index
      %13 = vector.load %arg4[%c0_12, %c0_13] : memref<1x512xf32, #tpu.memory_space<vmem>>, vector<1x512xf32>
      %14 = vector.broadcast %13 : vector<1x512xf32> to vector<8x512xf32>
      %15 = arith.addf %12, %14 : vector<8x512xf32>
      %c0_14 = arith.constant 0 : index
      %c0_15 = arith.constant 0 : index
      %16 = vector.load %arg5[%c0_14, %c0_15] : memref<8x512xf32, #tpu.memory_space<vmem>>, vector<8x512xf32>
      tpu.vector_store %arg5[%c0_14, %c0_15], %15 {strides = array<i32>} : memref<8x512xf32, #tpu.memory_space<vmem>>, vector<8x512xf32>,
    } else {
    }
    return
  }
  func.func @transform_0(%arg0: i32, %arg1: i32) -> (i32, i32) {
    %c0_i32 = arith.constant 0 : i32
    return %arg0, %arg1 : i32, i32
  }
  func.func @transform_1(%arg0: i32, %arg1: i32) -> (i32, i32) {
    %c0_i32 = arith.constant 0 : i32
    %c0_i32_0 = arith.constant 0 : i32
    return %arg1, %c0_i32 : i32, i32
  }
  func.func @transform_2(%arg0: i32, %arg1: i32) -> (i32, i32) {
    %c0_i32 = arith.constant 0 : i32
    %c0_i32_0 = arith.constant 0 : i32
    %c0_i32_1 = arith.constant 0 : i32
    return %c0_i32, %c0_i32_0 : i32, i32
  }
  func.func @transform_3(%arg0: i32, %arg1: i32) -> (i32, i32) {
    %c0_i32 = arith.constant 0 : i32
    %c0_i32_0 = arith.constant 0 : i32
    return %arg0, %c0_i32 : i32, i32
  }
}

module attributes {stable_mosaic.version = 11 : i64} {
  func.func @_mm_kernel(%arg0: i32, %arg1: i32, %arg2: memref<8x512xbf16, #tpu.memory_space<vmem>>, %arg3: memref<512x512xbf16, #tpu.memory_space<vmem>>, %arg4: memref<1x512xf32, #tpu.memory_space<vmem>>, %arg5: memref<8x512xf32, #tpu.memory_space<vmem>>, %arg6: memref<8x512xf32, #tpu.memory_space<vmem>>) attributes {dimension_semantics = [#tpu.dimension_semantics<parallel>, #tpu.dimension_semantics<arbitrary>], iteration_bounds = array<i64: 1, 9>, scalar_prefetch = 0 : i64, scratch_operands = 0 : i64, tpu.core_type = #tpu.core_type<tc>, window_params = [{transform_indices = @transform_0, window_bounds = array<i64: 8, 512>}, {transform_indices = @transform_1, window_bounds = array<i64: 512, 512>}, {pipeline_mode = #tpu.pipeline_mode<synchronous>, transform_indices = @transform_2, window_bounds = array<i64: 1, 512>}, {transform_indices = @transform_3, window_bounds = array<i64: 8, 512>}, {transform_indices = @transform_4, window_bounds = array<i64: 8, 512>}]} {
    %c0_i32 = arith.constant 0 : i32
    %0 = arith.cmpi eq, %arg1, %c0_i32 : i32
    %1 = arith.extui %0 : i1 to i32
    %c0_i32_0 = arith.constant 0 : i32
    %2 = arith.cmpi ne, %1, %c0_i32_0 : i32
    scf.if %2 {
      %cst_9 = arith.constant 0.000000e+00 : f32
      %12 = vector.broadcast %cst_9 : f32 to vector<8x512xf32>
      %c0_10 = arith.constant 0 : index
      %c0_11 = arith.constant 0 : index
      %13 = vector.load %arg6[%c0_10, %c0_11] : memref<8x512xf32, #tpu.memory_space<vmem>>, vector<8x512xf32>
      tpu.vector_store %arg6[%c0_10, %c0_11], %12 {strides = array<i32>} : memref<8x512xf32, #tpu.memory_space<vmem>>, vector<8x512xf32>,
    } else {
    }
    %c0 = arith.constant 0 : index
    %c0_1 = arith.constant 0 : index
    %3 = vector.load %arg6[%c0, %c0_1] : memref<8x512xf32, #tpu.memory_space<vmem>>, vector<8x512xf32>
    %c0_2 = arith.constant 0 : index
    %c0_3 = arith.constant 0 : index
    %4 = vector.load %arg2[%c0_2, %c0_3] : memref<8x512xbf16, #tpu.memory_space<vmem>>, vector<8x512xbf16>
    %c0_4 = arith.constant 0 : index
    %c0_5 = arith.constant 0 : index
    %5 = vector.load %arg3[%c0_4, %c0_5] : memref<512x512xbf16, #tpu.memory_space<vmem>>, vector<512x512xbf16>
    %cst = arith.constant dense<0.000000e+00> : vector<8x512xf32>
    %6 = tpu.matmul %4, %5, %cst {dimension_numbers = #tpu.dot_dimension_numbers<[1], [0], [0], [1], [0, 0, 1, 1], [], []>} : vector<8x512xbf16>, vector<512x512xbf16>, vector<8x512xf32> -> vector<8x512xf32>
    %7 = arith.addf %3, %6 : vector<8x512xf32>
    %c0_6 = arith.constant 0 : index
    %c0_7 = arith.constant 0 : index
    %8 = vector.load %arg6[%c0_6, %c0_7] : memref<8x512xf32, #tpu.memory_space<vmem>>, vector<8x512xf32>
    tpu.vector_store %arg6[%c0_6, %c0_7], %7 {strides = array<i32>} : memref<8x512xf32, #tpu.memory_space<vmem>>, vector<8x512xf32>,
    %c8_i32 = arith.constant 8 : i32
    %9 = arith.cmpi eq, %arg1, %c8_i32 : i32
    %10 = arith.extui %9 : i1 to i32
    %c0_i32_8 = arith.constant 0 : i32
    %11 = arith.cmpi ne, %10, %c0_i32_8 : i32
    scf.if %11 {
      %c0_9 = arith.constant 0 : index
      %c0_10 = arith.constant 0 : index
      %12 = vector.load %arg6[%c0_9, %c0_10] : memref<8x512xf32, #tpu.memory_space<vmem>>, vector<8x512xf32>
      %c0_11 = arith.constant 0 : index
      %c0_12 = arith.constant 0 : index
      %13 = vector.load %arg4[%c0_11, %c0_12] : memref<1x512xf32, #tpu.memory_space<vmem>>, vector<1x512xf32>
      %14 = vector.broadcast %13 : vector<1x512xf32> to vector<8x512xf32>
      %15 = arith.addf %12, %14 : vector<8x512xf32>
      %c0_13 = arith.constant 0 : index
      %c0_14 = arith.constant 0 : index
      %16 = vector.load %arg5[%c0_13, %c0_14] : memref<8x512xf32, #tpu.memory_space<vmem>>, vector<8x512xf32>
      %17 = arith.addf %15, %16 : vector<8x512xf32>
      %cst_15 = arith.constant 0.000000e+00 : f32
      %18 = vector.broadcast %cst_15 : f32 to vector<8x512xf32>
      %19 = arith.maximumf %17, %18 : vector<8x512xf32>
      %c0_16 = arith.constant 0 : index
      %c0_17 = arith.constant 0 : index
      %20 = vector.load %arg6[%c0_16, %c0_17] : memref<8x512xf32, #tpu.memory_space<vmem>>, vector<8x512xf32>
      tpu.vector_store %arg6[%c0_16, %c0_17], %19 {strides = array<i32>} : memref<8x512xf32, #tpu.memory_space<vmem>>, vector<8x512xf32>,
    } else {
    }
    return
  }
  func.func @transform_0(%arg0: i32, %arg1: i32) -> (i32, i32) {
    %c0_i32 = arith.constant 0 : i32
    return %arg0, %arg1 : i32, i32
  }
  func.func @transform_1(%arg0: i32, %arg1: i32) -> (i32, i32) {
    %c0_i32 = arith.constant 0 : i32
    %c0_i32_0 = arith.constant 0 : i32
    return %arg1, %c0_i32 : i32, i32
  }
  func.func @transform_2(%arg0: i32, %arg1: i32) -> (i32, i32) {
    %c0_i32 = arith.constant 0 : i32
    %c0_i32_0 = arith.constant 0 : i32
    %c0_i32_1 = arith.constant 0 : i32
    return %c0_i32, %c0_i32_0 : i32, i32
  }
  func.func @transform_3(%arg0: i32, %arg1: i32) -> (i32, i32) {
    %c0_i32 = arith.constant 0 : i32
    %c0_i32_0 = arith.constant 0 : i32
    return %arg0, %c0_i32 : i32, i32
  }
  func.func @transform_4(%arg0: i32, %arg1: i32) -> (i32, i32) {
    %c0_i32 = arith.constant 0 : i32
    %c0_i32_0 = arith.constant 0 : i32
    return %arg0, %c0_i32 : i32, i32
  }
}

module attributes {stable_mosaic.version = 11 : i64} {
  func.func @_mm_kernel(%arg0: i32, %arg1: i32, %arg2: memref<8x512xbf16, #tpu.memory_space<vmem>>, %arg3: memref<512x512xbf16, #tpu.memory_space<vmem>>, %arg4: memref<1x512xf32, #tpu.memory_space<vmem>>, %arg5: memref<8x512xf32, #tpu.memory_space<vmem>>) attributes {dimension_semantics = [#tpu.dimension_semantics<parallel>, #tpu.dimension_semantics<arbitrary>], iteration_bounds = array<i64: 1, 9>, scalar_prefetch = 0 : i64, scratch_operands = 0 : i64, tpu.core_type = #tpu.core_type<tc>, window_params = [{transform_indices = @transform_0, window_bounds = array<i64: 8, 512>}, {transform_indices = @transform_1, window_bounds = array<i64: 512, 512>}, {pipeline_mode = #tpu.pipeline_mode<synchronous>, transform_indices = @transform_2, window_bounds = array<i64: 1, 512>}, {transform_indices = @transform_3, window_bounds = array<i64: 8, 512>}]} {
    %c0_i32 = arith.constant 0 : i32
    %0 = arith.cmpi eq, %arg1, %c0_i32 : i32
    %1 = arith.extui %0 : i1 to i32
    %c0_i32_0 = arith.constant 0 : i32
    %2 = arith.cmpi ne, %1, %c0_i32_0 : i32
    scf.if %2 {
      %cst_9 = arith.constant 0.000000e+00 : f32
      %12 = vector.broadcast %cst_9 : f32 to vector<8x512xf32>
      %c0_10 = arith.constant 0 : index
      %c0_11 = arith.constant 0 : index
      %13 = vector.load %arg5[%c0_10, %c0_11] : memref<8x512xf32, #tpu.memory_space<vmem>>, vector<8x512xf32>
      tpu.vector_store %arg5[%c0_10, %c0_11], %12 {strides = array<i32>} : memref<8x512xf32, #tpu.memory_space<vmem>>, vector<8x512xf32>,
    } else {
    }
    %c0 = arith.constant 0 : index
    %c0_1 = arith.constant 0 : index
    %3 = vector.load %arg5[%c0, %c0_1] : memref<8x512xf32, #tpu.memory_space<vmem>>, vector<8x512xf32>
    %c0_2 = arith.constant 0 : index
    %c0_3 = arith.constant 0 : index
    %4 = vector.load %arg2[%c0_2, %c0_3] : memref<8x512xbf16, #tpu.memory_space<vmem>>, vector<8x512xbf16>
    %c0_4 = arith.constant 0 : index
    %c0_5 = arith.constant 0 : index
    %5 = vector.load %arg3[%c0_4, %c0_5] : memref<512x512xbf16, #tpu.memory_space<vmem>>, vector<512x512xbf16>
    %cst = arith.constant dense<0.000000e+00> : vector<8x512xf32>
    %6 = tpu.matmul %4, %5, %cst {dimension_numbers = #tpu.dot_dimension_numbers<[1], [0], [0], [1], [0, 0, 1, 1], [], []>} : vector<8x512xbf16>, vector<512x512xbf16>, vector<8x512xf32> -> vector<8x512xf32>
    %7 = arith.addf %3, %6 : vector<8x512xf32>
    %c0_6 = arith.constant 0 : index
    %c0_7 = arith.constant 0 : index
    %8 = vector.load %arg5[%c0_6, %c0_7] : memref<8x512xf32, #tpu.memory_space<vmem>>, vector<8x512xf32>
    tpu.vector_store %arg5[%c0_6, %c0_7], %7 {strides = array<i32>} : memref<8x512xf32, #tpu.memory_space<vmem>>, vector<8x512xf32>,
    %c8_i32 = arith.constant 8 : i32
    %9 = arith.cmpi eq, %arg1, %c8_i32 : i32
    %10 = arith.extui %9 : i1 to i32
    %c0_i32_8 = arith.constant 0 : i32
    %11 = arith.cmpi ne, %10, %c0_i32_8 : i32
    scf.if %11 {
      %c0_9 = arith.constant 0 : index
      %c0_10 = arith.constant 0 : index
      %12 = vector.load %arg5[%c0_9, %c0_10] : memref<8x512xf32, #tpu.memory_space<vmem>>, vector<8x512xf32>
      %c0_11 = arith.constant 0 : index
      %c0_12 = arith.constant 0 : index
      %13 = vector.load %arg4[%c0_11, %c0_12] : memref<1x512xf32, #tpu.memory_space<vmem>>, vector<1x512xf32>
      %14 = vector.broadcast %13 : vector<1x512xf32> to vector<8x512xf32>
      %15 = arith.addf %12, %14 : vector<8x512xf32>
      %cst_13 = arith.constant 0.000000e+00 : f32
      %16 = vector.broadcast %cst_13 : f32 to vector<8x512xf32>
      %17 = arith.maximumf %15, %16 : vector<8x512xf32>
      %c0_14 = arith.constant 0 : index
      %c0_15 = arith.constant 0 : index
      %18 = vector.load %arg5[%c0_14, %c0_15] : memref<8x512xf32, #tpu.memory_space<vmem>>, vector<8x512xf32>
      tpu.vector_store %arg5[%c0_14, %c0_15], %17 {strides = array<i32>} : memref<8x512xf32, #tpu.memory_space<vmem>>, vector<8x512xf32>,
    } else {
    }
    return
  }
  func.func @transform_0(%arg0: i32, %arg1: i32) -> (i32, i32) {
    %c0_i32 = arith.constant 0 : i32
    return %arg0, %arg1 : i32, i32
  }
  func.func @transform_1(%arg0: i32, %arg1: i32) -> (i32, i32) {
    %c0_i32 = arith.constant 0 : i32
    %c0_i32_0 = arith.constant 0 : i32
    return %arg1, %c0_i32 : i32, i32
  }
  func.func @transform_2(%arg0: i32, %arg1: i32) -> (i32, i32) {
    %c0_i32 = arith.constant 0 : i32
    %c0_i32_0 = arith.constant 0 : i32
    %c0_i32_1 = arith.constant 0 : i32
    return %c0_i32, %c0_i32_0 : i32, i32
  }
  func.func @transform_3(%arg0: i32, %arg1: i32) -> (i32, i32) {
    %c0_i32 = arith.constant 0 : i32
    %c0_i32_0 = arith.constant 0 : i32
    return %arg0, %c0_i32 : i32, i32
  }
}

module attributes {stable_mosaic.version = 11 : i64} {
  func.func @_mm_kernel(%arg0: i32, %arg1: i32, %arg2: memref<8x512xbf16, #tpu.memory_space<vmem>>, %arg3: memref<512x512xbf16, #tpu.memory_space<vmem>>, %arg4: memref<1x512xf32, #tpu.memory_space<vmem>>, %arg5: memref<8x512xf32, #tpu.memory_space<vmem>>) attributes {dimension_semantics = [#tpu.dimension_semantics<parallel>, #tpu.dimension_semantics<arbitrary>], iteration_bounds = array<i64: 1, 9>, scalar_prefetch = 0 : i64, scratch_operands = 0 : i64, tpu.core_type = #tpu.core_type<tc>, window_params = [{transform_indices = @transform_0, window_bounds = array<i64: 8, 512>}, {transform_indices = @transform_1, window_bounds = array<i64: 512, 512>}, {pipeline_mode = #tpu.pipeline_mode<synchronous>, transform_indices = @transform_2, window_bounds = array<i64: 1, 512>}, {transform_indices = @transform_3, window_bounds = array<i64: 8, 512>}]} {
    %c0_i32 = arith.constant 0 : i32
    %0 = arith.cmpi eq, %arg1, %c0_i32 : i32
    %1 = arith.extui %0 : i1 to i32
    %c0_i32_0 = arith.constant 0 : i32
    %2 = arith.cmpi ne, %1, %c0_i32_0 : i32
    scf.if %2 {
      %cst_9 = arith.constant 0.000000e+00 : f32
      %12 = vector.broadcast %cst_9 : f32 to vector<8x512xf32>
      %c0_10 = arith.constant 0 : index
      %c0_11 = arith.constant 0 : index
      %13 = vector.load %arg5[%c0_10, %c0_11] : memref<8x512xf32, #tpu.memory_space<vmem>>, vector<8x512xf32>
      tpu.vector_store %arg5[%c0_10, %c0_11], %12 {strides = array<i32>} : memref<8x512xf32, #tpu.memory_space<vmem>>, vector<8x512xf32>,
    } else {
    }
    %c0 = arith.constant 0 : index
    %c0_1 = arith.constant 0 : index
    %3 = vector.load %arg5[%c0, %c0_1] : memref<8x512xf32, #tpu.memory_space<vmem>>, vector<8x512xf32>
    %c0_2 = arith.constant 0 : index
    %c0_3 = arith.constant 0 : index
    %4 = vector.load %arg2[%c0_2, %c0_3] : memref<8x512xbf16, #tpu.memory_space<vmem>>, vector<8x512xbf16>
    %c0_4 = arith.constant 0 : index
    %c0_5 = arith.constant 0 : index
    %5 = vector.load %arg3[%c0_4, %c0_5] : memref<512x512xbf16, #tpu.memory_space<vmem>>, vector<512x512xbf16>
    %cst = arith.constant dense<0.000000e+00> : vector<8x512xf32>
    %6 = tpu.matmul %4, %5, %cst {dimension_numbers = #tpu.dot_dimension_numbers<[1], [0], [0], [1], [0, 0, 1, 1], [], []>} : vector<8x512xbf16>, vector<512x512xbf16>, vector<8x512xf32> -> vector<8x512xf32>
    %7 = arith.addf %3, %6 : vector<8x512xf32>
    %c0_6 = arith.constant 0 : index
    %c0_7 = arith.constant 0 : index
    %8 = vector.load %arg5[%c0_6, %c0_7] : memref<8x512xf32, #tpu.memory_space<vmem>>, vector<8x512xf32>
    tpu.vector_store %arg5[%c0_6, %c0_7], %7 {strides = array<i32>} : memref<8x512xf32, #tpu.memory_space<vmem>>, vector<8x512xf32>,
    %c8_i32 = arith.constant 8 : i32
    %9 = arith.cmpi eq, %arg1, %c8_i32 : i32
    %10 = arith.extui %9 : i1 to i32
    %c0_i32_8 = arith.constant 0 : i32
    %11 = arith.cmpi ne, %10, %c0_i32_8 : i32
    scf.if %11 {
      %c0_9 = arith.constant 0 : index
      %c0_10 = arith.constant 0 : index
      %12 = vector.load %arg5[%c0_9, %c0_10] : memref<8x512xf32, #tpu.memory_space<vmem>>, vector<8x512xf32>
      %c0_11 = arith.constant 0 : index
      %c0_12 = arith.constant 0 : index
      %13 = vector.load %arg4[%c0_11, %c0_12] : memref<1x512xf32, #tpu.memory_space<vmem>>, vector<1x512xf32>
      %14 = vector.broadcast %13 : vector<1x512xf32> to vector<8x512xf32>
      %15 = arith.addf %12, %14 : vector<8x512xf32>
      %cst_13 = arith.constant 0.000000e+00 : f32
      %16 = vector.broadcast %cst_13 : f32 to vector<8x512xf32>
      %17 = arith.maximumf %15, %16 : vector<8x512xf32>
      %c0_14 = arith.constant 0 : index
      %c0_15 = arith.constant 0 : index
      %18 = vector.load %arg5[%c0_14, %c0_15] : memref<8x512xf32, #tpu.memory_space<vmem>>, vector<8x512xf32>
      tpu.vector_store %arg5[%c0_14, %c0_15], %17 {strides = array<i32>} : memref<8x512xf32, #tpu.memory_space<vmem>>, vector<8x512xf32>,
    } else {
    }
    return
  }
  func.func @transform_0(%arg0: i32, %arg1: i32) -> (i32, i32) {
    %c0_i32 = arith.constant 0 : i32
    return %arg0, %arg1 : i32, i32
  }
  func.func @transform_1(%arg0: i32, %arg1: i32) -> (i32, i32) {
    %c0_i32 = arith.constant 0 : i32
    %c0_i32_0 = arith.constant 0 : i32
    return %arg1, %c0_i32 : i32, i32
  }
  func.func @transform_2(%arg0: i32, %arg1: i32) -> (i32, i32) {
    %c0_i32 = arith.constant 0 : i32
    %c0_i32_0 = arith.constant 0 : i32
    %c0_i32_1 = arith.constant 0 : i32
    return %c0_i32, %c0_i32_0 : i32, i32
  }
  func.func @transform_3(%arg0: i32, %arg1: i32) -> (i32, i32) {
    %c0_i32 = arith.constant 0 : i32
    %c0_i32_0 = arith.constant 0 : i32
    return %arg0, %c0_i32 : i32, i32
  }
}

module attributes {stable_mosaic.version = 11 : i64} {
  func.func @_mean_over_hw_kernel(%arg0: memref<2x1x512xf32, #tpu.memory_space<vmem>>, %arg1: memref<2x512xf32, #tpu.memory_space<vmem>>) attributes {dimension_semantics = [], scalar_prefetch = 0 : i64, scratch_operands = 0 : i64, tpu.core_type = #tpu.core_type<tc>} {
    %c0 = arith.constant 0 : index
    %c0_0 = arith.constant 0 : index
    %c0_1 = arith.constant 0 : index
    %0 = vector.load %arg0[%c0, %c0_0, %c0_1] : memref<2x1x512xf32, #tpu.memory_space<vmem>>, vector<2x1x512xf32>
    %cst = arith.constant dense<0.000000e+00> : vector<2x512xf32>
    %1 = vector.multi_reduction <add>, %0, %cst [1] : vector<2x1x512xf32> to vector<2x512xf32>
    %cst_2 = arith.constant 1.000000e+00 : f32
    %2 = vector.broadcast %cst_2 : f32 to vector<2x512xf32>
    %3 = arith.divf %1, %2 : vector<2x512xf32>
    %c0_3 = arith.constant 0 : index
    %c0_4 = arith.constant 0 : index
    %4 = vector.load %arg1[%c0_3, %c0_4] : memref<2x512xf32, #tpu.memory_space<vmem>>, vector<2x512xf32>
    tpu.vector_store %arg1[%c0_3, %c0_4], %3 {strides = array<i32>} : memref<2x512xf32, #tpu.memory_space<vmem>>, vector<2x512xf32>,
    return
  }
}

module attributes {stable_mosaic.version = 11 : i64} {
  func.func @_mm_kernel(%arg0: i32, %arg1: i32, %arg2: memref<8x512xbf16, #tpu.memory_space<vmem>>, %arg3: memref<512x256xbf16, #tpu.memory_space<vmem>>, %arg4: memref<1x256xf32, #tpu.memory_space<vmem>>, %arg5: memref<8x256xf32, #tpu.memory_space<vmem>>) attributes {dimension_semantics = [#tpu.dimension_semantics<parallel>, #tpu.dimension_semantics<arbitrary>], iteration_bounds = array<i64: 1, 1>, scalar_prefetch = 0 : i64, scratch_operands = 0 : i64, tpu.core_type = #tpu.core_type<tc>, window_params = [{transform_indices = @transform_0, window_bounds = array<i64: 8, 512>}, {transform_indices = @transform_1, window_bounds = array<i64: 512, 256>}, {pipeline_mode = #tpu.pipeline_mode<synchronous>, transform_indices = @transform_2, window_bounds = array<i64: 1, 256>}, {transform_indices = @transform_3, window_bounds = array<i64: 8, 256>}]} {
    %c0_i32 = arith.constant 0 : i32
    %0 = arith.cmpi eq, %arg1, %c0_i32 : i32
    %1 = arith.extui %0 : i1 to i32
    %c0_i32_0 = arith.constant 0 : i32
    %2 = arith.cmpi ne, %1, %c0_i32_0 : i32
    scf.if %2 {
      %cst_10 = arith.constant 0.000000e+00 : f32
      %12 = vector.broadcast %cst_10 : f32 to vector<8x256xf32>
      %c0_11 = arith.constant 0 : index
      %c0_12 = arith.constant 0 : index
      %13 = vector.load %arg5[%c0_11, %c0_12] : memref<8x256xf32, #tpu.memory_space<vmem>>, vector<8x256xf32>
      tpu.vector_store %arg5[%c0_11, %c0_12], %12 {strides = array<i32>} : memref<8x256xf32, #tpu.memory_space<vmem>>, vector<8x256xf32>,
    } else {
    }
    %c0 = arith.constant 0 : index
    %c0_1 = arith.constant 0 : index
    %3 = vector.load %arg5[%c0, %c0_1] : memref<8x256xf32, #tpu.memory_space<vmem>>, vector<8x256xf32>
    %c0_2 = arith.constant 0 : index
    %c0_3 = arith.constant 0 : index
    %4 = vector.load %arg2[%c0_2, %c0_3] : memref<8x512xbf16, #tpu.memory_space<vmem>>, vector<8x512xbf16>
    %c0_4 = arith.constant 0 : index
    %c0_5 = arith.constant 0 : index
    %5 = vector.load %arg3[%c0_4, %c0_5] : memref<512x256xbf16, #tpu.memory_space<vmem>>, vector<512x256xbf16>
    %cst = arith.constant dense<0.000000e+00> : vector<8x256xf32>
    %6 = tpu.matmul %4, %5, %cst {dimension_numbers = #tpu.dot_dimension_numbers<[1], [0], [0], [1], [0, 0, 1, 1], [], []>} : vector<8x512xbf16>, vector<512x256xbf16>, vector<8x256xf32> -> vector<8x256xf32>
    %7 = arith.addf %3, %6 : vector<8x256xf32>
    %c0_6 = arith.constant 0 : index
    %c0_7 = arith.constant 0 : index
    %8 = vector.load %arg5[%c0_6, %c0_7] : memref<8x256xf32, #tpu.memory_space<vmem>>, vector<8x256xf32>
    tpu.vector_store %arg5[%c0_6, %c0_7], %7 {strides = array<i32>} : memref<8x256xf32, #tpu.memory_space<vmem>>, vector<8x256xf32>,
    %c0_i32_8 = arith.constant 0 : i32
    %9 = arith.cmpi eq, %arg1, %c0_i32_8 : i32
    %10 = arith.extui %9 : i1 to i32
    %c0_i32_9 = arith.constant 0 : i32
    %11 = arith.cmpi ne, %10, %c0_i32_9 : i32
    scf.if %11 {
      %c0_10 = arith.constant 0 : index
      %c0_11 = arith.constant 0 : index
      %12 = vector.load %arg5[%c0_10, %c0_11] : memref<8x256xf32, #tpu.memory_space<vmem>>, vector<8x256xf32>
      %c0_12 = arith.constant 0 : index
      %c0_13 = arith.constant 0 : index
      %13 = vector.load %arg4[%c0_12, %c0_13] : memref<1x256xf32, #tpu.memory_space<vmem>>, vector<1x256xf32>
      %14 = vector.broadcast %13 : vector<1x256xf32> to vector<8x256xf32>
      %15 = arith.addf %12, %14 : vector<8x256xf32>
      %c0_14 = arith.constant 0 : index
      %c0_15 = arith.constant 0 : index
      %16 = vector.load %arg5[%c0_14, %c0_15] : memref<8x256xf32, #tpu.memory_space<vmem>>, vector<8x256xf32>
      tpu.vector_store %arg5[%c0_14, %c0_15], %15 {strides = array<i32>} : memref<8x256xf32, #tpu.memory_space<vmem>>, vector<8x256xf32>,
    } else {
    }
    return
  }
  func.func @transform_0(%arg0: i32, %arg1: i32) -> (i32, i32) {
    %c0_i32 = arith.constant 0 : i32
    return %arg0, %arg1 : i32, i32
  }
  func.func @transform_1(%arg0: i32, %arg1: i32) -> (i32, i32) {
    %c0_i32 = arith.constant 0 : i32
    %c0_i32_0 = arith.constant 0 : i32
    return %arg1, %c0_i32 : i32, i32
  }
  func.func @transform_2(%arg0: i32, %arg1: i32) -> (i32, i32) {
    %c0_i32 = arith.constant 0 : i32
    %c0_i32_0 = arith.constant 0 : i32
    %c0_i32_1 = arith.constant 0 : i32
    return %c0_i32, %c0_i32_0 : i32, i32
  }
  func.func @transform_3(%arg0: i32, %arg1: i32) -> (i32, i32) {
    %c0_i32 = arith.constant 0 : i32
    %c0_i32_0 = arith.constant 0 : i32
    return %arg0, %c0_i32 : i32, i32
  }
}

</mosaic_0001>

<bundles_post_ra>
// kernel: resnet34_forward.39
= control target key start
LH: loop header
LB: loop body
LE: loop exit
PB: predicated region body
PF: predicated region fallthrough
CT: control target
= control target key end

     0   :  { %v1573_v0 = vmov 0   ;;  %s2127_s1 = inlined_call_operand.vmem [shape: bf16[256,128], index: 1, kind: input, shape index: {}]   ;;  %s2128_s0 = inlined_call_operand.vmem [shape: bf16[512,256], index: 0, kind: input, shape index: {}]   ;;  %s2129_s2 = inlined_call_operand.vmem [shape: f32[1,128], index: 2, kind: input, shape index: {}]   ;;  %s2130_s3 = inlined_call_operand.vmem [shape: f32[512,128], index: 3, kind: output, shape index: {}]  }
   0x1   :  { %659 = vmatprep.subr.bf16.mxu0 %v1573_v0  ;;  %1427 = vmatprep.subr.bf16.mxu1 %v1573_v0  ;;  %v1461_v1 = vld [vmem:[%s2127_s1] sm:$0xff]   ;;  %v1462_v2 = vld [vmem:[%s2127_s1 + $0x8] sm:$0xff]   ;;  %v1463_v3 = vld [vmem:[%s2127_s1 + $0x10] sm:$0xff]  }
   0x2   :  { %660 = vmatpush1.bf16.msra.mxu0 %v1461_v1  ;;  %1443 = vmatpush1.bf16.msra.mxu1 %v1461_v1  ;;  %v1464_v4 = vld [vmem:[%s2127_s1 + $0x18] sm:$0xff]   ;;  %v1465_v5 = vld [vmem:[%s2127_s1 + $0x20] sm:$0xff]   ;;  %v1466_v7 = vld [vmem:[%s2127_s1 + $0x28] sm:$0xff]  }
   0x3   :  { %661 = vmatprep.subr.bf16.mxu0 %v1573_v0  ;;  %1428 = vmatprep.subr.bf16.mxu1 %v1573_v0  ;;  %v1479_v6 = vld [vmem:[%s2128_s0 + $0x4] ss:$8 sps:$4 sm:$0xff]   ;;  %v1467_v9 = vld [vmem:[%s2127_s1 + $0x30] sm:$0xff]   ;;  %v1468_v10 = vld [vmem:[%s2127_s1 + $0x38] sm:$0xff]  }
   0x4   :  { %v1482_v8 = vld [vmem:[%s2128_s0 + $0x104] ss:$8 sps:$4 sm:$0xff]   ;;  %691 = vmatprep.mubr.bf16.mxu0 %v1479_v6  ;;  %v1471_v13 = vld [vmem:[%s2127_s1 + $0x50] sm:$0xff]   ;;  %v1472_v14 = vld [vmem:[%s2127_s1 + $0x58] sm:$0xff]  }
   0x5   :  { %819 = vmatprep.mubr.bf16.mxu1 %v1482_v8  ;;  %v1469_v11 = vld [vmem:[%s2127_s1 + $0x40] sm:$0xff]   ;;  %v1470_v12 = vld [vmem:[%s2127_s1 + $0x48] sm:$0xff]   ;;  %v1475_v17 = vld [vmem:[%s2127_s1 + $0x70] sm:$0xff]  }
   0x6   :  { %662 = vmatpush1.bf16.msra.mxu0 %v1462_v2  ;;  %1444 = vmatpush1.bf16.msra.mxu1 %v1462_v2  ;;  %v1473_v15 = vld [vmem:[%s2127_s1 + $0x60] sm:$0xff]   ;;  %v1474_v16 = vld [vmem:[%s2127_s1 + $0x68] sm:$0xff]   ;;  %v1476_v18 = vld [vmem:[%s2127_s1 + $0x78] sm:$0xff]  }
   0x7   :  { %663 = vmatprep.subr.bf16.mxu0 %v1573_v0  ;;  %1429 = vmatprep.subr.bf16.mxu1 %v1573_v0  ;;  %v1477_v19 = vld [vmem:[%s2128_s0] ss:$8 sps:$4 sm:$0xff]   ;;  %v1483_v21 = vld [vmem:[%s2128_s0 + $0x14] ss:$8 sps:$4 sm:$0xff]   ;;  %v1487_v23 = vld [vmem:[%s2128_s0 + $0x10] ss:$8 sps:$4 sm:$0xff]  }
   0x8   :  { %v1480_v20 = vld [vmem:[%s2128_s0 + $0x100] ss:$8 sps:$4 sm:$0xff]   ;;  %v1485_v22 = vld [vmem:[%s2128_s0 + $0x114] ss:$8 sps:$4 sm:$0xff]   ;;  %v1488_v24 = vld [vmem:[%s2128_s0 + $0x110] ss:$8 sps:$4 sm:$0xff]  }
   0x9   :  { %v1489_v25 = vld [vmem:[%s2128_s0 + $0x24] ss:$8 sps:$4 sm:$0xff]   ;;  %v1493_v27 = vld [vmem:[%s2128_s0 + $0x20] ss:$8 sps:$4 sm:$0xff]   ;;  %v1495_v29 = vld [vmem:[%s2128_s0 + $0x34] ss:$8 sps:$4 sm:$0xff]  }
   0xa   :  { %664 = vmatpush1.bf16.msra.mxu0 %v1463_v3  ;;  %1445 = vmatpush1.bf16.msra.mxu1 %v1463_v3  ;;  %v1491_v26 = vld [vmem:[%s2128_s0 + $0x124] ss:$8 sps:$4 sm:$0xff]   ;;  %v1494_v28 = vld [vmem:[%s2128_s0 + $0x120] ss:$8 sps:$4 sm:$0xff]   ;;  %v1497_v30 = vld [vmem:[%s2128_s0 + $0x134] ss:$8 sps:$4 sm:$0xff]  }
   0xb   :  { %665 = vmatprep.subr.bf16.mxu0 %v1573_v0  ;;  %1430 = vmatprep.subr.bf16.mxu1 %v1573_v0  ;;  %v1499_v31 = vld [vmem:[%s2128_s0 + $0x30] ss:$8 sps:$4 sm:$0xff]   ;;  %v1501_v33 = vld [vmem:[%s2128_s0 + $0x44] ss:$8 sps:$4 sm:$0xff]   ;;  %v1505_v35 = vld [vmem:[%s2128_s0 + $0x40] ss:$8 sps:$4 sm:$0xff]  }
   0xc   :  { %v1500_v32 = vld [vmem:[%s2128_s0 + $0x130] ss:$8 sps:$4 sm:$0xff]   ;;  %v1503_v34 = vld [vmem:[%s2128_s0 + $0x144] ss:$8 sps:$4 sm:$0xff]   ;;  %v1506_v36 = vld [vmem:[%s2128_s0 + $0x140] ss:$8 sps:$4 sm:$0xff]  }
   0xd   :  { %v1507_v37 = vld [vmem:[%s2128_s0 + $0x54] ss:$8 sps:$4 sm:$0xff]   ;;  %v1511_v39 = vld [vmem:[%s2128_s0 + $0x50] ss:$8 sps:$4 sm:$0xff]   ;;  %v1513_v41 = vld [vmem:[%s2128_s0 + $0x64] ss:$8 sps:$4 sm:$0xff]  }
   0xe   :  { %666 = vmatpush1.bf16.msra.mxu0 %v1464_v4  ;;  %1446 = vmatpush1.bf16.msra.mxu1 %v1464_v4  ;;  %v1509_v38 = vld [vmem:[%s2128_s0 + $0x154] ss:$8 sps:$4 sm:$0xff]   ;;  %v1512_v40 = vld [vmem:[%s2128_s0 + $0x150] ss:$8 sps:$4 sm:$0xff]   ;;  %v1515_v42 = vld [vmem:[%s2128_s0 + $0x164] ss:$8 sps:$4 sm:$0xff]  }
   0xf   :  { %667 = vmatprep.subr.bf16.mxu0 %v1573_v0  ;;  %1431 = vmatprep.subr.bf16.mxu1 %v1573_v0  ;;  %v1517_v43 = vld [vmem:[%s2128_s0 + $0x60] ss:$8 sps:$4 sm:$0xff]   ;;  %v1519_v45 = vld [vmem:[%s2128_s0 + $0x74] ss:$8 sps:$4 sm:$0xff]   ;;  %v1523_v47 = vld [vmem:[%s2128_s0 + $0x70] ss:$8 sps:$4 sm:$0xff]  }
  0x10   :  { %v1518_v44 = vld [vmem:[%s2128_s0 + $0x160] ss:$8 sps:$4 sm:$0xff]   ;;  %v1521_v46 = vld [vmem:[%s2128_s0 + $0x174] ss:$8 sps:$4 sm:$0xff]   ;;  %v1524_v48 = vld [vmem:[%s2128_s0 + $0x170] ss:$8 sps:$4 sm:$0xff]  }
  0x11   :  { %v1525_v49 = vld [vmem:[%s2128_s0 + $0x84] ss:$8 sps:$4 sm:$0xff]   ;;  %v1529_v51 = vld [vmem:[%s2128_s0 + $0x80] ss:$8 sps:$4 sm:$0xff]   ;;  %v1531_v53 = vld [vmem:[%s2128_s0 + $0x94] ss:$8 sps:$4 sm:$0xff]  }
  0x12   :  { %668 = vmatpush1.bf16.msra.mxu0 %v1465_v5  ;;  %1447 = vmatpush1.bf16.msra.mxu1 %v1465_v5  ;;  %v1527_v50 = vld [vmem:[%s2128_s0 + $0x184] ss:$8 sps:$4 sm:$0xff]   ;;  %v1530_v52 = vld [vmem:[%s2128_s0 + $0x180] ss:$8 sps:$4 sm:$0xff]   ;;  %v1533_v54 = vld [vmem:[%s2128_s0 + $0x194] ss:$8 sps:$4 sm:$0xff]  }
  0x13   :  { %669 = vmatprep.subr.bf16.mxu0 %v1573_v0  ;;  %1432 = vmatprep.subr.bf16.mxu1 %v1573_v0  ;;  %v1535_v55 = vld [vmem:[%s2128_s0 + $0x90] ss:$8 sps:$4 sm:$0xff]   ;;  %v1537_v57 = vld [vmem:[%s2128_s0 + $0xa4] ss:$8 sps:$4 sm:$0xff]   ;;  %v1541_v59 = vld [vmem:[%s2128_s0 + $0xa0] ss:$8 sps:$4 sm:$0xff]  }
  0x14   :  { %v1536_v56 = vld [vmem:[%s2128_s0 + $0x190] ss:$8 sps:$4 sm:$0xff]   ;;  %v1539_v58 = vld [vmem:[%s2128_s0 + $0x1a4] ss:$8 sps:$4 sm:$0xff]   ;;  %v1542_v60 = vld [vmem:[%s2128_s0 + $0x1a0] ss:$8 sps:$4 sm:$0xff]  }
  0x15   :  { %v1543_v61 = vld [vmem:[%s2128_s0 + $0xb4] ss:$8 sps:$4 sm:$0xff]   ;;  %v1547_v63 = vld [vmem:[%s2128_s0 + $0xb0] ss:$8 sps:$4 sm:$0xff]   ;;  %v1549_v1 = vld [vmem:[%s2128_s0 + $0xc4] ss:$8 sps:$4 sm:$0xff]  }
  0x16   :  { %670 = vmatpush1.bf16.msra.mxu0 %v1466_v7  ;;  %1448 = vmatpush1.bf16.msra.mxu1 %v1466_v7  ;;  %v1545_v62 = vld [vmem:[%s2128_s0 + $0x1b4] ss:$8 sps:$4 sm:$0xff]   ;;  %v1551_v2 = vld [vmem:[%s2128_s0 + $0x1c4] ss:$8 sps:$4 sm:$0xff]   ;;  %v1553_v3 = vld [vmem:[%s2128_s0 + $0xc0] ss:$8 sps:$4 sm:$0xff]  }
  0x17   :  { %671 = vmatprep.subr.bf16.mxu0 %v1573_v0  ;;  %1433 = vmatprep.subr.bf16.mxu1 %v1573_v0  ;;  %v1554_v4 = vld [vmem:[%s2128_s0 + $0x1c0] ss:$8 sps:$4 sm:$0xff]   ;;  %v1555_v5 = vld [vmem:[%s2128_s0 + $0xd4] ss:$8 sps:$4 sm:$0xff]   ;;  %v1559_v7 = vld [vmem:[%s2128_s0 + $0xd0] ss:$8 sps:$4 sm:$0xff]  }
  0x18   :  { %v1557_v6 = vld [vmem:[%s2128_s0 + $0x1d4] ss:$8 sps:$4 sm:$0xff]   ;;  %v1560_v8 = vld [vmem:[%s2128_s0 + $0x1d0] ss:$8 sps:$4 sm:$0xff]  }
  0x1a   :  { %672 = vmatpush1.bf16.msra.mxu0 %v1467_v9  ;;  %1449 = vmatpush1.bf16.msra.mxu1 %v1467_v9  ;;  %v1561_v9 = vld [vmem:[%s2128_s0 + $0xe4] ss:$8 sps:$4 sm:$0xff]  }
  0x1b   :  { %673 = vmatprep.subr.bf16.mxu0 %v1573_v0  ;;  %1434 = vmatprep.subr.bf16.mxu1 %v1573_v0 }
  0x1e   :  { %674 = vmatpush1.bf16.msra.mxu0 %v1468_v10  ;;  %1450 = vmatpush1.bf16.msra.mxu1 %v1468_v10  ;;  %v1563_v10 = vld [vmem:[%s2128_s0 + $0x1e4] ss:$8 sps:$4 sm:$0xff]  }
  0x1f   :  { %675 = vmatprep.subr.bf16.mxu0 %v1573_v0  ;;  %1435 = vmatprep.subr.bf16.mxu1 %v1573_v0 }
  0x22   :  { %676 = vmatpush1.bf16.msra.mxu0 %v1469_v11  ;;  %1451 = vmatpush1.bf16.msra.mxu1 %v1469_v11  ;;  %v1565_v11 = vld [vmem:[%s2128_s0 + $0xe0] ss:$8 sps:$4 sm:$0xff]  }
  0x23   :  { %677 = vmatprep.subr.bf16.mxu0 %v1573_v0  ;;  %1436 = vmatprep.subr.bf16.mxu1 %v1573_v0 }
  0x26   :  { %678 = vmatpush1.bf16.msra.mxu0 %v1470_v12  ;;  %1452 = vmatpush1.bf16.msra.mxu1 %v1470_v12  ;;  %v1566_v12 = vld [vmem:[%s2128_s0 + $0x1e0] ss:$8 sps:$4 sm:$0xff]  }
  0x27   :  { %679 = vmatprep.subr.bf16.mxu0 %v1573_v0  ;;  %1437 = vmatprep.subr.bf16.mxu1 %v1573_v0 }
  0x2a   :  { %680 = vmatpush1.bf16.msra.mxu0 %v1471_v13  ;;  %1453 = vmatpush1.bf16.msra.mxu1 %v1471_v13  ;;  %v1567_v13 = vld [vmem:[%s2128_s0 + $0xf4] ss:$8 sps:$4 sm:$0xff]  }
  0x2b   :  { %681 = vmatprep.subr.bf16.mxu0 %v1573_v0  ;;  %1438 = vmatprep.subr.bf16.mxu1 %v1573_v0 }
  0x2e   :  { %682 = vmatpush1.bf16.msra.mxu0 %v1472_v14  ;;  %1454 = vmatpush1.bf16.msra.mxu1 %v1472_v14  ;;  %v1569_v14 = vld [vmem:[%s2128_s0 + $0x1f4] ss:$8 sps:$4 sm:$0xff]  }
  0x2f   :  { %683 = vmatprep.subr.bf16.mxu0 %v1573_v0  ;;  %1439 = vmatprep.subr.bf16.mxu1 %v1573_v0 }
  0x32   :  { %684 = vmatpush1.bf16.msra.mxu0 %v1473_v15  ;;  %1455 = vmatpush1.bf16.msra.mxu1 %v1473_v15  ;;  %v1571_v15 = vld [vmem:[%s2128_s0 + $0xf0] ss:$8 sps:$4 sm:$0xff]  }
  0x33   :  { %685 = vmatprep.subr.bf16.mxu0 %v1573_v0  ;;  %1440 = vmatprep.subr.bf16.mxu1 %v1573_v0 }
  0x36   :  { %686 = vmatpush1.bf16.msra.mxu0 %v1474_v16  ;;  %1456 = vmatpush1.bf16.msra.mxu1 %v1474_v16  ;;  %v1572_v16 = vld [vmem:[%s2128_s0 + $0x1f0] ss:$8 sps:$4 sm:$0xff]  }
  0x37   :  { %687 = vmatprep.subr.bf16.mxu0 %v1573_v0  ;;  %1441 = vmatprep.subr.bf16.mxu1 %v1573_v0 }
  0x3a   :  { %688 = vmatpush1.bf16.msra.mxu0 %v1475_v17  ;;  %1457 = vmatpush1.bf16.msra.mxu1 %v1475_v17 }
  0x3b   :  { %689 = vmatprep.subr.bf16.mxu0 %v1573_v0  ;;  %1442 = vmatprep.subr.bf16.mxu1 %v1573_v0  ;;  %v1548_v0 = vld [vmem:[%s2128_s0 + $0x1b0] ss:$8 sps:$4 sm:$0xff]  }
  0x3e   :  { %690 = vmatpush1.bf16.msra.mxu0 %v1476_v18  ;;  %1458 = vmatpush1.bf16.msra.mxu1 %v1476_v18  ;;  %v1869_v18 = vld [vmem:[%s2129_s2] ss:$0 sm:$0xff] }
  0x41   :  { %692 = vmatmul.mubr.bf16.vlgmr.msra.gmra.mrb[0].mxu0 %v1477_v19  ;;  %820 = vmatmul.mubr.bf16.vlgmr.msra.gmra.mrb[0].mxu1 %v1480_v20 }
  0x42   :  { %699 = vmatprep.mubr.bf16.mxu0 %v1483_v21  ;;  %827 = vmatprep.mubr.bf16.mxu1 %v1485_v22 }
  0x49   :  { %700 = vmatmul.mubr.bf16.gmra.mrb[4].mxu0 %v1487_v23  ;;  %828 = vmatmul.mubr.bf16.gmra.mrb[4].mxu1 %v1488_v24 }
  0x4a   :  { %707 = vmatprep.mubr.bf16.mxu0 %v1489_v25  ;;  %835 = vmatprep.mubr.bf16.mxu1 %v1491_v26 }
  0x51   :  { %708 = vmatmul.mubr.bf16.gmra.mrb[8].mxu0 %v1493_v27  ;;  %836 = vmatmul.mubr.bf16.gmra.mrb[8].mxu1 %v1494_v28 }
  0x52   :  { %715 = vmatprep.mubr.bf16.mxu0 %v1495_v29  ;;  %843 = vmatprep.mubr.bf16.mxu1 %v1497_v30 }
  0x59   :  { %716 = vmatmul.mubr.bf16.gmra.mrb[12].mxu0 %v1499_v31  ;;  %844 = vmatmul.mubr.bf16.gmra.mrb[12].mxu1 %v1500_v32 }
  0x5a   :  { %723 = vmatprep.mubr.bf16.mxu0 %v1501_v33  ;;  %851 = vmatprep.mubr.bf16.mxu1 %v1503_v34 }
  0x61   :  { %724 = vmatmul.mubr.bf16.gmra.mrb[16].mxu0 %v1505_v35  ;;  %852 = vmatmul.mubr.bf16.gmra.mrb[16].mxu1 %v1506_v36 }
  0x62   :  { %731 = vmatprep.mubr.bf16.mxu0 %v1507_v37  ;;  %859 = vmatprep.mubr.bf16.mxu1 %v1509_v38 }
  0x69   :  { %732 = vmatmul.mubr.bf16.gmra.mrb[20].mxu0 %v1511_v39  ;;  %860 = vmatmul.mubr.bf16.gmra.mrb[20].mxu1 %v1512_v40 }
  0x6a   :  { %739 = vmatprep.mubr.bf16.mxu0 %v1513_v41  ;;  %867 = vmatprep.mubr.bf16.mxu1 %v1515_v42 }
  0x71   :  { %740 = vmatmul.mubr.bf16.gmra.mrb[24].mxu0 %v1517_v43  ;;  %868 = vmatmul.mubr.bf16.gmra.mrb[24].mxu1 %v1518_v44 }
  0x72   :  { %747 = vmatprep.mubr.bf16.mxu0 %v1519_v45  ;;  %875 = vmatprep.mubr.bf16.mxu1 %v1521_v46 }
  0x79   :  { %748 = vmatmul.mubr.bf16.gmra.mrb[28].mxu0 %v1523_v47  ;;  %876 = vmatmul.mubr.bf16.gmra.mrb[28].mxu1 %v1524_v48 }
  0x7a   :  { %755 = vmatprep.mubr.bf16.mxu0 %v1525_v49  ;;  %883 = vmatprep.mubr.bf16.mxu1 %v1527_v50 }
  0x81   :  { %756 = vmatmul.mubr.bf16.gmra.mrb[32].mxu0 %v1529_v51  ;;  %884 = vmatmul.mubr.bf16.gmra.mrb[32].mxu1 %v1530_v52 }
  0x82   :  { %763 = vmatprep.mubr.bf16.mxu0 %v1531_v53  ;;  %891 = vmatprep.mubr.bf16.mxu1 %v1533_v54 }
  0x89   :  { %764 = vmatmul.mubr.bf16.gmra.mrb[36].mxu0 %v1535_v55  ;;  %892 = vmatmul.mubr.bf16.gmra.mrb[36].mxu1 %v1536_v56 }
  0x8a   :  { %771 = vmatprep.mubr.bf16.mxu0 %v1537_v57  ;;  %899 = vmatprep.mubr.bf16.mxu1 %v1539_v58 }
  0x91   :  { %772 = vmatmul.mubr.bf16.gmra.mrb[40].mxu0 %v1541_v59  ;;  %900 = vmatmul.mubr.bf16.gmra.mrb[40].mxu1 %v1542_v60 }
  0x92   :  { %779 = vmatprep.mubr.bf16.mxu0 %v1543_v61  ;;  %907 = vmatprep.mubr.bf16.mxu1 %v1545_v62 }
  0x99   :  { %780 = vmatmul.mubr.bf16.gmra.mrb[44].mxu0 %v1547_v63  ;;  %908 = vmatmul.mubr.bf16.gmra.mrb[44].mxu1 %v1548_v0 }
  0x9a   :  { %787 = vmatprep.mubr.bf16.mxu0 %v1549_v1  ;;  %915 = vmatprep.mubr.bf16.mxu1 %v1551_v2 }
  0xa1   :  { %788 = vmatmul.mubr.bf16.gmra.mrb[48].mxu0 %v1553_v3  ;;  %916 = vmatmul.mubr.bf16.gmra.mrb[48].mxu1 %v1554_v4 }
  0xa2   :  { %795 = vmatprep.mubr.bf16.mxu0 %v1555_v5  ;;  %923 = vmatprep.mubr.bf16.mxu1 %v1557_v6 }
  0xa9   :  { %796 = vmatmul.mubr.bf16.gmra.mrb[52].mxu0 %v1559_v7  ;;  %924 = vmatmul.mubr.bf16.gmra.mrb[52].mxu1 %v1560_v8 }
  0xaa   :  { %803 = vmatprep.mubr.bf16.mxu0 %v1561_v9  ;;  %931 = vmatprep.mubr.bf16.mxu1 %v1563_v10 }
  0xb1   :  { %804 = vmatmul.mubr.bf16.gmra.mrb[56].mxu0 %v1565_v11  ;;  %932 = vmatmul.mubr.bf16.gmra.mrb[56].mxu1 %v1566_v12 }
  0xb2   :  { %811 = vmatprep.mubr.bf16.mxu0 %v1567_v13  ;;  %939 = vmatprep.mubr.bf16.mxu1 %v1569_v14 }
  0xb9   :  { %812 = vmatmul.mubr.bf16.gmra.mrb[60].mxu0 %v1571_v15  ;;  %940 = vmatmul.mubr.bf16.gmra.mrb[60].mxu1 %v1572_v16 }
 0x114   :  { %v693_v17 = vpop.f32.mrb[0].mxu0  ;;  %v821_v19 = vpop.f32.mrb[0].mxu1 }
 0x115   :  { %v695_v20 = vpop.f32.mrb[1].mxu0  ;;  %v823_v21 = vpop.f32.mrb[1].mxu1  ;;  %v1150_v24 = vadd.f32 %v1869_v18, %v693_v17  ;;  %v1182_v25 = vadd.f32 %v1869_v18, %v821_v19 }
 0x116   :  { %v696_v22 = vpop.f32.mrb[2].mxu0  ;;  %v824_v23 = vpop.f32.mrb[2].mxu1 }
 0x117   :  { %v698_v26 = vpop.f32.mrb[3].mxu0  ;;  %v826_v27 = vpop.f32.mrb[3].mxu1  ;;  %v1214_v28 = vmax.f32 %v1150_v24, 0.0  ;;  %v1246_v29 = vmax.f32 %v1182_v25, 0.0  ;;  %v1151_v30 = vadd.f32 %v1869_v18, %v696_v22  ;;  %v1183_v31 = vadd.f32 %v1869_v18, %v824_v23 }
 0x119   :  { %1278 = vst [vmem:[%s2130_s3] sm:$0xff] %v1214_v28  ;;  %1310 = vst [vmem:[%s2130_s3 + $0x100] sm:$0xff] %v1246_v29  ;;  %v1215_v32 = vmax.f32 %v1151_v30, 0.0  ;;  %v1247_v33 = vmax.f32 %v1183_v31, 0.0 }
 0x11b   :  { %1279 = vst [vmem:[%s2130_s3 + $0x8] sm:$0xff] %v1215_v32  ;;  %1311 = vst [vmem:[%s2130_s3 + $0x108] sm:$0xff] %v1247_v33 }
 0x11c   :  { %v701_v34 = vpop.f32.mrb[4].mxu0  ;;  %v829_v35 = vpop.f32.mrb[4].mxu1 }
 0x11d   :  { %v703_v36 = vpop.f32.mrb[5].mxu0  ;;  %v831_v37 = vpop.f32.mrb[5].mxu1  ;;  %v1152_v40 = vadd.f32 %v1869_v18, %v701_v34  ;;  %v1184_v41 = vadd.f32 %v1869_v18, %v829_v35 }
 0x11e   :  { %v704_v38 = vpop.f32.mrb[6].mxu0  ;;  %v832_v39 = vpop.f32.mrb[6].mxu1 }
 0x11f   :  { %v706_v42 = vpop.f32.mrb[7].mxu0  ;;  %v834_v43 = vpop.f32.mrb[7].mxu1  ;;  %v1216_v44 = vmax.f32 %v1152_v40, 0.0  ;;  %v1248_v45 = vmax.f32 %v1184_v41, 0.0  ;;  %v1153_v46 = vadd.f32 %v1869_v18, %v704_v38  ;;  %v1185_v47 = vadd.f32 %v1869_v18, %v832_v39 }
 0x121   :  { %1280 = vst [vmem:[%s2130_s3 + $0x10] sm:$0xff] %v1216_v44  ;;  %1312 = vst [vmem:[%s2130_s3 + $0x110] sm:$0xff] %v1248_v45  ;;  %v1217_v48 = vmax.f32 %v1153_v46, 0.0  ;;  %v1249_v49 = vmax.f32 %v1185_v47, 0.0 }
 0x123   :  { %1281 = vst [vmem:[%s2130_s3 + $0x18] sm:$0xff] %v1217_v48  ;;  %1313 = vst [vmem:[%s2130_s3 + $0x118] sm:$0xff] %v1249_v49 }
 0x124   :  { %v709_v50 = vpop.f32.mrb[8].mxu0  ;;  %v837_v51 = vpop.f32.mrb[8].mxu1 }
 0x125   :  { %v711_v52 = vpop.f32.mrb[9].mxu0  ;;  %v839_v53 = vpop.f32.mrb[9].mxu1  ;;  %v1154_v56 = vadd.f32 %v1869_v18, %v709_v50  ;;  %v1186_v57 = vadd.f32 %v1869_v18, %v837_v51 }
 0x126   :  { %v712_v54 = vpop.f32.mrb[10].mxu0  ;;  %v840_v55 = vpop.f32.mrb[10].mxu1 }
 0x127   :  { %v714_v58 = vpop.f32.mrb[11].mxu0  ;;  %v842_v59 = vpop.f32.mrb[11].mxu1  ;;  %v1218_v60 = vmax.f32 %v1154_v56, 0.0  ;;  %v1250_v61 = vmax.f32 %v1186_v57, 0.0  ;;  %v1155_v62 = vadd.f32 %v1869_v18, %v712_v54  ;;  %v1187_v63 = vadd.f32 %v1869_v18, %v840_v55 }
 0x129   :  { %1282 = vst [vmem:[%s2130_s3 + $0x20] sm:$0xff] %v1218_v60  ;;  %1314 = vst [vmem:[%s2130_s3 + $0x120] sm:$0xff] %v1250_v61  ;;  %v1219_v0 = vmax.f32 %v1155_v62, 0.0  ;;  %v1251_v1 = vmax.f32 %v1187_v63, 0.0 }
 0x12b   :  { %1283 = vst [vmem:[%s2130_s3 + $0x28] sm:$0xff] %v1219_v0  ;;  %1315 = vst [vmem:[%s2130_s3 + $0x128] sm:$0xff] %v1251_v1 }
 0x12c   :  { %v717_v2 = vpop.f32.mrb[12].mxu0  ;;  %v845_v3 = vpop.f32.mrb[12].mxu1 }
 0x12d   :  { %v719_v4 = vpop.f32.mrb[13].mxu0  ;;  %v847_v5 = vpop.f32.mrb[13].mxu1  ;;  %v1156_v8 = vadd.f32 %v1869_v18, %v717_v2  ;;  %v1188_v9 = vadd.f32 %v1869_v18, %v845_v3 }
 0x12e   :  { %v720_v6 = vpop.f32.mrb[14].mxu0  ;;  %v848_v7 = vpop.f32.mrb[14].mxu1 }
 0x12f   :  { %v722_v10 = vpop.f32.mrb[15].mxu0  ;;  %v850_v11 = vpop.f32.mrb[15].mxu1  ;;  %v1220_v12 = vmax.f32 %v1156_v8, 0.0  ;;  %v1252_v13 = vmax.f32 %v1188_v9, 0.0  ;;  %v1157_v14 = vadd.f32 %v1869_v18, %v720_v6  ;;  %v1189_v15 = vadd.f32 %v1869_v18, %v848_v7 }
 0x131   :  { %1284 = vst [vmem:[%s2130_s3 + $0x30] sm:$0xff] %v1220_v12  ;;  %1316 = vst [vmem:[%s2130_s3 + $0x130] sm:$0xff] %v1252_v13  ;;  %v1221_v16 = vmax.f32 %v1157_v14, 0.0  ;;  %v1253_v17 = vmax.f32 %v1189_v15, 0.0 }
 0x133   :  { %1285 = vst [vmem:[%s2130_s3 + $0x38] sm:$0xff] %v1221_v16  ;;  %1317 = vst [vmem:[%s2130_s3 + $0x138] sm:$0xff] %v1253_v17 }
 0x134   :  { %v725_v19 = vpop.f32.mrb[16].mxu0  ;;  %v853_v20 = vpop.f32.mrb[16].mxu1 }
 0x135   :  { %v727_v21 = vpop.f32.mrb[17].mxu0  ;;  %v855_v22 = vpop.f32.mrb[17].mxu1  ;;  %v1158_v25 = vadd.f32 %v1869_v18, %v725_v19  ;;  %v1190_v26 = vadd.f32 %v1869_v18, %v853_v20 }
 0x136   :  { %v728_v23 = vpop.f32.mrb[18].mxu0  ;;  %v856_v24 = vpop.f32.mrb[18].mxu1 }
 0x137   :  { %v730_v27 = vpop.f32.mrb[19].mxu0  ;;  %v858_v28 = vpop.f32.mrb[19].mxu1  ;;  %v1222_v29 = vmax.f32 %v1158_v25, 0.0  ;;  %v1254_v30 = vmax.f32 %v1190_v26, 0.0  ;;  %v1159_v31 = vadd.f32 %v1869_v18, %v728_v23  ;;  %v1191_v32 = vadd.f32 %v1869_v18, %v856_v24 }
 0x139   :  { %1286 = vst [vmem:[%s2130_s3 + $0x40] sm:$0xff] %v1222_v29  ;;  %1318 = vst [vmem:[%s2130_s3 + $0x140] sm:$0xff] %v1254_v30  ;;  %v1223_v33 = vmax.f32 %v1159_v31, 0.0  ;;  %v1255_v34 = vmax.f32 %v1191_v32, 0.0 }
 0x13b   :  { %1287 = vst [vmem:[%s2130_s3 + $0x48] sm:$0xff] %v1223_v33  ;;  %1319 = vst [vmem:[%s2130_s3 + $0x148] sm:$0xff] %v1255_v34 }
 0x13c   :  { %v733_v35 = vpop.f32.mrb[20].mxu0  ;;  %v861_v36 = vpop.f32.mrb[20].mxu1 }
 0x13d   :  { %v735_v37 = vpop.f32.mrb[21].mxu0  ;;  %v863_v38 = vpop.f32.mrb[21].mxu1  ;;  %v1160_v41 = vadd.f32 %v1869_v18, %v733_v35  ;;  %v1192_v42 = vadd.f32 %v1869_v18, %v861_v36 }
 0x13e   :  { %v736_v39 = vpop.f32.mrb[22].mxu0  ;;  %v864_v40 = vpop.f32.mrb[22].mxu1 }
 0x13f   :  { %v738_v43 = vpop.f32.mrb[23].mxu0  ;;  %v866_v44 = vpop.f32.mrb[23].mxu1  ;;  %v1224_v45 = vmax.f32 %v1160_v41, 0.0  ;;  %v1256_v46 = vmax.f32 %v1192_v42, 0.0  ;;  %v1161_v47 = vadd.f32 %v1869_v18, %v736_v39  ;;  %v1193_v48 = vadd.f32 %v1869_v18, %v864_v40 }
 0x141   :  { %1288 = vst [vmem:[%s2130_s3 + $0x50] sm:$0xff] %v1224_v45  ;;  %1320 = vst [vmem:[%s2130_s3 + $0x150] sm:$0xff] %v1256_v46  ;;  %v1225_v49 = vmax.f32 %v1161_v47, 0.0  ;;  %v1257_v50 = vmax.f32 %v1193_v48, 0.0 }
 0x143   :  { %1289 = vst [vmem:[%s2130_s3 + $0x58] sm:$0xff] %v1225_v49  ;;  %1321 = vst [vmem:[%s2130_s3 + $0x158] sm:$0xff] %v1257_v50 }
 0x144   :  { %v741_v51 = vpop.f32.mrb[24].mxu0  ;;  %v869_v52 = vpop.f32.mrb[24].mxu1 }
 0x145   :  { %v743_v53 = vpop.f32.mrb[25].mxu0  ;;  %v871_v54 = vpop.f32.mrb[25].mxu1  ;;  %v1162_v57 = vadd.f32 %v1869_v18, %v741_v51  ;;  %v1194_v58 = vadd.f32 %v1869_v18, %v869_v52 }
 0x146   :  { %v744_v55 = vpop.f32.mrb[26].mxu0  ;;  %v872_v56 = vpop.f32.mrb[26].mxu1 }
 0x147   :  { %v746_v59 = vpop.f32.mrb[27].mxu0  ;;  %v874_v60 = vpop.f32.mrb[27].mxu1  ;;  %v1226_v61 = vmax.f32 %v1162_v57, 0.0  ;;  %v1258_v62 = vmax.f32 %v1194_v58, 0.0  ;;  %v1163_v63 = vadd.f32 %v1869_v18, %v744_v55  ;;  %v1195_v0 = vadd.f32 %v1869_v18, %v872_v56 }
 0x149   :  { %1290 = vst [vmem:[%s2130_s3 + $0x60] sm:$0xff] %v1226_v61  ;;  %1322 = vst [vmem:[%s2130_s3 + $0x160] sm:$0xff] %v1258_v62  ;;  %v1227_v1 = vmax.f32 %v1163_v63, 0.0  ;;  %v1259_v2 = vmax.f32 %v1195_v0, 0.0 }
 0x14b   :  { %1291 = vst [vmem:[%s2130_s3 + $0x68] sm:$0xff] %v1227_v1  ;;  %1323 = vst [vmem:[%s2130_s3 + $0x168] sm:$0xff] %v1259_v2 }
 0x14c   :  { %v749_v3 = vpop.f32.mrb[28].mxu0  ;;  %v877_v4 = vpop.f32.mrb[28].mxu1 }
 0x14d   :  { %v751_v5 = vpop.f32.mrb[29].mxu0  ;;  %v879_v6 = vpop.f32.mrb[29].mxu1  ;;  %v1164_v9 = vadd.f32 %v1869_v18, %v749_v3  ;;  %v1196_v10 = vadd.f32 %v1869_v18, %v877_v4 }
 0x14e   :  { %v752_v7 = vpop.f32.mrb[30].mxu0  ;;  %v880_v8 = vpop.f32.mrb[30].mxu1 }
 0x14f   :  { %v754_v11 = vpop.f32.mrb[31].mxu0  ;;  %v882_v12 = vpop.f32.mrb[31].mxu1  ;;  %v1228_v13 = vmax.f32 %v1164_v9, 0.0  ;;  %v1260_v14 = vmax.f32 %v1196_v10, 0.0  ;;  %v1165_v15 = vadd.f32 %v1869_v18, %v752_v7  ;;  %v1197_v16 = vadd.f32 %v1869_v18, %v880_v8 }
 0x151   :  { %1292 = vst [vmem:[%s2130_s3 + $0x70] sm:$0xff] %v1228_v13  ;;  %1324 = vst [vmem:[%s2130_s3 + $0x170] sm:$0xff] %v1260_v14  ;;  %v1229_v17 = vmax.f32 %v1165_v15, 0.0  ;;  %v1261_v19 = vmax.f32 %v1197_v16, 0.0 }
 0x153   :  { %1293 = vst [vmem:[%s2130_s3 + $0x78] sm:$0xff] %v1229_v17  ;;  %1325 = vst [vmem:[%s2130_s3 + $0x178] sm:$0xff] %v1261_v19 }
 0x154   :  { %v757_v20 = vpop.f32.mrb[32].mxu0  ;;  %v885_v21 = vpop.f32.mrb[32].mxu1 }
 0x155   :  { %v759_v22 = vpop.f32.mrb[33].mxu0  ;;  %v887_v23 = vpop.f32.mrb[33].mxu1  ;;  %v1166_v26 = vadd.f32 %v1869_v18, %v757_v20  ;;  %v1198_v27 = vadd.f32 %v1869_v18, %v885_v21 }
 0x156   :  { %v760_v24 = vpop.f32.mrb[34].mxu0  ;;  %v888_v25 = vpop.f32.mrb[34].mxu1 }
 0x157   :  { %v762_v28 = vpop.f32.mrb[35].mxu0  ;;  %v890_v29 = vpop.f32.mrb[35].mxu1  ;;  %v1230_v30 = vmax.f32 %v1166_v26, 0.0  ;;  %v1262_v31 = vmax.f32 %v1198_v27, 0.0  ;;  %v1167_v32 = vadd.f32 %v1869_v18, %v760_v24  ;;  %v1199_v33 = vadd.f32 %v1869_v18, %v888_v25 }
 0x159   :  { %1294 = vst [vmem:[%s2130_s3 + $0x80] sm:$0xff] %v1230_v30  ;;  %1326 = vst [vmem:[%s2130_s3 + $0x180] sm:$0xff] %v1262_v31  ;;  %v1231_v34 = vmax.f32 %v1167_v32, 0.0  ;;  %v1263_v35 = vmax.f32 %v1199_v33, 0.0 }
 0x15b   :  { %1295 = vst [vmem:[%s2130_s3 + $0x88] sm:$0xff] %v1231_v34  ;;  %1327 = vst [vmem:[%s2130_s3 + $0x188] sm:$0xff] %v1263_v35 }
 0x15c   :  { %v765_v36 = vpop.f32.mrb[36].mxu0  ;;  %v893_v37 = vpop.f32.mrb[36].mxu1 }
 0x15d   :  { %v767_v38 = vpop.f32.mrb[37].mxu0  ;;  %v895_v39 = vpop.f32.mrb[37].mxu1  ;;  %v1168_v42 = vadd.f32 %v1869_v18, %v765_v36  ;;  %v1200_v43 = vadd.f32 %v1869_v18, %v893_v37 }
 0x15e   :  { %v768_v40 = vpop.f32.mrb[38].mxu0  ;;  %v896_v41 = vpop.f32.mrb[38].mxu1 }
 0x15f   :  { %v770_v44 = vpop.f32.mrb[39].mxu0  ;;  %v898_v45 = vpop.f32.mrb[39].mxu1  ;;  %v1232_v46 = vmax.f32 %v1168_v42, 0.0  ;;  %v1264_v47 = vmax.f32 %v1200_v43, 0.0  ;;  %v1169_v48 = vadd.f32 %v1869_v18, %v768_v40  ;;  %v1201_v49 = vadd.f32 %v1869_v18, %v896_v41 }
 0x161   :  { %1296 = vst [vmem:[%s2130_s3 + $0x90] sm:$0xff] %v1232_v46  ;;  %1328 = vst [vmem:[%s2130_s3 + $0x190] sm:$0xff] %v1264_v47  ;;  %v1233_v50 = vmax.f32 %v1169_v48, 0.0  ;;  %v1265_v51 = vmax.f32 %v1201_v49, 0.0 }
 0x163   :  { %1297 = vst [vmem:[%s2130_s3 + $0x98] sm:$0xff] %v1233_v50  ;;  %1329 = vst [vmem:[%s2130_s3 + $0x198] sm:$0xff] %v1265_v51 }
 0x164   :  { %v773_v52 = vpop.f32.mrb[40].mxu0  ;;  %v901_v53 = vpop.f32.mrb[40].mxu1 }
 0x165   :  { %v775_v54 = vpop.f32.mrb[41].mxu0  ;;  %v903_v55 = vpop.f32.mrb[41].mxu1  ;;  %v1170_v58 = vadd.f32 %v1869_v18, %v773_v52  ;;  %v1202_v59 = vadd.f32 %v1869_v18, %v901_v53 }
 0x166   :  { %v776_v56 = vpop.f32.mrb[42].mxu0  ;;  %v904_v57 = vpop.f32.mrb[42].mxu1 }
 0x167   :  { %v778_v60 = vpop.f32.mrb[43].mxu0  ;;  %v906_v61 = vpop.f32.mrb[43].mxu1  ;;  %v1234_v62 = vmax.f32 %v1170_v58, 0.0  ;;  %v1266_v63 = vmax.f32 %v1202_v59, 0.0  ;;  %v1171_v0 = vadd.f32 %v1869_v18, %v776_v56  ;;  %v1203_v1 = vadd.f32 %v1869_v18, %v904_v57 }
 0x169   :  { %1298 = vst [vmem:[%s2130_s3 + $0xa0] sm:$0xff] %v1234_v62  ;;  %1330 = vst [vmem:[%s2130_s3 + $0x1a0] sm:$0xff] %v1266_v63  ;;  %v1235_v2 = vmax.f32 %v1171_v0, 0.0  ;;  %v1267_v3 = vmax.f32 %v1203_v1, 0.0 }
 0x16b   :  { %1299 = vst [vmem:[%s2130_s3 + $0xa8] sm:$0xff] %v1235_v2  ;;  %1331 = vst [vmem:[%s2130_s3 + $0x1a8] sm:$0xff] %v1267_v3 }
 0x16c   :  { %v781_v4 = vpop.f32.mrb[44].mxu0  ;;  %v909_v5 = vpop.f32.mrb[44].mxu1 }
 0x16d   :  { %v783_v6 = vpop.f32.mrb[45].mxu0  ;;  %v911_v7 = vpop.f32.mrb[45].mxu1  ;;  %v1172_v10 = vadd.f32 %v1869_v18, %v781_v4  ;;  %v1204_v11 = vadd.f32 %v1869_v18, %v909_v5 }
 0x16e   :  { %v784_v8 = vpop.f32.mrb[46].mxu0  ;;  %v912_v9 = vpop.f32.mrb[46].mxu1 }
 0x16f   :  { %v786_v12 = vpop.f32.mrb[47].mxu0  ;;  %v914_v13 = vpop.f32.mrb[47].mxu1  ;;  %v1236_v14 = vmax.f32 %v1172_v10, 0.0  ;;  %v1268_v15 = vmax.f32 %v1204_v11, 0.0  ;;  %v1173_v16 = vadd.f32 %v1869_v18, %v784_v8  ;;  %v1205_v17 = vadd.f32 %v1869_v18, %v912_v9 }
 0x171   :  { %1300 = vst [vmem:[%s2130_s3 + $0xb0] sm:$0xff] %v1236_v14  ;;  %1332 = vst [vmem:[%s2130_s3 + $0x1b0] sm:$0xff] %v1268_v15  ;;  %v1237_v19 = vmax.f32 %v1173_v16, 0.0  ;;  %v1269_v20 = vmax.f32 %v1205_v17, 0.0 }
 0x173   :  { %1301 = vst [vmem:[%s2130_s3 + $0xb8] sm:$0xff] %v1237_v19  ;;  %1333 = vst [vmem:[%s2130_s3 + $0x1b8] sm:$0xff] %v1269_v20 }
 0x174   :  { %v789_v21 = vpop.f32.mrb[48].mxu0  ;;  %v917_v22 = vpop.f32.mrb[48].mxu1 }
 0x175   :  { %v791_v23 = vpop.f32.mrb[49].mxu0  ;;  %v919_v24 = vpop.f32.mrb[49].mxu1  ;;  %v1174_v27 = vadd.f32 %v1869_v18, %v789_v21  ;;  %v1206_v28 = vadd.f32 %v1869_v18, %v917_v22 }
 0x176   :  { %v792_v25 = vpop.f32.mrb[50].mxu0  ;;  %v920_v26 = vpop.f32.mrb[50].mxu1 }
 0x177   :  { %v794_v29 = vpop.f32.mrb[51].mxu0  ;;  %v922_v30 = vpop.f32.mrb[51].mxu1  ;;  %v1238_v31 = vmax.f32 %v1174_v27, 0.0  ;;  %v1270_v32 = vmax.f32 %v1206_v28, 0.0  ;;  %v1175_v33 = vadd.f32 %v1869_v18, %v792_v25  ;;  %v1207_v34 = vadd.f32 %v1869_v18, %v920_v26 }
 0x179   :  { %1302 = vst [vmem:[%s2130_s3 + $0xc0] sm:$0xff] %v1238_v31  ;;  %1334 = vst [vmem:[%s2130_s3 + $0x1c0] sm:$0xff] %v1270_v32  ;;  %v1239_v35 = vmax.f32 %v1175_v33, 0.0  ;;  %v1271_v36 = vmax.f32 %v1207_v34, 0.0 }
 0x17b   :  { %1303 = vst [vmem:[%s2130_s3 + $0xc8] sm:$0xff] %v1239_v35  ;;  %1335 = vst [vmem:[%s2130_s3 + $0x1c8] sm:$0xff] %v1271_v36 }
 0x17c   :  { %v797_v37 = vpop.f32.mrb[52].mxu0  ;;  %v925_v38 = vpop.f32.mrb[52].mxu1 }
 0x17d   :  { %v799_v39 = vpop.f32.mrb[53].mxu0  ;;  %v927_v40 = vpop.f32.mrb[53].mxu1  ;;  %v1176_v43 = vadd.f32 %v1869_v18, %v797_v37  ;;  %v1208_v44 = vadd.f32 %v1869_v18, %v925_v38 }
 0x17e   :  { %v800_v41 = vpop.f32.mrb[54].mxu0  ;;  %v928_v42 = vpop.f32.mrb[54].mxu1 }
 0x17f   :  { %v802_v45 = vpop.f32.mrb[55].mxu0  ;;  %v930_v46 = vpop.f32.mrb[55].mxu1  ;;  %v1240_v47 = vmax.f32 %v1176_v43, 0.0  ;;  %v1272_v48 = vmax.f32 %v1208_v44, 0.0  ;;  %v1177_v49 = vadd.f32 %v1869_v18, %v800_v41  ;;  %v1209_v50 = vadd.f32 %v1869_v18, %v928_v42 }
 0x181   :  { %1304 = vst [vmem:[%s2130_s3 + $0xd0] sm:$0xff] %v1240_v47  ;;  %1336 = vst [vmem:[%s2130_s3 + $0x1d0] sm:$0xff] %v1272_v48  ;;  %v1241_v51 = vmax.f32 %v1177_v49, 0.0  ;;  %v1273_v52 = vmax.f32 %v1209_v50, 0.0 }
 0x183   :  { %1305 = vst [vmem:[%s2130_s3 + $0xd8] sm:$0xff] %v1241_v51  ;;  %1337 = vst [vmem:[%s2130_s3 + $0x1d8] sm:$0xff] %v1273_v52 }
 0x184   :  { %v805_v53 = vpop.f32.mrb[56].mxu0  ;;  %v933_v54 = vpop.f32.mrb[56].mxu1 }
 0x185   :  { %v807_v55 = vpop.f32.mrb[57].mxu0  ;;  %v935_v56 = vpop.f32.mrb[57].mxu1  ;;  %v1178_v59 = vadd.f32 %v1869_v18, %v805_v53  ;;  %v1210_v60 = vadd.f32 %v1869_v18, %v933_v54 }
 0x186   :  { %v808_v57 = vpop.f32.mrb[58].mxu0  ;;  %v936_v58 = vpop.f32.mrb[58].mxu1 }
 0x187   :  { %v810_v61 = vpop.f32.mrb[59].mxu0  ;;  %v938_v62 = vpop.f32.mrb[59].mxu1  ;;  %v1242_v63 = vmax.f32 %v1178_v59, 0.0  ;;  %v1274_v0 = vmax.f32 %v1210_v60, 0.0  ;;  %v1179_v1 = vadd.f32 %v1869_v18, %v808_v57  ;;  %v1211_v2 = vadd.f32 %v1869_v18, %v936_v58 }
 0x189   :  { %1306 = vst [vmem:[%s2130_s3 + $0xe0] sm:$0xff] %v1242_v63  ;;  %1338 = vst [vmem:[%s2130_s3 + $0x1e0] sm:$0xff] %v1274_v0  ;;  %v1243_v3 = vmax.f32 %v1179_v1, 0.0  ;;  %v1275_v4 = vmax.f32 %v1211_v2, 0.0 }
 0x18b   :  { %1307 = vst [vmem:[%s2130_s3 + $0xe8] sm:$0xff] %v1243_v3  ;;  %1339 = vst [vmem:[%s2130_s3 + $0x1e8] sm:$0xff] %v1275_v4 }
 0x18c   :  { %v813_v5 = vpop.f32.mrb[60].mxu0  ;;  %v941_v6 = vpop.f32.mrb[60].mxu1 }
 0x18d   :  { %v815_v7 = vpop.f32.mrb[61].mxu0  ;;  %v943_v8 = vpop.f32.mrb[61].mxu1  ;;  %v1180_v11 = vadd.f32 %v1869_v18, %v813_v5  ;;  %v1212_v12 = vadd.f32 %v1869_v18, %v941_v6 }
 0x18e   :  { %v816_v9 = vpop.f32.mrb[62].mxu0  ;;  %v944_v10 = vpop.f32.mrb[62].mxu1 }
 0x18f   :  { %v818_v13 = vpop.f32.mrb[63].mxu0  ;;  %v946_v14 = vpop.f32.mrb[63].mxu1  ;;  %v1244_v15 = vmax.f32 %v1180_v11, 0.0  ;;  %v1276_v16 = vmax.f32 %v1212_v12, 0.0  ;;  %v1181_v17 = vadd.f32 %v1869_v18, %v816_v9  ;;  %v1213_v19 = vadd.f32 %v1869_v18, %v944_v10 }
 0x191   :  { %1308 = vst [vmem:[%s2130_s3 + $0xf0] sm:$0xff] %v1244_v15  ;;  %1340 = vst [vmem:[%s2130_s3 + $0x1f0] sm:$0xff] %v1276_v16  ;;  %v1245_v20 = vmax.f32 %v1181_v17, 0.0  ;;  %v1277_v21 = vmax.f32 %v1213_v19, 0.0 }
 0x193   :  { %1309 = vst [vmem:[%s2130_s3 + $0xf8] sm:$0xff] %v1245_v20  ;;  %1341 = vst [vmem:[%s2130_s3 + $0x1f8] sm:$0xff] %v1277_v21 }

// kernel: resnet34_forward.40
= control target key start
LH: loop header
LB: loop body
LE: loop exit
PB: predicated region body
PF: predicated region fallthrough
CT: control target
= control target key end

     0   :  { %vm152_vm0 = vcmask 523264   ;;  %s1095_s0 = inlined_call_operand.vmem [shape: f32[9,128,64], index: 0, kind: input, shape index: {}]   ;;  %s1096_s1 = inlined_call_operand.vmem [shape: f32[128,64], index: 1, kind: output, shape index: {}]  }
   0x1   :  { %v8_v0 = vld [vmem:[%s1095_s0] sm:$0xff]  ;;  %v9_v13 = vld [vmem:[%s1095_s0 + $0x8] sm:$0xff]  ;;  %v10_v32 = vld [vmem:[%s1095_s0 + $0x10] sm:$0xff] }
   0x2   :  { %v24_v1 = vld [vmem:[%s1095_s0 + $0x80] sm:$0xff]  ;;  %v153_v5 = vsel %vm152_vm0, %v8_v0, -inf  ;;  %v25_v14 = vld [vmem:[%s1095_s0 + $0x88] sm:$0xff]  ;;  %v170_v19 = vsel %vm152_vm0, %v9_v13, -inf  ;;  %v26_v33 = vld [vmem:[%s1095_s0 + $0x90] sm:$0xff]  ;;  %v187_v38 = vsel %vm152_vm0, %v10_v32, -inf }
   0x3   :  { %v40_v2 = vld [vmem:[%s1095_s0 + $0x100] sm:$0xff]  ;;  %v154_v6 = vsel %vm152_vm0, %v24_v1, -inf  ;;  %v41_v15 = vld [vmem:[%s1095_s0 + $0x108] sm:$0xff]  ;;  %v171_v20 = vsel %vm152_vm0, %v25_v14, -inf  ;;  %v42_v34 = vld [vmem:[%s1095_s0 + $0x110] sm:$0xff]  ;;  %v188_v39 = vsel %vm152_vm0, %v26_v33, -inf }
   0x4   :  { %v56_v3 = vld [vmem:[%s1095_s0 + $0x180] sm:$0xff]  ;;  %v156_v7 = vsel %vm152_vm0, %v40_v2, -inf  ;;  %v155_v11 = vmax.f32 %v153_v5, %v154_v6  ;;  %v57_v18 = vld [vmem:[%s1095_s0 + $0x188] sm:$0xff]  ;;  %v173_v21 = vsel %vm152_vm0, %v41_v15, -inf  ;;  %v172_v27 = vmax.f32 %v170_v19, %v171_v20  ;;  %v58_v37 = vld [vmem:[%s1095_s0 + $0x190] sm:$0xff] }
   0x5   :  { %v72_v4 = vld [vmem:[%s1095_s0 + $0x200] sm:$0xff]  ;;  %v158_v12 = vsel %vm152_vm0, %v56_v3, -inf  ;;  %v73_v24 = vld [vmem:[%s1095_s0 + $0x208] sm:$0xff]  ;;  %v175_v31 = vsel %vm152_vm0, %v57_v18, -inf  ;;  %v190_v40 = vsel %vm152_vm0, %v42_v34, -inf  ;;  %v74_v45 = vld [vmem:[%s1095_s0 + $0x210] sm:$0xff]  ;;  %v189_v46 = vmax.f32 %v187_v38, %v188_v39 }
   0x6   :  { %v88_v8 = vld [vmem:[%s1095_s0 + $0x280] sm:$0xff]  ;;  %v157_v17 = vmax.f32 %v155_v11, %v156_v7  ;;  %v160_v22 = vsel %vm152_vm0, %v72_v4, -inf  ;;  %v89_v25 = vld [vmem:[%s1095_s0 + $0x288] sm:$0xff]  ;;  %v174_v36 = vmax.f32 %v172_v27, %v173_v21  ;;  %v177_v44 = vsel %vm152_vm0, %v73_v24, -inf  ;;  %v11_v51 = vld [vmem:[%s1095_s0 + $0x18] sm:$0xff] }
   0x7   :  { %v104_v9 = vld [vmem:[%s1095_s0 + $0x300] sm:$0xff]  ;;  %v162_v23 = vsel %vm152_vm0, %v88_v8, -inf  ;;  %v105_v26 = vld [vmem:[%s1095_s0 + $0x308] sm:$0xff]  ;;  %v179_v48 = vsel %vm152_vm0, %v89_v25, -inf  ;;  %v192_v50 = vsel %vm152_vm0, %v58_v37, -inf  ;;  %v27_v52 = vld [vmem:[%s1095_s0 + $0x98] sm:$0xff]  ;;  %v191_v58 = vmax.f32 %v189_v46, %v190_v40 }
   0x8   :  { %v120_v10 = vld [vmem:[%s1095_s0 + $0x380] sm:$0xff]  ;;  %v159_v28 = vmax.f32 %v157_v17, %v158_v12  ;;  %v164_v29 = vsel %vm152_vm0, %v104_v9, -inf  ;;  %v121_v35 = vld [vmem:[%s1095_s0 + $0x388] sm:$0xff]  ;;  %v176_v47 = vmax.f32 %v174_v36, %v175_v31  ;;  %v181_v49 = vsel %vm152_vm0, %v105_v26, -inf  ;;  %v43_v53 = vld [vmem:[%s1095_s0 + $0x118] sm:$0xff] }
   0x9   :  { %v136_v16 = vld [vmem:[%s1095_s0 + $0x400] sm:$0xff]  ;;  %v166_v30 = vsel %vm152_vm0, %v120_v10, -inf  ;;  %v137_v43 = vld [vmem:[%s1095_s0 + $0x408] sm:$0xff]  ;;  %v183_v55 = vsel %vm152_vm0, %v121_v35, -inf  ;;  %v90_v56 = vld [vmem:[%s1095_s0 + $0x290] sm:$0xff]  ;;  %v204_v60 = vsel %vm152_vm0, %v11_v51, -inf  ;;  %v193_v4 = vmax.f32 %v191_v58, %v192_v50 }
   0xa   :  { %v161_v41 = vmax.f32 %v159_v28, %v160_v22  ;;  %v168_v42 = vsel %vm152_vm0, %v136_v16, -inf  ;;  %v106_v57 = vld [vmem:[%s1095_s0 + $0x310] sm:$0xff]  ;;  %v59_v59 = vld [vmem:[%s1095_s0 + $0x198] sm:$0xff]  ;;  %v178_v61 = vmax.f32 %v176_v47, %v177_v44  ;;  %v194_v62 = vsel %vm152_vm0, %v74_v45, -inf  ;;  %v12_v6 = vld [vmem:[%s1095_s0 + $0x20] sm:$0xff] }
   0xb   :  { %v75_v63 = vld [vmem:[%s1095_s0 + $0x218] sm:$0xff]  ;;  %v205_v0 = vsel %vm152_vm0, %v27_v52, -inf  ;;  %v207_v1 = vsel %vm152_vm0, %v43_v53, -inf  ;;  %v185_v3 = vsel %vm152_vm0, %v137_v43, -inf  ;;  %v28_v7 = vld [vmem:[%s1095_s0 + $0xa0] sm:$0xff]  ;;  %v196_v10 = vsel %vm152_vm0, %v90_v56, -inf }
   0xc   :  { %v163_v54 = vmax.f32 %v161_v41, %v162_v23  ;;  %v206_v5 = vmax.f32 %v204_v60, %v205_v0  ;;  %v44_v8 = vld [vmem:[%s1095_s0 + $0x120] sm:$0xff]  ;;  %v180_v9 = vmax.f32 %v178_v61, %v179_v48  ;;  %v198_v11 = vsel %vm152_vm0, %v106_v57, -inf  ;;  %v122_v14 = vld [vmem:[%s1095_s0 + $0x390] sm:$0xff]  ;;  %v91_v16 = vld [vmem:[%s1095_s0 + $0x298] sm:$0xff] }
   0xd   :  { %v209_v12 = vsel %vm152_vm0, %v59_v59, -inf  ;;  %v195_v15 = vmax.f32 %v193_v4, %v194_v62  ;;  %v211_v18 = vsel %vm152_vm0, %v75_v63, -inf  ;;  %v60_v19 = vld [vmem:[%s1095_s0 + $0x1a0] sm:$0xff]  ;;  %v138_v21 = vld [vmem:[%s1095_s0 + $0x410] sm:$0xff]  ;;  %v221_v22 = vsel %vm152_vm0, %v12_v6, -inf  ;;  %v107_v27 = vld [vmem:[%s1095_s0 + $0x318] sm:$0xff] }
   0xe   :  { %v165_v2 = vmax.f32 %v163_v54, %v164_v29  ;;  %v208_v17 = vmax.f32 %v206_v5, %v207_v1  ;;  %v182_v20 = vmax.f32 %v180_v9, %v181_v49  ;;  %v222_v23 = vsel %vm152_vm0, %v28_v7, -inf  ;;  %v76_v29 = vld [vmem:[%s1095_s0 + $0x220] sm:$0xff]  ;;  %v13_v31 = vld [vmem:[%s1095_s0 + $0x28] sm:$0xff]  ;;  %v123_v39 = vld [vmem:[%s1095_s0 + $0x398] sm:$0xff] }
   0xf   :  { %v224_v24 = vsel %vm152_vm0, %v44_v8, -inf  ;;  %v197_v26 = vmax.f32 %v195_v15, %v196_v10  ;;  %v200_v33 = vsel %vm152_vm0, %v122_v14, -inf  ;;  %v213_v34 = vsel %vm152_vm0, %v91_v16, -inf  ;;  %v29_v36 = vld [vmem:[%s1095_s0 + $0xa8] sm:$0xff]  ;;  %v92_v41 = vld [vmem:[%s1095_s0 + $0x2a0] sm:$0xff]  ;;  %v139_v50 = vld [vmem:[%s1095_s0 + $0x418] sm:$0xff] }
  0x10   :  { %v167_v13 = vmax.f32 %v165_v2, %v166_v30  ;;  %v210_v28 = vmax.f32 %v208_v17, %v209_v12  ;;  %v223_v30 = vmax.f32 %v221_v22, %v222_v23  ;;  %v184_v32 = vmax.f32 %v182_v20, %v183_v55  ;;  %v45_v43 = vld [vmem:[%s1095_s0 + $0x128] sm:$0xff]  ;;  %v108_v52 = vld [vmem:[%s1095_s0 + $0x320] sm:$0xff]  ;;  %v14_v60 = vld [vmem:[%s1095_s0 + $0x30] sm:$0xff] }
  0x11   :  { %v226_v35 = vsel %vm152_vm0, %v60_v19, -inf  ;;  %v199_v37 = vmax.f32 %v197_v26, %v198_v11  ;;  %v202_v38 = vsel %vm152_vm0, %v138_v21, -inf  ;;  %v215_v45 = vsel %vm152_vm0, %v107_v27, -inf  ;;  %v61_v47 = vld [vmem:[%s1095_s0 + $0x1a8] sm:$0xff]  ;;  %v30_v61 = vld [vmem:[%s1095_s0 + $0xb0] sm:$0xff]  ;;  %v124_v0 = vld [vmem:[%s1095_s0 + $0x3a0] sm:$0xff] }
  0x12   :  { %v169_v25 = vmax.f32 %v167_v13, %v168_v42  ;;  %v212_v40 = vmax.f32 %v210_v28, %v211_v18  ;;  %v225_v42 = vmax.f32 %v223_v30, %v224_v24  ;;  %v186_v44 = vmax.f32 %v184_v32, %v185_v3  ;;  %v77_v54 = vld [vmem:[%s1095_s0 + $0x228] sm:$0xff]  ;;  %v46_v3 = vld [vmem:[%s1095_s0 + $0x130] sm:$0xff]  ;;  %v140_v11 = vld [vmem:[%s1095_s0 + $0x420] sm:$0xff] }
  0x13   :  { %v228_v46 = vsel %vm152_vm0, %v76_v29, -inf  ;;  %v238_v48 = vsel %vm152_vm0, %v13_v31, -inf  ;;  %v201_v49 = vmax.f32 %v199_v37, %v200_v33  ;;  %v239_v55 = vsel %vm152_vm0, %v29_v36, -inf  ;;  %v93_v6 = vld [vmem:[%s1095_s0 + $0x2a8] sm:$0xff]  ;;  %v62_v9 = vld [vmem:[%s1095_s0 + $0x1b0] sm:$0xff]  ;;  %v15_v21 = vld [vmem:[%s1095_s0 + $0x38] sm:$0xff] }
  0x14   :  { %425 = vst.msk [vmem:[%s1096_s1] sm:$0xff] %vm152_vm0, %v169_v25  ;;  %v214_v51 = vmax.f32 %v212_v40, %v213_v34  ;;  %v227_v53 = vmax.f32 %v225_v42, %v226_v35  ;;  %426 = vst.msk [vmem:[%s1096_s1 + $0x8] sm:$0xff] %vm152_vm0, %v186_v44  ;;  %v217_v56 = vsel %vm152_vm0, %v123_v39, -inf  ;;  %v230_v57 = vsel %vm152_vm0, %v92_v41, -inf  ;;  %v109_v13 = vld [vmem:[%s1095_s0 + $0x328] sm:$0xff]  ;;  %v78_v18 = vld [vmem:[%s1095_s0 + $0x230] sm:$0xff] }
  0x15   :  { %v240_v58 = vmax.f32 %v238_v48, %v239_v55  ;;  %v241_v59 = vsel %vm152_vm0, %v45_v43, -inf  ;;  %v203_v62 = vmax.f32 %v201_v49, %v202_v38  ;;  %v243_v2 = vsel %vm152_vm0, %v61_v47, -inf  ;;  %v31_v22 = vld [vmem:[%s1095_s0 + $0xb8] sm:$0xff]  ;;  %v125_v29 = vld [vmem:[%s1095_s0 + $0x3a8] sm:$0xff]  ;;  %v94_v32 = vld [vmem:[%s1095_s0 + $0x2b0] sm:$0xff] }
  0x16   :  { %v216_v63 = vmax.f32 %v214_v51, %v215_v45  ;;  %v229_v1 = vmax.f32 %v227_v53, %v228_v46  ;;  %v219_v4 = vsel %vm152_vm0, %v139_v50, -inf  ;;  %v232_v5 = vsel %vm152_vm0, %v108_v52, -inf  ;;  %v47_v27 = vld [vmem:[%s1095_s0 + $0x138] sm:$0xff]  ;;  %v141_v36 = vld [vmem:[%s1095_s0 + $0x428] sm:$0xff]  ;;  %v110_v37 = vld [vmem:[%s1095_s0 + $0x330] sm:$0xff] }
  0x17   :  { %v242_v7 = vmax.f32 %v240_v58, %v241_v59  ;;  %v245_v8 = vsel %vm152_vm0, %v77_v54, -inf  ;;  %427 = vst.msk [vmem:[%s1096_s1 + $0x10] sm:$0xff] %vm152_vm0, %v203_v62  ;;  %v255_v14 = vsel %vm152_vm0, %v14_v60, -inf  ;;  %v256_v15 = vsel %vm152_vm0, %v30_v61, -inf  ;;  %v63_v34 = vld [vmem:[%s1095_s0 + $0x1b8] sm:$0xff]  ;;  %v16_v46 = vld [vmem:[%s1095_s0 + $0x40] sm:$0xff] }
  0x18   :  { %v218_v10 = vmax.f32 %v216_v63, %v217_v56  ;;  %v231_v12 = vmax.f32 %v229_v1, %v230_v57  ;;  %v234_v16 = vsel %vm152_vm0, %v124_v0, -inf  ;;  %v257_v19 = vmax.f32 %v255_v14, %v256_v15  ;;  %v79_v43 = vld [vmem:[%s1095_s0 + $0x238] sm:$0xff]  ;;  %v32_v47 = vld [vmem:[%s1095_s0 + $0xc0] sm:$0xff]  ;;  %v126_v50 = vld [vmem:[%s1095_s0 + $0x3b0] sm:$0xff] }
  0x19   :  { %v244_v17 = vmax.f32 %v242_v7, %v243_v2  ;;  %v258_v20 = vsel %vm152_vm0, %v46_v3, -inf  ;;  %v247_v25 = vsel %vm152_vm0, %v93_v6, -inf  ;;  %v260_v26 = vsel %vm152_vm0, %v62_v9, -inf  ;;  %v95_v56 = vld [vmem:[%s1095_s0 + $0x2b8] sm:$0xff]  ;;  %v48_v58 = vld [vmem:[%s1095_s0 + $0x140] sm:$0xff]  ;;  %v142_v60 = vld [vmem:[%s1095_s0 + $0x430] sm:$0xff] }
  0x1a   :  { %v220_v23 = vmax.f32 %v218_v10, %v219_v4  ;;  %v233_v24 = vmax.f32 %v231_v12, %v232_v5  ;;  %v236_v28 = vsel %vm152_vm0, %v140_v11, -inf  ;;  %v249_v31 = vsel %vm152_vm0, %v109_v13, -inf  ;;  %v64_v59 = vld [vmem:[%s1095_s0 + $0x1c0] sm:$0xff]  ;;  %v111_v3 = vld [vmem:[%s1095_s0 + $0x338] sm:$0xff]  ;;  %v17_v7 = vld [vmem:[%s1095_s0 + $0x48] sm:$0xff] }
  0x1b   :  { %v246_v30 = vmax.f32 %v244_v17, %v245_v8  ;;  %v259_v33 = vmax.f32 %v257_v19, %v258_v20  ;;  %v262_v38 = vsel %vm152_vm0, %v78_v18, -inf  ;;  %v272_v39 = vsel %vm152_vm0, %v15_v21, -inf  ;;  %v80_v5 = vld [vmem:[%s1095_s0 + $0x240] sm:$0xff]  ;;  %v33_v12 = vld [vmem:[%s1095_s0 + $0xc8] sm:$0xff]  ;;  %v127_v15 = vld [vmem:[%s1095_s0 + $0x3b8] sm:$0xff] }
  0x1c   :  { %428 = vst.msk [vmem:[%s1096_s1 + $0x18] sm:$0xff] %vm152_vm0, %v220_v23  ;;  %v235_v35 = vmax.f32 %v233_v24, %v234_v16  ;;  %v273_v40 = vsel %vm152_vm0, %v31_v22, -inf  ;;  %v275_v45 = vsel %vm152_vm0, %v47_v27, -inf  ;;  %v251_v49 = vsel %vm152_vm0, %v125_v29, -inf  ;;  %v96_v17 = vld [vmem:[%s1095_s0 + $0x2c0] sm:$0xff]  ;;  %v49_v19 = vld [vmem:[%s1095_s0 + $0x148] sm:$0xff] }
  0x1d   :  { %v248_v41 = vmax.f32 %v246_v30, %v247_v25  ;;  %v261_v42 = vmax.f32 %v259_v33, %v260_v26  ;;  %v274_v44 = vmax.f32 %v272_v39, %v273_v40  ;;  %v264_v51 = vsel %vm152_vm0, %v94_v32, -inf  ;;  %v65_v23 = vld [vmem:[%s1095_s0 + $0x1c8] sm:$0xff]  ;;  %v143_v26 = vld [vmem:[%s1095_s0 + $0x438] sm:$0xff]  ;;  %v128_v40 = vld [vmem:[%s1095_s0 + $0x3c0] sm:$0xff] }
  0x1e   :  { %v237_v48 = vmax.f32 %v235_v35, %v236_v28  ;;  %v277_v52 = vsel %vm152_vm0, %v63_v34, -inf  ;;  %v253_v54 = vsel %vm152_vm0, %v141_v36, -inf  ;;  %v266_v61 = vsel %vm152_vm0, %v110_v37, -inf  ;;  %v112_v28 = vld [vmem:[%s1095_s0 + $0x340] sm:$0xff]  ;;  %v81_v30 = vld [vmem:[%s1095_s0 + $0x248] sm:$0xff]  ;;  %v18_v36 = vld [vmem:[%s1095_s0 + $0x50] sm:$0xff] }
  0x1f   :  { %v250_v53 = vmax.f32 %v248_v41, %v249_v31  ;;  %v263_v55 = vmax.f32 %v261_v42, %v262_v38  ;;  %v276_v57 = vmax.f32 %v274_v44, %v275_v45  ;;  %v279_v62 = vsel %vm152_vm0, %v79_v43, -inf  ;;  %v34_v37 = vld [vmem:[%s1095_s0 + $0xd0] sm:$0xff] }
  0x20   :  { %429 = vst.msk [vmem:[%s1096_s1 + $0x20] sm:$0xff] %vm152_vm0, %v237_v48  ;;  %v289_v63 = vsel %vm152_vm0, %v16_v46, -inf  ;;  %v290_v0 = vsel %vm152_vm0, %v32_v47, -inf  ;;  %v268_v8 = vsel %vm152_vm0, %v126_v50, -inf  ;;  %v281_v9 = vsel %vm152_vm0, %v95_v56, -inf  ;;  %v50_v43 = vld [vmem:[%s1095_s0 + $0x150] sm:$0xff] }
  0x21   :  { %v252_v1 = vmax.f32 %v250_v53, %v251_v49  ;;  %v265_v2 = vmax.f32 %v263_v55, %v264_v51  ;;  %v278_v4 = vmax.f32 %v276_v57, %v277_v52  ;;  %v291_v6 = vmax.f32 %v289_v63, %v290_v0  ;;  %v97_v46 = vld [vmem:[%s1095_s0 + $0x2c8] sm:$0xff]  ;;  %v66_v49 = vld [vmem:[%s1095_s0 + $0x1d0] sm:$0xff]  ;;  %v144_v51 = vld [vmem:[%s1095_s0 + $0x440] sm:$0xff] }
  0x22   :  { %v292_v10 = vsel %vm152_vm0, %v48_v58, -inf  ;;  %v294_v11 = vsel %vm152_vm0, %v64_v59, -inf  ;;  %v270_v20 = vsel %vm152_vm0, %v142_v60, -inf  ;;  %v283_v21 = vsel %vm152_vm0, %v111_v3, -inf  ;;  %v113_v53 = vld [vmem:[%s1095_s0 + $0x348] sm:$0xff]  ;;  %v82_v58 = vld [vmem:[%s1095_s0 + $0x250] sm:$0xff] }
  0x23   :  { %v254_v13 = vmax.f32 %v252_v1, %v253_v54  ;;  %v267_v14 = vmax.f32 %v265_v2, %v266_v61  ;;  %v280_v16 = vmax.f32 %v278_v4, %v279_v62  ;;  %v293_v18 = vmax.f32 %v291_v6, %v292_v10  ;;  %v19_v61 = vld [vmem:[%s1095_s0 + $0x58] sm:$0xff] }
  0x24   :  { %v296_v22 = vsel %vm152_vm0, %v80_v5, -inf  ;;  %v306_v24 = vsel %vm152_vm0, %v17_v7, -inf  ;;  %v307_v31 = vsel %vm152_vm0, %v33_v12, -inf  ;;  %v285_v32 = vsel %vm152_vm0, %v127_v15, -inf  ;;  %v35_v62 = vld [vmem:[%s1095_s0 + $0xd8] sm:$0xff]  ;;  %v129_v5 = vld [vmem:[%s1095_s0 + $0x3c8] sm:$0xff] }
  0x25   :  { %430 = vst.msk [vmem:[%s1096_s1 + $0x28] sm:$0xff] %vm152_vm0, %v254_v13  ;;  %v269_v25 = vmax.f32 %v267_v14, %v268_v8  ;;  %v282_v27 = vmax.f32 %v280_v16, %v281_v9  ;;  %v295_v29 = vmax.f32 %v293_v18, %v294_v11  ;;  %v298_v33 = vsel %vm152_vm0, %v96_v17, -inf  ;;  %v51_v3 = vld [vmem:[%s1095_s0 + $0x158] sm:$0xff]  ;;  %v98_v8 = vld [vmem:[%s1095_s0 + $0x2d0] sm:$0xff]  ;;  %v145_v12 = vld [vmem:[%s1095_s0 + $0x448] sm:$0xff] }
  0x26   :  { %v308_v34 = vmax.f32 %v306_v24, %v307_v31  ;;  %v309_v35 = vsel %vm152_vm0, %v49_v19, -inf  ;;  %v311_v42 = vsel %vm152_vm0, %v65_v23, -inf  ;;  %v287_v44 = vsel %vm152_vm0, %v143_v26, -inf  ;;  %v67_v10 = vld [vmem:[%s1095_s0 + $0x1d8] sm:$0xff]  ;;  %v114_v13 = vld [vmem:[%s1095_s0 + $0x350] sm:$0xff]  ;;  %v36_v23 = vld [vmem:[%s1095_s0 + $0xe0] sm:$0xff] }
  0x27   :  { %v271_v38 = vmax.f32 %v269_v25, %v270_v20  ;;  %v284_v39 = vmax.f32 %v282_v27, %v283_v21  ;;  %v297_v41 = vmax.f32 %v295_v29, %v296_v22  ;;  %v300_v45 = vsel %vm152_vm0, %v112_v28, -inf  ;;  %v83_v19 = vld [vmem:[%s1095_s0 + $0x258] sm:$0xff]  ;;  %v20_v22 = vld [vmem:[%s1095_s0 + $0x60] sm:$0xff]  ;;  %v130_v26 = vld [vmem:[%s1095_s0 + $0x3d0] sm:$0xff] }
  0x28   :  { %v310_v47 = vmax.f32 %v308_v34, %v309_v35  ;;  %v313_v48 = vsel %vm152_vm0, %v81_v30, -inf  ;;  %v323_v54 = vsel %vm152_vm0, %v18_v36, -inf  ;;  %v324_v55 = vsel %vm152_vm0, %v34_v37, -inf  ;;  %v52_v34 = vld [vmem:[%s1095_s0 + $0x160] sm:$0xff]  ;;  %v146_v36 = vld [vmem:[%s1095_s0 + $0x450] sm:$0xff] }
  0x29   :  { %431 = vst.msk [vmem:[%s1096_s1 + $0x30] sm:$0xff] %vm152_vm0, %v271_v38  ;;  %v286_v50 = vmax.f32 %v284_v39, %v285_v32  ;;  %v299_v52 = vmax.f32 %v297_v41, %v298_v33  ;;  %v302_v56 = vsel %vm152_vm0, %v128_v40, -inf  ;;  %v325_v59 = vmax.f32 %v323_v54, %v324_v55  ;;  %v99_v32 = vld [vmem:[%s1095_s0 + $0x2d8] sm:$0xff]  ;;  %v68_v35 = vld [vmem:[%s1095_s0 + $0x1e0] sm:$0xff] }
  0x2a   :  { %v312_v57 = vmax.f32 %v310_v47, %v311_v42  ;;  %v326_v60 = vsel %vm152_vm0, %v50_v43, -inf  ;;  %v315_v1 = vsel %vm152_vm0, %v97_v46, -inf  ;;  %v328_v2 = vsel %vm152_vm0, %v66_v49, -inf  ;;  %v115_v43 = vld [vmem:[%s1095_s0 + $0x358] sm:$0xff]  ;;  %v21_v47 = vld [vmem:[%s1095_s0 + $0x68] sm:$0xff] }
  0x2b   :  { %v288_v63 = vmax.f32 %v286_v50, %v287_v44  ;;  %v301_v0 = vmax.f32 %v299_v52, %v300_v45  ;;  %v304_v4 = vsel %vm152_vm0, %v144_v51, -inf  ;;  %v317_v7 = vsel %vm152_vm0, %v113_v53, -inf  ;;  %v84_v45 = vld [vmem:[%s1095_s0 + $0x260] sm:$0xff]  ;;  %v37_v52 = vld [vmem:[%s1095_s0 + $0xe8] sm:$0xff]  ;;  %v131_v55 = vld [vmem:[%s1095_s0 + $0x3d8] sm:$0xff] }
  0x2c   :  { %v314_v6 = vmax.f32 %v312_v57, %v313_v48  ;;  %v327_v9 = vmax.f32 %v325_v59, %v326_v60  ;;  %v330_v14 = vsel %vm152_vm0, %v82_v58, -inf  ;;  %v340_v15 = vsel %vm152_vm0, %v19_v61, -inf  ;;  %v100_v57 = vld [vmem:[%s1095_s0 + $0x2e0] sm:$0xff]  ;;  %v53_v59 = vld [vmem:[%s1095_s0 + $0x168] sm:$0xff] }
  0x2d   :  { %432 = vst.msk [vmem:[%s1096_s1 + $0x38] sm:$0xff] %vm152_vm0, %v288_v63  ;;  %v303_v11 = vmax.f32 %v301_v0, %v302_v56  ;;  %v341_v16 = vsel %vm152_vm0, %v35_v62, -inf  ;;  %v343_v21 = vsel %vm152_vm0, %v51_v3, -inf  ;;  %v319_v25 = vsel %vm152_vm0, %v129_v5, -inf  ;;  %v69_v63 = vld [vmem:[%s1095_s0 + $0x1e8] sm:$0xff] }
  0x2e   :  { %v316_v17 = vmax.f32 %v314_v6, %v315_v1  ;;  %v329_v18 = vmax.f32 %v327_v9, %v328_v2  ;;  %v342_v20 = vmax.f32 %v340_v15, %v341_v16  ;;  %v332_v27 = vsel %vm152_vm0, %v98_v8, -inf  ;;  %v147_v2 = vld [vmem:[%s1095_s0 + $0x458] sm:$0xff]  ;;  %v85_v6 = vld [vmem:[%s1095_s0 + $0x268] sm:$0xff]  ;;  %v132_v16 = vld [vmem:[%s1095_s0 + $0x3e0] sm:$0xff] }
  0x2f   :  { %v305_v24 = vmax.f32 %v303_v11, %v304_v4  ;;  %v345_v28 = vsel %vm152_vm0, %v67_v10, -inf  ;;  %v321_v30 = vsel %vm152_vm0, %v145_v12, -inf  ;;  %v334_v37 = vsel %vm152_vm0, %v114_v13, -inf  ;;  %v116_v4 = vld [vmem:[%s1095_s0 + $0x360] sm:$0xff]  ;;  %v22_v12 = vld [vmem:[%s1095_s0 + $0x70] sm:$0xff] }
  0x30   :  { %v318_v29 = vmax.f32 %v316_v17, %v317_v7  ;;  %v331_v31 = vmax.f32 %v329_v18, %v330_v14  ;;  %v344_v33 = vmax.f32 %v342_v20, %v343_v21  ;;  %v347_v38 = vsel %vm152_vm0, %v83_v19, -inf  ;;  %v38_v13 = vld [vmem:[%s1095_s0 + $0xf0] sm:$0xff] }
  0x31   :  { %433 = vst.msk [vmem:[%s1096_s1 + $0x40] sm:$0xff] %vm152_vm0, %v305_v24  ;;  %v357_v39 = vsel %vm152_vm0, %v20_v22, -inf  ;;  %v358_v40 = vsel %vm152_vm0, %v36_v23, -inf  ;;  %v336_v48 = vsel %vm152_vm0, %v130_v26, -inf  ;;  %v349_v49 = vsel %vm152_vm0, %v99_v32, -inf  ;;  %v54_v19 = vld [vmem:[%s1095_s0 + $0x170] sm:$0xff] }
  0x32   :  { %v320_v41 = vmax.f32 %v318_v29, %v319_v25  ;;  %v333_v42 = vmax.f32 %v331_v31, %v332_v27  ;;  %v346_v44 = vmax.f32 %v344_v33, %v345_v28  ;;  %v359_v46 = vmax.f32 %v357_v39, %v358_v40  ;;  %v101_v22 = vld [vmem:[%s1095_s0 + $0x2e8] sm:$0xff]  ;;  %v70_v25 = vld [vmem:[%s1095_s0 + $0x1f0] sm:$0xff]  ;;  %v148_v27 = vld [vmem:[%s1095_s0 + $0x460] sm:$0xff] }
  0x33   :  { %v360_v50 = vsel %vm152_vm0, %v52_v34, -inf  ;;  %v362_v51 = vsel %vm152_vm0, %v68_v35, -inf  ;;  %v338_v60 = vsel %vm152_vm0, %v146_v36, -inf  ;;  %v351_v61 = vsel %vm152_vm0, %v115_v43, -inf  ;;  %v117_v29 = vld [vmem:[%s1095_s0 + $0x368] sm:$0xff]  ;;  %v86_v34 = vld [vmem:[%s1095_s0 + $0x270] sm:$0xff] }
  0x34   :  { %v322_v53 = vmax.f32 %v320_v41, %v321_v30  ;;  %v335_v54 = vmax.f32 %v333_v42, %v334_v37  ;;  %v348_v56 = vmax.f32 %v346_v44, %v347_v38  ;;  %v361_v58 = vmax.f32 %v359_v46, %v360_v50  ;;  %v23_v37 = vld [vmem:[%s1095_s0 + $0x78] sm:$0xff] }
  0x35   :  { %v364_v62 = vsel %vm152_vm0, %v84_v45, -inf  ;;  %v374_v0 = vsel %vm152_vm0, %v21_v47, -inf  ;;  %v375_v7 = vsel %vm152_vm0, %v37_v52, -inf  ;;  %v353_v8 = vsel %vm152_vm0, %v131_v55, -inf  ;;  %v39_v38 = vld [vmem:[%s1095_s0 + $0xf8] sm:$0xff]  ;;  %v133_v45 = vld [vmem:[%s1095_s0 + $0x3e8] sm:$0xff] }
  0x36   :  { %434 = vst.msk [vmem:[%s1096_s1 + $0x48] sm:$0xff] %vm152_vm0, %v322_v53  ;;  %v337_v1 = vmax.f32 %v335_v54, %v336_v48  ;;  %v350_v3 = vmax.f32 %v348_v56, %v349_v49  ;;  %v363_v5 = vmax.f32 %v361_v58, %v362_v51  ;;  %v366_v9 = vsel %vm152_vm0, %v100_v57, -inf  ;;  %v55_v43 = vld [vmem:[%s1095_s0 + $0x178] sm:$0xff]  ;;  %v102_v48 = vld [vmem:[%s1095_s0 + $0x2f0] sm:$0xff]  ;;  %v149_v55 = vld [vmem:[%s1095_s0 + $0x468] sm:$0xff] }
  0x37   :  { %v376_v10 = vmax.f32 %v374_v0, %v375_v7  ;;  %v377_v11 = vsel %vm152_vm0, %v53_v59, -inf  ;;  %v379_v18 = vsel %vm152_vm0, %v69_v63, -inf  ;;  %v355_v20 = vsel %vm152_vm0, %v147_v2, -inf  ;;  %v71_v50 = vld [vmem:[%s1095_s0 + $0x1f8] sm:$0xff]  ;;  %v118_v57 = vld [vmem:[%s1095_s0 + $0x370] sm:$0xff] }
  0x38   :  { %v339_v14 = vmax.f32 %v337_v1, %v338_v60  ;;  %v352_v15 = vmax.f32 %v350_v3, %v351_v61  ;;  %v365_v17 = vmax.f32 %v363_v5, %v364_v62  ;;  %v368_v21 = vsel %vm152_vm0, %v116_v4, -inf  ;;  %v87_v59 = vld [vmem:[%s1095_s0 + $0x278] sm:$0xff]  ;;  %v134_v3 = vld [vmem:[%s1095_s0 + $0x3f0] sm:$0xff] }
  0x39   :  { %v378_v23 = vmax.f32 %v376_v10, %v377_v11  ;;  %v381_v24 = vsel %vm152_vm0, %v85_v6, -inf  ;;  %v391_v30 = vsel %vm152_vm0, %v22_v12, -inf  ;;  %v392_v31 = vsel %vm152_vm0, %v38_v13, -inf  ;;  %v103_v5 = vld [vmem:[%s1095_s0 + $0x2f8] sm:$0xff]  ;;  %v150_v11 = vld [vmem:[%s1095_s0 + $0x470] sm:$0xff] }
  0x3a   :  { %435 = vst.msk [vmem:[%s1096_s1 + $0x50] sm:$0xff] %vm152_vm0, %v339_v14  ;;  %v354_v26 = vmax.f32 %v352_v15, %v353_v8  ;;  %v367_v28 = vmax.f32 %v365_v17, %v366_v9  ;;  %v370_v32 = vsel %vm152_vm0, %v132_v16, -inf  ;;  %v393_v35 = vmax.f32 %v391_v30, %v392_v31  ;;  %v119_v13 = vld [vmem:[%s1095_s0 + $0x378] sm:$0xff] }
  0x3b   :  { %v380_v33 = vmax.f32 %v378_v23, %v379_v18  ;;  %v394_v36 = vsel %vm152_vm0, %v54_v19, -inf  ;;  %v383_v41 = vsel %vm152_vm0, %v101_v22, -inf  ;;  %v396_v42 = vsel %vm152_vm0, %v70_v25, -inf  ;;  %v135_v19 = vld [vmem:[%s1095_s0 + $0x3f8] sm:$0xff] }
  0x3c   :  { %v356_v39 = vmax.f32 %v354_v26, %v355_v20  ;;  %v369_v40 = vmax.f32 %v367_v28, %v368_v21  ;;  %v372_v44 = vsel %vm152_vm0, %v148_v27, -inf  ;;  %v385_v47 = vsel %vm152_vm0, %v117_v29, -inf }
  0x3d   :  { %v382_v46 = vmax.f32 %v380_v33, %v381_v24  ;;  %v395_v49 = vmax.f32 %v393_v35, %v394_v36  ;;  %v398_v52 = vsel %vm152_vm0, %v86_v34, -inf  ;;  %v408_v53 = vsel %vm152_vm0, %v23_v37, -inf  ;;  %v151_v24 = vld [vmem:[%s1095_s0 + $0x478] sm:$0xff] }
  0x3e   :  { %436 = vst.msk [vmem:[%s1096_s1 + $0x58] sm:$0xff] %vm152_vm0, %v356_v39  ;;  %v371_v51 = vmax.f32 %v369_v40, %v370_v32  ;;  %v409_v54 = vsel %vm152_vm0, %v39_v38, -inf  ;;  %v411_v61 = vsel %vm152_vm0, %v55_v43, -inf  ;;  %v387_v63 = vsel %vm152_vm0, %v133_v45, -inf }
  0x3f   :  { %v384_v56 = vmax.f32 %v382_v46, %v383_v41  ;;  %v397_v58 = vmax.f32 %v395_v49, %v396_v42  ;;  %v410_v60 = vmax.f32 %v408_v53, %v409_v54  ;;  %v400_v0 = vsel %vm152_vm0, %v102_v48, -inf }
  0x40   :  { %v373_v62 = vmax.f32 %v371_v51, %v372_v44  ;;  %v413_v1 = vsel %vm152_vm0, %v71_v50, -inf  ;;  %v389_v7 = vsel %vm152_vm0, %v149_v55, -inf  ;;  %v402_v8 = vsel %vm152_vm0, %v118_v57, -inf }
  0x41   :  { %v386_v2 = vmax.f32 %v384_v56, %v385_v47  ;;  %v399_v4 = vmax.f32 %v397_v58, %v398_v52  ;;  %v412_v6 = vmax.f32 %v410_v60, %v411_v61  ;;  %v415_v9 = vsel %vm152_vm0, %v87_v59, -inf }
  0x42   :  { %437 = vst.msk [vmem:[%s1096_s1 + $0x60] sm:$0xff] %vm152_vm0, %v373_v62  ;;  %v404_v15 = vsel %vm152_vm0, %v134_v3, -inf  ;;  %v417_v16 = vsel %vm152_vm0, %v103_v5, -inf  ;;  %v406_v21 = vsel %vm152_vm0, %v150_v11, -inf  ;;  %v419_v22 = vsel %vm152_vm0, %v119_v13, -inf }
  0x43   :  { %v388_v10 = vmax.f32 %v386_v2, %v387_v63  ;;  %v401_v12 = vmax.f32 %v399_v4, %v400_v0  ;;  %v414_v14 = vmax.f32 %v412_v6, %v413_v1  ;;  %v421_v26 = vsel %vm152_vm0, %v135_v19, -inf }
  0x44   :  { %v423_v29 = vsel %vm152_vm0, %v151_v24, -inf }
  0x45   :  { %v390_v17 = vmax.f32 %v388_v10, %v389_v7  ;;  %v403_v18 = vmax.f32 %v401_v12, %v402_v8  ;;  %v416_v20 = vmax.f32 %v414_v14, %v415_v9 }
  0x47   :  { %438 = vst.msk [vmem:[%s1096_s1 + $0x68] sm:$0xff] %vm152_vm0, %v390_v17  ;;  %v405_v23 = vmax.f32 %v403_v18, %v404_v15  ;;  %v418_v25 = vmax.f32 %v416_v20, %v417_v16 }
  0x49   :  { %v407_v27 = vmax.f32 %v405_v23, %v406_v21  ;;  %v420_v28 = vmax.f32 %v418_v25, %v419_v22 }
  0x4b   :  { %439 = vst.msk [vmem:[%s1096_s1 + $0x70] sm:$0xff] %vm152_vm0, %v407_v27  ;;  %v422_v30 = vmax.f32 %v420_v28, %v421_v26 }
  0x4d   :  { %v424_v31 = vmax.f32 %v422_v30, %v423_v29 }
  0x4f   :  { %440 = vst.msk [vmem:[%s1096_s1 + $0x78] sm:$0xff] %vm152_vm0, %v424_v31 }

// kernel: resnet34_forward.41
= control target key start
LH: loop header
LB: loop body
LE: loop exit
PB: predicated region body
PF: predicated region fallthrough
CT: control target
= control target key end

     0   :  { %s1757_s1 = inlined_call_operand.vmem [shape: bf16[640,128], index: 1, kind: input, shape index: {}]   ;;  %s1758_s0 = inlined_call_operand.vmem [shape: bf16[128,640], index: 0, kind: input, shape index: {}]   ;;  %s1759_s2 = inlined_call_operand.vmem [shape: f32[1,128], index: 2, kind: input, shape index: {}]   ;;  %s1760_s3 = inlined_call_operand.vmem [shape: f32[128,128], index: 3, kind: output, shape index: {}]  }
   0x1   :  { %v1302_v0 = vld [vmem:[%s1757_s1 + $0x40] sm:$0xff]   ;;  %v1306_v4 = vld [vmem:[%s1757_s1 + $0x48] sm:$0xff]   ;;  %v1310_v8 = vld [vmem:[%s1757_s1 + $0x50] sm:$0xff]  }
   0x2   :  { %v1303_v1 = vld [vmem:[%s1757_s1 + $0xc0] sm:$0xff]   ;;  %1109 = vmatprep.subr.bf16.mxu0 %v1302_v0  ;;  %v1307_v5 = vld [vmem:[%s1757_s1 + $0xc8] sm:$0xff]   ;;  %v1311_v9 = vld [vmem:[%s1757_s1 + $0xd0] sm:$0xff]  }
   0x3   :  { %v1304_v2 = vld [vmem:[%s1757_s1] sm:$0xff]   ;;  %1173 = vmatprep.subr.bf16.mxu1 %v1303_v1  ;;  %v1308_v6 = vld [vmem:[%s1757_s1 + $0x8] sm:$0xff]   ;;  %v1312_v10 = vld [vmem:[%s1757_s1 + $0x10] sm:$0xff]  }
   0x4   :  { %v1305_v3 = vld [vmem:[%s1757_s1 + $0x80] sm:$0xff]   ;;  %1110 = vmatpush3.bf16.msra.mxu0 %v1304_v2  ;;  %v1309_v7 = vld [vmem:[%s1757_s1 + $0x88] sm:$0xff]   ;;  %v1313_v11 = vld [vmem:[%s1757_s1 + $0x90] sm:$0xff]  }
   0x5   :  { %1174 = vmatpush3.bf16.msra.mxu1 %v1305_v3  ;;  %1111 = vmatprep.subr.bf16.mxu0 %v1306_v4  ;;  %v1314_v12 = vld [vmem:[%s1757_s1 + $0x58] sm:$0xff]   ;;  %v1318_v16 = vld [vmem:[%s1757_s1 + $0x60] sm:$0xff]   ;;  %v1322_v20 = vld [vmem:[%s1757_s1 + $0x68] sm:$0xff]  }
   0x6   :  { %1175 = vmatprep.subr.bf16.mxu1 %v1307_v5  ;;  %v1315_v13 = vld [vmem:[%s1757_s1 + $0xd8] sm:$0xff]   ;;  %v1319_v17 = vld [vmem:[%s1757_s1 + $0xe0] sm:$0xff]   ;;  %v1323_v21 = vld [vmem:[%s1757_s1 + $0xe8] sm:$0xff]  }
   0x7   :  { %v1316_v14 = vld [vmem:[%s1757_s1 + $0x18] sm:$0xff]   ;;  %v1320_v18 = vld [vmem:[%s1757_s1 + $0x20] sm:$0xff]   ;;  %v1324_v22 = vld [vmem:[%s1757_s1 + $0x28] sm:$0xff]  }
   0x8   :  { %1112 = vmatpush3.bf16.msra.mxu0 %v1308_v6  ;;  %v1317_v15 = vld [vmem:[%s1757_s1 + $0x98] sm:$0xff]   ;;  %v1321_v19 = vld [vmem:[%s1757_s1 + $0xa0] sm:$0xff]   ;;  %v1325_v23 = vld [vmem:[%s1757_s1 + $0xa8] sm:$0xff]  }
   0x9   :  { %1176 = vmatpush3.bf16.msra.mxu1 %v1309_v7  ;;  %1113 = vmatprep.subr.bf16.mxu0 %v1310_v8  ;;  %v1326_v24 = vld [vmem:[%s1757_s1 + $0x70] sm:$0xff]   ;;  %v1330_v28 = vld [vmem:[%s1757_s1 + $0x78] sm:$0xff]   ;;  %v1339_v35 = vld [vmem:[%s1758_s0 + $0xc] ss:$20 sps:$4 sm:$0xff]  }
   0xa   :  { %1177 = vmatprep.subr.bf16.mxu1 %v1311_v9  ;;  %v1327_v25 = vld [vmem:[%s1757_s1 + $0xf0] sm:$0xff]   ;;  %v1331_v29 = vld [vmem:[%s1757_s1 + $0xf8] sm:$0xff]   ;;  %v1340_v36 = vld [vmem:[%s1757_s1 + $0x100] sm:$0xff]   ;;  %756 = vmatprep.mubr.bf16.mxu1 %v1339_v35 }
   0xb   :  { %v1328_v26 = vld [vmem:[%s1757_s1 + $0x30] sm:$0xff]   ;;  %v1332_v30 = vld [vmem:[%s1757_s1 + $0x38] sm:$0xff]   ;;  %v1341_v37 = vld [vmem:[%s1758_s0 + $0x2c] ss:$20 sps:$4 sm:$0xff]  }
   0xc   :  { %1114 = vmatpush3.bf16.msra.mxu0 %v1312_v10  ;;  %v1329_v27 = vld [vmem:[%s1757_s1 + $0xb0] sm:$0xff]   ;;  %v1333_v31 = vld [vmem:[%s1757_s1 + $0xb8] sm:$0xff]   ;;  %v1347_v39 = vld [vmem:[%s1757_s1 + $0x108] sm:$0xff]  }
   0xd   :  { %1178 = vmatpush3.bf16.msra.mxu1 %v1313_v11  ;;  %1115 = vmatprep.subr.bf16.mxu0 %v1314_v12  ;;  %v1334_v32 = vld [vmem:[%s1758_s0] ss:$20 sps:$4 sm:$0xff]   ;;  %v1336_v33 = vld [vmem:[%s1758_s0 + $0x4] ss:$20 sps:$4 sm:$0xff]   ;;  %v1337_v34 = vld [vmem:[%s1758_s0 + $0x8] ss:$20 sps:$4 sm:$0xff]  }
   0xe   :  { %1179 = vmatprep.subr.bf16.mxu1 %v1315_v13  ;;  %659 = vmatprep.mubr.bf16.mxu0 %v1336_v33  ;;  %v1343_v38 = vld [vmem:[%s1758_s0 + $0x34] ss:$20 sps:$4 sm:$0xff]   ;;  %v1346_v41 = vld [vmem:[%s1758_s0 + $0x30] ss:$20 sps:$4 sm:$0xff]   ;;  %v1361_v45 = vld [vmem:[%s1757_s1 + $0x118] sm:$0xff]  }
   0xf   :  { %v1345_v40 = vld [vmem:[%s1758_s0 + $0x28] ss:$20 sps:$4 sm:$0xff]   ;;  %v1354_v44 = vld [vmem:[%s1757_s1 + $0x110] sm:$0xff]   ;;  %v1353_v47 = vld [vmem:[%s1758_s0 + $0x58] ss:$20 sps:$4 sm:$0xff]  }
  0x10   :  { %1116 = vmatpush3.bf16.msra.mxu0 %v1316_v14  ;;  %v1348_v42 = vld [vmem:[%s1758_s0 + $0x54] ss:$20 sps:$4 sm:$0xff]   ;;  %v1350_v43 = vld [vmem:[%s1758_s0 + $0x5c] ss:$20 sps:$4 sm:$0xff]   ;;  %v1357_v49 = vld [vmem:[%s1758_s0 + $0x84] ss:$20 sps:$4 sm:$0xff]  }
  0x11   :  { %1180 = vmatpush3.bf16.msra.mxu1 %v1317_v15  ;;  %1117 = vmatprep.subr.bf16.mxu0 %v1318_v16  ;;  %v1352_v46 = vld [vmem:[%s1758_s0 + $0x50] ss:$20 sps:$4 sm:$0xff]   ;;  %v1375_v51 = vld [vmem:[%s1757_s1 + $0x128] sm:$0xff]   ;;  %v1360_v53 = vld [vmem:[%s1758_s0 + $0x80] ss:$20 sps:$4 sm:$0xff]  }
  0x12   :  { %1181 = vmatprep.subr.bf16.mxu1 %v1319_v17  ;;  %v1355_v48 = vld [vmem:[%s1758_s0 + $0x7c] ss:$20 sps:$4 sm:$0xff]   ;;  %v1368_v50 = vld [vmem:[%s1757_s1 + $0x120] sm:$0xff]   ;;  %v1359_v52 = vld [vmem:[%s1758_s0 + $0x78] ss:$20 sps:$4 sm:$0xff]  }
  0x13   :  { %v1362_v54 = vld [vmem:[%s1758_s0 + $0xa4] ss:$20 sps:$4 sm:$0xff]   ;;  %v1382_v55 = vld [vmem:[%s1757_s1 + $0x130] sm:$0xff]   ;;  %v1364_v56 = vld [vmem:[%s1758_s0 + $0xac] ss:$20 sps:$4 sm:$0xff]  }
  0x14   :  { %1118 = vmatpush3.bf16.msra.mxu0 %v1320_v18  ;;  %v1389_v57 = vld [vmem:[%s1757_s1 + $0x138] sm:$0xff]   ;;  %v1366_v58 = vld [vmem:[%s1758_s0 + $0xa0] ss:$20 sps:$4 sm:$0xff]   ;;  %v1374_v63 = vld [vmem:[%s1758_s0 + $0xd0] ss:$20 sps:$4 sm:$0xff]  }
  0x15   :  { %1182 = vmatpush3.bf16.msra.mxu1 %v1321_v19  ;;  %1119 = vmatprep.subr.bf16.mxu0 %v1322_v20  ;;  %v1367_v59 = vld [vmem:[%s1758_s0 + $0xa8] ss:$20 sps:$4 sm:$0xff]   ;;  %v1369_v60 = vld [vmem:[%s1758_s0 + $0xcc] ss:$20 sps:$4 sm:$0xff]   ;;  %v1380_v2 = vld [vmem:[%s1758_s0 + $0xf0] ss:$20 sps:$4 sm:$0xff]  }
  0x16   :  { %1183 = vmatprep.subr.bf16.mxu1 %v1323_v21  ;;  %v1371_v61 = vld [vmem:[%s1758_s0 + $0xd4] ss:$20 sps:$4 sm:$0xff]   ;;  %v1378_v1 = vld [vmem:[%s1758_s0 + $0xfc] ss:$20 sps:$4 sm:$0xff]   ;;  %v1381_v3 = vld [vmem:[%s1758_s0 + $0xf8] ss:$20 sps:$4 sm:$0xff]  }
  0x17   :  { %v1373_v62 = vld [vmem:[%s1758_s0 + $0xc8] ss:$20 sps:$4 sm:$0xff]   ;;  %v1385_v5 = vld [vmem:[%s1758_s0 + $0x124] ss:$20 sps:$4 sm:$0xff]   ;;  %v1388_v7 = vld [vmem:[%s1758_s0 + $0x120] ss:$20 sps:$4 sm:$0xff]  }
  0x18   :  { %1120 = vmatpush3.bf16.msra.mxu0 %v1324_v22  ;;  %v1376_v0 = vld [vmem:[%s1758_s0 + $0xf4] ss:$20 sps:$4 sm:$0xff]   ;;  %v1383_v4 = vld [vmem:[%s1758_s0 + $0x11c] ss:$20 sps:$4 sm:$0xff]   ;;  %v1387_v6 = vld [vmem:[%s1758_s0 + $0x118] ss:$20 sps:$4 sm:$0xff]  }
  0x19   :  { %1184 = vmatpush3.bf16.msra.mxu1 %v1325_v23  ;;  %1121 = vmatprep.subr.bf16.mxu0 %v1326_v24  ;;  %v1390_v8 = vld [vmem:[%s1758_s0 + $0x10] ss:$20 sps:$4 sm:$0xff]   ;;  %v1392_v10 = vld [vmem:[%s1758_s0 + $0x38] ss:$20 sps:$4 sm:$0xff]   ;;  %v1394_v12 = vld [vmem:[%s1758_s0 + $0x60] ss:$20 sps:$4 sm:$0xff]  }
  0x1a   :  { %1185 = vmatprep.subr.bf16.mxu1 %v1327_v25  ;;  %v1391_v9 = vld [vmem:[%s1758_s0 + $0xb0] ss:$20 sps:$4 sm:$0xff]   ;;  %v1393_v11 = vld [vmem:[%s1758_s0 + $0xd8] ss:$20 sps:$4 sm:$0xff]   ;;  %v1395_v13 = vld [vmem:[%s1758_s0 + $0x100] ss:$20 sps:$4 sm:$0xff]  }
  0x1b   :  { %v1396_v14 = vld [vmem:[%s1758_s0 + $0x88] ss:$20 sps:$4 sm:$0xff]  }
  0x1c   :  { %1122 = vmatpush3.bf16.msra.mxu0 %v1328_v26  ;;  %v1397_v15 = vld [vmem:[%s1758_s0 + $0x128] ss:$20 sps:$4 sm:$0xff]  }
  0x1d   :  { %1186 = vmatpush3.bf16.msra.mxu1 %v1329_v27  ;;  %1123 = vmatprep.subr.bf16.mxu0 %v1330_v28 }
  0x1e   :  { %1187 = vmatprep.subr.bf16.mxu1 %v1331_v29 }
  0x20   :  { %1124 = vmatpush3.bf16.msra.mxu0 %v1332_v30 }
  0x21   :  { %1188 = vmatpush3.bf16.msra.mxu1 %v1333_v31  ;;  %1253 = vmatprep.subr.bf16.mxu0 %v1340_v36 }
  0x22   :  { %1285 = vmatprep.subr.bf16.mxu1 %v1340_v36 }
  0x23   :  { %660 = vmatmul.mubr.bf16.vlgmr.msra.gmra.mrb[0].mxu0 %v1334_v32 }
  0x24   :  { %757 = vmatmul.mubr.bf16.vlgmr.msra.gmra.mrb[0].mxu1 %v1337_v34  ;;  %1254 = vmatpush3.bf16.msra.mxu0 %v1340_v36 }
  0x25   :  { %1293 = vmatpush3.bf16.msra.mxu1 %v1340_v36  ;;  %667 = vmatprep.mubr.bf16.mxu0 %v1341_v37 }
  0x26   :  { %764 = vmatprep.mubr.bf16.mxu1 %v1343_v38  ;;  %1255 = vmatprep.subr.bf16.mxu0 %v1347_v39 }
  0x27   :  { %1286 = vmatprep.subr.bf16.mxu1 %v1347_v39 }
  0x28   :  { %1256 = vmatpush3.bf16.msra.mxu0 %v1347_v39 }
  0x29   :  { %1294 = vmatpush3.bf16.msra.mxu1 %v1347_v39  ;;  %1257 = vmatprep.subr.bf16.mxu0 %v1354_v44 }
  0x2a   :  { %1287 = vmatprep.subr.bf16.mxu1 %v1354_v44 }
  0x2b   :  { %668 = vmatmul.mubr.bf16.gmra.mrb[4].mxu0 %v1345_v40 }
  0x2c   :  { %765 = vmatmul.mubr.bf16.gmra.mrb[4].mxu1 %v1346_v41  ;;  %675 = vmatprep.mubr.bf16.mxu0 %v1348_v42 }
  0x2d   :  { %772 = vmatprep.mubr.bf16.mxu1 %v1350_v43  ;;  %1258 = vmatpush3.bf16.msra.mxu0 %v1354_v44 }
  0x2e   :  { %1295 = vmatpush3.bf16.msra.mxu1 %v1354_v44  ;;  %1259 = vmatprep.subr.bf16.mxu0 %v1361_v45 }
  0x2f   :  { %1288 = vmatprep.subr.bf16.mxu1 %v1361_v45 }
  0x31   :  { %1260 = vmatpush3.bf16.msra.mxu0 %v1361_v45 }
  0x32   :  { %1296 = vmatpush3.bf16.msra.mxu1 %v1361_v45  ;;  %1261 = vmatprep.subr.bf16.mxu0 %v1368_v50 }
  0x33   :  { %676 = vmatmul.mubr.bf16.gmra.mrb[8].mxu0 %v1352_v46  ;;  %1289 = vmatprep.subr.bf16.mxu1 %v1368_v50 }
  0x34   :  { %773 = vmatmul.mubr.bf16.gmra.mrb[8].mxu1 %v1353_v47  ;;  %683 = vmatprep.mubr.bf16.mxu0 %v1355_v48 }
  0x35   :  { %780 = vmatprep.mubr.bf16.mxu1 %v1357_v49  ;;  %1262 = vmatpush3.bf16.msra.mxu0 %v1368_v50 }
  0x36   :  { %1297 = vmatpush3.bf16.msra.mxu1 %v1368_v50  ;;  %1263 = vmatprep.subr.bf16.mxu0 %v1375_v51 }
  0x37   :  { %1290 = vmatprep.subr.bf16.mxu1 %v1375_v51 }
  0x39   :  { %1264 = vmatpush3.bf16.msra.mxu0 %v1375_v51 }
  0x3a   :  { %1298 = vmatpush3.bf16.msra.mxu1 %v1375_v51  ;;  %1265 = vmatprep.subr.bf16.mxu0 %v1382_v55 }
  0x3b   :  { %684 = vmatmul.mubr.bf16.gmra.mrb[12].mxu0 %v1359_v52  ;;  %1291 = vmatprep.subr.bf16.mxu1 %v1382_v55 }
  0x3c   :  { %781 = vmatmul.mubr.bf16.gmra.mrb[12].mxu1 %v1360_v53  ;;  %691 = vmatprep.mubr.bf16.mxu0 %v1362_v54 }
  0x3d   :  { %788 = vmatprep.mubr.bf16.mxu1 %v1364_v56  ;;  %1266 = vmatpush3.bf16.msra.mxu0 %v1382_v55 }
  0x3e   :  { %1299 = vmatpush3.bf16.msra.mxu1 %v1382_v55  ;;  %1267 = vmatprep.subr.bf16.mxu0 %v1389_v57 }
  0x3f   :  { %1292 = vmatprep.subr.bf16.mxu1 %v1389_v57 }
  0x41   :  { %1268 = vmatpush3.bf16.msra.mxu0 %v1389_v57 }
  0x42   :  { %1300 = vmatpush3.bf16.msra.mxu1 %v1389_v57 }
  0x43   :  { %692 = vmatmul.mubr.bf16.gmra.mrb[16].mxu0 %v1366_v58 }
  0x44   :  { %789 = vmatmul.mubr.bf16.gmra.mrb[16].mxu1 %v1367_v59  ;;  %699 = vmatprep.mubr.bf16.mxu0 %v1369_v60 }
  0x45   :  { %796 = vmatprep.mubr.bf16.mxu1 %v1371_v61 }
  0x4b   :  { %700 = vmatmul.mubr.bf16.gmra.mrb[20].mxu0 %v1373_v62 }
  0x4c   :  { %797 = vmatmul.mubr.bf16.gmra.mrb[20].mxu1 %v1374_v63  ;;  %707 = vmatprep.mubr.bf16.mxu0 %v1376_v0 }
  0x4d   :  { %804 = vmatprep.mubr.bf16.mxu1 %v1378_v1 }
  0x53   :  { %708 = vmatmul.mubr.bf16.gmra.mrb[24].mxu0 %v1380_v2 }
  0x54   :  { %805 = vmatmul.mubr.bf16.gmra.mrb[24].mxu1 %v1381_v3  ;;  %715 = vmatprep.mubr.bf16.mxu0 %v1383_v4 }
  0x55   :  { %812 = vmatprep.mubr.bf16.mxu1 %v1385_v5 }
  0x5b   :  { %716 = vmatmul.mubr.bf16.gmra.mrb[28].mxu0 %v1387_v6 }
  0x5c   :  { %813 = vmatmul.mubr.bf16.gmra.mrb[28].mxu1 %v1388_v7  ;;  %1269 = vmatprep.mubr.bf16.mxu0 %v1390_v8 }
  0x5d   :  { %1277 = vmatprep.mubr.bf16.mxu1 %v1391_v9 }
  0x63   :  { %1270 = vmatmul.mubr.bf16.vlgmr.msra.gmra.mrb[32].mxu0 %v1392_v10 }
  0x64   :  { %1278 = vmatmul.mubr.bf16.vlgmr.msra.gmra.mrb[32].mxu1 %v1393_v11  ;;  %1273 = vmatprep.mubr.bf16.mxu0 %v1394_v12 }
  0x65   :  { %1281 = vmatprep.mubr.bf16.mxu1 %v1395_v13 }
  0x6b   :  { %1274 = vmatmul.mubr.bf16.gmra.mrb[36].mxu0 %v1396_v14 }
  0x6c   :  { %1282 = vmatmul.mubr.bf16.gmra.mrb[36].mxu1 %v1397_v15 }
  0xf6   :  { %v1125_v16 = vpop.f32.mrb[0].mxu0 }
  0xf7   :  { %v1189_v17 = vpop.f32.mrb[0].mxu1  ;;  %v1126_v18 = vpop.f32.mrb[1].mxu0 }
  0xf8   :  { %v1127_v19 = vadd.f32 %v1126_v18, %v1125_v16  ;;  %v1190_v20 = vpop.f32.mrb[1].mxu1  ;;  %v1128_v21 = vpop.f32.mrb[2].mxu0 }
  0xf9   :  { %v1191_v22 = vadd.f32 %v1190_v20, %v1189_v17  ;;  %v1192_v23 = vpop.f32.mrb[2].mxu1  ;;  %v1129_v24 = vpop.f32.mrb[3].mxu0 }
  0xfa   :  { %v1130_v25 = vadd.f32 %v1129_v24, %v1128_v21  ;;  %v1193_v26 = vpop.f32.mrb[3].mxu1 }
  0xfb   :  { %v1194_v27 = vadd.f32 %v1193_v26, %v1192_v23  ;;  %v1658_v28 = vadd.f32 %v1191_v22, %v1127_v19 }
  0xfd   :  { %v1660_v29 = vadd.f32 %v1194_v27, %v1130_v25 }
  0xfe   :  { %v1131_v30 = vpop.f32.mrb[4].mxu0 }
  0xff   :  { %v1195_v31 = vpop.f32.mrb[4].mxu1  ;;  %v1132_v32 = vpop.f32.mrb[5].mxu0 }
 0x100   :  { %v1133_v33 = vadd.f32 %v1132_v32, %v1131_v30  ;;  %v1196_v34 = vpop.f32.mrb[5].mxu1  ;;  %v1134_v35 = vpop.f32.mrb[6].mxu0 }
 0x101   :  { %v1197_v36 = vadd.f32 %v1196_v34, %v1195_v31  ;;  %v1198_v37 = vpop.f32.mrb[6].mxu1  ;;  %v1135_v38 = vpop.f32.mrb[7].mxu0 }
 0x102   :  { %v1136_v39 = vadd.f32 %v1135_v38, %v1134_v35  ;;  %v1199_v40 = vpop.f32.mrb[7].mxu1 }
 0x103   :  { %v1200_v41 = vadd.f32 %v1199_v40, %v1198_v37  ;;  %v1662_v42 = vadd.f32 %v1197_v36, %v1133_v33 }
 0x105   :  { %v1664_v43 = vadd.f32 %v1200_v41, %v1136_v39 }
 0x106   :  { %v1137_v44 = vpop.f32.mrb[8].mxu0 }
 0x107   :  { %v1201_v45 = vpop.f32.mrb[8].mxu1  ;;  %v1138_v46 = vpop.f32.mrb[9].mxu0 }
 0x108   :  { %v1139_v47 = vadd.f32 %v1138_v46, %v1137_v44  ;;  %v1202_v48 = vpop.f32.mrb[9].mxu1  ;;  %v1140_v49 = vpop.f32.mrb[10].mxu0 }
 0x109   :  { %v1203_v50 = vadd.f32 %v1202_v48, %v1201_v45  ;;  %v1204_v51 = vpop.f32.mrb[10].mxu1  ;;  %v1141_v52 = vpop.f32.mrb[11].mxu0 }
 0x10a   :  { %v1142_v53 = vadd.f32 %v1141_v52, %v1140_v49  ;;  %v1205_v54 = vpop.f32.mrb[11].mxu1 }
 0x10b   :  { %v1206_v55 = vadd.f32 %v1205_v54, %v1204_v51  ;;  %v1666_v56 = vadd.f32 %v1203_v50, %v1139_v47 }
 0x10d   :  { %v1668_v57 = vadd.f32 %v1206_v55, %v1142_v53 }
 0x10e   :  { %v1143_v58 = vpop.f32.mrb[12].mxu0 }
 0x10f   :  { %v1207_v59 = vpop.f32.mrb[12].mxu1  ;;  %v1144_v60 = vpop.f32.mrb[13].mxu0 }
 0x110   :  { %v1145_v61 = vadd.f32 %v1144_v60, %v1143_v58  ;;  %v1208_v62 = vpop.f32.mrb[13].mxu1  ;;  %v1146_v63 = vpop.f32.mrb[14].mxu0 }
 0x111   :  { %v1209_v0 = vadd.f32 %v1208_v62, %v1207_v59  ;;  %v1210_v1 = vpop.f32.mrb[14].mxu1  ;;  %v1147_v2 = vpop.f32.mrb[15].mxu0 }
 0x112   :  { %v1148_v3 = vadd.f32 %v1147_v2, %v1146_v63  ;;  %v1211_v4 = vpop.f32.mrb[15].mxu1 }
 0x113   :  { %v1212_v5 = vadd.f32 %v1211_v4, %v1210_v1  ;;  %v1670_v6 = vadd.f32 %v1209_v0, %v1145_v61 }
 0x115   :  { %v1672_v7 = vadd.f32 %v1212_v5, %v1148_v3 }
 0x116   :  { %v1149_v8 = vpop.f32.mrb[16].mxu0 }
 0x117   :  { %v1213_v9 = vpop.f32.mrb[16].mxu1  ;;  %v1150_v10 = vpop.f32.mrb[17].mxu0 }
 0x118   :  { %v1151_v11 = vadd.f32 %v1150_v10, %v1149_v8  ;;  %v1214_v12 = vpop.f32.mrb[17].mxu1  ;;  %v1152_v13 = vpop.f32.mrb[18].mxu0 }
 0x119   :  { %v1215_v14 = vadd.f32 %v1214_v12, %v1213_v9  ;;  %v1216_v15 = vpop.f32.mrb[18].mxu1  ;;  %v1153_v16 = vpop.f32.mrb[19].mxu0  ;;  %v1682_v12 = vld [vmem:[%s1759_s2] ss:$0 sm:$0xff] }
 0x11a   :  { %v1154_v17 = vadd.f32 %v1153_v16, %v1152_v13  ;;  %v1217_v18 = vpop.f32.mrb[19].mxu1 }
 0x11b   :  { %v1218_v19 = vadd.f32 %v1217_v18, %v1216_v15  ;;  %v791_v20 = vadd.f32 %v1215_v14, %v1151_v11 }
 0x11d   :  { %v794_v21 = vadd.f32 %v1218_v19, %v1154_v17 }
 0x11e   :  { %v1155_v22 = vpop.f32.mrb[20].mxu0 }
 0x11f   :  { %v1219_v23 = vpop.f32.mrb[20].mxu1  ;;  %v1156_v24 = vpop.f32.mrb[21].mxu0 }
 0x120   :  { %v1157_v25 = vadd.f32 %v1156_v24, %v1155_v22  ;;  %v1220_v26 = vpop.f32.mrb[21].mxu1  ;;  %v1158_v27 = vpop.f32.mrb[22].mxu0 }
 0x121   :  { %v1221_v30 = vadd.f32 %v1220_v26, %v1219_v23  ;;  %v1222_v31 = vpop.f32.mrb[22].mxu1  ;;  %v1159_v32 = vpop.f32.mrb[23].mxu0 }
 0x122   :  { %v1160_v33 = vadd.f32 %v1159_v32, %v1158_v27  ;;  %v1223_v34 = vpop.f32.mrb[23].mxu1 }
 0x123   :  { %v1224_v35 = vadd.f32 %v1223_v34, %v1222_v31  ;;  %v799_v36 = vadd.f32 %v1221_v30, %v1157_v25 }
 0x125   :  { %v802_v37 = vadd.f32 %v1224_v35, %v1160_v33 }
 0x126   :  { %v1161_v38 = vpop.f32.mrb[24].mxu0 }
 0x127   :  { %v1225_v39 = vpop.f32.mrb[24].mxu1  ;;  %v1162_v40 = vpop.f32.mrb[25].mxu0 }
 0x128   :  { %v1163_v41 = vadd.f32 %v1162_v40, %v1161_v38  ;;  %v1226_v44 = vpop.f32.mrb[25].mxu1  ;;  %v1164_v45 = vpop.f32.mrb[26].mxu0 }
 0x129   :  { %v1227_v46 = vadd.f32 %v1226_v44, %v1225_v39  ;;  %v1228_v47 = vpop.f32.mrb[26].mxu1  ;;  %v1165_v48 = vpop.f32.mrb[27].mxu0 }
 0x12a   :  { %v1166_v49 = vadd.f32 %v1165_v48, %v1164_v45  ;;  %v1229_v50 = vpop.f32.mrb[27].mxu1 }
 0x12b   :  { %v1230_v51 = vadd.f32 %v1229_v50, %v1228_v47  ;;  %v1674_v52 = vadd.f32 %v1227_v46, %v1163_v41 }
 0x12d   :  { %v1676_v53 = vadd.f32 %v1230_v51, %v1166_v49 }
 0x12e   :  { %v1167_v54 = vpop.f32.mrb[28].mxu0 }
 0x12f   :  { %v1231_v55 = vpop.f32.mrb[28].mxu1  ;;  %v1168_v58 = vpop.f32.mrb[29].mxu0 }
 0x130   :  { %v1169_v59 = vadd.f32 %v1168_v58, %v1167_v54  ;;  %v1232_v60 = vpop.f32.mrb[29].mxu1  ;;  %v1170_v61 = vpop.f32.mrb[30].mxu0 }
 0x131   :  { %v1233_v62 = vadd.f32 %v1232_v60, %v1231_v55  ;;  %v1234_v63 = vpop.f32.mrb[30].mxu1  ;;  %v1171_v0 = vpop.f32.mrb[31].mxu0 }
 0x132   :  { %v1172_v1 = vadd.f32 %v1171_v0, %v1170_v61  ;;  %v1235_v2 = vpop.f32.mrb[31].mxu1 }
 0x133   :  { %v1236_v3 = vadd.f32 %v1235_v2, %v1234_v63  ;;  %v815_v4 = vadd.f32 %v1233_v62, %v1169_v59 }
 0x135   :  { %v818_v5 = vadd.f32 %v1236_v3, %v1172_v1 }
 0x136   :  { %v1271_v8 = vpop.f32.mrb[32].mxu0 }
 0x137   :  { %v864_v9 = vadd.f32 %v1271_v8, %v1662_v42  ;;  %v1279_v10 = vpop.f32.mrb[32].mxu1  ;;  %v855_v11 = vpop.f32.mrb[33].mxu0 }
 0x138   :  { %v896_v13 = vadd.f32 %v1279_v10, %v799_v36  ;;  %v856_v14 = vadd.f32 %v855_v11, %v1658_v28  ;;  %v887_v15 = vpop.f32.mrb[33].mxu1  ;;  %v1272_v16 = vpop.f32.mrb[34].mxu0 }
 0x139   :  { %v888_v17 = vadd.f32 %v887_v15, %v791_v20  ;;  %v867_v18 = vadd.f32 %v1272_v16, %v1664_v43  ;;  %v1280_v19 = vpop.f32.mrb[34].mxu1  ;;  %v858_v22 = vpop.f32.mrb[35].mxu0  ;;  %v978_v25 = vadd.f32 %v1682_v12, %v864_v9 }
 0x13a   :  { %v899_v23 = vadd.f32 %v1280_v19, %v802_v37  ;;  %v859_v42 = vadd.f32 %v858_v22, %v1660_v29  ;;  %v890_v24 = vpop.f32.mrb[35].mxu1  ;;  %v986_v27 = vadd.f32 %v1682_v12, %v896_v13  ;;  %v976_v30 = vadd.f32 %v1682_v12, %v856_v14 }
 0x13b   :  { %v891_v26 = vadd.f32 %v890_v24, %v794_v21  ;;  %v994_v31 = vmax.f32 %v978_v25, 0.0  ;;  %v984_v28 = vadd.f32 %v1682_v12, %v888_v17  ;;  %v979_v20 = vadd.f32 %v1682_v12, %v867_v18 }
 0x13c   :  { %v1002_v32 = vmax.f32 %v986_v27, 0.0  ;;  %v992_v43 = vmax.f32 %v976_v30, 0.0  ;;  %v987_v33 = vadd.f32 %v1682_v12, %v899_v23  ;;  %v977_v34 = vadd.f32 %v1682_v12, %v859_v42 }
 0x13d   :  { %1010 = vst [vmem:[%s1760_s3 + $0x10] sm:$0xff] %v994_v31  ;;  %v1000_v21 = vmax.f32 %v984_v28, 0.0  ;;  %v995_v35 = vmax.f32 %v979_v20, 0.0  ;;  %v985_v36 = vadd.f32 %v1682_v12, %v891_v26 }
 0x13e   :  { %v1275_v29 = vpop.f32.mrb[36].mxu0  ;;  %1018 = vst [vmem:[%s1760_s3 + $0x50] sm:$0xff] %v1002_v32  ;;  %1008 = vst [vmem:[%s1760_s3] sm:$0xff] %v992_v43  ;;  %v1003_v40 = vmax.f32 %v987_v33, 0.0  ;;  %v993_v41 = vmax.f32 %v977_v34, 0.0 }
 0x13f   :  { %v880_v37 = vadd.f32 %v1275_v29, %v1670_v6  ;;  %v1283_v38 = vpop.f32.mrb[36].mxu1  ;;  %v871_v39 = vpop.f32.mrb[37].mxu0  ;;  %1016 = vst [vmem:[%s1760_s3 + $0x40] sm:$0xff] %v1000_v21  ;;  %1011 = vst [vmem:[%s1760_s3 + $0x18] sm:$0xff] %v995_v35  ;;  %v1001_v6 = vmax.f32 %v985_v36, 0.0 }
 0x140   :  { %v912_v44 = vadd.f32 %v1283_v38, %v815_v4  ;;  %v872_v45 = vadd.f32 %v871_v39, %v1666_v56  ;;  %v903_v46 = vpop.f32.mrb[37].mxu1  ;;  %v1276_v47 = vpop.f32.mrb[38].mxu0  ;;  %1019 = vst [vmem:[%s1760_s3 + $0x58] sm:$0xff] %v1003_v40  ;;  %1009 = vst [vmem:[%s1760_s3 + $0x8] sm:$0xff] %v993_v41 }
 0x141   :  { %v904_v48 = vadd.f32 %v903_v46, %v1674_v52  ;;  %v883_v49 = vadd.f32 %v1276_v47, %v1672_v7  ;;  %v1284_v50 = vpop.f32.mrb[38].mxu1  ;;  %v874_v51 = vpop.f32.mrb[39].mxu0  ;;  %1017 = vst [vmem:[%s1760_s3 + $0x48] sm:$0xff] %v1001_v6  ;;  %v982_v7 = vadd.f32 %v1682_v12, %v880_v37 }
 0x142   :  { %v915_v56 = vadd.f32 %v1284_v50, %v818_v5  ;;  %v875_v54 = vadd.f32 %v874_v51, %v1668_v57  ;;  %v906_v55 = vpop.f32.mrb[39].mxu1  ;;  %v990_v58 = vadd.f32 %v1682_v12, %v912_v44  ;;  %v980_v59 = vadd.f32 %v1682_v12, %v872_v45 }
 0x143   :  { %v907_v52 = vadd.f32 %v906_v55, %v1676_v53  ;;  %v998_v60 = vmax.f32 %v982_v7, 0.0  ;;  %v988_v61 = vadd.f32 %v1682_v12, %v904_v48  ;;  %v983_v62 = vadd.f32 %v1682_v12, %v883_v49 }
 0x144   :  { %v1006_v63 = vmax.f32 %v990_v58, 0.0  ;;  %v996_v57 = vmax.f32 %v980_v59, 0.0  ;;  %v991_v0 = vadd.f32 %v1682_v12, %v915_v56  ;;  %v981_v1 = vadd.f32 %v1682_v12, %v875_v54 }
 0x145   :  { %1014 = vst [vmem:[%s1760_s3 + $0x30] sm:$0xff] %v998_v60  ;;  %v1004_v53 = vmax.f32 %v988_v61, 0.0  ;;  %v999_v2 = vmax.f32 %v983_v62, 0.0  ;;  %v989_v3 = vadd.f32 %v1682_v12, %v907_v52 }
 0x146   :  { %1022 = vst [vmem:[%s1760_s3 + $0x70] sm:$0xff] %v1006_v63  ;;  %1012 = vst [vmem:[%s1760_s3 + $0x20] sm:$0xff] %v996_v57  ;;  %v1007_v4 = vmax.f32 %v991_v0, 0.0  ;;  %v997_v5 = vmax.f32 %v981_v1, 0.0 }
 0x147   :  { %1020 = vst [vmem:[%s1760_s3 + $0x60] sm:$0xff] %v1004_v53  ;;  %1015 = vst [vmem:[%s1760_s3 + $0x38] sm:$0xff] %v999_v2  ;;  %v1005_v8 = vmax.f32 %v989_v3, 0.0 }
 0x148   :  { %1023 = vst [vmem:[%s1760_s3 + $0x78] sm:$0xff] %v1007_v4  ;;  %1013 = vst [vmem:[%s1760_s3 + $0x28] sm:$0xff] %v997_v5 }
 0x149   :  { %1021 = vst [vmem:[%s1760_s3 + $0x68] sm:$0xff] %v1005_v8 }

// kernel: resnet34_forward.42
= control target key start
LH: loop header
LB: loop body
LE: loop exit
PB: predicated region body
PF: predicated region fallthrough
CT: control target
= control target key end

     0   :  { %s1854_s1 = inlined_call_operand.vmem [shape: bf16[640,128], index: 1, kind: input, shape index: {}]   ;;  %s1855_s0 = inlined_call_operand.vmem [shape: bf16[128,640], index: 0, kind: input, shape index: {}]   ;;  %s1856_s2 = inlined_call_operand.vmem [shape: f32[1,128], index: 2, kind: input, shape index: {}]   ;;  %s1857_s3 = inlined_call_operand.vmem [shape: f32[128,128], index: 3, kind: input, shape index: {}]   ;;  %s1858_s4 = inlined_call_operand.vmem [shape: f32[128,128], index: 4, kind: output, shape index: {}]  }
   0x1   :  { %v1337_v0 = vld [vmem:[%s1854_s1 + $0x40] sm:$0xff]   ;;  %v1341_v4 = vld [vmem:[%s1854_s1 + $0x48] sm:$0xff]   ;;  %v1345_v8 = vld [vmem:[%s1854_s1 + $0x50] sm:$0xff]  }
   0x2   :  { %v1338_v1 = vld [vmem:[%s1854_s1 + $0xc0] sm:$0xff]   ;;  %1144 = vmatprep.subr.bf16.mxu0 %v1337_v0  ;;  %v1342_v5 = vld [vmem:[%s1854_s1 + $0xc8] sm:$0xff]   ;;  %v1346_v9 = vld [vmem:[%s1854_s1 + $0xd0] sm:$0xff]  }
   0x3   :  { %v1339_v2 = vld [vmem:[%s1854_s1] sm:$0xff]   ;;  %1208 = vmatprep.subr.bf16.mxu1 %v1338_v1  ;;  %v1343_v6 = vld [vmem:[%s1854_s1 + $0x8] sm:$0xff]   ;;  %v1347_v10 = vld [vmem:[%s1854_s1 + $0x10] sm:$0xff]  }
   0x4   :  { %v1340_v3 = vld [vmem:[%s1854_s1 + $0x80] sm:$0xff]   ;;  %1145 = vmatpush3.bf16.msra.mxu0 %v1339_v2  ;;  %v1344_v7 = vld [vmem:[%s1854_s1 + $0x88] sm:$0xff]   ;;  %v1348_v11 = vld [vmem:[%s1854_s1 + $0x90] sm:$0xff]  }
   0x5   :  { %1209 = vmatpush3.bf16.msra.mxu1 %v1340_v3  ;;  %1146 = vmatprep.subr.bf16.mxu0 %v1341_v4  ;;  %v1349_v12 = vld [vmem:[%s1854_s1 + $0x58] sm:$0xff]   ;;  %v1353_v16 = vld [vmem:[%s1854_s1 + $0x60] sm:$0xff]   ;;  %v1357_v20 = vld [vmem:[%s1854_s1 + $0x68] sm:$0xff]  }
   0x6   :  { %1210 = vmatprep.subr.bf16.mxu1 %v1342_v5  ;;  %v1350_v13 = vld [vmem:[%s1854_s1 + $0xd8] sm:$0xff]   ;;  %v1354_v17 = vld [vmem:[%s1854_s1 + $0xe0] sm:$0xff]   ;;  %v1358_v21 = vld [vmem:[%s1854_s1 + $0xe8] sm:$0xff]  }
   0x7   :  { %v1351_v14 = vld [vmem:[%s1854_s1 + $0x18] sm:$0xff]   ;;  %v1355_v18 = vld [vmem:[%s1854_s1 + $0x20] sm:$0xff]   ;;  %v1359_v22 = vld [vmem:[%s1854_s1 + $0x28] sm:$0xff]  }
   0x8   :  { %1147 = vmatpush3.bf16.msra.mxu0 %v1343_v6  ;;  %v1352_v15 = vld [vmem:[%s1854_s1 + $0x98] sm:$0xff]   ;;  %v1356_v19 = vld [vmem:[%s1854_s1 + $0xa0] sm:$0xff]   ;;  %v1360_v23 = vld [vmem:[%s1854_s1 + $0xa8] sm:$0xff]  }
   0x9   :  { %1211 = vmatpush3.bf16.msra.mxu1 %v1344_v7  ;;  %1148 = vmatprep.subr.bf16.mxu0 %v1345_v8  ;;  %v1361_v24 = vld [vmem:[%s1854_s1 + $0x70] sm:$0xff]   ;;  %v1365_v28 = vld [vmem:[%s1854_s1 + $0x78] sm:$0xff]   ;;  %v1374_v35 = vld [vmem:[%s1855_s0 + $0xc] ss:$20 sps:$4 sm:$0xff]  }
   0xa   :  { %1212 = vmatprep.subr.bf16.mxu1 %v1346_v9  ;;  %v1362_v25 = vld [vmem:[%s1854_s1 + $0xf0] sm:$0xff]   ;;  %v1366_v29 = vld [vmem:[%s1854_s1 + $0xf8] sm:$0xff]   ;;  %v1375_v36 = vld [vmem:[%s1854_s1 + $0x100] sm:$0xff]   ;;  %759 = vmatprep.mubr.bf16.mxu1 %v1374_v35 }
   0xb   :  { %v1363_v26 = vld [vmem:[%s1854_s1 + $0x30] sm:$0xff]   ;;  %v1367_v30 = vld [vmem:[%s1854_s1 + $0x38] sm:$0xff]   ;;  %v1376_v37 = vld [vmem:[%s1855_s0 + $0x2c] ss:$20 sps:$4 sm:$0xff]  }
   0xc   :  { %1149 = vmatpush3.bf16.msra.mxu0 %v1347_v10  ;;  %v1364_v27 = vld [vmem:[%s1854_s1 + $0xb0] sm:$0xff]   ;;  %v1368_v31 = vld [vmem:[%s1854_s1 + $0xb8] sm:$0xff]   ;;  %v1382_v39 = vld [vmem:[%s1854_s1 + $0x108] sm:$0xff]  }
   0xd   :  { %1213 = vmatpush3.bf16.msra.mxu1 %v1348_v11  ;;  %1150 = vmatprep.subr.bf16.mxu0 %v1349_v12  ;;  %v1369_v32 = vld [vmem:[%s1855_s0] ss:$20 sps:$4 sm:$0xff]   ;;  %v1371_v33 = vld [vmem:[%s1855_s0 + $0x4] ss:$20 sps:$4 sm:$0xff]   ;;  %v1372_v34 = vld [vmem:[%s1855_s0 + $0x8] ss:$20 sps:$4 sm:$0xff]  }
   0xe   :  { %1214 = vmatprep.subr.bf16.mxu1 %v1350_v13  ;;  %662 = vmatprep.mubr.bf16.mxu0 %v1371_v33  ;;  %v1378_v38 = vld [vmem:[%s1855_s0 + $0x34] ss:$20 sps:$4 sm:$0xff]   ;;  %v1381_v41 = vld [vmem:[%s1855_s0 + $0x30] ss:$20 sps:$4 sm:$0xff]   ;;  %v1396_v45 = vld [vmem:[%s1854_s1 + $0x118] sm:$0xff]  }
   0xf   :  { %v1380_v40 = vld [vmem:[%s1855_s0 + $0x28] ss:$20 sps:$4 sm:$0xff]   ;;  %v1389_v44 = vld [vmem:[%s1854_s1 + $0x110] sm:$0xff]   ;;  %v1388_v47 = vld [vmem:[%s1855_s0 + $0x58] ss:$20 sps:$4 sm:$0xff]  }
  0x10   :  { %1151 = vmatpush3.bf16.msra.mxu0 %v1351_v14  ;;  %v1383_v42 = vld [vmem:[%s1855_s0 + $0x54] ss:$20 sps:$4 sm:$0xff]   ;;  %v1385_v43 = vld [vmem:[%s1855_s0 + $0x5c] ss:$20 sps:$4 sm:$0xff]   ;;  %v1392_v49 = vld [vmem:[%s1855_s0 + $0x84] ss:$20 sps:$4 sm:$0xff]  }
  0x11   :  { %1215 = vmatpush3.bf16.msra.mxu1 %v1352_v15  ;;  %1152 = vmatprep.subr.bf16.mxu0 %v1353_v16  ;;  %v1387_v46 = vld [vmem:[%s1855_s0 + $0x50] ss:$20 sps:$4 sm:$0xff]   ;;  %v1410_v51 = vld [vmem:[%s1854_s1 + $0x128] sm:$0xff]   ;;  %v1395_v53 = vld [vmem:[%s1855_s0 + $0x80] ss:$20 sps:$4 sm:$0xff]  }
  0x12   :  { %1216 = vmatprep.subr.bf16.mxu1 %v1354_v17  ;;  %v1390_v48 = vld [vmem:[%s1855_s0 + $0x7c] ss:$20 sps:$4 sm:$0xff]   ;;  %v1403_v50 = vld [vmem:[%s1854_s1 + $0x120] sm:$0xff]   ;;  %v1394_v52 = vld [vmem:[%s1855_s0 + $0x78] ss:$20 sps:$4 sm:$0xff]  }
  0x13   :  { %v1397_v54 = vld [vmem:[%s1855_s0 + $0xa4] ss:$20 sps:$4 sm:$0xff]   ;;  %v1417_v55 = vld [vmem:[%s1854_s1 + $0x130] sm:$0xff]   ;;  %v1399_v56 = vld [vmem:[%s1855_s0 + $0xac] ss:$20 sps:$4 sm:$0xff]  }
  0x14   :  { %1153 = vmatpush3.bf16.msra.mxu0 %v1355_v18  ;;  %v1424_v57 = vld [vmem:[%s1854_s1 + $0x138] sm:$0xff]   ;;  %v1401_v58 = vld [vmem:[%s1855_s0 + $0xa0] ss:$20 sps:$4 sm:$0xff]   ;;  %v1409_v63 = vld [vmem:[%s1855_s0 + $0xd0] ss:$20 sps:$4 sm:$0xff]  }
  0x15   :  { %1217 = vmatpush3.bf16.msra.mxu1 %v1356_v19  ;;  %1154 = vmatprep.subr.bf16.mxu0 %v1357_v20  ;;  %v1402_v59 = vld [vmem:[%s1855_s0 + $0xa8] ss:$20 sps:$4 sm:$0xff]   ;;  %v1404_v60 = vld [vmem:[%s1855_s0 + $0xcc] ss:$20 sps:$4 sm:$0xff]   ;;  %v1415_v2 = vld [vmem:[%s1855_s0 + $0xf0] ss:$20 sps:$4 sm:$0xff]  }
  0x16   :  { %1218 = vmatprep.subr.bf16.mxu1 %v1358_v21  ;;  %v1406_v61 = vld [vmem:[%s1855_s0 + $0xd4] ss:$20 sps:$4 sm:$0xff]   ;;  %v1413_v1 = vld [vmem:[%s1855_s0 + $0xfc] ss:$20 sps:$4 sm:$0xff]   ;;  %v1416_v3 = vld [vmem:[%s1855_s0 + $0xf8] ss:$20 sps:$4 sm:$0xff]  }
  0x17   :  { %v1408_v62 = vld [vmem:[%s1855_s0 + $0xc8] ss:$20 sps:$4 sm:$0xff]   ;;  %v1420_v5 = vld [vmem:[%s1855_s0 + $0x124] ss:$20 sps:$4 sm:$0xff]   ;;  %v1423_v7 = vld [vmem:[%s1855_s0 + $0x120] ss:$20 sps:$4 sm:$0xff]  }
  0x18   :  { %1155 = vmatpush3.bf16.msra.mxu0 %v1359_v22  ;;  %v1411_v0 = vld [vmem:[%s1855_s0 + $0xf4] ss:$20 sps:$4 sm:$0xff]   ;;  %v1418_v4 = vld [vmem:[%s1855_s0 + $0x11c] ss:$20 sps:$4 sm:$0xff]   ;;  %v1422_v6 = vld [vmem:[%s1855_s0 + $0x118] ss:$20 sps:$4 sm:$0xff]  }
  0x19   :  { %1219 = vmatpush3.bf16.msra.mxu1 %v1360_v23  ;;  %1156 = vmatprep.subr.bf16.mxu0 %v1361_v24  ;;  %v1425_v8 = vld [vmem:[%s1855_s0 + $0x10] ss:$20 sps:$4 sm:$0xff]   ;;  %v1427_v10 = vld [vmem:[%s1855_s0 + $0x38] ss:$20 sps:$4 sm:$0xff]   ;;  %v1429_v12 = vld [vmem:[%s1855_s0 + $0x60] ss:$20 sps:$4 sm:$0xff]  }
  0x1a   :  { %1220 = vmatprep.subr.bf16.mxu1 %v1362_v25  ;;  %v1426_v9 = vld [vmem:[%s1855_s0 + $0xb0] ss:$20 sps:$4 sm:$0xff]   ;;  %v1428_v11 = vld [vmem:[%s1855_s0 + $0xd8] ss:$20 sps:$4 sm:$0xff]   ;;  %v1430_v13 = vld [vmem:[%s1855_s0 + $0x100] ss:$20 sps:$4 sm:$0xff]  }
  0x1b   :  { %v1431_v14 = vld [vmem:[%s1855_s0 + $0x88] ss:$20 sps:$4 sm:$0xff]  }
  0x1c   :  { %1157 = vmatpush3.bf16.msra.mxu0 %v1363_v26  ;;  %v1432_v15 = vld [vmem:[%s1855_s0 + $0x128] ss:$20 sps:$4 sm:$0xff]  }
  0x1d   :  { %1221 = vmatpush3.bf16.msra.mxu1 %v1364_v27  ;;  %1158 = vmatprep.subr.bf16.mxu0 %v1365_v28 }
  0x1e   :  { %1222 = vmatprep.subr.bf16.mxu1 %v1366_v29 }
  0x20   :  { %1159 = vmatpush3.bf16.msra.mxu0 %v1367_v30 }
  0x21   :  { %1223 = vmatpush3.bf16.msra.mxu1 %v1368_v31  ;;  %1288 = vmatprep.subr.bf16.mxu0 %v1375_v36 }
  0x22   :  { %1320 = vmatprep.subr.bf16.mxu1 %v1375_v36 }
  0x23   :  { %663 = vmatmul.mubr.bf16.vlgmr.msra.gmra.mrb[0].mxu0 %v1369_v32 }
  0x24   :  { %760 = vmatmul.mubr.bf16.vlgmr.msra.gmra.mrb[0].mxu1 %v1372_v34  ;;  %1289 = vmatpush3.bf16.msra.mxu0 %v1375_v36 }
  0x25   :  { %1328 = vmatpush3.bf16.msra.mxu1 %v1375_v36  ;;  %670 = vmatprep.mubr.bf16.mxu0 %v1376_v37 }
  0x26   :  { %767 = vmatprep.mubr.bf16.mxu1 %v1378_v38  ;;  %1290 = vmatprep.subr.bf16.mxu0 %v1382_v39 }
  0x27   :  { %1321 = vmatprep.subr.bf16.mxu1 %v1382_v39 }
  0x28   :  { %1291 = vmatpush3.bf16.msra.mxu0 %v1382_v39 }
  0x29   :  { %1329 = vmatpush3.bf16.msra.mxu1 %v1382_v39  ;;  %1292 = vmatprep.subr.bf16.mxu0 %v1389_v44 }
  0x2a   :  { %1322 = vmatprep.subr.bf16.mxu1 %v1389_v44 }
  0x2b   :  { %671 = vmatmul.mubr.bf16.gmra.mrb[4].mxu0 %v1380_v40 }
  0x2c   :  { %768 = vmatmul.mubr.bf16.gmra.mrb[4].mxu1 %v1381_v41  ;;  %678 = vmatprep.mubr.bf16.mxu0 %v1383_v42 }
  0x2d   :  { %775 = vmatprep.mubr.bf16.mxu1 %v1385_v43  ;;  %1293 = vmatpush3.bf16.msra.mxu0 %v1389_v44 }
  0x2e   :  { %1330 = vmatpush3.bf16.msra.mxu1 %v1389_v44  ;;  %1294 = vmatprep.subr.bf16.mxu0 %v1396_v45 }
  0x2f   :  { %1323 = vmatprep.subr.bf16.mxu1 %v1396_v45 }
  0x31   :  { %1295 = vmatpush3.bf16.msra.mxu0 %v1396_v45 }
  0x32   :  { %1331 = vmatpush3.bf16.msra.mxu1 %v1396_v45  ;;  %1296 = vmatprep.subr.bf16.mxu0 %v1403_v50 }
  0x33   :  { %679 = vmatmul.mubr.bf16.gmra.mrb[8].mxu0 %v1387_v46  ;;  %1324 = vmatprep.subr.bf16.mxu1 %v1403_v50 }
  0x34   :  { %776 = vmatmul.mubr.bf16.gmra.mrb[8].mxu1 %v1388_v47  ;;  %686 = vmatprep.mubr.bf16.mxu0 %v1390_v48 }
  0x35   :  { %783 = vmatprep.mubr.bf16.mxu1 %v1392_v49  ;;  %1297 = vmatpush3.bf16.msra.mxu0 %v1403_v50 }
  0x36   :  { %1332 = vmatpush3.bf16.msra.mxu1 %v1403_v50  ;;  %1298 = vmatprep.subr.bf16.mxu0 %v1410_v51 }
  0x37   :  { %1325 = vmatprep.subr.bf16.mxu1 %v1410_v51 }
  0x39   :  { %1299 = vmatpush3.bf16.msra.mxu0 %v1410_v51 }
  0x3a   :  { %1333 = vmatpush3.bf16.msra.mxu1 %v1410_v51  ;;  %1300 = vmatprep.subr.bf16.mxu0 %v1417_v55 }
  0x3b   :  { %687 = vmatmul.mubr.bf16.gmra.mrb[12].mxu0 %v1394_v52  ;;  %1326 = vmatprep.subr.bf16.mxu1 %v1417_v55 }
  0x3c   :  { %784 = vmatmul.mubr.bf16.gmra.mrb[12].mxu1 %v1395_v53  ;;  %694 = vmatprep.mubr.bf16.mxu0 %v1397_v54 }
  0x3d   :  { %791 = vmatprep.mubr.bf16.mxu1 %v1399_v56  ;;  %1301 = vmatpush3.bf16.msra.mxu0 %v1417_v55 }
  0x3e   :  { %1334 = vmatpush3.bf16.msra.mxu1 %v1417_v55  ;;  %1302 = vmatprep.subr.bf16.mxu0 %v1424_v57 }
  0x3f   :  { %1327 = vmatprep.subr.bf16.mxu1 %v1424_v57 }
  0x41   :  { %1303 = vmatpush3.bf16.msra.mxu0 %v1424_v57 }
  0x42   :  { %1335 = vmatpush3.bf16.msra.mxu1 %v1424_v57 }
  0x43   :  { %695 = vmatmul.mubr.bf16.gmra.mrb[16].mxu0 %v1401_v58 }
  0x44   :  { %792 = vmatmul.mubr.bf16.gmra.mrb[16].mxu1 %v1402_v59  ;;  %702 = vmatprep.mubr.bf16.mxu0 %v1404_v60 }
  0x45   :  { %799 = vmatprep.mubr.bf16.mxu1 %v1406_v61 }
  0x4b   :  { %703 = vmatmul.mubr.bf16.gmra.mrb[20].mxu0 %v1408_v62 }
  0x4c   :  { %800 = vmatmul.mubr.bf16.gmra.mrb[20].mxu1 %v1409_v63  ;;  %710 = vmatprep.mubr.bf16.mxu0 %v1411_v0 }
  0x4d   :  { %807 = vmatprep.mubr.bf16.mxu1 %v1413_v1 }
  0x53   :  { %711 = vmatmul.mubr.bf16.gmra.mrb[24].mxu0 %v1415_v2 }
  0x54   :  { %808 = vmatmul.mubr.bf16.gmra.mrb[24].mxu1 %v1416_v3  ;;  %718 = vmatprep.mubr.bf16.mxu0 %v1418_v4 }
  0x55   :  { %815 = vmatprep.mubr.bf16.mxu1 %v1420_v5 }
  0x5b   :  { %719 = vmatmul.mubr.bf16.gmra.mrb[28].mxu0 %v1422_v6 }
  0x5c   :  { %816 = vmatmul.mubr.bf16.gmra.mrb[28].mxu1 %v1423_v7  ;;  %1304 = vmatprep.mubr.bf16.mxu0 %v1425_v8 }
  0x5d   :  { %1312 = vmatprep.mubr.bf16.mxu1 %v1426_v9 }
  0x63   :  { %1305 = vmatmul.mubr.bf16.vlgmr.msra.gmra.mrb[32].mxu0 %v1427_v10 }
  0x64   :  { %1313 = vmatmul.mubr.bf16.vlgmr.msra.gmra.mrb[32].mxu1 %v1428_v11  ;;  %1308 = vmatprep.mubr.bf16.mxu0 %v1429_v12 }
  0x65   :  { %1316 = vmatprep.mubr.bf16.mxu1 %v1430_v13 }
  0x6b   :  { %1309 = vmatmul.mubr.bf16.gmra.mrb[36].mxu0 %v1431_v14 }
  0x6c   :  { %1317 = vmatmul.mubr.bf16.gmra.mrb[36].mxu1 %v1432_v15 }
  0xf6   :  { %v1160_v16 = vpop.f32.mrb[0].mxu0 }
  0xf7   :  { %v1224_v17 = vpop.f32.mrb[0].mxu1  ;;  %v1161_v18 = vpop.f32.mrb[1].mxu0 }
  0xf8   :  { %v1162_v19 = vadd.f32 %v1161_v18, %v1160_v16  ;;  %v1225_v20 = vpop.f32.mrb[1].mxu1  ;;  %v1163_v21 = vpop.f32.mrb[2].mxu0 }
  0xf9   :  { %v1226_v22 = vadd.f32 %v1225_v20, %v1224_v17  ;;  %v1227_v23 = vpop.f32.mrb[2].mxu1  ;;  %v1164_v24 = vpop.f32.mrb[3].mxu0 }
  0xfa   :  { %v1165_v25 = vadd.f32 %v1164_v24, %v1163_v21  ;;  %v1228_v26 = vpop.f32.mrb[3].mxu1 }
  0xfb   :  { %v1229_v27 = vadd.f32 %v1228_v26, %v1227_v23  ;;  %v1698_v28 = vadd.f32 %v1226_v22, %v1162_v19 }
  0xfd   :  { %v1700_v29 = vadd.f32 %v1229_v27, %v1165_v25 }
  0xfe   :  { %v1166_v30 = vpop.f32.mrb[4].mxu0 }
  0xff   :  { %v1230_v31 = vpop.f32.mrb[4].mxu1  ;;  %v1167_v32 = vpop.f32.mrb[5].mxu0 }
 0x100   :  { %v1168_v33 = vadd.f32 %v1167_v32, %v1166_v30  ;;  %v1231_v34 = vpop.f32.mrb[5].mxu1  ;;  %v1169_v35 = vpop.f32.mrb[6].mxu0 }
 0x101   :  { %v1232_v36 = vadd.f32 %v1231_v34, %v1230_v31  ;;  %v1233_v37 = vpop.f32.mrb[6].mxu1  ;;  %v1170_v38 = vpop.f32.mrb[7].mxu0 }
 0x102   :  { %v1171_v39 = vadd.f32 %v1170_v38, %v1169_v35  ;;  %v1234_v40 = vpop.f32.mrb[7].mxu1 }
 0x103   :  { %v1235_v41 = vadd.f32 %v1234_v40, %v1233_v37  ;;  %v1702_v42 = vadd.f32 %v1232_v36, %v1168_v33 }
 0x105   :  { %v1704_v43 = vadd.f32 %v1235_v41, %v1171_v39 }
 0x106   :  { %v1172_v44 = vpop.f32.mrb[8].mxu0 }
 0x107   :  { %v1236_v45 = vpop.f32.mrb[8].mxu1  ;;  %v1173_v46 = vpop.f32.mrb[9].mxu0 }
 0x108   :  { %v1174_v47 = vadd.f32 %v1173_v46, %v1172_v44  ;;  %v1237_v48 = vpop.f32.mrb[9].mxu1  ;;  %v1175_v49 = vpop.f32.mrb[10].mxu0 }
 0x109   :  { %v1238_v50 = vadd.f32 %v1237_v48, %v1236_v45  ;;  %v1239_v51 = vpop.f32.mrb[10].mxu1  ;;  %v1176_v52 = vpop.f32.mrb[11].mxu0 }
 0x10a   :  { %v1177_v53 = vadd.f32 %v1176_v52, %v1175_v49  ;;  %v1240_v54 = vpop.f32.mrb[11].mxu1 }
 0x10b   :  { %v1241_v55 = vadd.f32 %v1240_v54, %v1239_v51  ;;  %v1706_v56 = vadd.f32 %v1238_v50, %v1174_v47 }
 0x10d   :  { %v1708_v57 = vadd.f32 %v1241_v55, %v1177_v53 }
 0x10e   :  { %v1178_v58 = vpop.f32.mrb[12].mxu0 }
 0x10f   :  { %v1242_v59 = vpop.f32.mrb[12].mxu1  ;;  %v1179_v60 = vpop.f32.mrb[13].mxu0 }
 0x110   :  { %v1180_v61 = vadd.f32 %v1179_v60, %v1178_v58  ;;  %v1243_v62 = vpop.f32.mrb[13].mxu1  ;;  %v1181_v63 = vpop.f32.mrb[14].mxu0 }
 0x111   :  { %v1244_v0 = vadd.f32 %v1243_v62, %v1242_v59  ;;  %v1245_v1 = vpop.f32.mrb[14].mxu1  ;;  %v1182_v2 = vpop.f32.mrb[15].mxu0 }
 0x112   :  { %v1183_v3 = vadd.f32 %v1182_v2, %v1181_v63  ;;  %v1246_v4 = vpop.f32.mrb[15].mxu1 }
 0x113   :  { %v1247_v5 = vadd.f32 %v1246_v4, %v1245_v1  ;;  %v1710_v6 = vadd.f32 %v1244_v0, %v1180_v61 }
 0x115   :  { %v1712_v7 = vadd.f32 %v1247_v5, %v1183_v3 }
 0x116   :  { %v1184_v8 = vpop.f32.mrb[16].mxu0 }
 0x117   :  { %v1248_v9 = vpop.f32.mrb[16].mxu1  ;;  %v1185_v10 = vpop.f32.mrb[17].mxu0 }
 0x118   :  { %v1186_v11 = vadd.f32 %v1185_v10, %v1184_v8  ;;  %v1249_v12 = vpop.f32.mrb[17].mxu1  ;;  %v1187_v13 = vpop.f32.mrb[18].mxu0 }
 0x119   :  { %v1250_v14 = vadd.f32 %v1249_v12, %v1248_v9  ;;  %v1251_v15 = vpop.f32.mrb[18].mxu1  ;;  %v1188_v16 = vpop.f32.mrb[19].mxu0  ;;  %v1728_v12 = vld [vmem:[%s1856_s2] ss:$0 sm:$0xff] }
 0x11a   :  { %v1189_v17 = vadd.f32 %v1188_v16, %v1187_v13  ;;  %v1252_v18 = vpop.f32.mrb[19].mxu1 }
 0x11b   :  { %v1253_v19 = vadd.f32 %v1252_v18, %v1251_v15  ;;  %v794_v20 = vadd.f32 %v1250_v14, %v1186_v11 }
 0x11d   :  { %v1714_v21 = vadd.f32 %v1253_v19, %v1189_v17 }
 0x11e   :  { %v1190_v22 = vpop.f32.mrb[20].mxu0 }
 0x11f   :  { %v1254_v23 = vpop.f32.mrb[20].mxu1  ;;  %v1191_v24 = vpop.f32.mrb[21].mxu0 }
 0x120   :  { %v1192_v25 = vadd.f32 %v1191_v24, %v1190_v22  ;;  %v1255_v26 = vpop.f32.mrb[21].mxu1  ;;  %v1193_v27 = vpop.f32.mrb[22].mxu0 }
 0x121   :  { %v1256_v30 = vadd.f32 %v1255_v26, %v1254_v23  ;;  %v1257_v31 = vpop.f32.mrb[22].mxu1  ;;  %v1194_v32 = vpop.f32.mrb[23].mxu0 }
 0x122   :  { %v1195_v33 = vadd.f32 %v1194_v32, %v1193_v27  ;;  %v1258_v34 = vpop.f32.mrb[23].mxu1 }
 0x123   :  { %v1259_v35 = vadd.f32 %v1258_v34, %v1257_v31  ;;  %v802_v36 = vadd.f32 %v1256_v30, %v1192_v25  ;;  %v998_v31 = vld [vmem:[%s1857_s3 + $0x18] sm:$0xff] }
 0x125   :  { %v805_v37 = vadd.f32 %v1259_v35, %v1195_v33  ;;  %v996_v35 = vld [vmem:[%s1857_s3 + $0x8] sm:$0xff] }
 0x126   :  { %v1196_v38 = vpop.f32.mrb[24].mxu0 }
 0x127   :  { %v1260_v39 = vpop.f32.mrb[24].mxu1  ;;  %v1197_v40 = vpop.f32.mrb[25].mxu0 }
 0x128   :  { %v1198_v41 = vadd.f32 %v1197_v40, %v1196_v38  ;;  %v1261_v44 = vpop.f32.mrb[25].mxu1  ;;  %v1199_v45 = vpop.f32.mrb[26].mxu0  ;;  %v1004_v40 = vld [vmem:[%s1857_s3 + $0x48] sm:$0xff] }
 0x129   :  { %v1262_v46 = vadd.f32 %v1261_v44, %v1260_v39  ;;  %v1263_v47 = vpop.f32.mrb[26].mxu1  ;;  %v1200_v48 = vpop.f32.mrb[27].mxu0 }
 0x12a   :  { %v1201_v49 = vadd.f32 %v1200_v48, %v1199_v45  ;;  %v1264_v50 = vpop.f32.mrb[27].mxu1 }
 0x12b   :  { %v1265_v51 = vadd.f32 %v1264_v50, %v1263_v47  ;;  %v1716_v52 = vadd.f32 %v1262_v46, %v1198_v41 }
 0x12d   :  { %v1718_v53 = vadd.f32 %v1265_v51, %v1201_v49 }
 0x12e   :  { %v1202_v54 = vpop.f32.mrb[28].mxu0 }
 0x12f   :  { %v1266_v55 = vpop.f32.mrb[28].mxu1  ;;  %v1203_v58 = vpop.f32.mrb[29].mxu0 }
 0x130   :  { %v1204_v59 = vadd.f32 %v1203_v58, %v1202_v54  ;;  %v1267_v60 = vpop.f32.mrb[29].mxu1  ;;  %v1205_v61 = vpop.f32.mrb[30].mxu0 }
 0x131   :  { %v1268_v62 = vadd.f32 %v1267_v60, %v1266_v55  ;;  %v1269_v63 = vpop.f32.mrb[30].mxu1  ;;  %v1206_v0 = vpop.f32.mrb[31].mxu0 }
 0x132   :  { %v1207_v1 = vadd.f32 %v1206_v0, %v1205_v61  ;;  %v1270_v2 = vpop.f32.mrb[31].mxu1 }
 0x133   :  { %v1271_v3 = vadd.f32 %v1270_v2, %v1269_v63  ;;  %v1720_v4 = vadd.f32 %v1268_v62, %v1204_v59 }
 0x135   :  { %v1722_v5 = vadd.f32 %v1271_v3, %v1207_v1 }
 0x136   :  { %v1306_v8 = vpop.f32.mrb[32].mxu0 }
 0x137   :  { %v867_v9 = vadd.f32 %v1306_v8, %v1702_v42  ;;  %v1314_v10 = vpop.f32.mrb[32].mxu1  ;;  %v858_v11 = vpop.f32.mrb[33].mxu0  ;;  %v997_v42 = vld [vmem:[%s1857_s3 + $0x10] sm:$0xff] }
 0x138   :  { %v899_v13 = vadd.f32 %v1314_v10, %v802_v36  ;;  %v859_v14 = vadd.f32 %v858_v11, %v1698_v28  ;;  %v890_v15 = vpop.f32.mrb[33].mxu1  ;;  %v1307_v16 = vpop.f32.mrb[34].mxu0  ;;  %v1005_v28 = vld [vmem:[%s1857_s3 + $0x50] sm:$0xff] }
 0x139   :  { %v891_v17 = vadd.f32 %v890_v15, %v794_v20  ;;  %v870_v18 = vadd.f32 %v1307_v16, %v1704_v43  ;;  %v1315_v19 = vpop.f32.mrb[34].mxu1  ;;  %v861_v22 = vpop.f32.mrb[35].mxu0  ;;  %v981_v26 = vadd.f32 %v1728_v12, %v867_v9  ;;  %v995_v43 = vld [vmem:[%s1857_s3] sm:$0xff] }
 0x13a   :  { %v902_v23 = vadd.f32 %v1315_v19, %v805_v37  ;;  %v862_v24 = vadd.f32 %v861_v22, %v1700_v29  ;;  %v893_v25 = vpop.f32.mrb[35].mxu1  ;;  %v989_v27 = vadd.f32 %v1728_v12, %v899_v13  ;;  %v979_v30 = vadd.f32 %v1728_v12, %v859_v14  ;;  %v1003_v29 = vld [vmem:[%s1857_s3 + $0x40] sm:$0xff] }
 0x13b   :  { %v894_v20 = vadd.f32 %v893_v25, %v1714_v21  ;;  %v1013_v32 = vadd.f32 %v997_v42, %v981_v26  ;;  %v987_v33 = vadd.f32 %v1728_v12, %v891_v17  ;;  %v982_v34 = vadd.f32 %v1728_v12, %v870_v18  ;;  %v1006_v21 = vld [vmem:[%s1857_s3 + $0x58] sm:$0xff]  ;;  %v999_v15 = vld [vmem:[%s1857_s3 + $0x20] sm:$0xff] }
 0x13c   :  { %v1021_v36 = vadd.f32 %v1005_v28, %v989_v27  ;;  %v1011_v37 = vadd.f32 %v995_v43, %v979_v30  ;;  %v990_v38 = vadd.f32 %v1728_v12, %v902_v23  ;;  %v980_v39 = vadd.f32 %v1728_v12, %v862_v24  ;;  %v1007_v17 = vld [vmem:[%s1857_s3 + $0x60] sm:$0xff]  ;;  %v1002_v18 = vld [vmem:[%s1857_s3 + $0x38] sm:$0xff]  ;;  %v1000_v23 = vld [vmem:[%s1857_s3 + $0x28] sm:$0xff] }
 0x13d   :  { %v1029_v44 = vmax.f32 %v1013_v32, 0.0  ;;  %v1019_v45 = vadd.f32 %v1003_v29, %v987_v33  ;;  %v1014_v46 = vadd.f32 %v998_v31, %v982_v34  ;;  %v988_v47 = vadd.f32 %v1728_v12, %v894_v20  ;;  %v1008_v43 = vld [vmem:[%s1857_s3 + $0x68] sm:$0xff] }
 0x13e   :  { %v1310_v41 = vpop.f32.mrb[36].mxu0  ;;  %v1037_v50 = vmax.f32 %v1021_v36, 0.0  ;;  %v1027_v51 = vmax.f32 %v1011_v37, 0.0  ;;  %v1022_v54 = vadd.f32 %v1006_v21, %v990_v38  ;;  %v1012_v55 = vadd.f32 %v996_v35, %v980_v39 }
 0x13f   :  { %v1318_v48 = vpop.f32.mrb[36].mxu1  ;;  %v874_v49 = vpop.f32.mrb[37].mxu0  ;;  %1045 = vst [vmem:[%s1858_s4 + $0x10] sm:$0xff] %v1029_v44  ;;  %v1035_v60 = vmax.f32 %v1019_v45, 0.0  ;;  %v1030_v61 = vmax.f32 %v1014_v46, 0.0  ;;  %v1020_v62 = vadd.f32 %v1004_v40, %v988_v47  ;;  %v883_v63 = vadd.f32 %v1310_v41, %v1710_v6 }
 0x140   :  { %v906_v58 = vpop.f32.mrb[37].mxu1  ;;  %v1311_v59 = vpop.f32.mrb[38].mxu0  ;;  %1053 = vst [vmem:[%s1858_s4 + $0x50] sm:$0xff] %v1037_v50  ;;  %1043 = vst [vmem:[%s1858_s4] sm:$0xff] %v1027_v51  ;;  %v1038_v2 = vmax.f32 %v1022_v54, 0.0  ;;  %v1028_v3 = vmax.f32 %v1012_v55, 0.0  ;;  %v915_v8 = vadd.f32 %v1318_v48, %v1720_v4  ;;  %v875_v9 = vadd.f32 %v874_v49, %v1706_v56  ;;  %v1001_v56 = vld [vmem:[%s1857_s3 + $0x30] sm:$0xff] }
 0x141   :  { %v1319_v0 = vpop.f32.mrb[38].mxu1  ;;  %v877_v1 = vpop.f32.mrb[39].mxu0  ;;  %1051 = vst [vmem:[%s1858_s4 + $0x40] sm:$0xff] %v1035_v60  ;;  %1046 = vst [vmem:[%s1858_s4 + $0x18] sm:$0xff] %v1030_v61  ;;  %v1036_v6 = vmax.f32 %v1020_v62, 0.0  ;;  %v907_v11 = vadd.f32 %v906_v58, %v1716_v52  ;;  %v886_v13 = vadd.f32 %v1311_v59, %v1712_v7  ;;  %v985_v7 = vadd.f32 %v1728_v12, %v883_v63  ;;  %v1009_v52 = vld [vmem:[%s1857_s3 + $0x70] sm:$0xff] }
 0x142   :  { %v909_v10 = vpop.f32.mrb[39].mxu1  ;;  %1054 = vst [vmem:[%s1858_s4 + $0x58] sm:$0xff] %v1038_v2  ;;  %1044 = vst [vmem:[%s1858_s4 + $0x8] sm:$0xff] %v1028_v3  ;;  %v918_v4 = vadd.f32 %v1319_v0, %v1722_v5  ;;  %v878_v14 = vadd.f32 %v877_v1, %v1708_v57  ;;  %v993_v5 = vadd.f32 %v1728_v12, %v915_v8 }
 0x143   :  { %1052 = vst [vmem:[%s1858_s4 + $0x48] sm:$0xff] %v1036_v6  ;;  %v910_v16 = vadd.f32 %v909_v10, %v1718_v53  ;;  %v983_v57 = vadd.f32 %v1728_v12, %v875_v9  ;;  %v1017_v19 = vadd.f32 %v1001_v56, %v985_v7  ;;  %v991_v22 = vadd.f32 %v1728_v12, %v907_v11  ;;  %v1010_v53 = vld [vmem:[%s1857_s3 + $0x78] sm:$0xff] }
 0x144   :  { %v986_v42 = vadd.f32 %v1728_v12, %v886_v13  ;;  %v1025_v24 = vadd.f32 %v1009_v52, %v993_v5  ;;  %v994_v26 = vadd.f32 %v1728_v12, %v918_v4  ;;  %v984_v28 = vadd.f32 %v1728_v12, %v878_v14 }
 0x145   :  { %v1015_v25 = vadd.f32 %v999_v15, %v983_v57  ;;  %v1033_v20 = vmax.f32 %v1017_v19, 0.0  ;;  %v1023_v27 = vadd.f32 %v1007_v17, %v991_v22  ;;  %v992_v29 = vadd.f32 %v1728_v12, %v910_v16 }
 0x146   :  { %v1018_v30 = vadd.f32 %v1002_v18, %v986_v42  ;;  %v1041_v31 = vmax.f32 %v1025_v24, 0.0  ;;  %v1026_v33 = vadd.f32 %v1010_v53, %v994_v26  ;;  %v1016_v34 = vadd.f32 %v1000_v23, %v984_v28 }
 0x147   :  { %v1031_v32 = vmax.f32 %v1015_v25, 0.0  ;;  %1049 = vst [vmem:[%s1858_s4 + $0x30] sm:$0xff] %v1033_v20  ;;  %v1039_v21 = vmax.f32 %v1023_v27, 0.0  ;;  %v1024_v36 = vadd.f32 %v1008_v43, %v992_v29 }
 0x148   :  { %v1034_v35 = vmax.f32 %v1018_v30, 0.0  ;;  %1057 = vst [vmem:[%s1858_s4 + $0x70] sm:$0xff] %v1041_v31  ;;  %v1042_v12 = vmax.f32 %v1026_v33, 0.0  ;;  %v1032_v37 = vmax.f32 %v1016_v34, 0.0 }
 0x149   :  { %1047 = vst [vmem:[%s1858_s4 + $0x20] sm:$0xff] %v1031_v32  ;;  %1055 = vst [vmem:[%s1858_s4 + $0x60] sm:$0xff] %v1039_v21  ;;  %v1040_v38 = vmax.f32 %v1024_v36, 0.0 }
 0x14a   :  { %1050 = vst [vmem:[%s1858_s4 + $0x38] sm:$0xff] %v1034_v35  ;;  %1058 = vst [vmem:[%s1858_s4 + $0x78] sm:$0xff] %v1042_v12 }
 0x14b   :  { %1048 = vst [vmem:[%s1858_s4 + $0x28] sm:$0xff] %v1032_v37  ;;  %1056 = vst [vmem:[%s1858_s4 + $0x68] sm:$0xff] %v1040_v38 }

// kernel: resnet34_forward.47
= control target key start
LH: loop header
LB: loop body
LE: loop exit
PB: predicated region body
PF: predicated region fallthrough
CT: control target
= control target key end

     0   :  { %s973_s1 = inlined_call_operand.vmem [shape: bf16[640,128], index: 1, kind: input, shape index: {}]   ;;  %s974_s0 = inlined_call_operand.vmem [shape: bf16[32,640], index: 0, kind: input, shape index: {}]   ;;  %s975_s2 = inlined_call_operand.vmem [shape: f32[1,128], index: 2, kind: input, shape index: {}]   ;;  %s976_s3 = inlined_call_operand.vmem [shape: f32[32,128], index: 3, kind: output, shape index: {}]  }
   0x1   :  { %v734_v0 = vld [vmem:[%s973_s1 + $0x40] sm:$0xff]   ;;  %v738_v4 = vld [vmem:[%s973_s1 + $0x48] sm:$0xff]   ;;  %v742_v8 = vld [vmem:[%s973_s1 + $0x50] sm:$0xff]  }
   0x2   :  { %v735_v1 = vld [vmem:[%s973_s1 + $0xc0] sm:$0xff]   ;;  %647 = vmatprep.subr.bf16.mxu0 %v734_v0  ;;  %v739_v5 = vld [vmem:[%s973_s1 + $0xc8] sm:$0xff]   ;;  %v743_v9 = vld [vmem:[%s973_s1 + $0xd0] sm:$0xff]  }
   0x3   :  { %v736_v2 = vld [vmem:[%s973_s1] sm:$0xff]   ;;  %675 = vmatprep.subr.bf16.mxu1 %v735_v1  ;;  %v740_v6 = vld [vmem:[%s973_s1 + $0x8] sm:$0xff]   ;;  %v744_v10 = vld [vmem:[%s973_s1 + $0x10] sm:$0xff]  }
   0x4   :  { %v737_v3 = vld [vmem:[%s973_s1 + $0x80] sm:$0xff]   ;;  %648 = vmatpush3.bf16.msra.mxu0 %v736_v2  ;;  %v741_v7 = vld [vmem:[%s973_s1 + $0x88] sm:$0xff]   ;;  %v745_v11 = vld [vmem:[%s973_s1 + $0x90] sm:$0xff]  }
   0x5   :  { %676 = vmatpush3.bf16.msra.mxu1 %v737_v3  ;;  %649 = vmatprep.subr.bf16.mxu0 %v738_v4  ;;  %v746_v12 = vld [vmem:[%s973_s1 + $0x58] sm:$0xff]   ;;  %v750_v16 = vld [vmem:[%s973_s1 + $0x60] sm:$0xff]   ;;  %v754_v20 = vld [vmem:[%s973_s1 + $0x68] sm:$0xff]  }
   0x6   :  { %677 = vmatprep.subr.bf16.mxu1 %v739_v5  ;;  %v747_v13 = vld [vmem:[%s973_s1 + $0xd8] sm:$0xff]   ;;  %v751_v17 = vld [vmem:[%s973_s1 + $0xe0] sm:$0xff]   ;;  %v755_v21 = vld [vmem:[%s973_s1 + $0xe8] sm:$0xff]  }
   0x7   :  { %v748_v14 = vld [vmem:[%s973_s1 + $0x18] sm:$0xff]   ;;  %v752_v18 = vld [vmem:[%s973_s1 + $0x20] sm:$0xff]   ;;  %v756_v22 = vld [vmem:[%s973_s1 + $0x28] sm:$0xff]  }
   0x8   :  { %650 = vmatpush3.bf16.msra.mxu0 %v740_v6  ;;  %v749_v15 = vld [vmem:[%s973_s1 + $0x98] sm:$0xff]   ;;  %v753_v19 = vld [vmem:[%s973_s1 + $0xa0] sm:$0xff]   ;;  %v757_v23 = vld [vmem:[%s973_s1 + $0xa8] sm:$0xff]  }
   0x9   :  { %678 = vmatpush3.bf16.msra.mxu1 %v741_v7  ;;  %651 = vmatprep.subr.bf16.mxu0 %v742_v8  ;;  %v758_v24 = vld [vmem:[%s973_s1 + $0x70] sm:$0xff]   ;;  %v762_v28 = vld [vmem:[%s973_s1 + $0x78] sm:$0xff]   ;;  %v771_v35 = vld [vmem:[%s974_s0 + $0xc] ss:$20 sps:$4 sm:$0xff]  }
   0xa   :  { %679 = vmatprep.subr.bf16.mxu1 %v743_v9  ;;  %v759_v25 = vld [vmem:[%s973_s1 + $0xf0] sm:$0xff]   ;;  %v763_v29 = vld [vmem:[%s973_s1 + $0xf8] sm:$0xff]   ;;  %v772_v36 = vld [vmem:[%s973_s1 + $0x100] sm:$0xff]   ;;  %492 = vmatprep.mubr.bf16.mxu1 %v771_v35 }
   0xb   :  { %v760_v26 = vld [vmem:[%s973_s1 + $0x30] sm:$0xff]   ;;  %v764_v30 = vld [vmem:[%s973_s1 + $0x38] sm:$0xff]   ;;  %v773_v37 = vld [vmem:[%s973_s1 + $0x108] sm:$0xff]  }
   0xc   :  { %652 = vmatpush3.bf16.msra.mxu0 %v744_v10  ;;  %v761_v27 = vld [vmem:[%s973_s1 + $0xb0] sm:$0xff]   ;;  %v765_v31 = vld [vmem:[%s973_s1 + $0xb8] sm:$0xff]   ;;  %v777_v39 = vld [vmem:[%s974_s0 + $0x2c] ss:$20 sps:$4 sm:$0xff]  }
   0xd   :  { %680 = vmatpush3.bf16.msra.mxu1 %v745_v11  ;;  %653 = vmatprep.subr.bf16.mxu0 %v746_v12  ;;  %v766_v32 = vld [vmem:[%s974_s0] ss:$20 sps:$4 sm:$0xff]   ;;  %v768_v33 = vld [vmem:[%s974_s0 + $0x4] ss:$20 sps:$4 sm:$0xff]   ;;  %v769_v34 = vld [vmem:[%s974_s0 + $0x8] ss:$20 sps:$4 sm:$0xff]  }
   0xe   :  { %681 = vmatprep.subr.bf16.mxu1 %v747_v13  ;;  %443 = vmatprep.mubr.bf16.mxu0 %v768_v33  ;;  %v774_v38 = vld [vmem:[%s973_s1 + $0x110] sm:$0xff]   ;;  %v775_v41 = vld [vmem:[%s973_s1 + $0x118] sm:$0xff]   ;;  %v776_v45 = vld [vmem:[%s973_s1 + $0x120] sm:$0xff]  }
   0xf   :  { %v779_v40 = vld [vmem:[%s974_s0 + $0x34] ss:$20 sps:$4 sm:$0xff]   ;;  %v783_v43 = vld [vmem:[%s974_s0 + $0x30] ss:$20 sps:$4 sm:$0xff]   ;;  %v785_v48 = vld [vmem:[%s973_s1 + $0x138] sm:$0xff]  }
  0x10   :  { %654 = vmatpush3.bf16.msra.mxu0 %v748_v14  ;;  %v782_v42 = vld [vmem:[%s974_s0 + $0x28] ss:$20 sps:$4 sm:$0xff]   ;;  %v786_v44 = vld [vmem:[%s974_s0 + $0x10] ss:$20 sps:$4 sm:$0xff]   ;;  %v787_v49 = vld [vmem:[%s974_s0 + $0x38] ss:$20 sps:$4 sm:$0xff]  }
  0x11   :  { %682 = vmatpush3.bf16.msra.mxu1 %v749_v15  ;;  %655 = vmatprep.subr.bf16.mxu0 %v750_v16  ;;  %v781_v46 = vld [vmem:[%s973_s1 + $0x128] sm:$0xff]   ;;  %v784_v47 = vld [vmem:[%s973_s1 + $0x130] sm:$0xff]  }
  0x12   :  { %683 = vmatprep.subr.bf16.mxu1 %v751_v17  ;;  %v646_v17 = vld [vmem:[%s975_s2] ss:$0 sm:$0xff] }
  0x14   :  { %656 = vmatpush3.bf16.msra.mxu0 %v752_v18 }
  0x15   :  { %684 = vmatpush3.bf16.msra.mxu1 %v753_v19  ;;  %657 = vmatprep.subr.bf16.mxu0 %v754_v20 }
  0x16   :  { %685 = vmatprep.subr.bf16.mxu1 %v755_v21 }
  0x18   :  { %658 = vmatpush3.bf16.msra.mxu0 %v756_v22 }
  0x19   :  { %686 = vmatpush3.bf16.msra.mxu1 %v757_v23  ;;  %659 = vmatprep.subr.bf16.mxu0 %v758_v24 }
  0x1a   :  { %687 = vmatprep.subr.bf16.mxu1 %v759_v25 }
  0x1c   :  { %660 = vmatpush3.bf16.msra.mxu0 %v760_v26 }
  0x1d   :  { %688 = vmatpush3.bf16.msra.mxu1 %v761_v27  ;;  %661 = vmatprep.subr.bf16.mxu0 %v762_v28 }
  0x1e   :  { %689 = vmatprep.subr.bf16.mxu1 %v763_v29 }
  0x20   :  { %662 = vmatpush3.bf16.msra.mxu0 %v764_v30 }
  0x21   :  { %690 = vmatpush3.bf16.msra.mxu1 %v765_v31  ;;  %713 = vmatprep.subr.bf16.mxu0 %v772_v36 }
  0x23   :  { %444 = vmatmul.mubr.bf16.vlgmr.msra.gmra.mrb[0].mxu0 %v766_v32 }
  0x24   :  { %493 = vmatmul.mubr.bf16.vlgmr.msra.gmra.mrb[0].mxu1 %v769_v34  ;;  %714 = vmatpush3.bf16.msra.mxu0 %v772_v36 }
  0x25   :  { %715 = vmatprep.subr.bf16.mxu0 %v773_v37  ;;  %451 = vmatprep.mubr.bf16.mxu0 %v777_v39 }
  0x26   :  { %500 = vmatprep.mubr.bf16.mxu1 %v779_v40 }
  0x28   :  { %716 = vmatpush3.bf16.msra.mxu0 %v773_v37 }
  0x29   :  { %717 = vmatprep.subr.bf16.mxu0 %v774_v38 }
  0x2b   :  { %452 = vmatmul.mubr.bf16.gmra.mrb[4].mxu0 %v782_v42 }
  0x2c   :  { %501 = vmatmul.mubr.bf16.gmra.mrb[4].mxu1 %v783_v43  ;;  %718 = vmatpush3.bf16.msra.mxu0 %v774_v38 }
  0x2d   :  { %719 = vmatprep.subr.bf16.mxu0 %v775_v41  ;;  %729 = vmatprep.mubr.bf16.mxu0 %v786_v44 }
  0x30   :  { %720 = vmatpush3.bf16.msra.mxu0 %v775_v41 }
  0x31   :  { %721 = vmatprep.subr.bf16.mxu0 %v776_v45 }
  0x34   :  { %722 = vmatpush3.bf16.msra.mxu0 %v776_v45 }
  0x35   :  { %723 = vmatprep.subr.bf16.mxu0 %v781_v46 }
  0x38   :  { %724 = vmatpush3.bf16.msra.mxu0 %v781_v46 }
  0x39   :  { %725 = vmatprep.subr.bf16.mxu0 %v784_v47 }
  0x3c   :  { %726 = vmatpush3.bf16.msra.mxu0 %v784_v47 }
  0x3d   :  { %727 = vmatprep.subr.bf16.mxu0 %v785_v48 }
  0x40   :  { %728 = vmatpush3.bf16.msra.mxu0 %v785_v48 }
  0x43   :  { %730 = vmatmul.mubr.bf16.vlgmr.msra.gmra.mrb[8].mxu0 %v787_v49 }
  0xf6   :  { %v663_v50 = vpop.f32.mrb[0].mxu0 }
  0xf7   :  { %v691_v51 = vpop.f32.mrb[0].mxu1  ;;  %v664_v52 = vpop.f32.mrb[1].mxu0 }
  0xf8   :  { %v665_v53 = vadd.f32 %v664_v52, %v663_v50  ;;  %v692_v54 = vpop.f32.mrb[1].mxu1  ;;  %v666_v55 = vpop.f32.mrb[2].mxu0 }
  0xf9   :  { %v693_v56 = vadd.f32 %v692_v54, %v691_v51  ;;  %v694_v57 = vpop.f32.mrb[2].mxu1  ;;  %v667_v58 = vpop.f32.mrb[3].mxu0 }
  0xfa   :  { %v668_v59 = vadd.f32 %v667_v58, %v666_v55  ;;  %v695_v60 = vpop.f32.mrb[3].mxu1 }
  0xfb   :  { %v696_v61 = vadd.f32 %v695_v60, %v694_v57  ;;  %v495_v62 = vadd.f32 %v693_v56, %v665_v53 }
  0xfd   :  { %v498_v63 = vadd.f32 %v696_v61, %v668_v59 }
  0xfe   :  { %v669_v0 = vpop.f32.mrb[4].mxu0 }
  0xff   :  { %v697_v1 = vpop.f32.mrb[4].mxu1  ;;  %v670_v2 = vpop.f32.mrb[5].mxu0 }
 0x100   :  { %v671_v3 = vadd.f32 %v670_v2, %v669_v0  ;;  %v698_v4 = vpop.f32.mrb[5].mxu1  ;;  %v672_v5 = vpop.f32.mrb[6].mxu0 }
 0x101   :  { %v699_v6 = vadd.f32 %v698_v4, %v697_v1  ;;  %v700_v7 = vpop.f32.mrb[6].mxu1  ;;  %v673_v8 = vpop.f32.mrb[7].mxu0 }
 0x102   :  { %v674_v9 = vadd.f32 %v673_v8, %v672_v5  ;;  %v701_v10 = vpop.f32.mrb[7].mxu1 }
 0x103   :  { %v702_v11 = vadd.f32 %v701_v10, %v700_v7  ;;  %v503_v12 = vadd.f32 %v699_v6, %v671_v3 }
 0x105   :  { %v506_v13 = vadd.f32 %v702_v11, %v674_v9 }
 0x116   :  { %v731_v14 = vpop.f32.mrb[8].mxu0 }
 0x117   :  { %v552_v15 = vadd.f32 %v731_v14, %v503_v12  ;;  %v543_v16 = vpop.f32.mrb[9].mxu0 }
 0x118   :  { %v544_v18 = vadd.f32 %v543_v16, %v495_v62  ;;  %v732_v19 = vpop.f32.mrb[10].mxu0 }
 0x119   :  { %v555_v20 = vadd.f32 %v732_v19, %v506_v13  ;;  %v546_v21 = vpop.f32.mrb[11].mxu0  ;;  %v582_v23 = vadd.f32 %v646_v17, %v552_v15 }
 0x11a   :  { %v547_v22 = vadd.f32 %v546_v21, %v498_v63  ;;  %v580_v24 = vadd.f32 %v646_v17, %v544_v18 }
 0x11b   :  { %v586_v25 = vmax.f32 %v582_v23, 0.0  ;;  %v583_v26 = vadd.f32 %v646_v17, %v555_v20 }
 0x11c   :  { %v584_v27 = vmax.f32 %v580_v24, 0.0  ;;  %v581_v28 = vadd.f32 %v646_v17, %v547_v22 }
 0x11d   :  { %590 = vst [vmem:[%s976_s3 + $0x10] sm:$0xff] %v586_v25  ;;  %v587_v29 = vmax.f32 %v583_v26, 0.0 }
 0x11e   :  { %588 = vst [vmem:[%s976_s3] sm:$0xff] %v584_v27  ;;  %v585_v30 = vmax.f32 %v581_v28, 0.0 }
 0x11f   :  { %591 = vst [vmem:[%s976_s3 + $0x18] sm:$0xff] %v587_v29 }
 0x120   :  { %589 = vst [vmem:[%s976_s3 + $0x8] sm:$0xff] %v585_v30 }

// kernel: resnet34_forward.48
= control target key start
LH: loop header
LB: loop body
LE: loop exit
PB: predicated region body
PF: predicated region fallthrough
CT: control target
= control target key end

     0   :  { %s307_s1 = inlined_call_operand.vmem [shape: bf16[128,128], index: 1, kind: input, shape index: {}]   ;;  %s308_s0 = inlined_call_operand.vmem [shape: bf16[32,128], index: 0, kind: input, shape index: {}]   ;;  %s309_s2 = inlined_call_operand.vmem [shape: f32[1,128], index: 2, kind: input, shape index: {}]   ;;  %s310_s3 = inlined_call_operand.vmem [shape: f32[32,128], index: 3, kind: output, shape index: {}]  }
   0x1   :  { %v232_v0 = vld [vmem:[%s307_s1] sm:$0xff]   ;;  %v233_v1 = vld [vmem:[%s307_s1 + $0x8] sm:$0xff]   ;;  %v234_v2 = vld [vmem:[%s307_s1 + $0x10] sm:$0xff]  }
   0x2   :  { %211 = vmatprep.subr.bf16.mxu0 %v232_v0  ;;  %v235_v3 = vld [vmem:[%s307_s1 + $0x18] sm:$0xff]   ;;  %v240_v4 = vld [vmem:[%s308_s0] sm:$0xff]   ;;  %v237_v6 = vld [vmem:[%s307_s1 + $0x28] sm:$0xff]  }
   0x3   :  { %212 = vmatpush3.bf16.msra.mxu0 %v232_v0  ;;  %227 = vmatprep.mubr.bf16.mxu0 %v240_v4  ;;  %v236_v5 = vld [vmem:[%s307_s1 + $0x20] sm:$0xff]   ;;  %v238_v7 = vld [vmem:[%s307_s1 + $0x30] sm:$0xff]   ;;  %v239_v8 = vld [vmem:[%s307_s1 + $0x38] sm:$0xff]  }
   0x4   :  { %213 = vmatprep.subr.bf16.mxu0 %v233_v1  ;;  %v241_v9 = vld [vmem:[%s308_s0 + $0x8] sm:$0xff]   ;;  %v200_v11 = vld [vmem:[%s309_s2] ss:$0 sm:$0xff] }
   0x7   :  { %214 = vmatpush3.bf16.msra.mxu0 %v233_v1 }
   0x8   :  { %215 = vmatprep.subr.bf16.mxu0 %v234_v2 }
   0xb   :  { %216 = vmatpush3.bf16.msra.mxu0 %v234_v2 }
   0xc   :  { %217 = vmatprep.subr.bf16.mxu0 %v235_v3 }
   0xf   :  { %218 = vmatpush3.bf16.msra.mxu0 %v235_v3 }
  0x10   :  { %219 = vmatprep.subr.bf16.mxu0 %v236_v5 }
  0x13   :  { %220 = vmatpush3.bf16.msra.mxu0 %v236_v5 }
  0x14   :  { %221 = vmatprep.subr.bf16.mxu0 %v237_v6 }
  0x17   :  { %222 = vmatpush3.bf16.msra.mxu0 %v237_v6 }
  0x18   :  { %223 = vmatprep.subr.bf16.mxu0 %v238_v7 }
  0x1b   :  { %224 = vmatpush3.bf16.msra.mxu0 %v238_v7 }
  0x1c   :  { %225 = vmatprep.subr.bf16.mxu0 %v239_v8 }
  0x1f   :  { %226 = vmatpush3.bf16.msra.mxu0 %v239_v8 }
  0x22   :  { %228 = vmatmul.mubr.bf16.vlgmr.msra.gmra.mrb[0].mxu0 %v241_v9 }
  0xf5   :  { %v229_v10 = vpop.f32.mrb[0].mxu0 }
  0xf6   :  { %v141_v12 = vpop.f32.mrb[1].mxu0  ;;  %v180_v14 = vadd.f32 %v229_v10, %v200_v11 }
  0xf7   :  { %v230_v13 = vpop.f32.mrb[2].mxu0  ;;  %v178_v16 = vadd.f32 %v200_v11, %v141_v12 }
  0xf8   :  { %v144_v15 = vpop.f32.mrb[3].mxu0  ;;  %184 = vst [vmem:[%s310_s3 + $0x10] sm:$0xff] %v180_v14  ;;  %v181_v17 = vadd.f32 %v230_v13, %v200_v11 }
  0xf9   :  { %182 = vst [vmem:[%s310_s3] sm:$0xff] %v178_v16  ;;  %v179_v18 = vadd.f32 %v200_v11, %v144_v15 }
  0xfa   :  { %185 = vst [vmem:[%s310_s3 + $0x18] sm:$0xff] %v181_v17 }
  0xfb   :  { %183 = vst [vmem:[%s310_s3 + $0x8] sm:$0xff] %v179_v18 }

// kernel: resnet34_forward.49
= control target key start
LH: loop header
LB: loop body
LE: loop exit
PB: predicated region body
PF: predicated region fallthrough
CT: control target
= control target key end

     0   :  { %s1663_s1 = inlined_call_operand.vmem [shape: bf16[1152,128], index: 1, kind: input, shape index: {}]   ;;  %s1664_s0 = inlined_call_operand.vmem [shape: bf16[32,1152], index: 0, kind: input, shape index: {}]   ;;  %s1665_s2 = inlined_call_operand.vmem [shape: f32[1,128], index: 2, kind: input, shape index: {}]   ;;  %s1666_s3 = inlined_call_operand.vmem [shape: f32[32,128], index: 3, kind: input, shape index: {}]   ;;  %s1667_s4 = inlined_call_operand.vmem [shape: f32[32,128], index: 4, kind: output, shape index: {}]  }
   0x1   :  { %v1243_v0 = vld [vmem:[%s1663_s1 + $0x40] sm:$0xff]   ;;  %v1247_v4 = vld [vmem:[%s1663_s1 + $0x48] sm:$0xff]   ;;  %v1251_v8 = vld [vmem:[%s1663_s1 + $0x50] sm:$0xff]  }
   0x2   :  { %v1244_v1 = vld [vmem:[%s1663_s1 + $0xc0] sm:$0xff]   ;;  %1100 = vmatprep.subr.bf16.mxu0 %v1243_v0  ;;  %v1248_v5 = vld [vmem:[%s1663_s1 + $0xc8] sm:$0xff]   ;;  %v1252_v9 = vld [vmem:[%s1663_s1 + $0xd0] sm:$0xff]  }
   0x3   :  { %v1245_v2 = vld [vmem:[%s1663_s1] sm:$0xff]   ;;  %1128 = vmatprep.subr.bf16.mxu1 %v1244_v1  ;;  %v1249_v6 = vld [vmem:[%s1663_s1 + $0x8] sm:$0xff]   ;;  %v1253_v10 = vld [vmem:[%s1663_s1 + $0x10] sm:$0xff]  }
   0x4   :  { %v1246_v3 = vld [vmem:[%s1663_s1 + $0x80] sm:$0xff]   ;;  %1101 = vmatpush3.bf16.msra.mxu0 %v1245_v2  ;;  %v1250_v7 = vld [vmem:[%s1663_s1 + $0x88] sm:$0xff]   ;;  %v1254_v11 = vld [vmem:[%s1663_s1 + $0x90] sm:$0xff]  }
   0x5   :  { %1129 = vmatpush3.bf16.msra.mxu1 %v1246_v3  ;;  %1102 = vmatprep.subr.bf16.mxu0 %v1247_v4  ;;  %v1255_v12 = vld [vmem:[%s1663_s1 + $0x58] sm:$0xff]   ;;  %v1259_v16 = vld [vmem:[%s1663_s1 + $0x60] sm:$0xff]   ;;  %v1263_v20 = vld [vmem:[%s1663_s1 + $0x68] sm:$0xff]  }
   0x6   :  { %1130 = vmatprep.subr.bf16.mxu1 %v1248_v5  ;;  %v1256_v13 = vld [vmem:[%s1663_s1 + $0xd8] sm:$0xff]   ;;  %v1260_v17 = vld [vmem:[%s1663_s1 + $0xe0] sm:$0xff]   ;;  %v1264_v21 = vld [vmem:[%s1663_s1 + $0xe8] sm:$0xff]  }
   0x7   :  { %v1257_v14 = vld [vmem:[%s1663_s1 + $0x18] sm:$0xff]   ;;  %v1261_v18 = vld [vmem:[%s1663_s1 + $0x20] sm:$0xff]   ;;  %v1265_v22 = vld [vmem:[%s1663_s1 + $0x28] sm:$0xff]  }
   0x8   :  { %1103 = vmatpush3.bf16.msra.mxu0 %v1249_v6  ;;  %v1258_v15 = vld [vmem:[%s1663_s1 + $0x98] sm:$0xff]   ;;  %v1262_v19 = vld [vmem:[%s1663_s1 + $0xa0] sm:$0xff]   ;;  %v1266_v23 = vld [vmem:[%s1663_s1 + $0xa8] sm:$0xff]  }
   0x9   :  { %1131 = vmatpush3.bf16.msra.mxu1 %v1250_v7  ;;  %1104 = vmatprep.subr.bf16.mxu0 %v1251_v8  ;;  %v1267_v24 = vld [vmem:[%s1663_s1 + $0x70] sm:$0xff]   ;;  %v1271_v28 = vld [vmem:[%s1663_s1 + $0x78] sm:$0xff]   ;;  %v1275_v32 = vld [vmem:[%s1664_s0] ss:$36 sps:$4 sm:$0xff]  }
   0xa   :  { %1132 = vmatprep.subr.bf16.mxu1 %v1252_v9  ;;  %v1268_v25 = vld [vmem:[%s1663_s1 + $0xf0] sm:$0xff]   ;;  %v1272_v29 = vld [vmem:[%s1663_s1 + $0xf8] sm:$0xff]   ;;  %v1277_v33 = vld [vmem:[%s1664_s0 + $0x4] ss:$36 sps:$4 sm:$0xff]  }
   0xb   :  { %v1269_v26 = vld [vmem:[%s1663_s1 + $0x30] sm:$0xff]   ;;  %v1273_v30 = vld [vmem:[%s1663_s1 + $0x38] sm:$0xff]   ;;  %v1278_v34 = vld [vmem:[%s1664_s0 + $0x8] ss:$36 sps:$4 sm:$0xff]   ;;  %750 = vmatprep.mubr.bf16.mxu0 %v1277_v33 }
   0xc   :  { %1105 = vmatpush3.bf16.msra.mxu0 %v1253_v10  ;;  %v1270_v27 = vld [vmem:[%s1663_s1 + $0xb0] sm:$0xff]   ;;  %v1274_v31 = vld [vmem:[%s1663_s1 + $0xb8] sm:$0xff]   ;;  %v1281_v36 = vld [vmem:[%s1663_s1 + $0x140] sm:$0xff]  }
   0xd   :  { %1133 = vmatpush3.bf16.msra.mxu1 %v1254_v11  ;;  %1106 = vmatprep.subr.bf16.mxu0 %v1255_v12  ;;  %v1280_v35 = vld [vmem:[%s1664_s0 + $0xc] ss:$36 sps:$4 sm:$0xff]   ;;  %v1282_v37 = vld [vmem:[%s1663_s1 + $0x100] sm:$0xff]   ;;  %v1293_v48 = vld [vmem:[%s1663_s1 + $0x158] sm:$0xff]  }
   0xe   :  { %1134 = vmatprep.subr.bf16.mxu1 %v1256_v13  ;;  %799 = vmatprep.mubr.bf16.mxu1 %v1280_v35  ;;  %v1283_v38 = vld [vmem:[%s1663_s1 + $0x1c0] sm:$0xff]   ;;  %v1285_v40 = vld [vmem:[%s1663_s1 + $0x148] sm:$0xff]   ;;  %v1289_v44 = vld [vmem:[%s1663_s1 + $0x150] sm:$0xff]  }
   0xf   :  { %v1284_v39 = vld [vmem:[%s1663_s1 + $0x180] sm:$0xff]   ;;  %v1286_v41 = vld [vmem:[%s1663_s1 + $0x108] sm:$0xff]   ;;  %v1290_v45 = vld [vmem:[%s1663_s1 + $0x110] sm:$0xff]  }
  0x10   :  { %1107 = vmatpush3.bf16.msra.mxu0 %v1257_v14  ;;  %v1287_v42 = vld [vmem:[%s1663_s1 + $0x1c8] sm:$0xff]   ;;  %v1291_v46 = vld [vmem:[%s1663_s1 + $0x1d0] sm:$0xff]   ;;  %v1294_v49 = vld [vmem:[%s1663_s1 + $0x118] sm:$0xff]  }
  0x11   :  { %1135 = vmatpush3.bf16.msra.mxu1 %v1258_v15  ;;  %1108 = vmatprep.subr.bf16.mxu0 %v1259_v16  ;;  %v1288_v43 = vld [vmem:[%s1663_s1 + $0x188] sm:$0xff]   ;;  %v1292_v47 = vld [vmem:[%s1663_s1 + $0x190] sm:$0xff]   ;;  %v1295_v50 = vld [vmem:[%s1663_s1 + $0x1d8] sm:$0xff]  }
  0x12   :  { %1136 = vmatprep.subr.bf16.mxu1 %v1260_v17  ;;  %v1296_v51 = vld [vmem:[%s1663_s1 + $0x198] sm:$0xff]   ;;  %v1297_v52 = vld [vmem:[%s1663_s1 + $0x160] sm:$0xff]   ;;  %v1301_v56 = vld [vmem:[%s1663_s1 + $0x168] sm:$0xff]  }
  0x13   :  { %v1298_v53 = vld [vmem:[%s1663_s1 + $0x120] sm:$0xff]   ;;  %v1302_v57 = vld [vmem:[%s1664_s0 + $0x4c] ss:$36 sps:$4 sm:$0xff]   ;;  %v1304_v58 = vld [vmem:[%s1664_s0 + $0x54] ss:$36 sps:$4 sm:$0xff]  }
  0x14   :  { %1109 = vmatpush3.bf16.msra.mxu0 %v1261_v18  ;;  %v1299_v54 = vld [vmem:[%s1663_s1 + $0x1e0] sm:$0xff]   ;;  %v1306_v59 = vld [vmem:[%s1663_s1 + $0x128] sm:$0xff]   ;;  %v1308_v61 = vld [vmem:[%s1664_s0 + $0x50] ss:$36 sps:$4 sm:$0xff]  }
  0x15   :  { %1137 = vmatpush3.bf16.msra.mxu1 %v1262_v19  ;;  %1110 = vmatprep.subr.bf16.mxu0 %v1263_v20  ;;  %v1300_v55 = vld [vmem:[%s1663_s1 + $0x1a0] sm:$0xff]   ;;  %v1307_v60 = vld [vmem:[%s1664_s0 + $0x48] ss:$36 sps:$4 sm:$0xff]   ;;  %v1311_v0 = vld [vmem:[%s1663_s1 + $0x170] sm:$0xff]  }
  0x16   :  { %1138 = vmatprep.subr.bf16.mxu1 %v1264_v21  ;;  %v1309_v62 = vld [vmem:[%s1663_s1 + $0x1e8] sm:$0xff]   ;;  %v1312_v1 = vld [vmem:[%s1663_s1 + $0x130] sm:$0xff]   ;;  %v1315_v4 = vld [vmem:[%s1663_s1 + $0x178] sm:$0xff]  }
  0x17   :  { %v1310_v63 = vld [vmem:[%s1663_s1 + $0x1a8] sm:$0xff]   ;;  %v1313_v2 = vld [vmem:[%s1663_s1 + $0x1f0] sm:$0xff]   ;;  %v1316_v5 = vld [vmem:[%s1663_s1 + $0x138] sm:$0xff]  }
  0x18   :  { %1111 = vmatpush3.bf16.msra.mxu0 %v1265_v22  ;;  %v1314_v3 = vld [vmem:[%s1663_s1 + $0x1b0] sm:$0xff]   ;;  %v1317_v6 = vld [vmem:[%s1663_s1 + $0x1f8] sm:$0xff]   ;;  %v1322_v10 = vld [vmem:[%s1663_s1 + $0x200] sm:$0xff]  }
  0x19   :  { %1139 = vmatpush3.bf16.msra.mxu1 %v1266_v23  ;;  %1112 = vmatprep.subr.bf16.mxu0 %v1267_v24  ;;  %v1318_v7 = vld [vmem:[%s1664_s0 + $0x10] ss:$36 sps:$4 sm:$0xff]   ;;  %v1321_v9 = vld [vmem:[%s1663_s1 + $0x1b8] sm:$0xff]   ;;  %v1326_v13 = vld [vmem:[%s1663_s1 + $0x208] sm:$0xff]  }
  0x1a   :  { %1140 = vmatprep.subr.bf16.mxu1 %v1268_v25  ;;  %v1320_v8 = vld [vmem:[%s1664_s0 + $0x14] ss:$36 sps:$4 sm:$0xff]   ;;  %v1325_v12 = vld [vmem:[%s1664_s0 + $0x1c] ss:$36 sps:$4 sm:$0xff]   ;;  %v1331_v17 = vld [vmem:[%s1664_s0 + $0x64] ss:$36 sps:$4 sm:$0xff]  }
  0x1b   :  { %v1323_v11 = vld [vmem:[%s1664_s0 + $0x18] ss:$36 sps:$4 sm:$0xff]   ;;  %v1330_v16 = vld [vmem:[%s1663_s1 + $0x210] sm:$0xff]   ;;  %v1333_v18 = vld [vmem:[%s1664_s0 + $0x60] ss:$36 sps:$4 sm:$0xff]  }
  0x1c   :  { %1113 = vmatpush3.bf16.msra.mxu0 %v1269_v26  ;;  %v1327_v14 = vld [vmem:[%s1664_s0 + $0x5c] ss:$36 sps:$4 sm:$0xff]   ;;  %v1336_v22 = vld [vmem:[%s1663_s1 + $0x228] sm:$0xff]   ;;  %v1337_v23 = vld [vmem:[%s1663_s1 + $0x230] sm:$0xff]  }
  0x1d   :  { %1141 = vmatpush3.bf16.msra.mxu1 %v1270_v27  ;;  %1114 = vmatprep.subr.bf16.mxu0 %v1271_v28  ;;  %v1329_v15 = vld [vmem:[%s1664_s0 + $0x58] ss:$36 sps:$4 sm:$0xff]   ;;  %v1335_v20 = vld [vmem:[%s1663_s1 + $0x220] sm:$0xff]   ;;  %v1340_v25 = vld [vmem:[%s1664_s0 + $0x68] ss:$36 sps:$4 sm:$0xff]  }
  0x1e   :  { %1142 = vmatprep.subr.bf16.mxu1 %v1272_v29  ;;  %v1334_v19 = vld [vmem:[%s1663_s1 + $0x218] sm:$0xff]   ;;  %v1339_v21 = vld [vmem:[%s1664_s0 + $0x20] ss:$36 sps:$4 sm:$0xff]  }
  0x1f   :  { %v1338_v24 = vld [vmem:[%s1663_s1 + $0x238] sm:$0xff]  }
  0x20   :  { %1115 = vmatpush3.bf16.msra.mxu0 %v1273_v30 }
  0x21   :  { %1143 = vmatpush3.bf16.msra.mxu1 %v1274_v31  ;;  %1156 = vmatprep.subr.bf16.mxu0 %v1281_v36 }
  0x22   :  { %1184 = vmatprep.subr.bf16.mxu1 %v1283_v38 }
  0x23   :  { %751 = vmatmul.mubr.bf16.vlgmr.msra.gmra.mrb[0].mxu0 %v1275_v32 }
  0x24   :  { %800 = vmatmul.mubr.bf16.vlgmr.msra.gmra.mrb[0].mxu1 %v1278_v34  ;;  %1157 = vmatpush3.bf16.msra.mxu0 %v1282_v37 }
  0x25   :  { %1185 = vmatpush3.bf16.msra.mxu1 %v1284_v39  ;;  %1158 = vmatprep.subr.bf16.mxu0 %v1285_v40 }
  0x26   :  { %1186 = vmatprep.subr.bf16.mxu1 %v1287_v42  ;;  %758 = vmatprep.mubr.bf16.mxu0 %v1302_v57 }
  0x27   :  { %807 = vmatprep.mubr.bf16.mxu1 %v1304_v58 }
  0x28   :  { %1159 = vmatpush3.bf16.msra.mxu0 %v1286_v41 }
  0x29   :  { %1187 = vmatpush3.bf16.msra.mxu1 %v1288_v43  ;;  %1160 = vmatprep.subr.bf16.mxu0 %v1289_v44 }
  0x2a   :  { %1188 = vmatprep.subr.bf16.mxu1 %v1291_v46 }
  0x2b   :  { %759 = vmatmul.mubr.bf16.gmra.mrb[4].mxu0 %v1307_v60 }
  0x2c   :  { %1161 = vmatpush3.bf16.msra.mxu0 %v1290_v45  ;;  %808 = vmatmul.mubr.bf16.gmra.mrb[4].mxu1 %v1308_v61 }
  0x2d   :  { %1189 = vmatpush3.bf16.msra.mxu1 %v1292_v47  ;;  %1162 = vmatprep.subr.bf16.mxu0 %v1293_v48 }
  0x2e   :  { %1190 = vmatprep.subr.bf16.mxu1 %v1295_v50  ;;  %848 = vmatprep.mubr.bf16.mxu0 %v1320_v8 }
  0x2f   :  { %897 = vmatprep.mubr.bf16.mxu1 %v1325_v12 }
  0x30   :  { %1163 = vmatpush3.bf16.msra.mxu0 %v1294_v49 }
  0x31   :  { %1191 = vmatpush3.bf16.msra.mxu1 %v1296_v51  ;;  %1164 = vmatprep.subr.bf16.mxu0 %v1297_v52 }
  0x32   :  { %1192 = vmatprep.subr.bf16.mxu1 %v1299_v54 }
  0x34   :  { %1165 = vmatpush3.bf16.msra.mxu0 %v1298_v53 }
  0x35   :  { %1193 = vmatpush3.bf16.msra.mxu1 %v1300_v55  ;;  %1166 = vmatprep.subr.bf16.mxu0 %v1301_v56 }
  0x36   :  { %1194 = vmatprep.subr.bf16.mxu1 %v1309_v62 }
  0x38   :  { %1167 = vmatpush3.bf16.msra.mxu0 %v1306_v59 }
  0x39   :  { %1195 = vmatpush3.bf16.msra.mxu1 %v1310_v63  ;;  %1168 = vmatprep.subr.bf16.mxu0 %v1311_v0 }
  0x3a   :  { %1196 = vmatprep.subr.bf16.mxu1 %v1313_v2 }
  0x3c   :  { %1169 = vmatpush3.bf16.msra.mxu0 %v1312_v1 }
  0x3d   :  { %1197 = vmatpush3.bf16.msra.mxu1 %v1314_v3  ;;  %1170 = vmatprep.subr.bf16.mxu0 %v1315_v4 }
  0x3e   :  { %1198 = vmatprep.subr.bf16.mxu1 %v1317_v6 }
  0x40   :  { %1171 = vmatpush3.bf16.msra.mxu0 %v1316_v5 }
  0x41   :  { %1199 = vmatpush3.bf16.msra.mxu1 %v1321_v9  ;;  %1222 = vmatprep.subr.bf16.mxu0 %v1322_v10 }
  0x43   :  { %849 = vmatmul.mubr.bf16.vlgmr.msra.gmra.mrb[8].mxu0 %v1318_v7 }
  0x44   :  { %1223 = vmatpush3.bf16.msra.mxu0 %v1322_v10  ;;  %898 = vmatmul.mubr.bf16.vlgmr.msra.gmra.mrb[8].mxu1 %v1323_v11 }
  0x45   :  { %1224 = vmatprep.subr.bf16.mxu0 %v1326_v13  ;;  %856 = vmatprep.mubr.bf16.mxu0 %v1327_v14 }
  0x46   :  { %905 = vmatprep.mubr.bf16.mxu1 %v1331_v17 }
  0x48   :  { %1225 = vmatpush3.bf16.msra.mxu0 %v1326_v13 }
  0x49   :  { %1226 = vmatprep.subr.bf16.mxu0 %v1330_v16 }
  0x4b   :  { %857 = vmatmul.mubr.bf16.gmra.mrb[12].mxu0 %v1329_v15 }
  0x4c   :  { %1227 = vmatpush3.bf16.msra.mxu0 %v1330_v16  ;;  %906 = vmatmul.mubr.bf16.gmra.mrb[12].mxu1 %v1333_v18 }
  0x4d   :  { %1228 = vmatprep.subr.bf16.mxu0 %v1334_v19  ;;  %1238 = vmatprep.mubr.bf16.mxu0 %v1339_v21 }
  0x50   :  { %1229 = vmatpush3.bf16.msra.mxu0 %v1334_v19 }
  0x51   :  { %1230 = vmatprep.subr.bf16.mxu0 %v1335_v20 }
  0x54   :  { %1231 = vmatpush3.bf16.msra.mxu0 %v1335_v20 }
  0x55   :  { %1232 = vmatprep.subr.bf16.mxu0 %v1336_v22 }
  0x58   :  { %1233 = vmatpush3.bf16.msra.mxu0 %v1336_v22 }
  0x59   :  { %1234 = vmatprep.subr.bf16.mxu0 %v1337_v23 }
  0x5c   :  { %1235 = vmatpush3.bf16.msra.mxu0 %v1337_v23 }
  0x5d   :  { %1236 = vmatprep.subr.bf16.mxu0 %v1338_v24 }
  0x60   :  { %1237 = vmatpush3.bf16.msra.mxu0 %v1338_v24 }
  0x63   :  { %1239 = vmatmul.mubr.bf16.vlgmr.msra.gmra.mrb[16].mxu0 %v1340_v25  ;;  %v1099_v25 = vld [vmem:[%s1665_s2] ss:$0 sm:$0xff] }
  0xf6   :  { %v1116_v26 = vpop.f32.mrb[0].mxu0 }
  0xf7   :  { %v1144_v27 = vpop.f32.mrb[0].mxu1  ;;  %v1117_v28 = vpop.f32.mrb[1].mxu0 }
  0xf8   :  { %v1118_v29 = vadd.f32 %v1117_v28, %v1116_v26  ;;  %v1145_v30 = vpop.f32.mrb[1].mxu1  ;;  %v1119_v31 = vpop.f32.mrb[2].mxu0 }
  0xf9   :  { %v1146_v32 = vadd.f32 %v1145_v30, %v1144_v27  ;;  %v1147_v33 = vpop.f32.mrb[2].mxu1  ;;  %v1120_v34 = vpop.f32.mrb[3].mxu0  ;;  %v991_v30 = vld [vmem:[%s1666_s3 + $0x10] sm:$0xff] }
  0xfa   :  { %v1121_v35 = vadd.f32 %v1120_v34, %v1119_v31  ;;  %v1148_v36 = vpop.f32.mrb[3].mxu1 }
  0xfb   :  { %v802_v37 = vadd.f32 %v1146_v32, %v1118_v29  ;;  %v1149_v38 = vadd.f32 %v1148_v36, %v1147_v33  ;;  %v989_v33 = vld [vmem:[%s1666_s3] sm:$0xff] }
  0xfd   :  { %v805_v39 = vadd.f32 %v1149_v38, %v1121_v35  ;;  %v992_v35 = vld [vmem:[%s1666_s3 + $0x18] sm:$0xff]  ;;  %v990_v38 = vld [vmem:[%s1666_s3 + $0x8] sm:$0xff] }
  0xfe   :  { %v1122_v40 = vpop.f32.mrb[4].mxu0 }
  0xff   :  { %v1150_v41 = vpop.f32.mrb[4].mxu1  ;;  %v1123_v42 = vpop.f32.mrb[5].mxu0 }
 0x100   :  { %v1151_v43 = vpop.f32.mrb[5].mxu1  ;;  %v1124_v44 = vadd.f32 %v1123_v42, %v1122_v40  ;;  %v1125_v46 = vpop.f32.mrb[6].mxu0 }
 0x101   :  { %v1152_v45 = vadd.f32 %v1151_v43, %v1150_v41  ;;  %v1153_v47 = vpop.f32.mrb[6].mxu1  ;;  %v1126_v48 = vpop.f32.mrb[7].mxu0 }
 0x102   :  { %v1154_v49 = vpop.f32.mrb[7].mxu1  ;;  %v1127_v51 = vadd.f32 %v1126_v48, %v1125_v46 }
 0x103   :  { %v810_v50 = vadd.f32 %v1152_v45, %v1124_v44  ;;  %v1155_v52 = vadd.f32 %v1154_v49, %v1153_v47 }
 0x105   :  { %v813_v53 = vadd.f32 %v1155_v52, %v1127_v51 }
 0x116   :  { %v1172_v54 = vpop.f32.mrb[8].mxu0 }
 0x117   :  { %v1173_v55 = vpop.f32.mrb[9].mxu0  ;;  %v1200_v58 = vpop.f32.mrb[8].mxu1 }
 0x118   :  { %v1174_v56 = vadd.f32 %v1173_v55, %v1172_v54  ;;  %v1175_v57 = vpop.f32.mrb[10].mxu0  ;;  %v1201_v62 = vpop.f32.mrb[9].mxu1 }
 0x119   :  { %v1176_v59 = vpop.f32.mrb[11].mxu0  ;;  %v1202_v63 = vadd.f32 %v1201_v62, %v1200_v58  ;;  %v1203_v0 = vpop.f32.mrb[10].mxu1 }
 0x11a   :  { %v851_v60 = vadd.f32 %v1174_v56, %v802_v37  ;;  %v1177_v61 = vadd.f32 %v1176_v59, %v1175_v57  ;;  %v1204_v2 = vpop.f32.mrb[11].mxu1 }
 0x11b   :  { %v1205_v3 = vadd.f32 %v1204_v2, %v1203_v0 }
 0x11c   :  { %v854_v1 = vadd.f32 %v1177_v61, %v805_v39  ;;  %v900_v4 = vadd.f32 %v1202_v63, %v851_v60 }
 0x11e   :  { %v1178_v5 = vpop.f32.mrb[12].mxu0  ;;  %v903_v7 = vadd.f32 %v1205_v3, %v854_v1 }
 0x11f   :  { %v1179_v6 = vpop.f32.mrb[13].mxu0  ;;  %v1206_v10 = vpop.f32.mrb[12].mxu1 }
 0x120   :  { %v1180_v8 = vadd.f32 %v1179_v6, %v1178_v5  ;;  %v1181_v9 = vpop.f32.mrb[14].mxu0  ;;  %v1207_v14 = vpop.f32.mrb[13].mxu1 }
 0x121   :  { %v1182_v11 = vpop.f32.mrb[15].mxu0  ;;  %v1208_v15 = vadd.f32 %v1207_v14, %v1206_v10  ;;  %v1209_v16 = vpop.f32.mrb[14].mxu1 }
 0x122   :  { %v859_v12 = vadd.f32 %v1180_v8, %v810_v50  ;;  %v1183_v13 = vadd.f32 %v1182_v11, %v1181_v9  ;;  %v1210_v18 = vpop.f32.mrb[15].mxu1 }
 0x123   :  { %v1211_v19 = vadd.f32 %v1210_v18, %v1209_v16 }
 0x124   :  { %v862_v17 = vadd.f32 %v1183_v13, %v813_v53  ;;  %v908_v20 = vadd.f32 %v1208_v15, %v859_v12 }
 0x126   :  { %v911_v21 = vadd.f32 %v1211_v19, %v862_v17 }
 0x136   :  { %v1240_v22 = vpop.f32.mrb[16].mxu0 }
 0x137   :  { %v957_v23 = vadd.f32 %v1240_v22, %v908_v20  ;;  %v948_v24 = vpop.f32.mrb[17].mxu0 }
 0x138   :  { %v949_v26 = vadd.f32 %v948_v24, %v900_v4  ;;  %v1241_v27 = vpop.f32.mrb[18].mxu0 }
 0x139   :  { %v960_v28 = vadd.f32 %v1241_v27, %v911_v21  ;;  %v951_v29 = vpop.f32.mrb[19].mxu0  ;;  %v987_v32 = vadd.f32 %v1099_v25, %v957_v23 }
 0x13a   :  { %v952_v31 = vadd.f32 %v951_v29, %v903_v7  ;;  %v985_v34 = vadd.f32 %v1099_v25, %v949_v26 }
 0x13b   :  { %v995_v36 = vadd.f32 %v991_v30, %v987_v32  ;;  %v988_v37 = vadd.f32 %v1099_v25, %v960_v28 }
 0x13c   :  { %v993_v39 = vadd.f32 %v989_v33, %v985_v34  ;;  %v986_v40 = vadd.f32 %v1099_v25, %v952_v31 }
 0x13d   :  { %v999_v41 = vmax.f32 %v995_v36, 0.0  ;;  %v996_v42 = vadd.f32 %v992_v35, %v988_v37 }
 0x13e   :  { %v997_v43 = vmax.f32 %v993_v39, 0.0  ;;  %v994_v44 = vadd.f32 %v990_v38, %v986_v40 }
 0x13f   :  { %1003 = vst [vmem:[%s1667_s4 + $0x10] sm:$0xff] %v999_v41  ;;  %v1000_v45 = vmax.f32 %v996_v42, 0.0 }
 0x140   :  { %1001 = vst [vmem:[%s1667_s4] sm:$0xff] %v997_v43  ;;  %v998_v46 = vmax.f32 %v994_v44, 0.0 }
 0x141   :  { %1004 = vst [vmem:[%s1667_s4 + $0x18] sm:$0xff] %v1000_v45 }
 0x142   :  { %1002 = vst [vmem:[%s1667_s4 + $0x8] sm:$0xff] %v998_v46 }

// kernel: resnet34_forward.50
= control target key start
LH: loop header
LB: loop body
LE: loop exit
PB: predicated region body
PF: predicated region fallthrough
CT: control target
= control target key end

     0   :  { %s1635_s1 = inlined_call_operand.vmem [shape: bf16[1152,128], index: 1, kind: input, shape index: {}]   ;;  %s1636_s0 = inlined_call_operand.vmem [shape: bf16[32,1152], index: 0, kind: input, shape index: {}]   ;;  %s1637_s2 = inlined_call_operand.vmem [shape: f32[1,128], index: 2, kind: input, shape index: {}]   ;;  %s1638_s3 = inlined_call_operand.vmem [shape: f32[32,128], index: 3, kind: output, shape index: {}]  }
   0x1   :  { %v1232_v0 = vld [vmem:[%s1635_s1 + $0x40] sm:$0xff]   ;;  %v1236_v4 = vld [vmem:[%s1635_s1 + $0x48] sm:$0xff]   ;;  %v1240_v8 = vld [vmem:[%s1635_s1 + $0x50] sm:$0xff]  }
   0x2   :  { %v1233_v1 = vld [vmem:[%s1635_s1 + $0xc0] sm:$0xff]   ;;  %1089 = vmatprep.subr.bf16.mxu0 %v1232_v0  ;;  %v1237_v5 = vld [vmem:[%s1635_s1 + $0xc8] sm:$0xff]   ;;  %v1241_v9 = vld [vmem:[%s1635_s1 + $0xd0] sm:$0xff]  }
   0x3   :  { %v1234_v2 = vld [vmem:[%s1635_s1] sm:$0xff]   ;;  %1117 = vmatprep.subr.bf16.mxu1 %v1233_v1  ;;  %v1238_v6 = vld [vmem:[%s1635_s1 + $0x8] sm:$0xff]   ;;  %v1242_v10 = vld [vmem:[%s1635_s1 + $0x10] sm:$0xff]  }
   0x4   :  { %v1235_v3 = vld [vmem:[%s1635_s1 + $0x80] sm:$0xff]   ;;  %1090 = vmatpush3.bf16.msra.mxu0 %v1234_v2  ;;  %v1239_v7 = vld [vmem:[%s1635_s1 + $0x88] sm:$0xff]   ;;  %v1243_v11 = vld [vmem:[%s1635_s1 + $0x90] sm:$0xff]  }
   0x5   :  { %1118 = vmatpush3.bf16.msra.mxu1 %v1235_v3  ;;  %1091 = vmatprep.subr.bf16.mxu0 %v1236_v4  ;;  %v1244_v12 = vld [vmem:[%s1635_s1 + $0x58] sm:$0xff]   ;;  %v1248_v16 = vld [vmem:[%s1635_s1 + $0x60] sm:$0xff]   ;;  %v1252_v20 = vld [vmem:[%s1635_s1 + $0x68] sm:$0xff]  }
   0x6   :  { %1119 = vmatprep.subr.bf16.mxu1 %v1237_v5  ;;  %v1245_v13 = vld [vmem:[%s1635_s1 + $0xd8] sm:$0xff]   ;;  %v1249_v17 = vld [vmem:[%s1635_s1 + $0xe0] sm:$0xff]   ;;  %v1253_v21 = vld [vmem:[%s1635_s1 + $0xe8] sm:$0xff]  }
   0x7   :  { %v1246_v14 = vld [vmem:[%s1635_s1 + $0x18] sm:$0xff]   ;;  %v1250_v18 = vld [vmem:[%s1635_s1 + $0x20] sm:$0xff]   ;;  %v1254_v22 = vld [vmem:[%s1635_s1 + $0x28] sm:$0xff]  }
   0x8   :  { %1092 = vmatpush3.bf16.msra.mxu0 %v1238_v6  ;;  %v1247_v15 = vld [vmem:[%s1635_s1 + $0x98] sm:$0xff]   ;;  %v1251_v19 = vld [vmem:[%s1635_s1 + $0xa0] sm:$0xff]   ;;  %v1255_v23 = vld [vmem:[%s1635_s1 + $0xa8] sm:$0xff]  }
   0x9   :  { %1120 = vmatpush3.bf16.msra.mxu1 %v1239_v7  ;;  %1093 = vmatprep.subr.bf16.mxu0 %v1240_v8  ;;  %v1256_v24 = vld [vmem:[%s1635_s1 + $0x70] sm:$0xff]   ;;  %v1260_v28 = vld [vmem:[%s1635_s1 + $0x78] sm:$0xff]   ;;  %v1264_v32 = vld [vmem:[%s1636_s0] ss:$36 sps:$4 sm:$0xff]  }
   0xa   :  { %1121 = vmatprep.subr.bf16.mxu1 %v1241_v9  ;;  %v1257_v25 = vld [vmem:[%s1635_s1 + $0xf0] sm:$0xff]   ;;  %v1261_v29 = vld [vmem:[%s1635_s1 + $0xf8] sm:$0xff]   ;;  %v1266_v33 = vld [vmem:[%s1636_s0 + $0x4] ss:$36 sps:$4 sm:$0xff]  }
   0xb   :  { %v1258_v26 = vld [vmem:[%s1635_s1 + $0x30] sm:$0xff]   ;;  %v1262_v30 = vld [vmem:[%s1635_s1 + $0x38] sm:$0xff]   ;;  %v1267_v34 = vld [vmem:[%s1636_s0 + $0x8] ss:$36 sps:$4 sm:$0xff]   ;;  %747 = vmatprep.mubr.bf16.mxu0 %v1266_v33 }
   0xc   :  { %1094 = vmatpush3.bf16.msra.mxu0 %v1242_v10  ;;  %v1259_v27 = vld [vmem:[%s1635_s1 + $0xb0] sm:$0xff]   ;;  %v1263_v31 = vld [vmem:[%s1635_s1 + $0xb8] sm:$0xff]   ;;  %v1270_v36 = vld [vmem:[%s1635_s1 + $0x140] sm:$0xff]  }
   0xd   :  { %1122 = vmatpush3.bf16.msra.mxu1 %v1243_v11  ;;  %1095 = vmatprep.subr.bf16.mxu0 %v1244_v12  ;;  %v1269_v35 = vld [vmem:[%s1636_s0 + $0xc] ss:$36 sps:$4 sm:$0xff]   ;;  %v1271_v37 = vld [vmem:[%s1635_s1 + $0x100] sm:$0xff]   ;;  %v1282_v48 = vld [vmem:[%s1635_s1 + $0x158] sm:$0xff]  }
   0xe   :  { %1123 = vmatprep.subr.bf16.mxu1 %v1245_v13  ;;  %796 = vmatprep.mubr.bf16.mxu1 %v1269_v35  ;;  %v1272_v38 = vld [vmem:[%s1635_s1 + $0x1c0] sm:$0xff]   ;;  %v1274_v40 = vld [vmem:[%s1635_s1 + $0x148] sm:$0xff]   ;;  %v1278_v44 = vld [vmem:[%s1635_s1 + $0x150] sm:$0xff]  }
   0xf   :  { %v1273_v39 = vld [vmem:[%s1635_s1 + $0x180] sm:$0xff]   ;;  %v1275_v41 = vld [vmem:[%s1635_s1 + $0x108] sm:$0xff]   ;;  %v1279_v45 = vld [vmem:[%s1635_s1 + $0x110] sm:$0xff]  }
  0x10   :  { %1096 = vmatpush3.bf16.msra.mxu0 %v1246_v14  ;;  %v1276_v42 = vld [vmem:[%s1635_s1 + $0x1c8] sm:$0xff]   ;;  %v1280_v46 = vld [vmem:[%s1635_s1 + $0x1d0] sm:$0xff]   ;;  %v1283_v49 = vld [vmem:[%s1635_s1 + $0x118] sm:$0xff]  }
  0x11   :  { %1124 = vmatpush3.bf16.msra.mxu1 %v1247_v15  ;;  %1097 = vmatprep.subr.bf16.mxu0 %v1248_v16  ;;  %v1277_v43 = vld [vmem:[%s1635_s1 + $0x188] sm:$0xff]   ;;  %v1281_v47 = vld [vmem:[%s1635_s1 + $0x190] sm:$0xff]   ;;  %v1284_v50 = vld [vmem:[%s1635_s1 + $0x1d8] sm:$0xff]  }
  0x12   :  { %1125 = vmatprep.subr.bf16.mxu1 %v1249_v17  ;;  %v1285_v51 = vld [vmem:[%s1635_s1 + $0x198] sm:$0xff]   ;;  %v1286_v52 = vld [vmem:[%s1635_s1 + $0x160] sm:$0xff]   ;;  %v1290_v56 = vld [vmem:[%s1635_s1 + $0x168] sm:$0xff]  }
  0x13   :  { %v1287_v53 = vld [vmem:[%s1635_s1 + $0x120] sm:$0xff]   ;;  %v1291_v57 = vld [vmem:[%s1636_s0 + $0x4c] ss:$36 sps:$4 sm:$0xff]   ;;  %v1293_v58 = vld [vmem:[%s1636_s0 + $0x54] ss:$36 sps:$4 sm:$0xff]  }
  0x14   :  { %1098 = vmatpush3.bf16.msra.mxu0 %v1250_v18  ;;  %v1288_v54 = vld [vmem:[%s1635_s1 + $0x1e0] sm:$0xff]   ;;  %v1295_v59 = vld [vmem:[%s1635_s1 + $0x128] sm:$0xff]   ;;  %v1297_v61 = vld [vmem:[%s1636_s0 + $0x50] ss:$36 sps:$4 sm:$0xff]  }
  0x15   :  { %1126 = vmatpush3.bf16.msra.mxu1 %v1251_v19  ;;  %1099 = vmatprep.subr.bf16.mxu0 %v1252_v20  ;;  %v1289_v55 = vld [vmem:[%s1635_s1 + $0x1a0] sm:$0xff]   ;;  %v1296_v60 = vld [vmem:[%s1636_s0 + $0x48] ss:$36 sps:$4 sm:$0xff]   ;;  %v1300_v0 = vld [vmem:[%s1635_s1 + $0x170] sm:$0xff]  }
  0x16   :  { %1127 = vmatprep.subr.bf16.mxu1 %v1253_v21  ;;  %v1298_v62 = vld [vmem:[%s1635_s1 + $0x1e8] sm:$0xff]   ;;  %v1301_v1 = vld [vmem:[%s1635_s1 + $0x130] sm:$0xff]   ;;  %v1304_v4 = vld [vmem:[%s1635_s1 + $0x178] sm:$0xff]  }
  0x17   :  { %v1299_v63 = vld [vmem:[%s1635_s1 + $0x1a8] sm:$0xff]   ;;  %v1302_v2 = vld [vmem:[%s1635_s1 + $0x1f0] sm:$0xff]   ;;  %v1305_v5 = vld [vmem:[%s1635_s1 + $0x138] sm:$0xff]  }
  0x18   :  { %1100 = vmatpush3.bf16.msra.mxu0 %v1254_v22  ;;  %v1303_v3 = vld [vmem:[%s1635_s1 + $0x1b0] sm:$0xff]   ;;  %v1306_v6 = vld [vmem:[%s1635_s1 + $0x1f8] sm:$0xff]   ;;  %v1311_v10 = vld [vmem:[%s1635_s1 + $0x200] sm:$0xff]  }
  0x19   :  { %1128 = vmatpush3.bf16.msra.mxu1 %v1255_v23  ;;  %1101 = vmatprep.subr.bf16.mxu0 %v1256_v24  ;;  %v1307_v7 = vld [vmem:[%s1636_s0 + $0x10] ss:$36 sps:$4 sm:$0xff]   ;;  %v1310_v9 = vld [vmem:[%s1635_s1 + $0x1b8] sm:$0xff]   ;;  %v1315_v13 = vld [vmem:[%s1635_s1 + $0x208] sm:$0xff]  }
  0x1a   :  { %1129 = vmatprep.subr.bf16.mxu1 %v1257_v25  ;;  %v1309_v8 = vld [vmem:[%s1636_s0 + $0x14] ss:$36 sps:$4 sm:$0xff]   ;;  %v1314_v12 = vld [vmem:[%s1636_s0 + $0x1c] ss:$36 sps:$4 sm:$0xff]   ;;  %v1320_v17 = vld [vmem:[%s1636_s0 + $0x64] ss:$36 sps:$4 sm:$0xff]  }
  0x1b   :  { %v1312_v11 = vld [vmem:[%s1636_s0 + $0x18] ss:$36 sps:$4 sm:$0xff]   ;;  %v1319_v16 = vld [vmem:[%s1635_s1 + $0x210] sm:$0xff]   ;;  %v1322_v18 = vld [vmem:[%s1636_s0 + $0x60] ss:$36 sps:$4 sm:$0xff]  }
  0x1c   :  { %1102 = vmatpush3.bf16.msra.mxu0 %v1258_v26  ;;  %v1316_v14 = vld [vmem:[%s1636_s0 + $0x5c] ss:$36 sps:$4 sm:$0xff]   ;;  %v1325_v22 = vld [vmem:[%s1635_s1 + $0x228] sm:$0xff]   ;;  %v1326_v23 = vld [vmem:[%s1635_s1 + $0x230] sm:$0xff]  }
  0x1d   :  { %1130 = vmatpush3.bf16.msra.mxu1 %v1259_v27  ;;  %1103 = vmatprep.subr.bf16.mxu0 %v1260_v28  ;;  %v1318_v15 = vld [vmem:[%s1636_s0 + $0x58] ss:$36 sps:$4 sm:$0xff]   ;;  %v1324_v20 = vld [vmem:[%s1635_s1 + $0x220] sm:$0xff]   ;;  %v1329_v25 = vld [vmem:[%s1636_s0 + $0x68] ss:$36 sps:$4 sm:$0xff]  }
  0x1e   :  { %1131 = vmatprep.subr.bf16.mxu1 %v1261_v29  ;;  %v1323_v19 = vld [vmem:[%s1635_s1 + $0x218] sm:$0xff]   ;;  %v1328_v21 = vld [vmem:[%s1636_s0 + $0x20] ss:$36 sps:$4 sm:$0xff]  }
  0x1f   :  { %v1327_v24 = vld [vmem:[%s1635_s1 + $0x238] sm:$0xff]  }
  0x20   :  { %1104 = vmatpush3.bf16.msra.mxu0 %v1262_v30 }
  0x21   :  { %1132 = vmatpush3.bf16.msra.mxu1 %v1263_v31  ;;  %1145 = vmatprep.subr.bf16.mxu0 %v1270_v36 }
  0x22   :  { %1173 = vmatprep.subr.bf16.mxu1 %v1272_v38 }
  0x23   :  { %748 = vmatmul.mubr.bf16.vlgmr.msra.gmra.mrb[0].mxu0 %v1264_v32 }
  0x24   :  { %797 = vmatmul.mubr.bf16.vlgmr.msra.gmra.mrb[0].mxu1 %v1267_v34  ;;  %1146 = vmatpush3.bf16.msra.mxu0 %v1271_v37 }
  0x25   :  { %1174 = vmatpush3.bf16.msra.mxu1 %v1273_v39  ;;  %1147 = vmatprep.subr.bf16.mxu0 %v1274_v40 }
  0x26   :  { %1175 = vmatprep.subr.bf16.mxu1 %v1276_v42  ;;  %755 = vmatprep.mubr.bf16.mxu0 %v1291_v57 }
  0x27   :  { %804 = vmatprep.mubr.bf16.mxu1 %v1293_v58 }
  0x28   :  { %1148 = vmatpush3.bf16.msra.mxu0 %v1275_v41 }
  0x29   :  { %1176 = vmatpush3.bf16.msra.mxu1 %v1277_v43  ;;  %1149 = vmatprep.subr.bf16.mxu0 %v1278_v44 }
  0x2a   :  { %1177 = vmatprep.subr.bf16.mxu1 %v1280_v46 }
  0x2b   :  { %756 = vmatmul.mubr.bf16.gmra.mrb[4].mxu0 %v1296_v60 }
  0x2c   :  { %1150 = vmatpush3.bf16.msra.mxu0 %v1279_v45  ;;  %805 = vmatmul.mubr.bf16.gmra.mrb[4].mxu1 %v1297_v61 }
  0x2d   :  { %1178 = vmatpush3.bf16.msra.mxu1 %v1281_v47  ;;  %1151 = vmatprep.subr.bf16.mxu0 %v1282_v48 }
  0x2e   :  { %1179 = vmatprep.subr.bf16.mxu1 %v1284_v50  ;;  %845 = vmatprep.mubr.bf16.mxu0 %v1309_v8 }
  0x2f   :  { %894 = vmatprep.mubr.bf16.mxu1 %v1314_v12 }
  0x30   :  { %1152 = vmatpush3.bf16.msra.mxu0 %v1283_v49 }
  0x31   :  { %1180 = vmatpush3.bf16.msra.mxu1 %v1285_v51  ;;  %1153 = vmatprep.subr.bf16.mxu0 %v1286_v52 }
  0x32   :  { %1181 = vmatprep.subr.bf16.mxu1 %v1288_v54 }
  0x34   :  { %1154 = vmatpush3.bf16.msra.mxu0 %v1287_v53 }
  0x35   :  { %1182 = vmatpush3.bf16.msra.mxu1 %v1289_v55  ;;  %1155 = vmatprep.subr.bf16.mxu0 %v1290_v56 }
  0x36   :  { %1183 = vmatprep.subr.bf16.mxu1 %v1298_v62 }
  0x38   :  { %1156 = vmatpush3.bf16.msra.mxu0 %v1295_v59 }
  0x39   :  { %1184 = vmatpush3.bf16.msra.mxu1 %v1299_v63  ;;  %1157 = vmatprep.subr.bf16.mxu0 %v1300_v0 }
  0x3a   :  { %1185 = vmatprep.subr.bf16.mxu1 %v1302_v2 }
  0x3c   :  { %1158 = vmatpush3.bf16.msra.mxu0 %v1301_v1 }
  0x3d   :  { %1186 = vmatpush3.bf16.msra.mxu1 %v1303_v3  ;;  %1159 = vmatprep.subr.bf16.mxu0 %v1304_v4 }
  0x3e   :  { %1187 = vmatprep.subr.bf16.mxu1 %v1306_v6 }
  0x40   :  { %1160 = vmatpush3.bf16.msra.mxu0 %v1305_v5 }
  0x41   :  { %1188 = vmatpush3.bf16.msra.mxu1 %v1310_v9  ;;  %1211 = vmatprep.subr.bf16.mxu0 %v1311_v10 }
  0x43   :  { %846 = vmatmul.mubr.bf16.vlgmr.msra.gmra.mrb[8].mxu0 %v1307_v7 }
  0x44   :  { %1212 = vmatpush3.bf16.msra.mxu0 %v1311_v10  ;;  %895 = vmatmul.mubr.bf16.vlgmr.msra.gmra.mrb[8].mxu1 %v1312_v11 }
  0x45   :  { %1213 = vmatprep.subr.bf16.mxu0 %v1315_v13  ;;  %853 = vmatprep.mubr.bf16.mxu0 %v1316_v14 }
  0x46   :  { %902 = vmatprep.mubr.bf16.mxu1 %v1320_v17 }
  0x48   :  { %1214 = vmatpush3.bf16.msra.mxu0 %v1315_v13 }
  0x49   :  { %1215 = vmatprep.subr.bf16.mxu0 %v1319_v16 }
  0x4b   :  { %854 = vmatmul.mubr.bf16.gmra.mrb[12].mxu0 %v1318_v15 }
  0x4c   :  { %1216 = vmatpush3.bf16.msra.mxu0 %v1319_v16  ;;  %903 = vmatmul.mubr.bf16.gmra.mrb[12].mxu1 %v1322_v18 }
  0x4d   :  { %1217 = vmatprep.subr.bf16.mxu0 %v1323_v19  ;;  %1227 = vmatprep.mubr.bf16.mxu0 %v1328_v21 }
  0x50   :  { %1218 = vmatpush3.bf16.msra.mxu0 %v1323_v19 }
  0x51   :  { %1219 = vmatprep.subr.bf16.mxu0 %v1324_v20 }
  0x54   :  { %1220 = vmatpush3.bf16.msra.mxu0 %v1324_v20 }
  0x55   :  { %1221 = vmatprep.subr.bf16.mxu0 %v1325_v22 }
  0x58   :  { %1222 = vmatpush3.bf16.msra.mxu0 %v1325_v22 }
  0x59   :  { %1223 = vmatprep.subr.bf16.mxu0 %v1326_v23 }
  0x5c   :  { %1224 = vmatpush3.bf16.msra.mxu0 %v1326_v23 }
  0x5d   :  { %1225 = vmatprep.subr.bf16.mxu0 %v1327_v24 }
  0x60   :  { %1226 = vmatpush3.bf16.msra.mxu0 %v1327_v24 }
  0x63   :  { %1228 = vmatmul.mubr.bf16.vlgmr.msra.gmra.mrb[16].mxu0 %v1329_v25  ;;  %v1088_v25 = vld [vmem:[%s1637_s2] ss:$0 sm:$0xff] }
  0xf6   :  { %v1105_v26 = vpop.f32.mrb[0].mxu0 }
  0xf7   :  { %v1133_v27 = vpop.f32.mrb[0].mxu1  ;;  %v1106_v28 = vpop.f32.mrb[1].mxu0 }
  0xf8   :  { %v1107_v29 = vadd.f32 %v1106_v28, %v1105_v26  ;;  %v1134_v30 = vpop.f32.mrb[1].mxu1  ;;  %v1108_v31 = vpop.f32.mrb[2].mxu0 }
  0xf9   :  { %v1135_v32 = vadd.f32 %v1134_v30, %v1133_v27  ;;  %v1136_v33 = vpop.f32.mrb[2].mxu1  ;;  %v1109_v34 = vpop.f32.mrb[3].mxu0 }
  0xfa   :  { %v1110_v35 = vadd.f32 %v1109_v34, %v1108_v31  ;;  %v1137_v36 = vpop.f32.mrb[3].mxu1 }
  0xfb   :  { %v799_v37 = vadd.f32 %v1135_v32, %v1107_v29  ;;  %v1138_v38 = vadd.f32 %v1137_v36, %v1136_v33 }
  0xfd   :  { %v802_v39 = vadd.f32 %v1138_v38, %v1110_v35 }
  0xfe   :  { %v1111_v40 = vpop.f32.mrb[4].mxu0 }
  0xff   :  { %v1139_v41 = vpop.f32.mrb[4].mxu1  ;;  %v1112_v42 = vpop.f32.mrb[5].mxu0 }
 0x100   :  { %v1140_v43 = vpop.f32.mrb[5].mxu1  ;;  %v1113_v44 = vadd.f32 %v1112_v42, %v1111_v40  ;;  %v1114_v46 = vpop.f32.mrb[6].mxu0 }
 0x101   :  { %v1141_v45 = vadd.f32 %v1140_v43, %v1139_v41  ;;  %v1142_v47 = vpop.f32.mrb[6].mxu1  ;;  %v1115_v48 = vpop.f32.mrb[7].mxu0 }
 0x102   :  { %v1143_v49 = vpop.f32.mrb[7].mxu1  ;;  %v1116_v51 = vadd.f32 %v1115_v48, %v1114_v46 }
 0x103   :  { %v807_v50 = vadd.f32 %v1141_v45, %v1113_v44  ;;  %v1144_v52 = vadd.f32 %v1143_v49, %v1142_v47 }
 0x105   :  { %v810_v53 = vadd.f32 %v1144_v52, %v1116_v51 }
 0x116   :  { %v1161_v54 = vpop.f32.mrb[8].mxu0 }
 0x117   :  { %v1162_v55 = vpop.f32.mrb[9].mxu0  ;;  %v1189_v58 = vpop.f32.mrb[8].mxu1 }
 0x118   :  { %v1163_v56 = vadd.f32 %v1162_v55, %v1161_v54  ;;  %v1164_v57 = vpop.f32.mrb[10].mxu0  ;;  %v1190_v62 = vpop.f32.mrb[9].mxu1 }
 0x119   :  { %v1165_v59 = vpop.f32.mrb[11].mxu0  ;;  %v1191_v63 = vadd.f32 %v1190_v62, %v1189_v58  ;;  %v1192_v0 = vpop.f32.mrb[10].mxu1 }
 0x11a   :  { %v848_v60 = vadd.f32 %v1163_v56, %v799_v37  ;;  %v1166_v61 = vadd.f32 %v1165_v59, %v1164_v57  ;;  %v1193_v2 = vpop.f32.mrb[11].mxu1 }
 0x11b   :  { %v1194_v3 = vadd.f32 %v1193_v2, %v1192_v0 }
 0x11c   :  { %v851_v1 = vadd.f32 %v1166_v61, %v802_v39  ;;  %v897_v4 = vadd.f32 %v1191_v63, %v848_v60 }
 0x11e   :  { %v1167_v5 = vpop.f32.mrb[12].mxu0  ;;  %v900_v7 = vadd.f32 %v1194_v3, %v851_v1 }
 0x11f   :  { %v1168_v6 = vpop.f32.mrb[13].mxu0  ;;  %v1195_v10 = vpop.f32.mrb[12].mxu1 }
 0x120   :  { %v1169_v8 = vadd.f32 %v1168_v6, %v1167_v5  ;;  %v1170_v9 = vpop.f32.mrb[14].mxu0  ;;  %v1196_v14 = vpop.f32.mrb[13].mxu1 }
 0x121   :  { %v1171_v11 = vpop.f32.mrb[15].mxu0  ;;  %v1197_v15 = vadd.f32 %v1196_v14, %v1195_v10  ;;  %v1198_v16 = vpop.f32.mrb[14].mxu1 }
 0x122   :  { %v856_v12 = vadd.f32 %v1169_v8, %v807_v50  ;;  %v1172_v13 = vadd.f32 %v1171_v11, %v1170_v9  ;;  %v1199_v18 = vpop.f32.mrb[15].mxu1 }
 0x123   :  { %v1200_v19 = vadd.f32 %v1199_v18, %v1198_v16 }
 0x124   :  { %v859_v17 = vadd.f32 %v1172_v13, %v810_v53  ;;  %v905_v20 = vadd.f32 %v1197_v15, %v856_v12 }
 0x126   :  { %v908_v21 = vadd.f32 %v1200_v19, %v859_v17 }
 0x136   :  { %v1229_v22 = vpop.f32.mrb[16].mxu0 }
 0x137   :  { %v954_v23 = vadd.f32 %v1229_v22, %v905_v20  ;;  %v945_v24 = vpop.f32.mrb[17].mxu0 }
 0x138   :  { %v946_v26 = vadd.f32 %v945_v24, %v897_v4  ;;  %v1230_v27 = vpop.f32.mrb[18].mxu0 }
 0x139   :  { %v957_v28 = vadd.f32 %v1230_v27, %v908_v21  ;;  %v948_v29 = vpop.f32.mrb[19].mxu0  ;;  %v984_v31 = vadd.f32 %v1088_v25, %v954_v23 }
 0x13a   :  { %v949_v30 = vadd.f32 %v948_v29, %v900_v7  ;;  %v982_v32 = vadd.f32 %v1088_v25, %v946_v26 }
 0x13b   :  { %v988_v33 = vmax.f32 %v984_v31, 0.0  ;;  %v985_v34 = vadd.f32 %v1088_v25, %v957_v28 }
 0x13c   :  { %v986_v35 = vmax.f32 %v982_v32, 0.0  ;;  %v983_v36 = vadd.f32 %v1088_v25, %v949_v30 }
 0x13d   :  { %992 = vst [vmem:[%s1638_s3 + $0x10] sm:$0xff] %v988_v33  ;;  %v989_v37 = vmax.f32 %v985_v34, 0.0 }
 0x13e   :  { %990 = vst [vmem:[%s1638_s3] sm:$0xff] %v986_v35  ;;  %v987_v38 = vmax.f32 %v983_v36, 0.0 }
 0x13f   :  { %993 = vst [vmem:[%s1638_s3 + $0x18] sm:$0xff] %v989_v37 }
 0x140   :  { %991 = vst [vmem:[%s1638_s3 + $0x8] sm:$0xff] %v987_v38 }

// kernel: resnet34_forward.56
= control target key start
LH: loop header
LB: loop body
LE: loop exit
PB: predicated region body
PF: predicated region fallthrough
CT: control target
= control target key end

     0   :  { %s2029_s1 = inlined_call_operand.vmem [shape: bf16[1152,256], index: 1, kind: input, shape index: {}]   ;;  %s2030_s0 = inlined_call_operand.vmem [shape: bf16[8,1152], index: 0, kind: input, shape index: {}]   ;;  %s2031_s2 = inlined_call_operand.vmem [shape: f32[1,256], index: 2, kind: input, shape index: {}]   ;;  %s2032_s3 = inlined_call_operand.vmem [shape: f32[8,256], index: 3, kind: output, shape index: {}]  }
   0x1   :  { %v1315_v0 = vld [vmem:[%s2029_s1 + $0x4] ss:$8 sps:$4 sm:$0xff]   ;;  %v1319_v2 = vld [vmem:[%s2029_s1] ss:$8 sps:$4 sm:$0xff]   ;;  %v1321_v4 = vld [vmem:[%s2029_s1 + $0x14] ss:$8 sps:$4 sm:$0xff]  }
   0x2   :  { %v1317_v1 = vld [vmem:[%s2029_s1 + $0x104] ss:$8 sps:$4 sm:$0xff]   ;;  %924 = vmatprep.subr.bf16.mxu0 %v1315_v0  ;;  %v1320_v3 = vld [vmem:[%s2029_s1 + $0x100] ss:$8 sps:$4 sm:$0xff]   ;;  %v1323_v5 = vld [vmem:[%s2029_s1 + $0x114] ss:$8 sps:$4 sm:$0xff]  }
   0x3   :  { %965 = vmatprep.subr.bf16.mxu1 %v1317_v1  ;;  %925 = vmatpush1.bf16.msra.mxu0 %v1319_v2  ;;  %v1325_v6 = vld [vmem:[%s2029_s1 + $0x10] ss:$8 sps:$4 sm:$0xff]   ;;  %v1327_v8 = vld [vmem:[%s2029_s1 + $0x24] ss:$8 sps:$4 sm:$0xff]   ;;  %v1331_v10 = vld [vmem:[%s2029_s1 + $0x20] ss:$8 sps:$4 sm:$0xff]  }
   0x4   :  { %966 = vmatpush1.bf16.msra.mxu1 %v1320_v3  ;;  %926 = vmatprep.subr.bf16.mxu0 %v1321_v4  ;;  %v1326_v7 = vld [vmem:[%s2029_s1 + $0x110] ss:$8 sps:$4 sm:$0xff]   ;;  %v1329_v9 = vld [vmem:[%s2029_s1 + $0x124] ss:$8 sps:$4 sm:$0xff]   ;;  %v1332_v11 = vld [vmem:[%s2029_s1 + $0x120] ss:$8 sps:$4 sm:$0xff]  }
   0x5   :  { %967 = vmatprep.subr.bf16.mxu1 %v1323_v5  ;;  %v1333_v12 = vld [vmem:[%s2029_s1 + $0x34] ss:$8 sps:$4 sm:$0xff]   ;;  %v1337_v14 = vld [vmem:[%s2029_s1 + $0x30] ss:$8 sps:$4 sm:$0xff]   ;;  %v1339_v16 = vld [vmem:[%s2029_s1 + $0x44] ss:$8 sps:$4 sm:$0xff]  }
   0x6   :  { %v1335_v13 = vld [vmem:[%s2029_s1 + $0x134] ss:$8 sps:$4 sm:$0xff]   ;;  %v1338_v15 = vld [vmem:[%s2029_s1 + $0x130] ss:$8 sps:$4 sm:$0xff]   ;;  %v1341_v17 = vld [vmem:[%s2029_s1 + $0x144] ss:$8 sps:$4 sm:$0xff]  }
   0x7   :  { %927 = vmatpush1.bf16.msra.mxu0 %v1325_v6  ;;  %v1343_v18 = vld [vmem:[%s2029_s1 + $0x40] ss:$8 sps:$4 sm:$0xff]   ;;  %v1345_v20 = vld [vmem:[%s2029_s1 + $0x54] ss:$8 sps:$4 sm:$0xff]   ;;  %v1349_v22 = vld [vmem:[%s2029_s1 + $0x50] ss:$8 sps:$4 sm:$0xff]  }
   0x8   :  { %968 = vmatpush1.bf16.msra.mxu1 %v1326_v7  ;;  %928 = vmatprep.subr.bf16.mxu0 %v1327_v8  ;;  %v1344_v19 = vld [vmem:[%s2029_s1 + $0x140] ss:$8 sps:$4 sm:$0xff]   ;;  %v1347_v21 = vld [vmem:[%s2029_s1 + $0x154] ss:$8 sps:$4 sm:$0xff]   ;;  %v1350_v23 = vld [vmem:[%s2029_s1 + $0x150] ss:$8 sps:$4 sm:$0xff]  }
   0x9   :  { %969 = vmatprep.subr.bf16.mxu1 %v1329_v9  ;;  %v1351_v24 = vld [vmem:[%s2029_s1 + $0x64] ss:$8 sps:$4 sm:$0xff]   ;;  %v1355_v26 = vld [vmem:[%s2029_s1 + $0x60] ss:$8 sps:$4 sm:$0xff]   ;;  %v1357_v28 = vld [vmem:[%s2029_s1 + $0x74] ss:$8 sps:$4 sm:$0xff]  }
   0xa   :  { %v1353_v25 = vld [vmem:[%s2029_s1 + $0x164] ss:$8 sps:$4 sm:$0xff]   ;;  %v1356_v27 = vld [vmem:[%s2029_s1 + $0x160] ss:$8 sps:$4 sm:$0xff]   ;;  %v1359_v29 = vld [vmem:[%s2029_s1 + $0x174] ss:$8 sps:$4 sm:$0xff]  }
   0xb   :  { %929 = vmatpush1.bf16.msra.mxu0 %v1331_v10  ;;  %v1361_v30 = vld [vmem:[%s2029_s1 + $0x70] ss:$8 sps:$4 sm:$0xff]   ;;  %v1363_v32 = vld [vmem:[%s2029_s1 + $0x84] ss:$8 sps:$4 sm:$0xff]   ;;  %v1367_v34 = vld [vmem:[%s2029_s1 + $0x80] ss:$8 sps:$4 sm:$0xff]  }
   0xc   :  { %970 = vmatpush1.bf16.msra.mxu1 %v1332_v11  ;;  %930 = vmatprep.subr.bf16.mxu0 %v1333_v12  ;;  %v1362_v31 = vld [vmem:[%s2029_s1 + $0x170] ss:$8 sps:$4 sm:$0xff]   ;;  %v1365_v33 = vld [vmem:[%s2029_s1 + $0x184] ss:$8 sps:$4 sm:$0xff]   ;;  %v1368_v35 = vld [vmem:[%s2029_s1 + $0x180] ss:$8 sps:$4 sm:$0xff]  }
   0xd   :  { %971 = vmatprep.subr.bf16.mxu1 %v1335_v13  ;;  %v1369_v36 = vld [vmem:[%s2029_s1 + $0x94] ss:$8 sps:$4 sm:$0xff]   ;;  %v1373_v38 = vld [vmem:[%s2029_s1 + $0x90] ss:$8 sps:$4 sm:$0xff]   ;;  %v1375_v40 = vld [vmem:[%s2029_s1 + $0xa4] ss:$8 sps:$4 sm:$0xff]  }
   0xe   :  { %v1371_v37 = vld [vmem:[%s2029_s1 + $0x194] ss:$8 sps:$4 sm:$0xff]   ;;  %v1374_v39 = vld [vmem:[%s2029_s1 + $0x190] ss:$8 sps:$4 sm:$0xff]   ;;  %v1377_v41 = vld [vmem:[%s2029_s1 + $0x1a4] ss:$8 sps:$4 sm:$0xff]  }
   0xf   :  { %931 = vmatpush1.bf16.msra.mxu0 %v1337_v14  ;;  %v1379_v42 = vld [vmem:[%s2029_s1 + $0xa0] ss:$8 sps:$4 sm:$0xff]   ;;  %v1381_v44 = vld [vmem:[%s2029_s1 + $0xb4] ss:$8 sps:$4 sm:$0xff]   ;;  %v1385_v49 = vld [vmem:[%s2029_s1 + $0xb0] ss:$8 sps:$4 sm:$0xff]  }
  0x10   :  { %972 = vmatpush1.bf16.msra.mxu1 %v1338_v15  ;;  %932 = vmatprep.subr.bf16.mxu0 %v1339_v16  ;;  %v1380_v43 = vld [vmem:[%s2029_s1 + $0x1a0] ss:$8 sps:$4 sm:$0xff]   ;;  %v1383_v45 = vld [vmem:[%s2029_s1 + $0x1b4] ss:$8 sps:$4 sm:$0xff]   ;;  %v1386_v50 = vld [vmem:[%s2029_s1 + $0x1b0] ss:$8 sps:$4 sm:$0xff]  }
  0x11   :  { %973 = vmatprep.subr.bf16.mxu1 %v1341_v17  ;;  %v23_v46 = vld [vmem:[%s2030_s0] sm:$0xff]  ;;  %v24_v48 = vld [vmem:[%s2030_s0 + $0x8] sm:$0xff]  ;;  %v1393_v56 = vld [vmem:[%s2029_s1 + $0xd4] ss:$8 sps:$4 sm:$0xff]  }
  0x12   :  { %v1161_v47 = vcombine.high %v23_v46, %v23_v46  ;;  %v1163_v51 = vcombine.high %v24_v48, %v24_v48  ;;  %v1387_v52 = vld [vmem:[%s2029_s1 + $0xc4] ss:$8 sps:$4 sm:$0xff]   ;;  %v1391_v54 = vld [vmem:[%s2029_s1 + $0xc0] ss:$8 sps:$4 sm:$0xff]   ;;  %v1395_v57 = vld [vmem:[%s2029_s1 + $0x1d4] ss:$8 sps:$4 sm:$0xff]   ;;  %v1160_v6 = vcombine.low %v23_v46, %v23_v46  ;;  %v1162_v7 = vcombine.low %v24_v48, %v24_v48 }
  0x13   :  { %933 = vmatpush1.bf16.msra.mxu0 %v1343_v18  ;;  %v1389_v53 = vld [vmem:[%s2029_s1 + $0x1c4] ss:$8 sps:$4 sm:$0xff]   ;;  %v1392_v55 = vld [vmem:[%s2029_s1 + $0x1c0] ss:$8 sps:$4 sm:$0xff]   ;;  %v1397_v58 = vld [vmem:[%s2029_s1 + $0xd0] ss:$8 sps:$4 sm:$0xff]  }
  0x14   :  { %974 = vmatpush1.bf16.msra.mxu1 %v1344_v19  ;;  %934 = vmatprep.subr.bf16.mxu0 %v1345_v20  ;;  %v1398_v59 = vld [vmem:[%s2029_s1 + $0x1d0] ss:$8 sps:$4 sm:$0xff]   ;;  %v1399_v60 = vld [vmem:[%s2029_s1 + $0xe4] ss:$8 sps:$4 sm:$0xff]   ;;  %v1403_v62 = vld [vmem:[%s2029_s1 + $0xe0] ss:$8 sps:$4 sm:$0xff]  }
  0x15   :  { %975 = vmatprep.subr.bf16.mxu1 %v1347_v21  ;;  %956 = vmatprep.mubr.bf16.mxu0 %v1161_v47  ;;  %v1401_v61 = vld [vmem:[%s2029_s1 + $0x1e4] ss:$8 sps:$4 sm:$0xff]   ;;  %v1404_v63 = vld [vmem:[%s2029_s1 + $0x1e0] ss:$8 sps:$4 sm:$0xff]   ;;  %v1405_v0 = vld [vmem:[%s2029_s1 + $0xf4] ss:$8 sps:$4 sm:$0xff]  }
  0x16   :  { %997 = vmatprep.mubr.bf16.mxu1 %v1163_v51  ;;  %v1407_v1 = vld [vmem:[%s2029_s1 + $0x1f4] ss:$8 sps:$4 sm:$0xff]   ;;  %v1409_v2 = vld [vmem:[%s2029_s1 + $0xf0] ss:$8 sps:$4 sm:$0xff]   ;;  %v1417_v4 = vld [vmem:[%s2029_s1 + $0x204] ss:$8 sps:$4 sm:$0xff]  }
  0x17   :  { %935 = vmatpush1.bf16.msra.mxu0 %v1349_v22  ;;  %v1410_v3 = vld [vmem:[%s2029_s1 + $0x1f0] ss:$8 sps:$4 sm:$0xff]   ;;  %v1420_v5 = vld [vmem:[%s2029_s1 + $0x304] ss:$8 sps:$4 sm:$0xff]   ;;  %v1415_v8 = vld [vmem:[%s2029_s1 + $0x200] ss:$8 sps:$4 sm:$0xff]  }
  0x18   :  { %976 = vmatpush1.bf16.msra.mxu1 %v1350_v23  ;;  %936 = vmatprep.subr.bf16.mxu0 %v1351_v24  ;;  %v1418_v9 = vld [vmem:[%s2029_s1 + $0x300] ss:$8 sps:$4 sm:$0xff]   ;;  %v1423_v10 = vld [vmem:[%s2029_s1 + $0x214] ss:$8 sps:$4 sm:$0xff]   ;;  %v1421_v12 = vld [vmem:[%s2029_s1 + $0x210] ss:$8 sps:$4 sm:$0xff]  }
  0x19   :  { %977 = vmatprep.subr.bf16.mxu1 %v1353_v25  ;;  %v1426_v11 = vld [vmem:[%s2029_s1 + $0x314] ss:$8 sps:$4 sm:$0xff]   ;;  %v1424_v13 = vld [vmem:[%s2029_s1 + $0x310] ss:$8 sps:$4 sm:$0xff]   ;;  %v1429_v14 = vld [vmem:[%s2029_s1 + $0x224] ss:$8 sps:$4 sm:$0xff]  }
  0x1a   :  { %v1432_v15 = vld [vmem:[%s2029_s1 + $0x324] ss:$8 sps:$4 sm:$0xff]   ;;  %v1427_v16 = vld [vmem:[%s2029_s1 + $0x220] ss:$8 sps:$4 sm:$0xff]   ;;  %v1435_v18 = vld [vmem:[%s2029_s1 + $0x234] ss:$8 sps:$4 sm:$0xff]  }
  0x1b   :  { %937 = vmatpush1.bf16.msra.mxu0 %v1355_v26  ;;  %v1430_v17 = vld [vmem:[%s2029_s1 + $0x320] ss:$8 sps:$4 sm:$0xff]   ;;  %v1438_v19 = vld [vmem:[%s2029_s1 + $0x334] ss:$8 sps:$4 sm:$0xff]   ;;  %v1433_v20 = vld [vmem:[%s2029_s1 + $0x230] ss:$8 sps:$4 sm:$0xff]  }
  0x1c   :  { %978 = vmatpush1.bf16.msra.mxu1 %v1356_v27  ;;  %938 = vmatprep.subr.bf16.mxu0 %v1357_v28  ;;  %v1436_v21 = vld [vmem:[%s2029_s1 + $0x330] ss:$8 sps:$4 sm:$0xff]   ;;  %v1441_v22 = vld [vmem:[%s2029_s1 + $0x244] ss:$8 sps:$4 sm:$0xff]   ;;  %v1439_v24 = vld [vmem:[%s2029_s1 + $0x240] ss:$8 sps:$4 sm:$0xff]  }
  0x1d   :  { %979 = vmatprep.subr.bf16.mxu1 %v1359_v29  ;;  %v1444_v23 = vld [vmem:[%s2029_s1 + $0x344] ss:$8 sps:$4 sm:$0xff]   ;;  %v1442_v25 = vld [vmem:[%s2029_s1 + $0x340] ss:$8 sps:$4 sm:$0xff]   ;;  %v1447_v26 = vld [vmem:[%s2029_s1 + $0x254] ss:$8 sps:$4 sm:$0xff]  }
  0x1e   :  { %v1450_v27 = vld [vmem:[%s2029_s1 + $0x354] ss:$8 sps:$4 sm:$0xff]   ;;  %v1445_v28 = vld [vmem:[%s2029_s1 + $0x250] ss:$8 sps:$4 sm:$0xff]   ;;  %v1480_v51 = vld [vmem:[%s2029_s1 + $0x3a4] ss:$8 sps:$4 sm:$0xff]  }
  0x1f   :  { %939 = vmatpush1.bf16.msra.mxu0 %v1361_v30  ;;  %v1448_v29 = vld [vmem:[%s2029_s1 + $0x350] ss:$8 sps:$4 sm:$0xff]   ;;  %v1453_v30 = vld [vmem:[%s2029_s1 + $0x264] ss:$8 sps:$4 sm:$0xff]   ;;  %v1471_v46 = vld [vmem:[%s2029_s1 + $0x294] ss:$8 sps:$4 sm:$0xff]  }
  0x20   :  { %980 = vmatpush1.bf16.msra.mxu1 %v1362_v31  ;;  %940 = vmatprep.subr.bf16.mxu0 %v1363_v32  ;;  %v1456_v31 = vld [vmem:[%s2029_s1 + $0x364] ss:$8 sps:$4 sm:$0xff]   ;;  %v1840_v32 = vld [vmem:[%s2030_s0 + $0x10] sm:$0xff] }
  0x21   :  { %981 = vmatprep.subr.bf16.mxu1 %v1365_v33  ;;  %v1451_v33 = vld [vmem:[%s2029_s1 + $0x260] ss:$8 sps:$4 sm:$0xff]   ;;  %v1474_v47 = vld [vmem:[%s2029_s1 + $0x394] ss:$8 sps:$4 sm:$0xff]   ;;  %v1469_v48 = vld [vmem:[%s2029_s1 + $0x290] ss:$8 sps:$4 sm:$0xff]  }
  0x23   :  { %941 = vmatpush1.bf16.msra.mxu0 %v1367_v34  ;;  %v1454_v34 = vld [vmem:[%s2029_s1 + $0x360] ss:$8 sps:$4 sm:$0xff]  }
  0x24   :  { %982 = vmatpush1.bf16.msra.mxu1 %v1368_v35  ;;  %942 = vmatprep.subr.bf16.mxu0 %v1369_v36  ;;  %v1165_v35 = vcombine.high %v1840_v32, %v1840_v32  ;;  %v1853_v36 = vld [vmem:[%s2030_s0 + $0x18] sm:$0xff] }
  0x25   :  { %983 = vmatprep.subr.bf16.mxu1 %v1371_v37  ;;  %v1459_v37 = vld [vmem:[%s2029_s1 + $0x274] ss:$8 sps:$4 sm:$0xff]  }
  0x27   :  { %943 = vmatpush1.bf16.msra.mxu0 %v1373_v38  ;;  %v1167_v38 = vcombine.high %v1853_v36, %v1853_v36 }
  0x28   :  { %984 = vmatpush1.bf16.msra.mxu1 %v1374_v39  ;;  %944 = vmatprep.subr.bf16.mxu0 %v1375_v40  ;;  %v1462_v39 = vld [vmem:[%s2029_s1 + $0x374] ss:$8 sps:$4 sm:$0xff]   ;;  %v1457_v40 = vld [vmem:[%s2029_s1 + $0x270] ss:$8 sps:$4 sm:$0xff]  }
  0x29   :  { %985 = vmatprep.subr.bf16.mxu1 %v1377_v41  ;;  %v1460_v41 = vld [vmem:[%s2029_s1 + $0x370] ss:$8 sps:$4 sm:$0xff]  }
  0x2b   :  { %945 = vmatpush1.bf16.msra.mxu0 %v1379_v42  ;;  %v1465_v42 = vld [vmem:[%s2029_s1 + $0x284] ss:$8 sps:$4 sm:$0xff]  }
  0x2c   :  { %986 = vmatpush1.bf16.msra.mxu1 %v1380_v43  ;;  %946 = vmatprep.subr.bf16.mxu0 %v1381_v44  ;;  %v1468_v43 = vld [vmem:[%s2029_s1 + $0x384] ss:$8 sps:$4 sm:$0xff]   ;;  %v1463_v44 = vld [vmem:[%s2029_s1 + $0x280] ss:$8 sps:$4 sm:$0xff]  }
  0x2d   :  { %987 = vmatprep.subr.bf16.mxu1 %v1383_v45  ;;  %v1466_v45 = vld [vmem:[%s2029_s1 + $0x380] ss:$8 sps:$4 sm:$0xff]  }
  0x2f   :  { %947 = vmatpush1.bf16.msra.mxu0 %v1385_v49  ;;  %v1472_v49 = vld [vmem:[%s2029_s1 + $0x390] ss:$8 sps:$4 sm:$0xff]  }
  0x30   :  { %988 = vmatpush1.bf16.msra.mxu1 %v1386_v50  ;;  %948 = vmatprep.subr.bf16.mxu0 %v1387_v52  ;;  %v1477_v50 = vld [vmem:[%s2029_s1 + $0x2a4] ss:$8 sps:$4 sm:$0xff]   ;;  %v1475_v52 = vld [vmem:[%s2029_s1 + $0x2a0] ss:$8 sps:$4 sm:$0xff]  }
  0x31   :  { %989 = vmatprep.subr.bf16.mxu1 %v1389_v53  ;;  %v1478_v53 = vld [vmem:[%s2029_s1 + $0x3a0] ss:$8 sps:$4 sm:$0xff]  }
  0x33   :  { %949 = vmatpush1.bf16.msra.mxu0 %v1391_v54  ;;  %v1483_v54 = vld [vmem:[%s2029_s1 + $0x2b4] ss:$8 sps:$4 sm:$0xff]  }
  0x34   :  { %990 = vmatpush1.bf16.msra.mxu1 %v1392_v55  ;;  %950 = vmatprep.subr.bf16.mxu0 %v1393_v56  ;;  %v1486_v55 = vld [vmem:[%s2029_s1 + $0x3b4] ss:$8 sps:$4 sm:$0xff]   ;;  %v1481_v56 = vld [vmem:[%s2029_s1 + $0x2b0] ss:$8 sps:$4 sm:$0xff]  }
  0x35   :  { %991 = vmatprep.subr.bf16.mxu1 %v1395_v57  ;;  %v1484_v57 = vld [vmem:[%s2029_s1 + $0x3b0] ss:$8 sps:$4 sm:$0xff]  }
  0x37   :  { %951 = vmatpush1.bf16.msra.mxu0 %v1397_v58  ;;  %v1489_v58 = vld [vmem:[%s2029_s1 + $0x2c4] ss:$8 sps:$4 sm:$0xff]  }
  0x38   :  { %992 = vmatpush1.bf16.msra.mxu1 %v1398_v59  ;;  %952 = vmatprep.subr.bf16.mxu0 %v1399_v60  ;;  %v1492_v59 = vld [vmem:[%s2029_s1 + $0x3c4] ss:$8 sps:$4 sm:$0xff]   ;;  %v1487_v60 = vld [vmem:[%s2029_s1 + $0x2c0] ss:$8 sps:$4 sm:$0xff]  }
  0x39   :  { %993 = vmatprep.subr.bf16.mxu1 %v1401_v61  ;;  %v1490_v61 = vld [vmem:[%s2029_s1 + $0x3c0] ss:$8 sps:$4 sm:$0xff]  }
  0x3b   :  { %953 = vmatpush1.bf16.msra.mxu0 %v1403_v62  ;;  %v1495_v62 = vld [vmem:[%s2029_s1 + $0x2d4] ss:$8 sps:$4 sm:$0xff]  }
  0x3c   :  { %994 = vmatpush1.bf16.msra.mxu1 %v1404_v63  ;;  %954 = vmatprep.subr.bf16.mxu0 %v1405_v0  ;;  %v1498_v63 = vld [vmem:[%s2029_s1 + $0x3d4] ss:$8 sps:$4 sm:$0xff]   ;;  %v1493_v0 = vld [vmem:[%s2029_s1 + $0x2d0] ss:$8 sps:$4 sm:$0xff]  }
  0x3d   :  { %995 = vmatprep.subr.bf16.mxu1 %v1407_v1  ;;  %v1496_v1 = vld [vmem:[%s2029_s1 + $0x3d0] ss:$8 sps:$4 sm:$0xff]  }
  0x3f   :  { %955 = vmatpush1.bf16.msra.mxu0 %v1409_v2  ;;  %v1501_v2 = vld [vmem:[%s2029_s1 + $0x2e4] ss:$8 sps:$4 sm:$0xff]  }
  0x40   :  { %996 = vmatpush1.bf16.msra.mxu1 %v1410_v3  ;;  %1006 = vmatprep.subr.bf16.mxu0 %v1417_v4  ;;  %v1504_v3 = vld [vmem:[%s2029_s1 + $0x3e4] ss:$8 sps:$4 sm:$0xff]   ;;  %v1499_v4 = vld [vmem:[%s2029_s1 + $0x2e0] ss:$8 sps:$4 sm:$0xff]  }
  0x41   :  { %1047 = vmatprep.subr.bf16.mxu1 %v1420_v5  ;;  %v1502_v5 = vld [vmem:[%s2029_s1 + $0x3e0] ss:$8 sps:$4 sm:$0xff]  }
  0x42   :  { %957 = vmatmul.mubr.bf16.vlgmr.msra.gmra.mrb[0].mxu0 %v1160_v6  ;;  %v1507_v6 = vld [vmem:[%s2029_s1 + $0x2f4] ss:$8 sps:$4 sm:$0xff]  }
  0x43   :  { %998 = vmatmul.mubr.bf16.vlgmr.msra.gmra.mrb[0].mxu1 %v1162_v7  ;;  %1007 = vmatpush1.bf16.msra.mxu0 %v1415_v8  ;;  %v1510_v7 = vld [vmem:[%s2029_s1 + $0x3f4] ss:$8 sps:$4 sm:$0xff]   ;;  %v1505_v8 = vld [vmem:[%s2029_s1 + $0x2f0] ss:$8 sps:$4 sm:$0xff]  }
  0x44   :  { %1048 = vmatpush1.bf16.msra.mxu1 %v1418_v9  ;;  %1008 = vmatprep.subr.bf16.mxu0 %v1423_v10  ;;  %v1508_v9 = vld [vmem:[%s2029_s1 + $0x3f0] ss:$8 sps:$4 sm:$0xff]   ;;  %v1515_v10 = vld [vmem:[%s2029_s1 + $0x404] ss:$8 sps:$4 sm:$0xff]  }
  0x45   :  { %1049 = vmatprep.subr.bf16.mxu1 %v1426_v11  ;;  %1038 = vmatprep.mubr.bf16.mxu0 %v1165_v35  ;;  %v1164_v11 = vcombine.low %v1840_v32, %v1840_v32 }
  0x46   :  { %1079 = vmatprep.mubr.bf16.mxu1 %v1167_v38 }
  0x47   :  { %1009 = vmatpush1.bf16.msra.mxu0 %v1421_v12  ;;  %v1166_v12 = vcombine.low %v1853_v36, %v1853_v36 }
  0x48   :  { %1050 = vmatpush1.bf16.msra.mxu1 %v1424_v13  ;;  %1010 = vmatprep.subr.bf16.mxu0 %v1429_v14  ;;  %v1513_v13 = vld [vmem:[%s2029_s1 + $0x400] ss:$8 sps:$4 sm:$0xff]   ;;  %v1520_v14 = vld [vmem:[%s2029_s1 + $0x414] ss:$8 sps:$4 sm:$0xff]  }
  0x49   :  { %1051 = vmatprep.subr.bf16.mxu1 %v1432_v15  ;;  %v1518_v15 = vld [vmem:[%s2029_s1 + $0x410] ss:$8 sps:$4 sm:$0xff]  }
  0x4b   :  { %1011 = vmatpush1.bf16.msra.mxu0 %v1427_v16  ;;  %v1540_v16 = vmov 0  }
  0x4c   :  { %1052 = vmatpush1.bf16.msra.mxu1 %v1430_v17  ;;  %1012 = vmatprep.subr.bf16.mxu0 %v1435_v18  ;;  %v1523_v17 = vld [vmem:[%s2029_s1 + $0x424] ss:$8 sps:$4 sm:$0xff]   ;;  %v1521_v18 = vld [vmem:[%s2029_s1 + $0x420] ss:$8 sps:$4 sm:$0xff]  }
  0x4d   :  { %1053 = vmatprep.subr.bf16.mxu1 %v1438_v19  ;;  %v1526_v19 = vld [vmem:[%s2029_s1 + $0x434] ss:$8 sps:$4 sm:$0xff]  }
  0x4f   :  { %1013 = vmatpush1.bf16.msra.mxu0 %v1433_v20  ;;  %v1524_v20 = vld [vmem:[%s2029_s1 + $0x430] ss:$8 sps:$4 sm:$0xff]  }
  0x50   :  { %1054 = vmatpush1.bf16.msra.mxu1 %v1436_v21  ;;  %1014 = vmatprep.subr.bf16.mxu0 %v1441_v22  ;;  %v1529_v21 = vld [vmem:[%s2029_s1 + $0x444] ss:$8 sps:$4 sm:$0xff]   ;;  %v1527_v22 = vld [vmem:[%s2029_s1 + $0x440] ss:$8 sps:$4 sm:$0xff]  }
  0x51   :  { %1055 = vmatprep.subr.bf16.mxu1 %v1444_v23  ;;  %v1532_v23 = vld [vmem:[%s2029_s1 + $0x454] ss:$8 sps:$4 sm:$0xff]  }
  0x53   :  { %1015 = vmatpush1.bf16.msra.mxu0 %v1439_v24  ;;  %v1530_v24 = vld [vmem:[%s2029_s1 + $0x450] ss:$8 sps:$4 sm:$0xff]  }
  0x54   :  { %1056 = vmatpush1.bf16.msra.mxu1 %v1442_v25  ;;  %1016 = vmatprep.subr.bf16.mxu0 %v1447_v26  ;;  %v1535_v25 = vld [vmem:[%s2029_s1 + $0x464] ss:$8 sps:$4 sm:$0xff]   ;;  %v1533_v26 = vld [vmem:[%s2029_s1 + $0x460] ss:$8 sps:$4 sm:$0xff]  }
  0x55   :  { %1057 = vmatprep.subr.bf16.mxu1 %v1450_v27  ;;  %v1538_v27 = vld [vmem:[%s2029_s1 + $0x474] ss:$8 sps:$4 sm:$0xff]  }
  0x57   :  { %1017 = vmatpush1.bf16.msra.mxu0 %v1445_v28  ;;  %v1536_v28 = vld [vmem:[%s2029_s1 + $0x470] ss:$8 sps:$4 sm:$0xff]  }
  0x58   :  { %1058 = vmatpush1.bf16.msra.mxu1 %v1448_v29  ;;  %1018 = vmatprep.subr.bf16.mxu0 %v1453_v30  ;;  %v1539_v29 = vld [vmem:[%s2030_s0 + $0x20] ss:$0 sps:$4 sm:$0xff]  }
  0x59   :  { %1059 = vmatprep.subr.bf16.mxu1 %v1456_v31 }
  0x5b   :  { %1019 = vmatpush1.bf16.msra.mxu0 %v1451_v33 }
  0x5c   :  { %1060 = vmatpush1.bf16.msra.mxu1 %v1454_v34  ;;  %1020 = vmatprep.subr.bf16.mxu0 %v1459_v37 }
  0x5d   :  { %1061 = vmatprep.subr.bf16.mxu1 %v1462_v39 }
  0x5f   :  { %1021 = vmatpush1.bf16.msra.mxu0 %v1457_v40 }
  0x60   :  { %1062 = vmatpush1.bf16.msra.mxu1 %v1460_v41  ;;  %1022 = vmatprep.subr.bf16.mxu0 %v1465_v42 }
  0x61   :  { %1063 = vmatprep.subr.bf16.mxu1 %v1468_v43 }
  0x63   :  { %1023 = vmatpush1.bf16.msra.mxu0 %v1463_v44 }
  0x64   :  { %1064 = vmatpush1.bf16.msra.mxu1 %v1466_v45  ;;  %1024 = vmatprep.subr.bf16.mxu0 %v1471_v46 }
  0x65   :  { %1065 = vmatprep.subr.bf16.mxu1 %v1474_v47 }
  0x67   :  { %1025 = vmatpush1.bf16.msra.mxu0 %v1469_v48 }
  0x68   :  { %1066 = vmatpush1.bf16.msra.mxu1 %v1472_v49  ;;  %1026 = vmatprep.subr.bf16.mxu0 %v1477_v50 }
  0x69   :  { %1067 = vmatprep.subr.bf16.mxu1 %v1480_v51 }
  0x6b   :  { %1027 = vmatpush1.bf16.msra.mxu0 %v1475_v52  ;;  %v1140_v52 = vlaneseq }
  0x6c   :  { %1068 = vmatpush1.bf16.msra.mxu1 %v1478_v53  ;;  %1028 = vmatprep.subr.bf16.mxu0 %v1483_v54 }
  0x6d   :  { %1069 = vmatprep.subr.bf16.mxu1 %v1486_v55  ;;  %v1141_v53 = vshrl.u32 %v1140_v52, 7  ;;  %v1138_v55 = vld [vmem:[%s2031_s2] sm:$0x3] }
  0x6f   :  { %1029 = vmatpush1.bf16.msra.mxu0 %v1481_v56  ;;  %v1142_v54 = vsub.s32 0, %v1141_v53  ;;  %v1146_v56 = vsub.s32 1, %v1141_v53 }
  0x70   :  { %1070 = vmatpush1.bf16.msra.mxu1 %v1484_v57  ;;  %1030 = vmatprep.subr.bf16.mxu0 %v1489_v58 }
  0x71   :  { %1071 = vmatprep.subr.bf16.mxu1 %v1492_v59  ;;  %v1143_v59 = vrot.slane %v1138_v55, %v1142_v54 }
  0x73   :  { %1031 = vmatpush1.bf16.msra.mxu0 %v1487_v60 }
  0x74   :  { %1072 = vmatpush1.bf16.msra.mxu1 %v1490_v61  ;;  %1032 = vmatprep.subr.bf16.mxu0 %v1495_v62  ;;  %v1147_v62 = vrot.slane %v1138_v55, %v1146_v56 }
  0x75   :  { %1073 = vmatprep.subr.bf16.mxu1 %v1498_v63 }
  0x77   :  { %1033 = vmatpush1.bf16.msra.mxu0 %v1493_v0 }
  0x78   :  { %1074 = vmatpush1.bf16.msra.mxu1 %v1496_v1  ;;  %1034 = vmatprep.subr.bf16.mxu0 %v1501_v2 }
  0x79   :  { %1075 = vmatprep.subr.bf16.mxu1 %v1504_v3 }
  0x7b   :  { %1035 = vmatpush1.bf16.msra.mxu0 %v1499_v4 }
  0x7c   :  { %1076 = vmatpush1.bf16.msra.mxu1 %v1502_v5  ;;  %1036 = vmatprep.subr.bf16.mxu0 %v1507_v6 }
  0x7d   :  { %1077 = vmatprep.subr.bf16.mxu1 %v1510_v7 }
  0x7f   :  { %1037 = vmatpush1.bf16.msra.mxu0 %v1505_v8 }
  0x80   :  { %1078 = vmatpush1.bf16.msra.mxu1 %v1508_v9  ;;  %1088 = vmatprep.subr.bf16.mxu0 %v1515_v10 }
  0x82   :  { %1039 = vmatmul.mubr.bf16.vlgmr.msra.gmra.mrb[4].mxu0 %v1164_v11 }
  0x83   :  { %1080 = vmatmul.mubr.bf16.vlgmr.msra.gmra.mrb[4].mxu1 %v1166_v12  ;;  %1089 = vmatpush1.bf16.msra.mxu0 %v1513_v13 }
  0x84   :  { %1120 = vmatprep.mubr.bf16.mxu0 %v1540_v16  ;;  %1090 = vmatprep.subr.bf16.mxu0 %v1520_v14 }
  0x87   :  { %1091 = vmatpush1.bf16.msra.mxu0 %v1518_v15 }
  0x88   :  { %1092 = vmatprep.subr.bf16.mxu0 %v1523_v17 }
  0x8b   :  { %1093 = vmatpush1.bf16.msra.mxu0 %v1521_v18 }
  0x8c   :  { %1094 = vmatprep.subr.bf16.mxu0 %v1526_v19 }
  0x8f   :  { %1095 = vmatpush1.bf16.msra.mxu0 %v1524_v20 }
  0x90   :  { %1096 = vmatprep.subr.bf16.mxu0 %v1529_v21 }
  0x93   :  { %1097 = vmatpush1.bf16.msra.mxu0 %v1527_v22 }
  0x94   :  { %1098 = vmatprep.subr.bf16.mxu0 %v1532_v23 }
  0x97   :  { %1099 = vmatpush1.bf16.msra.mxu0 %v1530_v24 }
  0x98   :  { %1100 = vmatprep.subr.bf16.mxu0 %v1535_v25 }
  0x9b   :  { %1101 = vmatpush1.bf16.msra.mxu0 %v1533_v26 }
  0x9c   :  { %1102 = vmatprep.subr.bf16.mxu0 %v1538_v27 }
  0x9f   :  { %1103 = vmatpush1.bf16.msra.mxu0 %v1536_v28 }
  0xa2   :  { %1121 = vmatmul.mubr.bf16.vlgmr.msra.gmra.mrb[8].mxu0 %v1539_v29 }
 0x115   :  { %v958_v30 = vpop.f32.mrb[0].mxu0 }
 0x116   :  { %v999_v31 = vpop.f32.mrb[0].mxu1  ;;  %v960_v33 = vpop.f32.mrb[1].mxu0 }
 0x117   :  { %v1000_v32 = vadd.f32 %v999_v31, %v958_v30  ;;  %v1001_v34 = vpop.f32.mrb[1].mxu1  ;;  %v962_v36 = vpop.f32.mrb[2].mxu0 }
 0x118   :  { %v1002_v35 = vadd.f32 %v1001_v34, %v960_v33  ;;  %v1003_v37 = vpop.f32.mrb[2].mxu1  ;;  %v963_v38 = vpop.f32.mrb[3].mxu0 }
 0x119   :  { %v1004_v39 = vpop.f32.mrb[3].mxu1 }
 0x155   :  { %v1040_v40 = vpop.f32.mrb[4].mxu0 }
 0x156   :  { %v1081_v41 = vpop.f32.mrb[4].mxu1  ;;  %v1041_v42 = vadd.f32 %v1040_v40, %v1000_v32  ;;  %v1042_v43 = vpop.f32.mrb[5].mxu0 }
 0x157   :  { %v1083_v44 = vpop.f32.mrb[5].mxu1  ;;  %v1043_v45 = vadd.f32 %v1042_v43, %v1002_v35  ;;  %v1044_v46 = vpop.f32.mrb[6].mxu0 }
 0x158   :  { %v1085_v47 = vpop.f32.mrb[6].mxu1  ;;  %v1082_v48 = vadd.f32 %v1081_v41, %v1041_v42  ;;  %v1045_v49 = vpop.f32.mrb[7].mxu0 }
 0x159   :  { %v1086_v50 = vpop.f32.mrb[7].mxu1  ;;  %v1084_v51 = vadd.f32 %v1083_v44, %v1043_v45 }
 0x175   :  { %v1122_v57 = vpop.f32.mrb[8].mxu0 }
 0x176   :  { %v1123_v58 = vadd.f32 %v1122_v57, %v1082_v48  ;;  %v1124_v60 = vpop.f32.mrb[9].mxu0 }
 0x177   :  { %v1125_v61 = vadd.f32 %v1124_v60, %v1084_v51  ;;  %v1126_v63 = vpop.f32.mrb[10].mxu0 }
 0x178   :  { %v1127_v0 = vpop.f32.mrb[11].mxu0  ;;  %v1150_v1 = vadd.f32 %v1143_v59, %v1123_v58 }
 0x179   :  { %v1151_v2 = vadd.f32 %v1147_v62, %v1125_v61 }
 0x17a   :  { %v1152_v3 = vmax.f32 %v1150_v1, 0.0 }
 0x17b   :  { %v1153_v4 = vmax.f32 %v1151_v2, 0.0 }
 0x17c   :  { %1154 = vst [vmem:[%s2032_s3] sm:$0xff] %v1152_v3 }
 0x17d   :  { %1155 = vst [vmem:[%s2032_s3 + $0x8] sm:$0xff] %v1153_v4 }

// kernel: resnet34_forward.57
= control target key start
LH: loop header
LB: loop body
LE: loop exit
PB: predicated region body
PF: predicated region fallthrough
CT: control target
= control target key end

     0   :  { %v232_v1 = vmov 0   ;;  %v172_v18 = vlaneseq  ;;  %s313_s1 = inlined_call_operand.vmem [shape: bf16[128,256], index: 1, kind: input, shape index: {}]   ;;  %s314_s0 = inlined_call_operand.vmem [shape: bf16[8,128], index: 0, kind: input, shape index: {}]   ;;  %s315_s2 = inlined_call_operand.vmem [shape: f32[1,256], index: 2, kind: input, shape index: {}]   ;;  %s316_s3 = inlined_call_operand.vmem [shape: f32[8,256], index: 3, kind: output, shape index: {}]  }
   0x1   :  { %v208_v0 = vld [vmem:[%s313_s1 + $0x4] ss:$8 sps:$4 sm:$0xff]   ;;  %152 = vmatprep.mubr.bf16.mxu0 %v232_v1  ;;  %v210_v2 = vld [vmem:[%s313_s1] ss:$8 sps:$4 sm:$0xff]   ;;  %v211_v3 = vld [vmem:[%s313_s1 + $0x14] ss:$8 sps:$4 sm:$0xff]  }
   0x2   :  { %120 = vmatprep.subr.bf16.mxu0 %v208_v0  ;;  %v213_v4 = vld [vmem:[%s313_s1 + $0x10] ss:$8 sps:$4 sm:$0xff]   ;;  %v214_v5 = vld [vmem:[%s313_s1 + $0x24] ss:$8 sps:$4 sm:$0xff]   ;;  %v216_v6 = vld [vmem:[%s313_s1 + $0x20] ss:$8 sps:$4 sm:$0xff]  }
   0x3   :  { %121 = vmatpush1.bf16.msra.mxu0 %v210_v2  ;;  %v217_v7 = vld [vmem:[%s313_s1 + $0x34] ss:$8 sps:$4 sm:$0xff]   ;;  %v219_v8 = vld [vmem:[%s313_s1 + $0x30] ss:$8 sps:$4 sm:$0xff]   ;;  %v220_v9 = vld [vmem:[%s313_s1 + $0x44] ss:$8 sps:$4 sm:$0xff]  }
   0x4   :  { %122 = vmatprep.subr.bf16.mxu0 %v211_v3  ;;  %v222_v10 = vld [vmem:[%s313_s1 + $0x40] ss:$8 sps:$4 sm:$0xff]   ;;  %v223_v11 = vld [vmem:[%s313_s1 + $0x54] ss:$8 sps:$4 sm:$0xff]   ;;  %v225_v12 = vld [vmem:[%s313_s1 + $0x50] ss:$8 sps:$4 sm:$0xff]  }
   0x5   :  { %v226_v13 = vld [vmem:[%s313_s1 + $0x64] ss:$8 sps:$4 sm:$0xff]   ;;  %v228_v14 = vld [vmem:[%s313_s1 + $0x60] ss:$8 sps:$4 sm:$0xff]   ;;  %v229_v15 = vld [vmem:[%s313_s1 + $0x74] ss:$8 sps:$4 sm:$0xff]  }
   0x6   :  { %v231_v16 = vld [vmem:[%s313_s1 + $0x70] ss:$8 sps:$4 sm:$0xff]   ;;  %v23_v17 = vld [vmem:[%s314_s0] sm:$0xf]  ;;  %v173_v19 = vshrl.u32 %v172_v18, 7 }
   0x7   :  { %123 = vmatpush1.bf16.msra.mxu0 %v213_v4  ;;  %v170_v21 = vld [vmem:[%s315_s2] sm:$0x3] }
   0x8   :  { %124 = vmatprep.subr.bf16.mxu0 %v214_v5  ;;  %v174_v20 = vsub.s32 0, %v173_v19  ;;  %v178_v22 = vsub.s32 1, %v173_v19 }
   0xa   :  { %v175_v23 = vrot.slane %v170_v21, %v174_v20  ;;  %v179_v25 = vrot.slane %v170_v21, %v178_v22 }
   0xb   :  { %125 = vmatpush1.bf16.msra.mxu0 %v216_v6 }
   0xc   :  { %126 = vmatprep.subr.bf16.mxu0 %v217_v7 }
   0xf   :  { %127 = vmatpush1.bf16.msra.mxu0 %v219_v8 }
  0x10   :  { %128 = vmatprep.subr.bf16.mxu0 %v220_v9 }
  0x13   :  { %129 = vmatpush1.bf16.msra.mxu0 %v222_v10 }
  0x14   :  { %130 = vmatprep.subr.bf16.mxu0 %v223_v11 }
  0x17   :  { %131 = vmatpush1.bf16.msra.mxu0 %v225_v12 }
  0x18   :  { %132 = vmatprep.subr.bf16.mxu0 %v226_v13 }
  0x1b   :  { %133 = vmatpush1.bf16.msra.mxu0 %v228_v14 }
  0x1c   :  { %134 = vmatprep.subr.bf16.mxu0 %v229_v15 }
  0x1f   :  { %135 = vmatpush1.bf16.msra.mxu0 %v231_v16 }
  0x22   :  { %153 = vmatmul.mubr.bf16.vlgmr.msra.gmra.mrb[0].mxu0 %v23_v17 }
  0xf5   :  { %v154_v24 = vpop.f32.mrb[0].mxu0 }
  0xf6   :  { %v156_v26 = vpop.f32.mrb[1].mxu0  ;;  %v182_v28 = vadd.f32 %v175_v23, %v154_v24 }
  0xf7   :  { %v158_v27 = vpop.f32.mrb[2].mxu0  ;;  %v183_v30 = vadd.f32 %v179_v25, %v156_v26 }
  0xf8   :  { %v159_v29 = vpop.f32.mrb[3].mxu0  ;;  %184 = vst [vmem:[%s316_s3] sm:$0xff] %v182_v28 }
  0xf9   :  { %185 = vst [vmem:[%s316_s3 + $0x8] sm:$0xff] %v183_v30 }

// kernel: resnet34_forward.58
= control target key start
LH: loop header
LB: loop body
LE: loop exit
PB: predicated region body
PF: predicated region fallthrough
CT: control target
= control target key end

     0   :  { %s1146_s15 = smov 0   ;;  %s1148_s16 = smov 0   ;;  %s1294_s0 = inlined_call_operand.vmem [shape: bf16[8,2560], index: 0, kind: input, shape index: {}]   ;;  %s1295_s1 = inlined_call_operand.vmem [shape: bf16[2560,256], index: 1, kind: input, shape index: {}]   ;;  %s1296_s2 = inlined_call_operand.vmem [shape: f32[1,256], index: 2, kind: input, shape index: {}]   ;;  %s1297_s3 = inlined_call_operand.vmem [shape: f32[8,256], index: 3, kind: input, shape index: {}]   ;;  %s1298_s4 = inlined_call_operand.vmem [shape: f32[8,256], index: 4, kind: output, shape index: {}]  }
   0x1   :  { %s1150_s17 = smov 0  }
   0x2 LB: > { %s23_s18 = sadd.s32 1, %s1114_s16  ;;  %p891_p0 = scmp.ge.s32.totalorder %s1118_s17, 1  ;;  %s1118_s17 = sphi %s1150_s17, %s14_s17   ;;  %s1114_s16 = sphi %s1148_s16, %s1300_s16   ;;  %s1110_s15 = sphi %s1146_s15, %s1299_s15  }
   0x3   : > { %p24_p1 = scmp.ge.s32.totalorder %s23_s18, 5  ;;  %p203_p2 = scmp.lt.s32.totalorder %s1118_s17, 6 }
   0x5   : > { %s1302_s18 = smov (%p24_p1, %s23_s18), 0  ;;  %p204_p3 = pnand %p891_p0, %p203_p2 }
   0x6   : > { %s892_s19 = sshll.u32 (!%p204_p3), %s1110_s15, 2  ;;  %s894_s20 = sshll.u32 (!%p204_p3), %s1110_s15, 6 }
   0x7   : > { %207 = sbr.rel (%p204_p3) target bundleno = 322 (0x142), region = 36  ;;  %p247_p4 = scmp.lt.s32.totalorder (!%p204_p3), %s892_s19, 19 }
   0x8   : > { %p255_p5 = scmp.lt.s32.totalorder (!%p204_p3), %s894_s20, 319  ;;  %p897_p6 = scmp.ne.s32.totalorder (!%p204_p3), %s1110_s15, 0 }
   0xe   : > { %s1304_s19 = smov (!%p247_p4, %s892_s19), 19  ;;  %s1306_s20 = smov (!%p255_p5, %s894_s20), 319 }
   0xf   : > { %s893_s21 = sshll.u32 %s1304_s19, 2  ;;  %s970_s25 = sshll.u32 %s1306_s20, 3  ;;  %v1120_v0 = vmov (!%p897_p6), 0.0  }
  0x10   : > { %s1171_s24 = scalar_lea.vmem %s1294_s0, %s893_s21  ;;  %s1176_s28 = scalar_lea.vmem %s1295_s1, %s970_s25  ;;  %275 = vst [vmem:[%s1298_s4] sm:$0xff] (!%p897_p6), %v1120_v0  ;;  %276 = vst [vmem:[%s1298_s4 + $0x8] sm:$0xff] (!%p897_p6), %v1120_v0 }
  0x11   : > { %274 = sbr.rel (%p897_p6) target bundleno = 24 (0x18), region = 40 }
  0x18 PF: > { %v996_v1 = vld [vmem:[%s1176_s28 + $0x4] ss:$8 sps:$4 sm:$0xff]   ;;  %v1000_v3 = vld [vmem:[%s1176_s28] ss:$8 sps:$4 sm:$0xff]   ;;  %v1002_v5 = vld [vmem:[%s1176_s28 + $0x14] ss:$8 sps:$4 sm:$0xff]  }
  0x19   : > { %v998_v2 = vld [vmem:[%s1176_s28 + $0x104] ss:$8 sps:$4 sm:$0xff]   ;;  %679 = vmatprep.subr.bf16.mxu0 %v996_v1  ;;  %v1001_v4 = vld [vmem:[%s1176_s28 + $0x100] ss:$8 sps:$4 sm:$0xff]   ;;  %v1004_v6 = vld [vmem:[%s1176_s28 + $0x114] ss:$8 sps:$4 sm:$0xff]  }
  0x1a   : > { %720 = vmatprep.subr.bf16.mxu1 %v998_v2  ;;  %680 = vmatpush1.bf16.msra.mxu0 %v1000_v3  ;;  %v1006_v7 = vld [vmem:[%s1176_s28 + $0x10] ss:$8 sps:$4 sm:$0xff]   ;;  %v1008_v9 = vld [vmem:[%s1176_s28 + $0x24] ss:$8 sps:$4 sm:$0xff]   ;;  %v1012_v11 = vld [vmem:[%s1176_s28 + $0x20] ss:$8 sps:$4 sm:$0xff]  }
  0x1b   : > { %721 = vmatpush1.bf16.msra.mxu1 %v1001_v4  ;;  %681 = vmatprep.subr.bf16.mxu0 %v1002_v5  ;;  %v1007_v8 = vld [vmem:[%s1176_s28 + $0x110] ss:$8 sps:$4 sm:$0xff]   ;;  %v1010_v10 = vld [vmem:[%s1176_s28 + $0x124] ss:$8 sps:$4 sm:$0xff]   ;;  %v1013_v12 = vld [vmem:[%s1176_s28 + $0x120] ss:$8 sps:$4 sm:$0xff]  }
  0x1c   : > { %722 = vmatprep.subr.bf16.mxu1 %v1004_v6  ;;  %v1014_v13 = vld [vmem:[%s1176_s28 + $0x34] ss:$8 sps:$4 sm:$0xff]   ;;  %v1018_v15 = vld [vmem:[%s1176_s28 + $0x30] ss:$8 sps:$4 sm:$0xff]   ;;  %v1020_v17 = vld [vmem:[%s1176_s28 + $0x44] ss:$8 sps:$4 sm:$0xff]  }
  0x1d   : > { %v1016_v14 = vld [vmem:[%s1176_s28 + $0x134] ss:$8 sps:$4 sm:$0xff]   ;;  %v1019_v16 = vld [vmem:[%s1176_s28 + $0x130] ss:$8 sps:$4 sm:$0xff]   ;;  %v1022_v18 = vld [vmem:[%s1176_s28 + $0x144] ss:$8 sps:$4 sm:$0xff]  }
  0x1e   : > { %682 = vmatpush1.bf16.msra.mxu0 %v1006_v7  ;;  %v1024_v19 = vld [vmem:[%s1176_s28 + $0x40] ss:$8 sps:$4 sm:$0xff]   ;;  %v1026_v21 = vld [vmem:[%s1176_s28 + $0x54] ss:$8 sps:$4 sm:$0xff]   ;;  %v1030_v23 = vld [vmem:[%s1176_s28 + $0x50] ss:$8 sps:$4 sm:$0xff]  }
  0x1f   : > { %723 = vmatpush1.bf16.msra.mxu1 %v1007_v8  ;;  %683 = vmatprep.subr.bf16.mxu0 %v1008_v9  ;;  %v1025_v20 = vld [vmem:[%s1176_s28 + $0x140] ss:$8 sps:$4 sm:$0xff]   ;;  %v1028_v22 = vld [vmem:[%s1176_s28 + $0x154] ss:$8 sps:$4 sm:$0xff]   ;;  %v1031_v24 = vld [vmem:[%s1176_s28 + $0x150] ss:$8 sps:$4 sm:$0xff]  }
  0x20   : > { %724 = vmatprep.subr.bf16.mxu1 %v1010_v10  ;;  %v1032_v25 = vld [vmem:[%s1176_s28 + $0x64] ss:$8 sps:$4 sm:$0xff]   ;;  %v1036_v27 = vld [vmem:[%s1176_s28 + $0x60] ss:$8 sps:$4 sm:$0xff]   ;;  %v1038_v29 = vld [vmem:[%s1176_s28 + $0x74] ss:$8 sps:$4 sm:$0xff]  }
  0x21   : > { %v1034_v26 = vld [vmem:[%s1176_s28 + $0x164] ss:$8 sps:$4 sm:$0xff]   ;;  %v1037_v28 = vld [vmem:[%s1176_s28 + $0x160] ss:$8 sps:$4 sm:$0xff]   ;;  %v1040_v30 = vld [vmem:[%s1176_s28 + $0x174] ss:$8 sps:$4 sm:$0xff]  }
  0x22   : > { %684 = vmatpush1.bf16.msra.mxu0 %v1012_v11  ;;  %v1042_v31 = vld [vmem:[%s1176_s28 + $0x70] ss:$8 sps:$4 sm:$0xff]   ;;  %v1044_v33 = vld [vmem:[%s1176_s28 + $0x84] ss:$8 sps:$4 sm:$0xff]   ;;  %v1048_v35 = vld [vmem:[%s1176_s28 + $0x80] ss:$8 sps:$4 sm:$0xff]  }
  0x23   : > { %725 = vmatpush1.bf16.msra.mxu1 %v1013_v12  ;;  %685 = vmatprep.subr.bf16.mxu0 %v1014_v13  ;;  %v1043_v32 = vld [vmem:[%s1176_s28 + $0x170] ss:$8 sps:$4 sm:$0xff]   ;;  %v1046_v34 = vld [vmem:[%s1176_s28 + $0x184] ss:$8 sps:$4 sm:$0xff]   ;;  %v1049_v36 = vld [vmem:[%s1176_s28 + $0x180] ss:$8 sps:$4 sm:$0xff]  }
  0x24   : > { %726 = vmatprep.subr.bf16.mxu1 %v1016_v14  ;;  %v1050_v37 = vld [vmem:[%s1176_s28 + $0x94] ss:$8 sps:$4 sm:$0xff]   ;;  %v1054_v39 = vld [vmem:[%s1176_s28 + $0x90] ss:$8 sps:$4 sm:$0xff]   ;;  %v1056_v41 = vld [vmem:[%s1176_s28 + $0xa4] ss:$8 sps:$4 sm:$0xff]  }
  0x25   : > { %v1052_v38 = vld [vmem:[%s1176_s28 + $0x194] ss:$8 sps:$4 sm:$0xff]   ;;  %v1055_v40 = vld [vmem:[%s1176_s28 + $0x190] ss:$8 sps:$4 sm:$0xff]   ;;  %v1058_v42 = vld [vmem:[%s1176_s28 + $0x1a4] ss:$8 sps:$4 sm:$0xff]  }
  0x26   : > { %686 = vmatpush1.bf16.msra.mxu0 %v1018_v15  ;;  %v1060_v43 = vld [vmem:[%s1176_s28 + $0xa0] ss:$8 sps:$4 sm:$0xff]   ;;  %v1062_v45 = vld [vmem:[%s1176_s28 + $0xb4] ss:$8 sps:$4 sm:$0xff]   ;;  %v1066_v50 = vld [vmem:[%s1176_s28 + $0xb0] ss:$8 sps:$4 sm:$0xff]  }
  0x27   : > { %727 = vmatpush1.bf16.msra.mxu1 %v1019_v16  ;;  %687 = vmatprep.subr.bf16.mxu0 %v1020_v17  ;;  %v1061_v44 = vld [vmem:[%s1176_s28 + $0x1a0] ss:$8 sps:$4 sm:$0xff]   ;;  %v1064_v46 = vld [vmem:[%s1176_s28 + $0x1b4] ss:$8 sps:$4 sm:$0xff]   ;;  %v1067_v51 = vld [vmem:[%s1176_s28 + $0x1b0] ss:$8 sps:$4 sm:$0xff]  }
  0x28   : > { %728 = vmatprep.subr.bf16.mxu1 %v1022_v18  ;;  %v279_v47 = vld [vmem:[%s1171_s24] sm:$0xff]  ;;  %v280_v49 = vld [vmem:[%s1171_s24 + $0x8] sm:$0xff]  ;;  %v1074_v57 = vld [vmem:[%s1176_s28 + $0xd4] ss:$8 sps:$4 sm:$0xff]   ;;  %p966_p7 = scmp.ne.s32.totalorder %s1110_s15, 4 }
  0x29   : > { %v899_v48 = vcombine.high %v279_v47, %v279_v47  ;;  %v901_v52 = vcombine.high %v280_v49, %v280_v49  ;;  %v1068_v53 = vld [vmem:[%s1176_s28 + $0xc4] ss:$8 sps:$4 sm:$0xff]   ;;  %v1072_v55 = vld [vmem:[%s1176_s28 + $0xc0] ss:$8 sps:$4 sm:$0xff]   ;;  %v1076_v58 = vld [vmem:[%s1176_s28 + $0x1d4] ss:$8 sps:$4 sm:$0xff]   ;;  %v898_v5 = vcombine.low %v279_v47, %v279_v47  ;;  %v900_v6 = vcombine.low %v280_v49, %v280_v49 }
  0x2a   : > { %688 = vmatpush1.bf16.msra.mxu0 %v1024_v19  ;;  %v1070_v54 = vld [vmem:[%s1176_s28 + $0x1c4] ss:$8 sps:$4 sm:$0xff]   ;;  %v1073_v56 = vld [vmem:[%s1176_s28 + $0x1c0] ss:$8 sps:$4 sm:$0xff]   ;;  %v1078_v59 = vld [vmem:[%s1176_s28 + $0xd0] ss:$8 sps:$4 sm:$0xff]  }
  0x2b   : > { %729 = vmatpush1.bf16.msra.mxu1 %v1025_v20  ;;  %689 = vmatprep.subr.bf16.mxu0 %v1026_v21  ;;  %v1079_v60 = vld [vmem:[%s1176_s28 + $0x1d0] ss:$8 sps:$4 sm:$0xff]   ;;  %v1080_v61 = vld [vmem:[%s1176_s28 + $0xe4] ss:$8 sps:$4 sm:$0xff]   ;;  %v1084_v63 = vld [vmem:[%s1176_s28 + $0xe0] ss:$8 sps:$4 sm:$0xff]   ;;  %v773_v21 = vlaneseq (!%p966_p7) }
  0x2c   : > { %730 = vmatprep.subr.bf16.mxu1 %v1028_v22  ;;  %711 = vmatprep.mubr.bf16.mxu0 %v899_v48  ;;  %v1082_v62 = vld [vmem:[%s1176_s28 + $0x1e4] ss:$8 sps:$4 sm:$0xff]   ;;  %v1085_v0 = vld [vmem:[%s1176_s28 + $0x1e0] ss:$8 sps:$4 sm:$0xff]   ;;  %v1086_v1 = vld [vmem:[%s1176_s28 + $0xf4] ss:$8 sps:$4 sm:$0xff]  }
  0x2d   : > { %752 = vmatprep.mubr.bf16.mxu1 %v901_v52  ;;  %v1088_v2 = vld [vmem:[%s1176_s28 + $0x1f4] ss:$8 sps:$4 sm:$0xff]   ;;  %v1090_v3 = vld [vmem:[%s1176_s28 + $0xf0] ss:$8 sps:$4 sm:$0xff]   ;;  %v277_v8 = vld [vmem:[%s1298_s4] sm:$0xff]  ;;  %v774_v22 = vshrl.u32 (!%p966_p7), %v773_v21, 7 }
  0x2e   : > { %690 = vmatpush1.bf16.msra.mxu0 %v1030_v23  ;;  %v1091_v4 = vld [vmem:[%s1176_s28 + $0x1f0] ss:$8 sps:$4 sm:$0xff]   ;;  %v278_v12 = vld [vmem:[%s1298_s4 + $0x8] sm:$0xff]  ;;  %v771_v23 = vld [vmem:[%s1296_s2] sm:$0x3] (!%p966_p7) }
  0x2f   : > { %731 = vmatpush1.bf16.msra.mxu1 %v1031_v24  ;;  %691 = vmatprep.subr.bf16.mxu0 %v1032_v25  ;;  %v775_v24 = vsub.s32 (!%p966_p7), 0, %v774_v22  ;;  %v779_v25 = vsub.s32 (!%p966_p7), 1, %v774_v22 }
  0x30   : > { %732 = vmatprep.subr.bf16.mxu1 %v1034_v26 }
  0x32   : > { %692 = vmatpush1.bf16.msra.mxu0 %v1036_v27 }
  0x33   : > { %733 = vmatpush1.bf16.msra.mxu1 %v1037_v28  ;;  %693 = vmatprep.subr.bf16.mxu0 %v1038_v29  ;;  %v776_v28 = vrot.slane (!%p966_p7), %v771_v23, %v775_v24  ;;  %v780_v29 = vrot.slane (!%p966_p7), %v771_v23, %v779_v25 }
  0x34   : > { %734 = vmatprep.subr.bf16.mxu1 %v1040_v30  ;;  %v785_v30 = vld [vmem:[%s1297_s3] sm:$0xff] (!%p966_p7) }
  0x36   : > { %694 = vmatpush1.bf16.msra.mxu0 %v1042_v31  ;;  %v786_v31 = vld [vmem:[%s1297_s3 + $0x8] sm:$0xff] (!%p966_p7) }
  0x37   : > { %735 = vmatpush1.bf16.msra.mxu1 %v1043_v32  ;;  %695 = vmatprep.subr.bf16.mxu0 %v1044_v33 }
  0x38   : > { %736 = vmatprep.subr.bf16.mxu1 %v1046_v34 }
  0x3a   : > { %696 = vmatpush1.bf16.msra.mxu0 %v1048_v35 }
  0x3b   : > { %737 = vmatpush1.bf16.msra.mxu1 %v1049_v36  ;;  %697 = vmatprep.subr.bf16.mxu0 %v1050_v37 }
  0x3c   : > { %738 = vmatprep.subr.bf16.mxu1 %v1052_v38 }
  0x3e   : > { %698 = vmatpush1.bf16.msra.mxu0 %v1054_v39 }
  0x3f   : > { %739 = vmatpush1.bf16.msra.mxu1 %v1055_v40  ;;  %699 = vmatprep.subr.bf16.mxu0 %v1056_v41 }
  0x40   : > { %740 = vmatprep.subr.bf16.mxu1 %v1058_v42 }
  0x42   : > { %700 = vmatpush1.bf16.msra.mxu0 %v1060_v43 }
  0x43   : > { %741 = vmatpush1.bf16.msra.mxu1 %v1061_v44  ;;  %701 = vmatprep.subr.bf16.mxu0 %v1062_v45 }
  0x44   : > { %742 = vmatprep.subr.bf16.mxu1 %v1064_v46 }
  0x46   : > { %702 = vmatpush1.bf16.msra.mxu0 %v1066_v50 }
  0x47   : > { %743 = vmatpush1.bf16.msra.mxu1 %v1067_v51  ;;  %703 = vmatprep.subr.bf16.mxu0 %v1068_v53 }
  0x48   : > { %744 = vmatprep.subr.bf16.mxu1 %v1070_v54 }
  0x4a   : > { %704 = vmatpush1.bf16.msra.mxu0 %v1072_v55 }
  0x4b   : > { %745 = vmatpush1.bf16.msra.mxu1 %v1073_v56  ;;  %705 = vmatprep.subr.bf16.mxu0 %v1074_v57 }
  0x4c   : > { %746 = vmatprep.subr.bf16.mxu1 %v1076_v58 }
  0x4e   : > { %706 = vmatpush1.bf16.msra.mxu0 %v1078_v59 }
  0x4f   : > { %747 = vmatpush1.bf16.msra.mxu1 %v1079_v60  ;;  %707 = vmatprep.subr.bf16.mxu0 %v1080_v61 }
  0x50   : > { %748 = vmatprep.subr.bf16.mxu1 %v1082_v62 }
  0x52   : > { %708 = vmatpush1.bf16.msra.mxu0 %v1084_v63 }
  0x53   : > { %749 = vmatpush1.bf16.msra.mxu1 %v1085_v0  ;;  %709 = vmatprep.subr.bf16.mxu0 %v1086_v1 }
  0x54   : > { %750 = vmatprep.subr.bf16.mxu1 %v1088_v2 }
  0x56   : > { %710 = vmatpush1.bf16.msra.mxu0 %v1090_v3 }
  0x57   : > { %751 = vmatpush1.bf16.msra.mxu1 %v1091_v4 }
  0x59   : > { %712 = vmatmul.mubr.bf16.vlgmr.msra.gmra.mrb[0].mxu0 %v898_v5 }
  0x5a   : > { %753 = vmatmul.mubr.bf16.vlgmr.msra.gmra.mrb[0].mxu1 %v900_v6 }
 0x12c   : > { %v713_v7 = vpop.f32.mrb[0].mxu0 }
 0x12d   : > { %v754_v9 = vpop.f32.mrb[0].mxu1  ;;  %v715_v11 = vpop.f32.mrb[1].mxu0  ;;  %768 = sbr.rel (%p966_p7) target bundleno = 322 (0x142), region = 44 }
 0x12e   : > { %v755_v10 = vadd.f32 %v754_v9, %v713_v7  ;;  %v756_v13 = vpop.f32.mrb[1].mxu1  ;;  %v717_v15 = vpop.f32.mrb[2].mxu0 }
 0x12f   : > { %v757_v14 = vadd.f32 %v756_v13, %v715_v11  ;;  %v758_v16 = vpop.f32.mrb[2].mxu1  ;;  %v718_v18 = vpop.f32.mrb[3].mxu0 }
 0x130   : > { %v761_v17 = vadd.f32 %v755_v10, %v277_v8  ;;  %v759_v19 = vpop.f32.mrb[3].mxu1 }
 0x131   : > { %v762_v20 = vadd.f32 %v757_v14, %v278_v12 }
 0x132   : > { %763 = vst [vmem:[%s1298_s4] sm:$0xff] %v761_v17 }
 0x133   : > { %764 = vst [vmem:[%s1298_s4 + $0x8] sm:$0xff] %v762_v20 }
 0x139   : > { %v769_v26 = vld [vmem:[%s1298_s4] sm:$0xff] }
 0x13a   : > { %v770_v27 = vld [vmem:[%s1298_s4 + $0x8] sm:$0xff]  ;;  %v783_v32 = vadd.f32 %v776_v28, %v769_v26 }
 0x13b   : > { %v784_v33 = vadd.f32 %v780_v29, %v770_v27 }
 0x13c   : > { %v787_v34 = vadd.f32 %v785_v30, %v783_v32 }
 0x13d   : > { %v788_v35 = vadd.f32 %v786_v31, %v784_v33 }
 0x13e   : > { %v789_v36 = vmax.f32 %v787_v34, 0.0 }
 0x13f   : > { %v790_v37 = vmax.f32 %v788_v35, 0.0 }
 0x140   : > { %791 = vst [vmem:[%s1298_s4] sm:$0xff] %v789_v36 }
 0x141   : > { %792 = vst [vmem:[%s1298_s4 + $0x8] sm:$0xff] %v790_v37 }
 0x142 PF: > { %s14_s17 = sadd.s32 1, %s1118_s17   ;;  %s1299_s15 = smov %s1114_s16 }
 0x143   : > { %p11_p8 = scmp.ge.s32.totalorder %s14_s17, 7   ;;  %s1300_s16 = smov %s1302_s18 }
 0x145   :  { %13 = sbr.rel (!%p11_p8) target bundleno = 2 (0x2), region = 80 }

// kernel: resnet34_forward.59
= control target key start
LH: loop header
LB: loop body
LE: loop exit
PB: predicated region body
PF: predicated region fallthrough
CT: control target
= control target key end

     0   :  { %s1074_s12 = smov 0   ;;  %s1076_s13 = smov 0   ;;  %s1216_s0 = inlined_call_operand.vmem [shape: bf16[8,2560], index: 0, kind: input, shape index: {}]   ;;  %s1217_s1 = inlined_call_operand.vmem [shape: bf16[2560,256], index: 1, kind: input, shape index: {}]   ;;  %s1218_s2 = inlined_call_operand.vmem [shape: f32[1,256], index: 2, kind: input, shape index: {}]   ;;  %s1219_s3 = inlined_call_operand.vmem [shape: f32[8,256], index: 3, kind: output, shape index: {}]  }
   0x1   :  { %s1078_s14 = smov 0  }
   0x2 LB: > { %s22_s15 = sadd.s32 1, %s1047_s13  ;;  %p824_p0 = scmp.ge.s32.totalorder %s1051_s14, 1  ;;  %s1051_s14 = sphi %s1078_s14, %s13_s14   ;;  %s1047_s13 = sphi %s1076_s13, %s1221_s13   ;;  %s1043_s12 = sphi %s1074_s12, %s1220_s12  }
   0x3   : > { %p23_p1 = scmp.ge.s32.totalorder %s22_s15, 5  ;;  %p168_p2 = scmp.lt.s32.totalorder %s1051_s14, 6 }
   0x5   : > { %s1223_s15 = smov (%p23_p1, %s22_s15), 0  ;;  %p169_p3 = pnand %p824_p0, %p168_p2 }
   0x6   : > { %s825_s16 = sshll.u32 (!%p169_p3), %s1043_s12, 2  ;;  %s827_s17 = sshll.u32 (!%p169_p3), %s1043_s12, 6 }
   0x7   : > { %172 = sbr.rel (%p169_p3) target bundleno = 320 (0x140), region = 32  ;;  %p205_p4 = scmp.lt.s32.totalorder (!%p169_p3), %s825_s16, 19 }
   0x8   : > { %p213_p5 = scmp.lt.s32.totalorder (!%p169_p3), %s827_s17, 319  ;;  %p830_p6 = scmp.ne.s32.totalorder (!%p169_p3), %s1043_s12, 0 }
   0xe   : > { %s1225_s16 = smov (!%p205_p4, %s825_s16), 19  ;;  %s1227_s17 = smov (!%p213_p5, %s827_s17), 319 }
   0xf   : > { %s826_s18 = sshll.u32 %s1225_s16, 2  ;;  %s903_s22 = sshll.u32 %s1227_s17, 3  ;;  %v1053_v0 = vmov (!%p830_p6), 0.0  }
  0x10   : > { %s1099_s21 = scalar_lea.vmem %s1216_s0, %s826_s18  ;;  %s1104_s25 = scalar_lea.vmem %s1217_s1, %s903_s22  ;;  %228 = vst [vmem:[%s1219_s3] sm:$0xff] (!%p830_p6), %v1053_v0  ;;  %229 = vst [vmem:[%s1219_s3 + $0x8] sm:$0xff] (!%p830_p6), %v1053_v0 }
  0x11   : > { %227 = sbr.rel (%p830_p6) target bundleno = 24 (0x18), region = 36 }
  0x18 PF: > { %v929_v1 = vld [vmem:[%s1104_s25 + $0x4] ss:$8 sps:$4 sm:$0xff]   ;;  %v933_v3 = vld [vmem:[%s1104_s25] ss:$8 sps:$4 sm:$0xff]   ;;  %v935_v5 = vld [vmem:[%s1104_s25 + $0x14] ss:$8 sps:$4 sm:$0xff]  }
  0x19   : > { %v931_v2 = vld [vmem:[%s1104_s25 + $0x104] ss:$8 sps:$4 sm:$0xff]   ;;  %632 = vmatprep.subr.bf16.mxu0 %v929_v1  ;;  %v934_v4 = vld [vmem:[%s1104_s25 + $0x100] ss:$8 sps:$4 sm:$0xff]   ;;  %v937_v6 = vld [vmem:[%s1104_s25 + $0x114] ss:$8 sps:$4 sm:$0xff]  }
  0x1a   : > { %673 = vmatprep.subr.bf16.mxu1 %v931_v2  ;;  %633 = vmatpush1.bf16.msra.mxu0 %v933_v3  ;;  %v939_v7 = vld [vmem:[%s1104_s25 + $0x10] ss:$8 sps:$4 sm:$0xff]   ;;  %v941_v9 = vld [vmem:[%s1104_s25 + $0x24] ss:$8 sps:$4 sm:$0xff]   ;;  %v945_v11 = vld [vmem:[%s1104_s25 + $0x20] ss:$8 sps:$4 sm:$0xff]  }
  0x1b   : > { %674 = vmatpush1.bf16.msra.mxu1 %v934_v4  ;;  %634 = vmatprep.subr.bf16.mxu0 %v935_v5  ;;  %v940_v8 = vld [vmem:[%s1104_s25 + $0x110] ss:$8 sps:$4 sm:$0xff]   ;;  %v943_v10 = vld [vmem:[%s1104_s25 + $0x124] ss:$8 sps:$4 sm:$0xff]   ;;  %v946_v12 = vld [vmem:[%s1104_s25 + $0x120] ss:$8 sps:$4 sm:$0xff]  }
  0x1c   : > { %675 = vmatprep.subr.bf16.mxu1 %v937_v6  ;;  %v947_v13 = vld [vmem:[%s1104_s25 + $0x34] ss:$8 sps:$4 sm:$0xff]   ;;  %v951_v15 = vld [vmem:[%s1104_s25 + $0x30] ss:$8 sps:$4 sm:$0xff]   ;;  %v953_v17 = vld [vmem:[%s1104_s25 + $0x44] ss:$8 sps:$4 sm:$0xff]  }
  0x1d   : > { %v949_v14 = vld [vmem:[%s1104_s25 + $0x134] ss:$8 sps:$4 sm:$0xff]   ;;  %v952_v16 = vld [vmem:[%s1104_s25 + $0x130] ss:$8 sps:$4 sm:$0xff]   ;;  %v955_v18 = vld [vmem:[%s1104_s25 + $0x144] ss:$8 sps:$4 sm:$0xff]  }
  0x1e   : > { %635 = vmatpush1.bf16.msra.mxu0 %v939_v7  ;;  %v957_v19 = vld [vmem:[%s1104_s25 + $0x40] ss:$8 sps:$4 sm:$0xff]   ;;  %v959_v21 = vld [vmem:[%s1104_s25 + $0x54] ss:$8 sps:$4 sm:$0xff]   ;;  %v963_v23 = vld [vmem:[%s1104_s25 + $0x50] ss:$8 sps:$4 sm:$0xff]  }
  0x1f   : > { %676 = vmatpush1.bf16.msra.mxu1 %v940_v8  ;;  %636 = vmatprep.subr.bf16.mxu0 %v941_v9  ;;  %v958_v20 = vld [vmem:[%s1104_s25 + $0x140] ss:$8 sps:$4 sm:$0xff]   ;;  %v961_v22 = vld [vmem:[%s1104_s25 + $0x154] ss:$8 sps:$4 sm:$0xff]   ;;  %v964_v24 = vld [vmem:[%s1104_s25 + $0x150] ss:$8 sps:$4 sm:$0xff]  }
  0x20   : > { %677 = vmatprep.subr.bf16.mxu1 %v943_v10  ;;  %v965_v25 = vld [vmem:[%s1104_s25 + $0x64] ss:$8 sps:$4 sm:$0xff]   ;;  %v969_v27 = vld [vmem:[%s1104_s25 + $0x60] ss:$8 sps:$4 sm:$0xff]   ;;  %v971_v29 = vld [vmem:[%s1104_s25 + $0x74] ss:$8 sps:$4 sm:$0xff]  }
  0x21   : > { %v967_v26 = vld [vmem:[%s1104_s25 + $0x164] ss:$8 sps:$4 sm:$0xff]   ;;  %v970_v28 = vld [vmem:[%s1104_s25 + $0x160] ss:$8 sps:$4 sm:$0xff]   ;;  %v973_v30 = vld [vmem:[%s1104_s25 + $0x174] ss:$8 sps:$4 sm:$0xff]  }
  0x22   : > { %637 = vmatpush1.bf16.msra.mxu0 %v945_v11  ;;  %v975_v31 = vld [vmem:[%s1104_s25 + $0x70] ss:$8 sps:$4 sm:$0xff]   ;;  %v977_v33 = vld [vmem:[%s1104_s25 + $0x84] ss:$8 sps:$4 sm:$0xff]   ;;  %v981_v35 = vld [vmem:[%s1104_s25 + $0x80] ss:$8 sps:$4 sm:$0xff]  }
  0x23   : > { %678 = vmatpush1.bf16.msra.mxu1 %v946_v12  ;;  %638 = vmatprep.subr.bf16.mxu0 %v947_v13  ;;  %v976_v32 = vld [vmem:[%s1104_s25 + $0x170] ss:$8 sps:$4 sm:$0xff]   ;;  %v979_v34 = vld [vmem:[%s1104_s25 + $0x184] ss:$8 sps:$4 sm:$0xff]   ;;  %v982_v36 = vld [vmem:[%s1104_s25 + $0x180] ss:$8 sps:$4 sm:$0xff]  }
  0x24   : > { %679 = vmatprep.subr.bf16.mxu1 %v949_v14  ;;  %v983_v37 = vld [vmem:[%s1104_s25 + $0x94] ss:$8 sps:$4 sm:$0xff]   ;;  %v987_v39 = vld [vmem:[%s1104_s25 + $0x90] ss:$8 sps:$4 sm:$0xff]   ;;  %v989_v41 = vld [vmem:[%s1104_s25 + $0xa4] ss:$8 sps:$4 sm:$0xff]  }
  0x25   : > { %v985_v38 = vld [vmem:[%s1104_s25 + $0x194] ss:$8 sps:$4 sm:$0xff]   ;;  %v988_v40 = vld [vmem:[%s1104_s25 + $0x190] ss:$8 sps:$4 sm:$0xff]   ;;  %v991_v42 = vld [vmem:[%s1104_s25 + $0x1a4] ss:$8 sps:$4 sm:$0xff]  }
  0x26   : > { %639 = vmatpush1.bf16.msra.mxu0 %v951_v15  ;;  %v993_v43 = vld [vmem:[%s1104_s25 + $0xa0] ss:$8 sps:$4 sm:$0xff]   ;;  %v995_v45 = vld [vmem:[%s1104_s25 + $0xb4] ss:$8 sps:$4 sm:$0xff]   ;;  %v999_v50 = vld [vmem:[%s1104_s25 + $0xb0] ss:$8 sps:$4 sm:$0xff]  }
  0x27   : > { %680 = vmatpush1.bf16.msra.mxu1 %v952_v16  ;;  %640 = vmatprep.subr.bf16.mxu0 %v953_v17  ;;  %v994_v44 = vld [vmem:[%s1104_s25 + $0x1a0] ss:$8 sps:$4 sm:$0xff]   ;;  %v997_v46 = vld [vmem:[%s1104_s25 + $0x1b4] ss:$8 sps:$4 sm:$0xff]   ;;  %v1000_v51 = vld [vmem:[%s1104_s25 + $0x1b0] ss:$8 sps:$4 sm:$0xff]  }
  0x28   : > { %681 = vmatprep.subr.bf16.mxu1 %v955_v18  ;;  %v232_v47 = vld [vmem:[%s1099_s21] sm:$0xff]  ;;  %v233_v49 = vld [vmem:[%s1099_s21 + $0x8] sm:$0xff]  ;;  %v1007_v57 = vld [vmem:[%s1104_s25 + $0xd4] ss:$8 sps:$4 sm:$0xff]   ;;  %p899_p7 = scmp.ne.s32.totalorder %s1043_s12, 4 }
  0x29   : > { %v832_v48 = vcombine.high %v232_v47, %v232_v47  ;;  %v834_v52 = vcombine.high %v233_v49, %v233_v49  ;;  %v1001_v53 = vld [vmem:[%s1104_s25 + $0xc4] ss:$8 sps:$4 sm:$0xff]   ;;  %v1005_v55 = vld [vmem:[%s1104_s25 + $0xc0] ss:$8 sps:$4 sm:$0xff]   ;;  %v1009_v58 = vld [vmem:[%s1104_s25 + $0x1d4] ss:$8 sps:$4 sm:$0xff]   ;;  %v831_v5 = vcombine.low %v232_v47, %v232_v47  ;;  %v833_v6 = vcombine.low %v233_v49, %v233_v49 }
  0x2a   : > { %641 = vmatpush1.bf16.msra.mxu0 %v957_v19  ;;  %v1003_v54 = vld [vmem:[%s1104_s25 + $0x1c4] ss:$8 sps:$4 sm:$0xff]   ;;  %v1006_v56 = vld [vmem:[%s1104_s25 + $0x1c0] ss:$8 sps:$4 sm:$0xff]   ;;  %v1011_v59 = vld [vmem:[%s1104_s25 + $0xd0] ss:$8 sps:$4 sm:$0xff]  }
  0x2b   : > { %682 = vmatpush1.bf16.msra.mxu1 %v958_v20  ;;  %642 = vmatprep.subr.bf16.mxu0 %v959_v21  ;;  %v1012_v60 = vld [vmem:[%s1104_s25 + $0x1d0] ss:$8 sps:$4 sm:$0xff]   ;;  %v1013_v61 = vld [vmem:[%s1104_s25 + $0xe4] ss:$8 sps:$4 sm:$0xff]   ;;  %v1017_v63 = vld [vmem:[%s1104_s25 + $0xe0] ss:$8 sps:$4 sm:$0xff]   ;;  %v726_v21 = vlaneseq (!%p899_p7) }
  0x2c   : > { %683 = vmatprep.subr.bf16.mxu1 %v961_v22  ;;  %664 = vmatprep.mubr.bf16.mxu0 %v832_v48  ;;  %v1015_v62 = vld [vmem:[%s1104_s25 + $0x1e4] ss:$8 sps:$4 sm:$0xff]   ;;  %v1018_v0 = vld [vmem:[%s1104_s25 + $0x1e0] ss:$8 sps:$4 sm:$0xff]   ;;  %v1019_v1 = vld [vmem:[%s1104_s25 + $0xf4] ss:$8 sps:$4 sm:$0xff]  }
  0x2d   : > { %705 = vmatprep.mubr.bf16.mxu1 %v834_v52  ;;  %v1021_v2 = vld [vmem:[%s1104_s25 + $0x1f4] ss:$8 sps:$4 sm:$0xff]   ;;  %v1023_v3 = vld [vmem:[%s1104_s25 + $0xf0] ss:$8 sps:$4 sm:$0xff]   ;;  %v230_v8 = vld [vmem:[%s1219_s3] sm:$0xff]  ;;  %v727_v22 = vshrl.u32 (!%p899_p7), %v726_v21, 7 }
  0x2e   : > { %643 = vmatpush1.bf16.msra.mxu0 %v963_v23  ;;  %v1024_v4 = vld [vmem:[%s1104_s25 + $0x1f0] ss:$8 sps:$4 sm:$0xff]   ;;  %v231_v12 = vld [vmem:[%s1219_s3 + $0x8] sm:$0xff]  ;;  %v724_v23 = vld [vmem:[%s1218_s2] sm:$0x3] (!%p899_p7) }
  0x2f   : > { %684 = vmatpush1.bf16.msra.mxu1 %v964_v24  ;;  %644 = vmatprep.subr.bf16.mxu0 %v965_v25  ;;  %v728_v24 = vsub.s32 (!%p899_p7), 0, %v727_v22  ;;  %v732_v25 = vsub.s32 (!%p899_p7), 1, %v727_v22 }
  0x30   : > { %685 = vmatprep.subr.bf16.mxu1 %v967_v26 }
  0x32   : > { %645 = vmatpush1.bf16.msra.mxu0 %v969_v27 }
  0x33   : > { %686 = vmatpush1.bf16.msra.mxu1 %v970_v28  ;;  %646 = vmatprep.subr.bf16.mxu0 %v971_v29  ;;  %v729_v28 = vrot.slane (!%p899_p7), %v724_v23, %v728_v24  ;;  %v733_v29 = vrot.slane (!%p899_p7), %v724_v23, %v732_v25 }
  0x34   : > { %687 = vmatprep.subr.bf16.mxu1 %v973_v30 }
  0x36   : > { %647 = vmatpush1.bf16.msra.mxu0 %v975_v31 }
  0x37   : > { %688 = vmatpush1.bf16.msra.mxu1 %v976_v32  ;;  %648 = vmatprep.subr.bf16.mxu0 %v977_v33 }
  0x38   : > { %689 = vmatprep.subr.bf16.mxu1 %v979_v34 }
  0x3a   : > { %649 = vmatpush1.bf16.msra.mxu0 %v981_v35 }
  0x3b   : > { %690 = vmatpush1.bf16.msra.mxu1 %v982_v36  ;;  %650 = vmatprep.subr.bf16.mxu0 %v983_v37 }
  0x3c   : > { %691 = vmatprep.subr.bf16.mxu1 %v985_v38 }
  0x3e   : > { %651 = vmatpush1.bf16.msra.mxu0 %v987_v39 }
  0x3f   : > { %692 = vmatpush1.bf16.msra.mxu1 %v988_v40  ;;  %652 = vmatprep.subr.bf16.mxu0 %v989_v41 }
  0x40   : > { %693 = vmatprep.subr.bf16.mxu1 %v991_v42 }
  0x42   : > { %653 = vmatpush1.bf16.msra.mxu0 %v993_v43 }
  0x43   : > { %694 = vmatpush1.bf16.msra.mxu1 %v994_v44  ;;  %654 = vmatprep.subr.bf16.mxu0 %v995_v45 }
  0x44   : > { %695 = vmatprep.subr.bf16.mxu1 %v997_v46 }
  0x46   : > { %655 = vmatpush1.bf16.msra.mxu0 %v999_v50 }
  0x47   : > { %696 = vmatpush1.bf16.msra.mxu1 %v1000_v51  ;;  %656 = vmatprep.subr.bf16.mxu0 %v1001_v53 }
  0x48   : > { %697 = vmatprep.subr.bf16.mxu1 %v1003_v54 }
  0x4a   : > { %657 = vmatpush1.bf16.msra.mxu0 %v1005_v55 }
  0x4b   : > { %698 = vmatpush1.bf16.msra.mxu1 %v1006_v56  ;;  %658 = vmatprep.subr.bf16.mxu0 %v1007_v57 }
  0x4c   : > { %699 = vmatprep.subr.bf16.mxu1 %v1009_v58 }
  0x4e   : > { %659 = vmatpush1.bf16.msra.mxu0 %v1011_v59 }
  0x4f   : > { %700 = vmatpush1.bf16.msra.mxu1 %v1012_v60  ;;  %660 = vmatprep.subr.bf16.mxu0 %v1013_v61 }
  0x50   : > { %701 = vmatprep.subr.bf16.mxu1 %v1015_v62 }
  0x52   : > { %661 = vmatpush1.bf16.msra.mxu0 %v1017_v63 }
  0x53   : > { %702 = vmatpush1.bf16.msra.mxu1 %v1018_v0  ;;  %662 = vmatprep.subr.bf16.mxu0 %v1019_v1 }
  0x54   : > { %703 = vmatprep.subr.bf16.mxu1 %v1021_v2 }
  0x56   : > { %663 = vmatpush1.bf16.msra.mxu0 %v1023_v3 }
  0x57   : > { %704 = vmatpush1.bf16.msra.mxu1 %v1024_v4 }
  0x59   : > { %665 = vmatmul.mubr.bf16.vlgmr.msra.gmra.mrb[0].mxu0 %v831_v5 }
  0x5a   : > { %706 = vmatmul.mubr.bf16.vlgmr.msra.gmra.mrb[0].mxu1 %v833_v6 }
 0x12c   : > { %v666_v7 = vpop.f32.mrb[0].mxu0 }
 0x12d   : > { %v707_v9 = vpop.f32.mrb[0].mxu1  ;;  %v668_v11 = vpop.f32.mrb[1].mxu0  ;;  %721 = sbr.rel (%p899_p7) target bundleno = 320 (0x140), region = 40 }
 0x12e   : > { %v708_v10 = vadd.f32 %v707_v9, %v666_v7  ;;  %v709_v13 = vpop.f32.mrb[1].mxu1  ;;  %v670_v15 = vpop.f32.mrb[2].mxu0 }
 0x12f   : > { %v710_v14 = vadd.f32 %v709_v13, %v668_v11  ;;  %v711_v16 = vpop.f32.mrb[2].mxu1  ;;  %v671_v18 = vpop.f32.mrb[3].mxu0 }
 0x130   : > { %v714_v17 = vadd.f32 %v708_v10, %v230_v8  ;;  %v712_v19 = vpop.f32.mrb[3].mxu1 }
 0x131   : > { %v715_v20 = vadd.f32 %v710_v14, %v231_v12 }
 0x132   : > { %716 = vst [vmem:[%s1219_s3] sm:$0xff] %v714_v17 }
 0x133   : > { %717 = vst [vmem:[%s1219_s3 + $0x8] sm:$0xff] %v715_v20 }
 0x139   : > { %v722_v26 = vld [vmem:[%s1219_s3] sm:$0xff] }
 0x13a   : > { %v723_v27 = vld [vmem:[%s1219_s3 + $0x8] sm:$0xff]  ;;  %v736_v30 = vadd.f32 %v729_v28, %v722_v26 }
 0x13b   : > { %v737_v31 = vadd.f32 %v733_v29, %v723_v27 }
 0x13c   : > { %v738_v32 = vmax.f32 %v736_v30, 0.0 }
 0x13d   : > { %v739_v33 = vmax.f32 %v737_v31, 0.0 }
 0x13e   : > { %740 = vst [vmem:[%s1219_s3] sm:$0xff] %v738_v32 }
 0x13f   : > { %741 = vst [vmem:[%s1219_s3 + $0x8] sm:$0xff] %v739_v33 }
 0x140 PF: > { %s13_s14 = sadd.s32 1, %s1051_s14   ;;  %s1220_s12 = smov %s1047_s13 }
 0x141   : > { %p10_p8 = scmp.ge.s32.totalorder %s13_s14, 7   ;;  %s1221_s13 = smov %s1223_s15 }
 0x143   :  { %12 = sbr.rel (!%p10_p8) target bundleno = 2 (0x2), region = 73 }

// kernel: resnet34_forward.69
= control target key start
LH: loop header
LB: loop body
LE: loop exit
PB: predicated region body
PF: predicated region fallthrough
CT: control target
= control target key end

     0   :  { %s1726_s12 = smov 0   ;;  %s1728_s13 = smov 0   ;;  %s1974_s0 = inlined_call_operand.vmem [shape: bf16[8,2560], index: 0, kind: input, shape index: {}]   ;;  %s1975_s1 = inlined_call_operand.vmem [shape: bf16[2560,512], index: 1, kind: input, shape index: {}]   ;;  %s1976_s2 = inlined_call_operand.vmem [shape: f32[1,512], index: 2, kind: input, shape index: {}]   ;;  %s1977_s3 = inlined_call_operand.vmem [shape: f32[8,512], index: 3, kind: output, shape index: {}]  }
   0x1   :  { %s1730_s14 = smov 0  }
   0x2 LB: > { %s22_s15 = sadd.s32 1, %s1699_s13  ;;  %p1316_p0 = scmp.ge.s32.totalorder %s1703_s14, 1  ;;  %s1703_s14 = sphi %s1730_s14, %s13_s14   ;;  %s1699_s13 = sphi %s1728_s13, %s1979_s13   ;;  %s1695_s12 = sphi %s1726_s12, %s1978_s12  }
   0x3   : > { %p23_p1 = scmp.ge.s32.totalorder %s22_s15, 5  ;;  %p168_p2 = scmp.lt.s32.totalorder %s1703_s14, 6 }
   0x5   : > { %s1981_s15 = smov (%p23_p1, %s22_s15), 0  ;;  %p169_p3 = pnand %p1316_p0, %p168_p2 }
   0x6   : > { %s1317_s16 = sshll.u32 (!%p169_p3), %s1695_s12, 2  ;;  %s1319_s17 = sshll.u32 (!%p169_p3), %s1695_s12, 6 }
   0x7   : > { %172 = sbr.rel (%p169_p3) target bundleno = 384 (0x180), region = 32  ;;  %p205_p4 = scmp.lt.s32.totalorder (!%p169_p3), %s1317_s16, 19 }
   0x8   : > { %p213_p5 = scmp.lt.s32.totalorder (!%p169_p3), %s1319_s17, 319  ;;  %p1322_p6 = scmp.ne.s32.totalorder (!%p169_p3), %s1695_s12, 0 }
   0xe   : > { %s1983_s16 = smov (!%p205_p4, %s1317_s16), 19  ;;  %s1985_s17 = smov (!%p213_p5, %s1319_s17), 319 }
   0xf   : > { %s1318_s18 = sshll.u32 %s1983_s16, 2  ;;  %s1459_s22 = sshll.u32 %s1985_s17, 4  ;;  %v1705_v0 = vmov (!%p1322_p6), 0.0  }
  0x10   : > { %s1751_s21 = scalar_lea.vmem %s1974_s0, %s1318_s18  ;;  %s1756_s25 = scalar_lea.vmem %s1975_s1, %s1459_s22  ;;  %228 = vst [vmem:[%s1977_s3] sm:$0xff] (!%p1322_p6), %v1705_v0  ;;  %229 = vst [vmem:[%s1977_s3 + $0x8] sm:$0xff] (!%p1322_p6), %v1705_v0 }
  0x11   : > { %227 = sbr.rel (%p1322_p6) target bundleno = 24 (0x18), region = 36  ;;  %230 = vst [vmem:[%s1977_s3 + $0x10] sm:$0xff] (!%p1322_p6), %v1705_v0  ;;  %231 = vst [vmem:[%s1977_s3 + $0x18] sm:$0xff] (!%p1322_p6), %v1705_v0 }
  0x18 PF: > { %v1485_v1 = vld [vmem:[%s1756_s25 + $0x4] ss:$16 sps:$4 sm:$0xff]   ;;  %v1489_v3 = vld [vmem:[%s1756_s25] ss:$16 sps:$4 sm:$0xff]   ;;  %v237_v49 = vld [vmem:[%s1751_s21 + $0x8] sm:$0xff]  ;;  %p1455_p7 = scmp.ne.s32.totalorder %s1695_s12, 4 }
  0x19   : > { %v1487_v2 = vld [vmem:[%s1756_s25 + $0x204] ss:$16 sps:$4 sm:$0xff]   ;;  %1020 = vmatprep.subr.bf16.mxu0 %v1485_v1  ;;  %v1490_v4 = vld [vmem:[%s1756_s25 + $0x200] ss:$16 sps:$4 sm:$0xff]   ;;  %v1326_v52 = vcombine.high %v237_v49, %v237_v49 }
  0x1a   : > { %1061 = vmatprep.subr.bf16.mxu1 %v1487_v2  ;;  %v1491_v5 = vld [vmem:[%s1756_s25 + $0x24] ss:$16 sps:$4 sm:$0xff]   ;;  %1021 = vmatpush1.bf16.msra.mxu0 %v1489_v3  ;;  %v1495_v7 = vld [vmem:[%s1756_s25 + $0x20] ss:$16 sps:$4 sm:$0xff]  }
  0x1b   : > { %1062 = vmatpush1.bf16.msra.mxu1 %v1490_v4  ;;  %v1493_v6 = vld [vmem:[%s1756_s25 + $0x224] ss:$16 sps:$4 sm:$0xff]   ;;  %1022 = vmatprep.subr.bf16.mxu0 %v1491_v5  ;;  %v1496_v8 = vld [vmem:[%s1756_s25 + $0x220] ss:$16 sps:$4 sm:$0xff]   ;;  %v1587_v5 = vld [vmem:[%s1756_s25 + $0xc] ss:$16 sps:$4 sm:$0xff]  }
  0x1c   : > { %1063 = vmatprep.subr.bf16.mxu1 %v1493_v6  ;;  %v1497_v9 = vld [vmem:[%s1756_s25 + $0x44] ss:$16 sps:$4 sm:$0xff]   ;;  %v1501_v11 = vld [vmem:[%s1756_s25 + $0x40] ss:$16 sps:$4 sm:$0xff]   ;;  %1093 = vmatprep.mubr.bf16.mxu1 %v1326_v52  ;;  %v1590_v6 = vld [vmem:[%s1756_s25 + $0x20c] ss:$16 sps:$4 sm:$0xff]  }
  0x1d   : > { %v1499_v10 = vld [vmem:[%s1756_s25 + $0x244] ss:$16 sps:$4 sm:$0xff]   ;;  %v1502_v12 = vld [vmem:[%s1756_s25 + $0x240] ss:$16 sps:$4 sm:$0xff]  }
  0x1e   : > { %1023 = vmatpush1.bf16.msra.mxu0 %v1495_v7  ;;  %v1503_v13 = vld [vmem:[%s1756_s25 + $0x64] ss:$16 sps:$4 sm:$0xff]   ;;  %v1507_v15 = vld [vmem:[%s1756_s25 + $0x60] ss:$16 sps:$4 sm:$0xff]  }
  0x1f   : > { %1064 = vmatpush1.bf16.msra.mxu1 %v1496_v8  ;;  %1024 = vmatprep.subr.bf16.mxu0 %v1497_v9  ;;  %v1505_v14 = vld [vmem:[%s1756_s25 + $0x264] ss:$16 sps:$4 sm:$0xff]   ;;  %v1508_v16 = vld [vmem:[%s1756_s25 + $0x260] ss:$16 sps:$4 sm:$0xff]   ;;  %v1844_v8 = vcombine.low %v237_v49, %v237_v49  ;;  %v1585_v9 = vld [vmem:[%s1756_s25 + $0x8] ss:$16 sps:$4 sm:$0xff]  }
  0x20   : > { %1065 = vmatprep.subr.bf16.mxu1 %v1499_v10  ;;  %v1509_v17 = vld [vmem:[%s1756_s25 + $0x84] ss:$16 sps:$4 sm:$0xff]   ;;  %v1513_v19 = vld [vmem:[%s1756_s25 + $0x80] ss:$16 sps:$4 sm:$0xff]   ;;  %v1588_v10 = vld [vmem:[%s1756_s25 + $0x208] ss:$16 sps:$4 sm:$0xff]  }
  0x21   : > { %v1511_v18 = vld [vmem:[%s1756_s25 + $0x284] ss:$16 sps:$4 sm:$0xff]   ;;  %v1514_v20 = vld [vmem:[%s1756_s25 + $0x280] ss:$16 sps:$4 sm:$0xff]   ;;  %v1645_v49 = vld [vmem:[%s1756_s25 + $0x148] ss:$16 sps:$4 sm:$0xff]  }
  0x22   : > { %1025 = vmatpush1.bf16.msra.mxu0 %v1501_v11  ;;  %v1515_v21 = vld [vmem:[%s1756_s25 + $0xa4] ss:$16 sps:$4 sm:$0xff]   ;;  %v1519_v23 = vld [vmem:[%s1756_s25 + $0xa0] ss:$16 sps:$4 sm:$0xff]   ;;  %v1593_v11 = vld [vmem:[%s1756_s25 + $0x2c] ss:$16 sps:$4 sm:$0xff]  }
  0x23   : > { %1066 = vmatpush1.bf16.msra.mxu1 %v1502_v12  ;;  %1026 = vmatprep.subr.bf16.mxu0 %v1503_v13  ;;  %v1517_v22 = vld [vmem:[%s1756_s25 + $0x2a4] ss:$16 sps:$4 sm:$0xff]   ;;  %v1520_v24 = vld [vmem:[%s1756_s25 + $0x2a0] ss:$16 sps:$4 sm:$0xff]   ;;  %v1596_v12 = vld [vmem:[%s1756_s25 + $0x22c] ss:$16 sps:$4 sm:$0xff]  }
  0x24   : > { %1067 = vmatprep.subr.bf16.mxu1 %v1505_v14  ;;  %v1521_v25 = vld [vmem:[%s1756_s25 + $0xc4] ss:$16 sps:$4 sm:$0xff]   ;;  %v1525_v27 = vld [vmem:[%s1756_s25 + $0xc0] ss:$16 sps:$4 sm:$0xff]   ;;  %v1591_v13 = vld [vmem:[%s1756_s25 + $0x28] ss:$16 sps:$4 sm:$0xff]  }
  0x25   : > { %v1523_v26 = vld [vmem:[%s1756_s25 + $0x2c4] ss:$16 sps:$4 sm:$0xff]   ;;  %v1526_v28 = vld [vmem:[%s1756_s25 + $0x2c0] ss:$16 sps:$4 sm:$0xff]   ;;  %v1594_v14 = vld [vmem:[%s1756_s25 + $0x228] ss:$16 sps:$4 sm:$0xff]  }
  0x26   : > { %1027 = vmatpush1.bf16.msra.mxu0 %v1507_v15  ;;  %v1527_v29 = vld [vmem:[%s1756_s25 + $0xe4] ss:$16 sps:$4 sm:$0xff]   ;;  %v1531_v31 = vld [vmem:[%s1756_s25 + $0xe0] ss:$16 sps:$4 sm:$0xff]   ;;  %v1599_v15 = vld [vmem:[%s1756_s25 + $0x4c] ss:$16 sps:$4 sm:$0xff]  }
  0x27   : > { %1068 = vmatpush1.bf16.msra.mxu1 %v1508_v16  ;;  %1028 = vmatprep.subr.bf16.mxu0 %v1509_v17  ;;  %v1529_v30 = vld [vmem:[%s1756_s25 + $0x2e4] ss:$16 sps:$4 sm:$0xff]   ;;  %v1532_v32 = vld [vmem:[%s1756_s25 + $0x2e0] ss:$16 sps:$4 sm:$0xff]   ;;  %v1602_v16 = vld [vmem:[%s1756_s25 + $0x24c] ss:$16 sps:$4 sm:$0xff]  }
  0x28   : > { %1069 = vmatprep.subr.bf16.mxu1 %v1511_v18  ;;  %v1533_v33 = vld [vmem:[%s1756_s25 + $0x104] ss:$16 sps:$4 sm:$0xff]   ;;  %v1537_v35 = vld [vmem:[%s1756_s25 + $0x100] ss:$16 sps:$4 sm:$0xff]   ;;  %v1597_v17 = vld [vmem:[%s1756_s25 + $0x48] ss:$16 sps:$4 sm:$0xff]  }
  0x29   : > { %v1535_v34 = vld [vmem:[%s1756_s25 + $0x304] ss:$16 sps:$4 sm:$0xff]   ;;  %v1538_v36 = vld [vmem:[%s1756_s25 + $0x300] ss:$16 sps:$4 sm:$0xff]   ;;  %v1600_v18 = vld [vmem:[%s1756_s25 + $0x248] ss:$16 sps:$4 sm:$0xff]  }
  0x2a   : > { %1029 = vmatpush1.bf16.msra.mxu0 %v1513_v19  ;;  %v1539_v37 = vld [vmem:[%s1756_s25 + $0x124] ss:$16 sps:$4 sm:$0xff]   ;;  %v1543_v39 = vld [vmem:[%s1756_s25 + $0x120] ss:$16 sps:$4 sm:$0xff]   ;;  %v1605_v19 = vld [vmem:[%s1756_s25 + $0x6c] ss:$16 sps:$4 sm:$0xff]  }
  0x2b   : > { %1070 = vmatpush1.bf16.msra.mxu1 %v1514_v20  ;;  %1030 = vmatprep.subr.bf16.mxu0 %v1515_v21  ;;  %v1541_v38 = vld [vmem:[%s1756_s25 + $0x324] ss:$16 sps:$4 sm:$0xff]   ;;  %v1544_v40 = vld [vmem:[%s1756_s25 + $0x320] ss:$16 sps:$4 sm:$0xff]   ;;  %v1608_v20 = vld [vmem:[%s1756_s25 + $0x26c] ss:$16 sps:$4 sm:$0xff]  }
  0x2c   : > { %1071 = vmatprep.subr.bf16.mxu1 %v1517_v22  ;;  %v1545_v41 = vld [vmem:[%s1756_s25 + $0x144] ss:$16 sps:$4 sm:$0xff]   ;;  %v1549_v43 = vld [vmem:[%s1756_s25 + $0x140] ss:$16 sps:$4 sm:$0xff]   ;;  %v1603_v21 = vld [vmem:[%s1756_s25 + $0x68] ss:$16 sps:$4 sm:$0xff]  }
  0x2d   : > { %v1547_v42 = vld [vmem:[%s1756_s25 + $0x344] ss:$16 sps:$4 sm:$0xff]   ;;  %v1550_v44 = vld [vmem:[%s1756_s25 + $0x340] ss:$16 sps:$4 sm:$0xff]   ;;  %v1606_v22 = vld [vmem:[%s1756_s25 + $0x268] ss:$16 sps:$4 sm:$0xff]  }
  0x2e   : > { %1031 = vmatpush1.bf16.msra.mxu0 %v1519_v23  ;;  %v1551_v45 = vld [vmem:[%s1756_s25 + $0x164] ss:$16 sps:$4 sm:$0xff]   ;;  %v1555_v50 = vld [vmem:[%s1756_s25 + $0x160] ss:$16 sps:$4 sm:$0xff]   ;;  %v1611_v23 = vld [vmem:[%s1756_s25 + $0x8c] ss:$16 sps:$4 sm:$0xff]  }
  0x2f   : > { %1072 = vmatpush1.bf16.msra.mxu1 %v1520_v24  ;;  %1032 = vmatprep.subr.bf16.mxu0 %v1521_v25  ;;  %v1553_v46 = vld [vmem:[%s1756_s25 + $0x364] ss:$16 sps:$4 sm:$0xff]   ;;  %v1556_v51 = vld [vmem:[%s1756_s25 + $0x360] ss:$16 sps:$4 sm:$0xff]   ;;  %v1614_v24 = vld [vmem:[%s1756_s25 + $0x28c] ss:$16 sps:$4 sm:$0xff]  }
  0x30   : > { %1073 = vmatprep.subr.bf16.mxu1 %v1523_v26  ;;  %v236_v47 = vld [vmem:[%s1751_s21] sm:$0xff]  ;;  %v1609_v25 = vld [vmem:[%s1756_s25 + $0x88] ss:$16 sps:$4 sm:$0xff]  }
  0x31   : > { %v1818_v48 = vcombine.high %v236_v47, %v236_v47  ;;  %v1557_v53 = vld [vmem:[%s1756_s25 + $0x184] ss:$16 sps:$4 sm:$0xff]   ;;  %v1561_v55 = vld [vmem:[%s1756_s25 + $0x180] ss:$16 sps:$4 sm:$0xff]   ;;  %v1842_v7 = vcombine.low %v236_v47, %v236_v47  ;;  %v1612_v26 = vld [vmem:[%s1756_s25 + $0x288] ss:$16 sps:$4 sm:$0xff]  }
  0x32   : > { %1033 = vmatpush1.bf16.msra.mxu0 %v1525_v27  ;;  %v1559_v54 = vld [vmem:[%s1756_s25 + $0x384] ss:$16 sps:$4 sm:$0xff]   ;;  %v1562_v56 = vld [vmem:[%s1756_s25 + $0x380] ss:$16 sps:$4 sm:$0xff]   ;;  %v1617_v27 = vld [vmem:[%s1756_s25 + $0xac] ss:$16 sps:$4 sm:$0xff]  }
  0x33   : > { %1074 = vmatpush1.bf16.msra.mxu1 %v1526_v28  ;;  %1034 = vmatprep.subr.bf16.mxu0 %v1527_v29  ;;  %v1563_v57 = vld [vmem:[%s1756_s25 + $0x1a4] ss:$16 sps:$4 sm:$0xff]   ;;  %v1567_v59 = vld [vmem:[%s1756_s25 + $0x1a0] ss:$16 sps:$4 sm:$0xff]   ;;  %v1620_v28 = vld [vmem:[%s1756_s25 + $0x2ac] ss:$16 sps:$4 sm:$0xff]  }
  0x34   : > { %1075 = vmatprep.subr.bf16.mxu1 %v1529_v30  ;;  %1052 = vmatprep.mubr.bf16.mxu0 %v1818_v48  ;;  %v1565_v58 = vld [vmem:[%s1756_s25 + $0x3a4] ss:$16 sps:$4 sm:$0xff]   ;;  %v1568_v60 = vld [vmem:[%s1756_s25 + $0x3a0] ss:$16 sps:$4 sm:$0xff]   ;;  %v1615_v29 = vld [vmem:[%s1756_s25 + $0xa8] ss:$16 sps:$4 sm:$0xff]  }
  0x35   : > { %v1569_v61 = vld [vmem:[%s1756_s25 + $0x1c4] ss:$16 sps:$4 sm:$0xff]   ;;  %v1573_v63 = vld [vmem:[%s1756_s25 + $0x1c0] ss:$16 sps:$4 sm:$0xff]   ;;  %v1618_v30 = vld [vmem:[%s1756_s25 + $0x2a8] ss:$16 sps:$4 sm:$0xff]  }
  0x36   : > { %1035 = vmatpush1.bf16.msra.mxu0 %v1531_v31  ;;  %v1571_v62 = vld [vmem:[%s1756_s25 + $0x3c4] ss:$16 sps:$4 sm:$0xff]   ;;  %v1574_v0 = vld [vmem:[%s1756_s25 + $0x3c0] ss:$16 sps:$4 sm:$0xff]   ;;  %v1623_v31 = vld [vmem:[%s1756_s25 + $0xcc] ss:$16 sps:$4 sm:$0xff]  }
  0x37   : > { %1076 = vmatpush1.bf16.msra.mxu1 %v1532_v32  ;;  %1036 = vmatprep.subr.bf16.mxu0 %v1533_v33  ;;  %v1575_v1 = vld [vmem:[%s1756_s25 + $0x1e4] ss:$16 sps:$4 sm:$0xff]   ;;  %v1579_v3 = vld [vmem:[%s1756_s25 + $0x1e0] ss:$16 sps:$4 sm:$0xff]   ;;  %v1626_v32 = vld [vmem:[%s1756_s25 + $0x2cc] ss:$16 sps:$4 sm:$0xff]  }
  0x38   : > { %1077 = vmatprep.subr.bf16.mxu1 %v1535_v34  ;;  %v1577_v2 = vld [vmem:[%s1756_s25 + $0x3e4] ss:$16 sps:$4 sm:$0xff]   ;;  %v1580_v4 = vld [vmem:[%s1756_s25 + $0x3e0] ss:$16 sps:$4 sm:$0xff]   ;;  %v1621_v33 = vld [vmem:[%s1756_s25 + $0xc8] ss:$16 sps:$4 sm:$0xff]  }
  0x39   : > { %v1624_v34 = vld [vmem:[%s1756_s25 + $0x2c8] ss:$16 sps:$4 sm:$0xff]   ;;  %v1647_v47 = vld [vmem:[%s1756_s25 + $0x14c] ss:$16 sps:$4 sm:$0xff]  }
  0x3a   : > { %1037 = vmatpush1.bf16.msra.mxu0 %v1537_v35  ;;  %v1629_v35 = vld [vmem:[%s1756_s25 + $0xec] ss:$16 sps:$4 sm:$0xff]  }
  0x3b   : > { %1078 = vmatpush1.bf16.msra.mxu1 %v1538_v36  ;;  %1038 = vmatprep.subr.bf16.mxu0 %v1539_v37  ;;  %v1632_v36 = vld [vmem:[%s1756_s25 + $0x2ec] ss:$16 sps:$4 sm:$0xff]   ;;  %v1627_v37 = vld [vmem:[%s1756_s25 + $0xe8] ss:$16 sps:$4 sm:$0xff]  }
  0x3c   : > { %1079 = vmatprep.subr.bf16.mxu1 %v1541_v38  ;;  %v1630_v38 = vld [vmem:[%s1756_s25 + $0x2e8] ss:$16 sps:$4 sm:$0xff]  }
  0x3e   : > { %1039 = vmatpush1.bf16.msra.mxu0 %v1543_v39  ;;  %v1635_v39 = vld [vmem:[%s1756_s25 + $0x10c] ss:$16 sps:$4 sm:$0xff]  }
  0x3f   : > { %1080 = vmatpush1.bf16.msra.mxu1 %v1544_v40  ;;  %1040 = vmatprep.subr.bf16.mxu0 %v1545_v41  ;;  %v1638_v40 = vld [vmem:[%s1756_s25 + $0x30c] ss:$16 sps:$4 sm:$0xff]   ;;  %v1633_v41 = vld [vmem:[%s1756_s25 + $0x108] ss:$16 sps:$4 sm:$0xff]  }
  0x40   : > { %1081 = vmatprep.subr.bf16.mxu1 %v1547_v42  ;;  %v1636_v42 = vld [vmem:[%s1756_s25 + $0x308] ss:$16 sps:$4 sm:$0xff]  }
  0x42   : > { %1041 = vmatpush1.bf16.msra.mxu0 %v1549_v43  ;;  %v1641_v43 = vld [vmem:[%s1756_s25 + $0x12c] ss:$16 sps:$4 sm:$0xff]  }
  0x43   : > { %1082 = vmatpush1.bf16.msra.mxu1 %v1550_v44  ;;  %1042 = vmatprep.subr.bf16.mxu0 %v1551_v45  ;;  %v1644_v44 = vld [vmem:[%s1756_s25 + $0x32c] ss:$16 sps:$4 sm:$0xff]   ;;  %v1639_v45 = vld [vmem:[%s1756_s25 + $0x128] ss:$16 sps:$4 sm:$0xff]  }
  0x44   : > { %1083 = vmatprep.subr.bf16.mxu1 %v1553_v46  ;;  %v1642_v46 = vld [vmem:[%s1756_s25 + $0x328] ss:$16 sps:$4 sm:$0xff]  }
  0x46   : > { %1043 = vmatpush1.bf16.msra.mxu0 %v1555_v50  ;;  %v1648_v50 = vld [vmem:[%s1756_s25 + $0x348] ss:$16 sps:$4 sm:$0xff]  }
  0x47   : > { %1084 = vmatpush1.bf16.msra.mxu1 %v1556_v51  ;;  %1044 = vmatprep.subr.bf16.mxu0 %v1557_v53  ;;  %v1653_v51 = vld [vmem:[%s1756_s25 + $0x16c] ss:$16 sps:$4 sm:$0xff]   ;;  %v1651_v53 = vld [vmem:[%s1756_s25 + $0x168] ss:$16 sps:$4 sm:$0xff]  }
  0x48   : > { %1085 = vmatprep.subr.bf16.mxu1 %v1559_v54  ;;  %v1654_v54 = vld [vmem:[%s1756_s25 + $0x368] ss:$16 sps:$4 sm:$0xff]  }
  0x4a   : > { %1045 = vmatpush1.bf16.msra.mxu0 %v1561_v55  ;;  %v1659_v55 = vld [vmem:[%s1756_s25 + $0x18c] ss:$16 sps:$4 sm:$0xff]  }
  0x4b   : > { %1086 = vmatpush1.bf16.msra.mxu1 %v1562_v56  ;;  %1046 = vmatprep.subr.bf16.mxu0 %v1563_v57  ;;  %v1662_v56 = vld [vmem:[%s1756_s25 + $0x38c] ss:$16 sps:$4 sm:$0xff]   ;;  %v1657_v57 = vld [vmem:[%s1756_s25 + $0x188] ss:$16 sps:$4 sm:$0xff]  }
  0x4c   : > { %1087 = vmatprep.subr.bf16.mxu1 %v1565_v58  ;;  %v1660_v58 = vld [vmem:[%s1756_s25 + $0x388] ss:$16 sps:$4 sm:$0xff]  }
  0x4e   : > { %1047 = vmatpush1.bf16.msra.mxu0 %v1567_v59  ;;  %v1665_v59 = vld [vmem:[%s1756_s25 + $0x1ac] ss:$16 sps:$4 sm:$0xff]  }
  0x4f   : > { %1088 = vmatpush1.bf16.msra.mxu1 %v1568_v60  ;;  %1048 = vmatprep.subr.bf16.mxu0 %v1569_v61  ;;  %v1668_v60 = vld [vmem:[%s1756_s25 + $0x3ac] ss:$16 sps:$4 sm:$0xff]   ;;  %v1663_v61 = vld [vmem:[%s1756_s25 + $0x1a8] ss:$16 sps:$4 sm:$0xff]  }
  0x50   : > { %1089 = vmatprep.subr.bf16.mxu1 %v1571_v62  ;;  %v1666_v62 = vld [vmem:[%s1756_s25 + $0x3a8] ss:$16 sps:$4 sm:$0xff]  }
  0x52   : > { %1049 = vmatpush1.bf16.msra.mxu0 %v1573_v63  ;;  %v1671_v63 = vld [vmem:[%s1756_s25 + $0x1cc] ss:$16 sps:$4 sm:$0xff]  }
  0x53   : > { %1090 = vmatpush1.bf16.msra.mxu1 %v1574_v0  ;;  %1050 = vmatprep.subr.bf16.mxu0 %v1575_v1  ;;  %v1674_v0 = vld [vmem:[%s1756_s25 + $0x3cc] ss:$16 sps:$4 sm:$0xff]   ;;  %v1669_v1 = vld [vmem:[%s1756_s25 + $0x1c8] ss:$16 sps:$4 sm:$0xff]  }
  0x54   : > { %1091 = vmatprep.subr.bf16.mxu1 %v1577_v2  ;;  %v1672_v2 = vld [vmem:[%s1756_s25 + $0x3c8] ss:$16 sps:$4 sm:$0xff]  }
  0x56   : > { %1051 = vmatpush1.bf16.msra.mxu0 %v1579_v3  ;;  %v1677_v3 = vld [vmem:[%s1756_s25 + $0x1ec] ss:$16 sps:$4 sm:$0xff]  }
  0x57   : > { %1092 = vmatpush1.bf16.msra.mxu1 %v1580_v4  ;;  %1102 = vmatprep.subr.bf16.mxu0 %v1587_v5  ;;  %v1680_v4 = vld [vmem:[%s1756_s25 + $0x3ec] ss:$16 sps:$4 sm:$0xff]   ;;  %v1675_v5 = vld [vmem:[%s1756_s25 + $0x1e8] ss:$16 sps:$4 sm:$0xff]  }
  0x58   : > { %1143 = vmatprep.subr.bf16.mxu1 %v1590_v6  ;;  %v1678_v6 = vld [vmem:[%s1756_s25 + $0x3e8] ss:$16 sps:$4 sm:$0xff]  }
  0x59   : > { %1053 = vmatmul.mubr.bf16.vlgmr.msra.gmra.mrb[0].mxu0 %v1842_v7 }
  0x5a   : > { %1094 = vmatmul.mubr.bf16.vlgmr.msra.gmra.mrb[0].mxu1 %v1844_v8  ;;  %1103 = vmatpush1.bf16.msra.mxu0 %v1585_v9 }
  0x5b   : > { %1144 = vmatpush1.bf16.msra.mxu1 %v1588_v10  ;;  %1104 = vmatprep.subr.bf16.mxu0 %v1593_v11  ;;  %v232_v10 = vld [vmem:[%s1977_s3] sm:$0xff] }
  0x5c   : > { %1145 = vmatprep.subr.bf16.mxu1 %v1596_v12  ;;  %1134 = vmatprep.mubr.bf16.mxu0 %v1818_v48  ;;  %v1650_v48 = vld [vmem:[%s1756_s25 + $0x34c] ss:$16 sps:$4 sm:$0xff]  }
  0x5d   : > { %1175 = vmatprep.mubr.bf16.mxu1 %v1326_v52  ;;  %v1656_v52 = vld [vmem:[%s1756_s25 + $0x36c] ss:$16 sps:$4 sm:$0xff]  }
  0x5e   : > { %1105 = vmatpush1.bf16.msra.mxu0 %v1591_v13 }
  0x5f   : > { %1146 = vmatpush1.bf16.msra.mxu1 %v1594_v14  ;;  %1106 = vmatprep.subr.bf16.mxu0 %v1599_v15  ;;  %v233_v14 = vld [vmem:[%s1977_s3 + $0x8] sm:$0xff] }
  0x60   : > { %1147 = vmatprep.subr.bf16.mxu1 %v1602_v16 }
  0x62   : > { %1107 = vmatpush1.bf16.msra.mxu0 %v1597_v17 }
  0x63   : > { %1148 = vmatpush1.bf16.msra.mxu1 %v1600_v18  ;;  %1108 = vmatprep.subr.bf16.mxu0 %v1605_v19 }
  0x64   : > { %1149 = vmatprep.subr.bf16.mxu1 %v1608_v20 }
  0x66   : > { %1109 = vmatpush1.bf16.msra.mxu0 %v1603_v21 }
  0x67   : > { %1150 = vmatpush1.bf16.msra.mxu1 %v1606_v22  ;;  %1110 = vmatprep.subr.bf16.mxu0 %v1611_v23  ;;  %v234_v22 = vld [vmem:[%s1977_s3 + $0x10] sm:$0xff] }
  0x68   : > { %1151 = vmatprep.subr.bf16.mxu1 %v1614_v24 }
  0x6a   : > { %1111 = vmatpush1.bf16.msra.mxu0 %v1609_v25 }
  0x6b   : > { %1152 = vmatpush1.bf16.msra.mxu1 %v1612_v26  ;;  %1112 = vmatprep.subr.bf16.mxu0 %v1617_v27  ;;  %v235_v26 = vld [vmem:[%s1977_s3 + $0x18] sm:$0xff] }
  0x6c   : > { %1153 = vmatprep.subr.bf16.mxu1 %v1620_v28 }
  0x6e   : > { %1113 = vmatpush1.bf16.msra.mxu0 %v1615_v29 }
  0x6f   : > { %1154 = vmatpush1.bf16.msra.mxu1 %v1618_v30  ;;  %1114 = vmatprep.subr.bf16.mxu0 %v1623_v31 }
  0x70   : > { %1155 = vmatprep.subr.bf16.mxu1 %v1626_v32 }
  0x72   : > { %1115 = vmatpush1.bf16.msra.mxu0 %v1621_v33 }
  0x73   : > { %1156 = vmatpush1.bf16.msra.mxu1 %v1624_v34  ;;  %1116 = vmatprep.subr.bf16.mxu0 %v1629_v35  ;;  %v1202_v35 = vlaneseq (!%p1455_p7) }
  0x74   : > { %1157 = vmatprep.subr.bf16.mxu1 %v1632_v36 }
  0x75   : > { %v1203_v36 = vshrl.u32 (!%p1455_p7), %v1202_v35, 7 }
  0x76   : > { %1117 = vmatpush1.bf16.msra.mxu0 %v1627_v37  ;;  %v1200_v37 = vld [vmem:[%s1976_s2] sm:$0xf] (!%p1455_p7) }
  0x77   : > { %1158 = vmatpush1.bf16.msra.mxu1 %v1630_v38  ;;  %1118 = vmatprep.subr.bf16.mxu0 %v1635_v39  ;;  %v1204_v39 = vsub.s32 (!%p1455_p7), 0, %v1203_v36 }
  0x78   : > { %1159 = vmatprep.subr.bf16.mxu1 %v1638_v40  ;;  %v1208_v40 = vsub.s32 (!%p1455_p7), 1, %v1203_v36 }
  0x7a   : > { %1119 = vmatpush1.bf16.msra.mxu0 %v1633_v41  ;;  %v1212_v41 = vsub.s32 (!%p1455_p7), 2, %v1203_v36 }
  0x7b   : > { %1160 = vmatpush1.bf16.msra.mxu1 %v1636_v42  ;;  %1120 = vmatprep.subr.bf16.mxu0 %v1641_v43  ;;  %v1216_v42 = vsub.s32 (!%p1455_p7), 3, %v1203_v36 }
  0x7c   : > { %1161 = vmatprep.subr.bf16.mxu1 %v1644_v44 }
  0x7e   : > { %1121 = vmatpush1.bf16.msra.mxu0 %v1639_v45 }
  0x7f   : > { %1162 = vmatpush1.bf16.msra.mxu1 %v1642_v46  ;;  %1122 = vmatprep.subr.bf16.mxu0 %v1647_v47  ;;  %v1205_v46 = vrot.slane (!%p1455_p7), %v1200_v37, %v1204_v39  ;;  %v1209_v47 = vrot.slane (!%p1455_p7), %v1200_v37, %v1208_v40 }
  0x80   : > { %1163 = vmatprep.subr.bf16.mxu1 %v1650_v48  ;;  %v1213_v48 = vrot.slane (!%p1455_p7), %v1200_v37, %v1212_v41 }
  0x82   : > { %1123 = vmatpush1.bf16.msra.mxu0 %v1645_v49  ;;  %v1217_v49 = vrot.slane (!%p1455_p7), %v1200_v37, %v1216_v42 }
  0x83   : > { %1164 = vmatpush1.bf16.msra.mxu1 %v1648_v50  ;;  %1124 = vmatprep.subr.bf16.mxu0 %v1653_v51 }
  0x84   : > { %1165 = vmatprep.subr.bf16.mxu1 %v1656_v52 }
  0x86   : > { %1125 = vmatpush1.bf16.msra.mxu0 %v1651_v53 }
  0x87   : > { %1166 = vmatpush1.bf16.msra.mxu1 %v1654_v54  ;;  %1126 = vmatprep.subr.bf16.mxu0 %v1659_v55 }
  0x88   : > { %1167 = vmatprep.subr.bf16.mxu1 %v1662_v56 }
  0x8a   : > { %1127 = vmatpush1.bf16.msra.mxu0 %v1657_v57 }
  0x8b   : > { %1168 = vmatpush1.bf16.msra.mxu1 %v1660_v58  ;;  %1128 = vmatprep.subr.bf16.mxu0 %v1665_v59 }
  0x8c   : > { %1169 = vmatprep.subr.bf16.mxu1 %v1668_v60 }
  0x8e   : > { %1129 = vmatpush1.bf16.msra.mxu0 %v1663_v61 }
  0x8f   : > { %1170 = vmatpush1.bf16.msra.mxu1 %v1666_v62  ;;  %1130 = vmatprep.subr.bf16.mxu0 %v1671_v63 }
  0x90   : > { %1171 = vmatprep.subr.bf16.mxu1 %v1674_v0 }
  0x92   : > { %1131 = vmatpush1.bf16.msra.mxu0 %v1669_v1 }
  0x93   : > { %1172 = vmatpush1.bf16.msra.mxu1 %v1672_v2  ;;  %1132 = vmatprep.subr.bf16.mxu0 %v1677_v3 }
  0x94   : > { %1173 = vmatprep.subr.bf16.mxu1 %v1680_v4 }
  0x96   : > { %1133 = vmatpush1.bf16.msra.mxu0 %v1675_v5 }
  0x97   : > { %1174 = vmatpush1.bf16.msra.mxu1 %v1678_v6 }
  0x99   : > { %1135 = vmatmul.mubr.bf16.vlgmr.msra.gmra.mrb[4].mxu0 %v1842_v7 }
  0x9a   : > { %1176 = vmatmul.mubr.bf16.vlgmr.msra.gmra.mrb[4].mxu1 %v1844_v8 }
 0x12c   : > { %v1054_v9 = vpop.f32.mrb[0].mxu0 }
 0x12d   : > { %v1095_v11 = vpop.f32.mrb[0].mxu1  ;;  %v1056_v13 = vpop.f32.mrb[1].mxu0 }
 0x12e   : > { %v1096_v12 = vadd.f32 %v1095_v11, %v1054_v9  ;;  %v1097_v15 = vpop.f32.mrb[1].mxu1  ;;  %v1058_v17 = vpop.f32.mrb[2].mxu0 }
 0x12f   : > { %v1098_v16 = vadd.f32 %v1097_v15, %v1056_v13  ;;  %v1099_v18 = vpop.f32.mrb[2].mxu1  ;;  %v1059_v7 = vpop.f32.mrb[3].mxu0 }
 0x130   : > { %v1184_v19 = vadd.f32 %v1096_v12, %v232_v10  ;;  %v1100_v20 = vpop.f32.mrb[3].mxu1 }
 0x131   : > { %v1185_v8 = vadd.f32 %v1098_v16, %v233_v14 }
 0x132   : > { %1188 = vst [vmem:[%s1977_s3] sm:$0xff] %v1184_v19 }
 0x133   : > { %1189 = vst [vmem:[%s1977_s3 + $0x8] sm:$0xff] %v1185_v8 }
 0x139   : > { %v1196_v38 = vld [vmem:[%s1977_s3] sm:$0xff] (!%p1455_p7) }
 0x13a   : > { %v1197_v43 = vld [vmem:[%s1977_s3 + $0x8] sm:$0xff] (!%p1455_p7)  ;;  %v1222_v50 = vadd.f32 (!%p1455_p7), %v1205_v46, %v1196_v38 }
 0x13b   : > { %v1223_v51 = vadd.f32 (!%p1455_p7), %v1209_v47, %v1197_v43 }
 0x13c   : > { %v1226_v54 = vmax.f32 (!%p1455_p7), %v1222_v50, 0.0 }
 0x13d   : > { %v1227_v55 = vmax.f32 (!%p1455_p7), %v1223_v51, 0.0 }
 0x13e   : > { %1230 = vst [vmem:[%s1977_s3] sm:$0xff] (!%p1455_p7), %v1226_v54 }
 0x13f   : > { %1231 = vst [vmem:[%s1977_s3 + $0x8] sm:$0xff] (!%p1455_p7), %v1227_v55 }
 0x16c   : > { %v1136_v21 = vpop.f32.mrb[4].mxu0 }
 0x16d   : > { %v1177_v23 = vpop.f32.mrb[4].mxu1  ;;  %v1138_v25 = vpop.f32.mrb[5].mxu0  ;;  %1195 = sbr.rel (%p1455_p7) target bundleno = 384 (0x180), region = 40 }
 0x16e   : > { %v1178_v24 = vadd.f32 %v1177_v23, %v1136_v21  ;;  %v1179_v27 = vpop.f32.mrb[5].mxu1  ;;  %v1140_v29 = vpop.f32.mrb[6].mxu0 }
 0x16f   : > { %v1180_v28 = vadd.f32 %v1179_v27, %v1138_v25  ;;  %v1181_v30 = vpop.f32.mrb[6].mxu1  ;;  %v1141_v32 = vpop.f32.mrb[7].mxu0 }
 0x170   : > { %v1186_v31 = vadd.f32 %v1178_v24, %v234_v22  ;;  %v1182_v33 = vpop.f32.mrb[7].mxu1 }
 0x171   : > { %v1187_v34 = vadd.f32 %v1180_v28, %v235_v26 }
 0x172   : > { %1190 = vst [vmem:[%s1977_s3 + $0x10] sm:$0xff] %v1186_v31 }
 0x173   : > { %1191 = vst [vmem:[%s1977_s3 + $0x18] sm:$0xff] %v1187_v34 }
 0x179   : > { %v1198_v44 = vld [vmem:[%s1977_s3 + $0x10] sm:$0xff] }
 0x17a   : > { %v1199_v45 = vld [vmem:[%s1977_s3 + $0x18] sm:$0xff]  ;;  %v1224_v52 = vadd.f32 %v1213_v48, %v1198_v44 }
 0x17b   : > { %v1225_v53 = vadd.f32 %v1217_v49, %v1199_v45 }
 0x17c   : > { %v1228_v56 = vmax.f32 %v1224_v52, 0.0 }
 0x17d   : > { %v1229_v57 = vmax.f32 %v1225_v53, 0.0 }
 0x17e   : > { %1232 = vst [vmem:[%s1977_s3 + $0x10] sm:$0xff] %v1228_v56 }
 0x17f   : > { %1233 = vst [vmem:[%s1977_s3 + $0x18] sm:$0xff] %v1229_v57 }
 0x180 PF: > { %s13_s14 = sadd.s32 1, %s1703_s14   ;;  %s1978_s12 = smov %s1699_s13 }
 0x181   : > { %p10_p8 = scmp.ge.s32.totalorder %s13_s14, 7   ;;  %s1979_s13 = smov %s1981_s15 }
 0x183   :  { %12 = sbr.rel (!%p10_p8) target bundleno = 2 (0x2), region = 73 }

// kernel: resnet34_forward.70
= control target key start
LH: loop header
LB: loop body
LE: loop exit
PB: predicated region body
PF: predicated region fallthrough
CT: control target
= control target key end

     0   :  { %s944_s1 = inlined_call_operand.vmem [shape: bf16[256,512], index: 1, kind: input, shape index: {}]   ;;  %s945_s0 = inlined_call_operand.vmem [shape: bf16[8,256], index: 0, kind: input, shape index: {}]   ;;  %s946_s2 = inlined_call_operand.vmem [shape: f32[1,512], index: 2, kind: input, shape index: {}]   ;;  %s947_s3 = inlined_call_operand.vmem [shape: f32[8,512], index: 3, kind: output, shape index: {}]  }
   0x1   :  { %v616_v0 = vld [vmem:[%s944_s1 + $0x4] ss:$16 sps:$4 sm:$0xff]   ;;  %v618_v1 = vld [vmem:[%s944_s1 + $0xc] ss:$16 sps:$4 sm:$0xff]   ;;  %v620_v2 = vld [vmem:[%s944_s1] ss:$16 sps:$4 sm:$0xff]  }
   0x2   :  { %418 = vmatprep.subr.bf16.mxu0 %v616_v0  ;;  %v621_v3 = vld [vmem:[%s944_s1 + $0x8] ss:$16 sps:$4 sm:$0xff]   ;;  %459 = vmatprep.subr.bf16.mxu1 %v618_v1  ;;  %v622_v4 = vld [vmem:[%s944_s1 + $0x24] ss:$16 sps:$4 sm:$0xff]   ;;  %v624_v5 = vld [vmem:[%s944_s1 + $0x2c] ss:$16 sps:$4 sm:$0xff]  }
   0x3   :  { %419 = vmatpush1.bf16.msra.mxu0 %v620_v2  ;;  %460 = vmatpush1.bf16.msra.mxu1 %v621_v3  ;;  %v626_v6 = vld [vmem:[%s944_s1 + $0x20] ss:$16 sps:$4 sm:$0xff]   ;;  %v627_v7 = vld [vmem:[%s944_s1 + $0x28] ss:$16 sps:$4 sm:$0xff]   ;;  %v628_v8 = vld [vmem:[%s944_s1 + $0x44] ss:$16 sps:$4 sm:$0xff]   ;;  %v517_v3 = vlaneseq }
   0x4   :  { %420 = vmatprep.subr.bf16.mxu0 %v622_v4  ;;  %461 = vmatprep.subr.bf16.mxu1 %v624_v5  ;;  %v630_v9 = vld [vmem:[%s944_s1 + $0x4c] ss:$16 sps:$4 sm:$0xff]   ;;  %v632_v10 = vld [vmem:[%s944_s1 + $0x40] ss:$16 sps:$4 sm:$0xff]   ;;  %v633_v11 = vld [vmem:[%s944_s1 + $0x48] ss:$16 sps:$4 sm:$0xff]  }
   0x5   :  { %v634_v12 = vld [vmem:[%s944_s1 + $0x64] ss:$16 sps:$4 sm:$0xff]   ;;  %v636_v13 = vld [vmem:[%s944_s1 + $0x6c] ss:$16 sps:$4 sm:$0xff]   ;;  %v638_v14 = vld [vmem:[%s944_s1 + $0x60] ss:$16 sps:$4 sm:$0xff]  }
   0x6   :  { %v639_v15 = vld [vmem:[%s944_s1 + $0x68] ss:$16 sps:$4 sm:$0xff]   ;;  %v640_v16 = vld [vmem:[%s944_s1 + $0x84] ss:$16 sps:$4 sm:$0xff]   ;;  %v642_v17 = vld [vmem:[%s944_s1 + $0x8c] ss:$16 sps:$4 sm:$0xff]  }
   0x7   :  { %421 = vmatpush1.bf16.msra.mxu0 %v626_v6  ;;  %462 = vmatpush1.bf16.msra.mxu1 %v627_v7  ;;  %v644_v18 = vld [vmem:[%s944_s1 + $0x80] ss:$16 sps:$4 sm:$0xff]   ;;  %v645_v19 = vld [vmem:[%s944_s1 + $0x88] ss:$16 sps:$4 sm:$0xff]   ;;  %v646_v20 = vld [vmem:[%s944_s1 + $0xa4] ss:$16 sps:$4 sm:$0xff]  }
   0x8   :  { %422 = vmatprep.subr.bf16.mxu0 %v628_v8  ;;  %463 = vmatprep.subr.bf16.mxu1 %v630_v9  ;;  %v648_v21 = vld [vmem:[%s944_s1 + $0xac] ss:$16 sps:$4 sm:$0xff]   ;;  %v650_v22 = vld [vmem:[%s944_s1 + $0xa0] ss:$16 sps:$4 sm:$0xff]   ;;  %v651_v23 = vld [vmem:[%s944_s1 + $0xa8] ss:$16 sps:$4 sm:$0xff]  }
   0x9   :  { %v652_v24 = vld [vmem:[%s944_s1 + $0xc4] ss:$16 sps:$4 sm:$0xff]   ;;  %v654_v25 = vld [vmem:[%s944_s1 + $0xcc] ss:$16 sps:$4 sm:$0xff]   ;;  %v656_v26 = vld [vmem:[%s944_s1 + $0xc0] ss:$16 sps:$4 sm:$0xff]  }
   0xa   :  { %v657_v27 = vld [vmem:[%s944_s1 + $0xc8] ss:$16 sps:$4 sm:$0xff]   ;;  %v658_v28 = vld [vmem:[%s944_s1 + $0xe4] ss:$16 sps:$4 sm:$0xff]   ;;  %v660_v29 = vld [vmem:[%s944_s1 + $0xec] ss:$16 sps:$4 sm:$0xff]  }
   0xb   :  { %423 = vmatpush1.bf16.msra.mxu0 %v632_v10  ;;  %464 = vmatpush1.bf16.msra.mxu1 %v633_v11  ;;  %v662_v30 = vld [vmem:[%s944_s1 + $0xe0] ss:$16 sps:$4 sm:$0xff]   ;;  %v663_v31 = vld [vmem:[%s944_s1 + $0xe8] ss:$16 sps:$4 sm:$0xff]   ;;  %v664_v32 = vld [vmem:[%s944_s1 + $0x104] ss:$16 sps:$4 sm:$0xff]  }
   0xc   :  { %424 = vmatprep.subr.bf16.mxu0 %v634_v12  ;;  %465 = vmatprep.subr.bf16.mxu1 %v636_v13  ;;  %v666_v33 = vld [vmem:[%s944_s1 + $0x10c] ss:$16 sps:$4 sm:$0xff]   ;;  %v668_v34 = vld [vmem:[%s944_s1 + $0x100] ss:$16 sps:$4 sm:$0xff]   ;;  %v669_v35 = vld [vmem:[%s944_s1 + $0x108] ss:$16 sps:$4 sm:$0xff]  }
   0xd   :  { %v670_v36 = vld [vmem:[%s944_s1 + $0x124] ss:$16 sps:$4 sm:$0xff]   ;;  %v672_v37 = vld [vmem:[%s944_s1 + $0x12c] ss:$16 sps:$4 sm:$0xff]   ;;  %v674_v38 = vld [vmem:[%s944_s1 + $0x120] ss:$16 sps:$4 sm:$0xff]  }
   0xe   :  { %v675_v39 = vld [vmem:[%s944_s1 + $0x128] ss:$16 sps:$4 sm:$0xff]   ;;  %v676_v40 = vld [vmem:[%s944_s1 + $0x144] ss:$16 sps:$4 sm:$0xff]   ;;  %v678_v41 = vld [vmem:[%s944_s1 + $0x14c] ss:$16 sps:$4 sm:$0xff]  }
   0xf   :  { %425 = vmatpush1.bf16.msra.mxu0 %v638_v14  ;;  %466 = vmatpush1.bf16.msra.mxu1 %v639_v15  ;;  %v680_v42 = vld [vmem:[%s944_s1 + $0x140] ss:$16 sps:$4 sm:$0xff]   ;;  %v681_v43 = vld [vmem:[%s944_s1 + $0x148] ss:$16 sps:$4 sm:$0xff]   ;;  %v682_v44 = vld [vmem:[%s944_s1 + $0x164] ss:$16 sps:$4 sm:$0xff]  }
  0x10   :  { %426 = vmatprep.subr.bf16.mxu0 %v640_v16  ;;  %467 = vmatprep.subr.bf16.mxu1 %v642_v17  ;;  %v684_v45 = vld [vmem:[%s944_s1 + $0x16c] ss:$16 sps:$4 sm:$0xff]   ;;  %v26_v46 = vld [vmem:[%s945_s0] sm:$0xff]  ;;  %v687_v49 = vld [vmem:[%s944_s1 + $0x168] ss:$16 sps:$4 sm:$0xff]   ;;  %v518_v4 = vshrl.u32 %v517_v3, 7 }
  0x11   :  { %v550_v47 = vcombine.high %v26_v46, %v26_v46  ;;  %v686_v48 = vld [vmem:[%s944_s1 + $0x160] ss:$16 sps:$4 sm:$0xff]   ;;  %v688_v50 = vld [vmem:[%s944_s1 + $0x184] ss:$16 sps:$4 sm:$0xff]   ;;  %v690_v51 = vld [vmem:[%s944_s1 + $0x18c] ss:$16 sps:$4 sm:$0xff]   ;;  %v549_v2 = vcombine.low %v26_v46, %v26_v46 }
  0x12   :  { %v692_v52 = vld [vmem:[%s944_s1 + $0x180] ss:$16 sps:$4 sm:$0xff]   ;;  %v693_v53 = vld [vmem:[%s944_s1 + $0x188] ss:$16 sps:$4 sm:$0xff]   ;;  %v694_v54 = vld [vmem:[%s944_s1 + $0x1a4] ss:$16 sps:$4 sm:$0xff]  }
  0x13   :  { %427 = vmatpush1.bf16.msra.mxu0 %v644_v18  ;;  %468 = vmatpush1.bf16.msra.mxu1 %v645_v19  ;;  %v696_v55 = vld [vmem:[%s944_s1 + $0x1ac] ss:$16 sps:$4 sm:$0xff]   ;;  %v698_v56 = vld [vmem:[%s944_s1 + $0x1a0] ss:$16 sps:$4 sm:$0xff]   ;;  %v699_v57 = vld [vmem:[%s944_s1 + $0x1a8] ss:$16 sps:$4 sm:$0xff]  }
  0x14   :  { %428 = vmatprep.subr.bf16.mxu0 %v646_v20  ;;  %469 = vmatprep.subr.bf16.mxu1 %v648_v21  ;;  %v700_v58 = vld [vmem:[%s944_s1 + $0x1c4] ss:$16 sps:$4 sm:$0xff]   ;;  %v702_v59 = vld [vmem:[%s944_s1 + $0x1cc] ss:$16 sps:$4 sm:$0xff]   ;;  %v704_v60 = vld [vmem:[%s944_s1 + $0x1c0] ss:$16 sps:$4 sm:$0xff]  }
  0x15   :  { %450 = vmatprep.mubr.bf16.mxu0 %v550_v47  ;;  %491 = vmatprep.mubr.bf16.mxu1 %v550_v47  ;;  %v705_v61 = vld [vmem:[%s944_s1 + $0x1c8] ss:$16 sps:$4 sm:$0xff]   ;;  %v706_v62 = vld [vmem:[%s944_s1 + $0x1e4] ss:$16 sps:$4 sm:$0xff]   ;;  %v708_v63 = vld [vmem:[%s944_s1 + $0x1ec] ss:$16 sps:$4 sm:$0xff]  }
  0x16   :  { %v710_v0 = vld [vmem:[%s944_s1 + $0x1e0] ss:$16 sps:$4 sm:$0xff]   ;;  %v711_v1 = vld [vmem:[%s944_s1 + $0x1e8] ss:$16 sps:$4 sm:$0xff]   ;;  %v519_v5 = vsub.s32 0, %v518_v4  ;;  %v527_v6 = vsub.s32 2, %v518_v4 }
  0x17   :  { %429 = vmatpush1.bf16.msra.mxu0 %v650_v22  ;;  %470 = vmatpush1.bf16.msra.mxu1 %v651_v23  ;;  %v515_v7 = vld [vmem:[%s946_s2] sm:$0xf]  ;;  %v523_v8 = vsub.s32 1, %v518_v4  ;;  %v531_v9 = vsub.s32 3, %v518_v4 }
  0x18   :  { %430 = vmatprep.subr.bf16.mxu0 %v652_v24  ;;  %471 = vmatprep.subr.bf16.mxu1 %v654_v25  ;;  %v520_v10 = vrot.slane %v515_v7, %v519_v5  ;;  %v528_v11 = vrot.slane %v515_v7, %v527_v6 }
  0x19   :  { %v524_v14 = vrot.slane %v515_v7, %v523_v8  ;;  %v532_v15 = vrot.slane %v515_v7, %v531_v9 }
  0x1b   :  { %431 = vmatpush1.bf16.msra.mxu0 %v656_v26  ;;  %472 = vmatpush1.bf16.msra.mxu1 %v657_v27 }
  0x1c   :  { %432 = vmatprep.subr.bf16.mxu0 %v658_v28  ;;  %473 = vmatprep.subr.bf16.mxu1 %v660_v29 }
  0x1f   :  { %433 = vmatpush1.bf16.msra.mxu0 %v662_v30  ;;  %474 = vmatpush1.bf16.msra.mxu1 %v663_v31 }
  0x20   :  { %434 = vmatprep.subr.bf16.mxu0 %v664_v32  ;;  %475 = vmatprep.subr.bf16.mxu1 %v666_v33 }
  0x23   :  { %435 = vmatpush1.bf16.msra.mxu0 %v668_v34  ;;  %476 = vmatpush1.bf16.msra.mxu1 %v669_v35 }
  0x24   :  { %436 = vmatprep.subr.bf16.mxu0 %v670_v36  ;;  %477 = vmatprep.subr.bf16.mxu1 %v672_v37 }
  0x27   :  { %437 = vmatpush1.bf16.msra.mxu0 %v674_v38  ;;  %478 = vmatpush1.bf16.msra.mxu1 %v675_v39 }
  0x28   :  { %438 = vmatprep.subr.bf16.mxu0 %v676_v40  ;;  %479 = vmatprep.subr.bf16.mxu1 %v678_v41 }
  0x2b   :  { %439 = vmatpush1.bf16.msra.mxu0 %v680_v42  ;;  %480 = vmatpush1.bf16.msra.mxu1 %v681_v43 }
  0x2c   :  { %440 = vmatprep.subr.bf16.mxu0 %v682_v44  ;;  %481 = vmatprep.subr.bf16.mxu1 %v684_v45 }
  0x2f   :  { %441 = vmatpush1.bf16.msra.mxu0 %v686_v48  ;;  %482 = vmatpush1.bf16.msra.mxu1 %v687_v49 }
  0x30   :  { %442 = vmatprep.subr.bf16.mxu0 %v688_v50  ;;  %483 = vmatprep.subr.bf16.mxu1 %v690_v51 }
  0x33   :  { %443 = vmatpush1.bf16.msra.mxu0 %v692_v52  ;;  %484 = vmatpush1.bf16.msra.mxu1 %v693_v53 }
  0x34   :  { %444 = vmatprep.subr.bf16.mxu0 %v694_v54  ;;  %485 = vmatprep.subr.bf16.mxu1 %v696_v55 }
  0x37   :  { %445 = vmatpush1.bf16.msra.mxu0 %v698_v56  ;;  %486 = vmatpush1.bf16.msra.mxu1 %v699_v57 }
  0x38   :  { %446 = vmatprep.subr.bf16.mxu0 %v700_v58  ;;  %487 = vmatprep.subr.bf16.mxu1 %v702_v59 }
  0x3b   :  { %447 = vmatpush1.bf16.msra.mxu0 %v704_v60  ;;  %488 = vmatpush1.bf16.msra.mxu1 %v705_v61 }
  0x3c   :  { %448 = vmatprep.subr.bf16.mxu0 %v706_v62  ;;  %489 = vmatprep.subr.bf16.mxu1 %v708_v63 }
  0x3f   :  { %449 = vmatpush1.bf16.msra.mxu0 %v710_v0  ;;  %490 = vmatpush1.bf16.msra.mxu1 %v711_v1 }
  0x42   :  { %451 = vmatmul.mubr.bf16.vlgmr.msra.gmra.mrb[0].mxu0 %v549_v2  ;;  %492 = vmatmul.mubr.bf16.vlgmr.msra.gmra.mrb[0].mxu1 %v549_v2 }
 0x115   :  { %v452_v12 = vpop.f32.mrb[0].mxu0  ;;  %v493_v13 = vpop.f32.mrb[0].mxu1 }
 0x116   :  { %v454_v16 = vpop.f32.mrb[1].mxu0  ;;  %v495_v17 = vpop.f32.mrb[1].mxu1  ;;  %v537_v20 = vadd.f32 %v520_v10, %v452_v12  ;;  %v539_v21 = vadd.f32 %v528_v11, %v493_v13 }
 0x117   :  { %v456_v18 = vpop.f32.mrb[2].mxu0  ;;  %v497_v19 = vpop.f32.mrb[2].mxu1  ;;  %v538_v24 = vadd.f32 %v524_v14, %v454_v16  ;;  %v540_v25 = vadd.f32 %v532_v15, %v495_v17 }
 0x118   :  { %v457_v22 = vpop.f32.mrb[3].mxu0  ;;  %v498_v23 = vpop.f32.mrb[3].mxu1  ;;  %541 = vst [vmem:[%s947_s3] sm:$0xff] %v537_v20  ;;  %543 = vst [vmem:[%s947_s3 + $0x10] sm:$0xff] %v539_v21 }
 0x119   :  { %542 = vst [vmem:[%s947_s3 + $0x8] sm:$0xff] %v538_v24  ;;  %544 = vst [vmem:[%s947_s3 + $0x18] sm:$0xff] %v540_v25 }

// kernel: resnet34_forward.71
= control target key start
LH: loop header
LB: loop body
LE: loop exit
PB: predicated region body
PF: predicated region fallthrough
CT: control target
= control target key end

     0   :  { %s1802_s15 = smov 0   ;;  %s1804_s16 = smov 0   ;;  %s2062_s0 = inlined_call_operand.vmem [shape: bf16[8,4608], index: 0, kind: input, shape index: {}]   ;;  %s2063_s1 = inlined_call_operand.vmem [shape: bf16[4608,512], index: 1, kind: input, shape index: {}]   ;;  %s2064_s2 = inlined_call_operand.vmem [shape: f32[1,512], index: 2, kind: input, shape index: {}]   ;;  %s2065_s3 = inlined_call_operand.vmem [shape: f32[8,512], index: 3, kind: input, shape index: {}]   ;;  %s2066_s4 = inlined_call_operand.vmem [shape: f32[8,512], index: 4, kind: output, shape index: {}]  }
   0x1   :  { %s1806_s17 = smov 0  }
   0x2 LB: > { %s23_s18 = sadd.s32 1, %s1770_s16  ;;  %p1387_p0 = scmp.ge.s32.totalorder %s1774_s17, 1  ;;  %s1774_s17 = sphi %s1806_s17, %s14_s17   ;;  %s1770_s16 = sphi %s1804_s16, %s2068_s16   ;;  %s1766_s15 = sphi %s1802_s15, %s2067_s15  }
   0x3   : > { %p24_p1 = scmp.ge.s32.totalorder %s23_s18, 9  ;;  %p203_p2 = scmp.lt.s32.totalorder %s1774_s17, 10 }
   0x5   : > { %s2070_s18 = smov (%p24_p1, %s23_s18), 0  ;;  %p204_p3 = pnand %p1387_p0, %p203_p2 }
   0x6   : > { %s1388_s19 = sshll.u32 (!%p204_p3), %s1766_s15, 2  ;;  %s1390_s20 = sshll.u32 (!%p204_p3), %s1766_s15, 6 }
   0x7   : > { %207 = sbr.rel (%p204_p3) target bundleno = 386 (0x182), region = 36  ;;  %p247_p4 = scmp.lt.s32.totalorder (!%p204_p3), %s1388_s19, 35 }
   0x8   : > { %p255_p5 = scmp.lt.s32.totalorder (!%p204_p3), %s1390_s20, 575  ;;  %p1393_p6 = scmp.ne.s32.totalorder (!%p204_p3), %s1766_s15, 0 }
   0xe   : > { %s2072_s19 = smov (!%p247_p4, %s1388_s19), 35  ;;  %s2074_s20 = smov (!%p255_p5, %s1390_s20), 575 }
   0xf   : > { %s1389_s21 = sshll.u32 %s2072_s19, 2  ;;  %s1530_s25 = sshll.u32 %s2074_s20, 4  ;;  %v1776_v0 = vmov (!%p1393_p6), 0.0  }
  0x10   : > { %s1827_s24 = scalar_lea.vmem %s2062_s0, %s1389_s21  ;;  %s1832_s28 = scalar_lea.vmem %s2063_s1, %s1530_s25  ;;  %275 = vst [vmem:[%s2066_s4] sm:$0xff] (!%p1393_p6), %v1776_v0  ;;  %276 = vst [vmem:[%s2066_s4 + $0x8] sm:$0xff] (!%p1393_p6), %v1776_v0 }
  0x11   : > { %274 = sbr.rel (%p1393_p6) target bundleno = 24 (0x18), region = 40  ;;  %277 = vst [vmem:[%s2066_s4 + $0x10] sm:$0xff] (!%p1393_p6), %v1776_v0  ;;  %278 = vst [vmem:[%s2066_s4 + $0x18] sm:$0xff] (!%p1393_p6), %v1776_v0 }
  0x18 PF: > { %v1556_v1 = vld [vmem:[%s1832_s28 + $0x4] ss:$16 sps:$4 sm:$0xff]   ;;  %v1560_v3 = vld [vmem:[%s1832_s28] ss:$16 sps:$4 sm:$0xff]   ;;  %v284_v49 = vld [vmem:[%s1827_s24 + $0x8] sm:$0xff]  ;;  %p1526_p7 = scmp.ne.s32.totalorder %s1766_s15, 8 }
  0x19   : > { %v1558_v2 = vld [vmem:[%s1832_s28 + $0x204] ss:$16 sps:$4 sm:$0xff]   ;;  %1067 = vmatprep.subr.bf16.mxu0 %v1556_v1  ;;  %v1561_v4 = vld [vmem:[%s1832_s28 + $0x200] ss:$16 sps:$4 sm:$0xff]   ;;  %v1397_v52 = vcombine.high %v284_v49, %v284_v49 }
  0x1a   : > { %1108 = vmatprep.subr.bf16.mxu1 %v1558_v2  ;;  %v1562_v5 = vld [vmem:[%s1832_s28 + $0x24] ss:$16 sps:$4 sm:$0xff]   ;;  %1068 = vmatpush1.bf16.msra.mxu0 %v1560_v3  ;;  %v1566_v7 = vld [vmem:[%s1832_s28 + $0x20] ss:$16 sps:$4 sm:$0xff]  }
  0x1b   : > { %1109 = vmatpush1.bf16.msra.mxu1 %v1561_v4  ;;  %v1564_v6 = vld [vmem:[%s1832_s28 + $0x224] ss:$16 sps:$4 sm:$0xff]   ;;  %1069 = vmatprep.subr.bf16.mxu0 %v1562_v5  ;;  %v1567_v8 = vld [vmem:[%s1832_s28 + $0x220] ss:$16 sps:$4 sm:$0xff]   ;;  %v1658_v5 = vld [vmem:[%s1832_s28 + $0xc] ss:$16 sps:$4 sm:$0xff]  }
  0x1c   : > { %1110 = vmatprep.subr.bf16.mxu1 %v1564_v6  ;;  %v1568_v9 = vld [vmem:[%s1832_s28 + $0x44] ss:$16 sps:$4 sm:$0xff]   ;;  %v1572_v11 = vld [vmem:[%s1832_s28 + $0x40] ss:$16 sps:$4 sm:$0xff]   ;;  %1140 = vmatprep.mubr.bf16.mxu1 %v1397_v52  ;;  %v1661_v6 = vld [vmem:[%s1832_s28 + $0x20c] ss:$16 sps:$4 sm:$0xff]  }
  0x1d   : > { %v1570_v10 = vld [vmem:[%s1832_s28 + $0x244] ss:$16 sps:$4 sm:$0xff]   ;;  %v1573_v12 = vld [vmem:[%s1832_s28 + $0x240] ss:$16 sps:$4 sm:$0xff]  }
  0x1e   : > { %1070 = vmatpush1.bf16.msra.mxu0 %v1566_v7  ;;  %v1574_v13 = vld [vmem:[%s1832_s28 + $0x64] ss:$16 sps:$4 sm:$0xff]   ;;  %v1578_v15 = vld [vmem:[%s1832_s28 + $0x60] ss:$16 sps:$4 sm:$0xff]  }
  0x1f   : > { %1111 = vmatpush1.bf16.msra.mxu1 %v1567_v8  ;;  %1071 = vmatprep.subr.bf16.mxu0 %v1568_v9  ;;  %v1576_v14 = vld [vmem:[%s1832_s28 + $0x264] ss:$16 sps:$4 sm:$0xff]   ;;  %v1579_v16 = vld [vmem:[%s1832_s28 + $0x260] ss:$16 sps:$4 sm:$0xff]   ;;  %v1920_v8 = vcombine.low %v284_v49, %v284_v49  ;;  %v1656_v9 = vld [vmem:[%s1832_s28 + $0x8] ss:$16 sps:$4 sm:$0xff]  }
  0x20   : > { %1112 = vmatprep.subr.bf16.mxu1 %v1570_v10  ;;  %v1580_v17 = vld [vmem:[%s1832_s28 + $0x84] ss:$16 sps:$4 sm:$0xff]   ;;  %v1584_v19 = vld [vmem:[%s1832_s28 + $0x80] ss:$16 sps:$4 sm:$0xff]   ;;  %v1659_v10 = vld [vmem:[%s1832_s28 + $0x208] ss:$16 sps:$4 sm:$0xff]  }
  0x21   : > { %v1582_v18 = vld [vmem:[%s1832_s28 + $0x284] ss:$16 sps:$4 sm:$0xff]   ;;  %v1585_v20 = vld [vmem:[%s1832_s28 + $0x280] ss:$16 sps:$4 sm:$0xff]   ;;  %v1716_v49 = vld [vmem:[%s1832_s28 + $0x148] ss:$16 sps:$4 sm:$0xff]  }
  0x22   : > { %1072 = vmatpush1.bf16.msra.mxu0 %v1572_v11  ;;  %v1586_v21 = vld [vmem:[%s1832_s28 + $0xa4] ss:$16 sps:$4 sm:$0xff]   ;;  %v1590_v23 = vld [vmem:[%s1832_s28 + $0xa0] ss:$16 sps:$4 sm:$0xff]   ;;  %v1664_v11 = vld [vmem:[%s1832_s28 + $0x2c] ss:$16 sps:$4 sm:$0xff]  }
  0x23   : > { %1113 = vmatpush1.bf16.msra.mxu1 %v1573_v12  ;;  %1073 = vmatprep.subr.bf16.mxu0 %v1574_v13  ;;  %v1588_v22 = vld [vmem:[%s1832_s28 + $0x2a4] ss:$16 sps:$4 sm:$0xff]   ;;  %v1591_v24 = vld [vmem:[%s1832_s28 + $0x2a0] ss:$16 sps:$4 sm:$0xff]   ;;  %v1667_v12 = vld [vmem:[%s1832_s28 + $0x22c] ss:$16 sps:$4 sm:$0xff]  }
  0x24   : > { %1114 = vmatprep.subr.bf16.mxu1 %v1576_v14  ;;  %v1592_v25 = vld [vmem:[%s1832_s28 + $0xc4] ss:$16 sps:$4 sm:$0xff]   ;;  %v1596_v27 = vld [vmem:[%s1832_s28 + $0xc0] ss:$16 sps:$4 sm:$0xff]   ;;  %v1662_v13 = vld [vmem:[%s1832_s28 + $0x28] ss:$16 sps:$4 sm:$0xff]  }
  0x25   : > { %v1594_v26 = vld [vmem:[%s1832_s28 + $0x2c4] ss:$16 sps:$4 sm:$0xff]   ;;  %v1597_v28 = vld [vmem:[%s1832_s28 + $0x2c0] ss:$16 sps:$4 sm:$0xff]   ;;  %v1665_v14 = vld [vmem:[%s1832_s28 + $0x228] ss:$16 sps:$4 sm:$0xff]  }
  0x26   : > { %1074 = vmatpush1.bf16.msra.mxu0 %v1578_v15  ;;  %v1598_v29 = vld [vmem:[%s1832_s28 + $0xe4] ss:$16 sps:$4 sm:$0xff]   ;;  %v1602_v31 = vld [vmem:[%s1832_s28 + $0xe0] ss:$16 sps:$4 sm:$0xff]   ;;  %v1670_v15 = vld [vmem:[%s1832_s28 + $0x4c] ss:$16 sps:$4 sm:$0xff]  }
  0x27   : > { %1115 = vmatpush1.bf16.msra.mxu1 %v1579_v16  ;;  %1075 = vmatprep.subr.bf16.mxu0 %v1580_v17  ;;  %v1600_v30 = vld [vmem:[%s1832_s28 + $0x2e4] ss:$16 sps:$4 sm:$0xff]   ;;  %v1603_v32 = vld [vmem:[%s1832_s28 + $0x2e0] ss:$16 sps:$4 sm:$0xff]   ;;  %v1673_v16 = vld [vmem:[%s1832_s28 + $0x24c] ss:$16 sps:$4 sm:$0xff]  }
  0x28   : > { %1116 = vmatprep.subr.bf16.mxu1 %v1582_v18  ;;  %v1604_v33 = vld [vmem:[%s1832_s28 + $0x104] ss:$16 sps:$4 sm:$0xff]   ;;  %v1608_v35 = vld [vmem:[%s1832_s28 + $0x100] ss:$16 sps:$4 sm:$0xff]   ;;  %v1668_v17 = vld [vmem:[%s1832_s28 + $0x48] ss:$16 sps:$4 sm:$0xff]  }
  0x29   : > { %v1606_v34 = vld [vmem:[%s1832_s28 + $0x304] ss:$16 sps:$4 sm:$0xff]   ;;  %v1609_v36 = vld [vmem:[%s1832_s28 + $0x300] ss:$16 sps:$4 sm:$0xff]   ;;  %v1671_v18 = vld [vmem:[%s1832_s28 + $0x248] ss:$16 sps:$4 sm:$0xff]  }
  0x2a   : > { %1076 = vmatpush1.bf16.msra.mxu0 %v1584_v19  ;;  %v1610_v37 = vld [vmem:[%s1832_s28 + $0x124] ss:$16 sps:$4 sm:$0xff]   ;;  %v1614_v39 = vld [vmem:[%s1832_s28 + $0x120] ss:$16 sps:$4 sm:$0xff]   ;;  %v1676_v19 = vld [vmem:[%s1832_s28 + $0x6c] ss:$16 sps:$4 sm:$0xff]  }
  0x2b   : > { %1117 = vmatpush1.bf16.msra.mxu1 %v1585_v20  ;;  %1077 = vmatprep.subr.bf16.mxu0 %v1586_v21  ;;  %v1612_v38 = vld [vmem:[%s1832_s28 + $0x324] ss:$16 sps:$4 sm:$0xff]   ;;  %v1615_v40 = vld [vmem:[%s1832_s28 + $0x320] ss:$16 sps:$4 sm:$0xff]   ;;  %v1679_v20 = vld [vmem:[%s1832_s28 + $0x26c] ss:$16 sps:$4 sm:$0xff]  }
  0x2c   : > { %1118 = vmatprep.subr.bf16.mxu1 %v1588_v22  ;;  %v1616_v41 = vld [vmem:[%s1832_s28 + $0x144] ss:$16 sps:$4 sm:$0xff]   ;;  %v1620_v43 = vld [vmem:[%s1832_s28 + $0x140] ss:$16 sps:$4 sm:$0xff]   ;;  %v1674_v21 = vld [vmem:[%s1832_s28 + $0x68] ss:$16 sps:$4 sm:$0xff]  }
  0x2d   : > { %v1618_v42 = vld [vmem:[%s1832_s28 + $0x344] ss:$16 sps:$4 sm:$0xff]   ;;  %v1621_v44 = vld [vmem:[%s1832_s28 + $0x340] ss:$16 sps:$4 sm:$0xff]   ;;  %v1677_v22 = vld [vmem:[%s1832_s28 + $0x268] ss:$16 sps:$4 sm:$0xff]  }
  0x2e   : > { %1078 = vmatpush1.bf16.msra.mxu0 %v1590_v23  ;;  %v1622_v45 = vld [vmem:[%s1832_s28 + $0x164] ss:$16 sps:$4 sm:$0xff]   ;;  %v1626_v50 = vld [vmem:[%s1832_s28 + $0x160] ss:$16 sps:$4 sm:$0xff]   ;;  %v1682_v23 = vld [vmem:[%s1832_s28 + $0x8c] ss:$16 sps:$4 sm:$0xff]  }
  0x2f   : > { %1119 = vmatpush1.bf16.msra.mxu1 %v1591_v24  ;;  %1079 = vmatprep.subr.bf16.mxu0 %v1592_v25  ;;  %v1624_v46 = vld [vmem:[%s1832_s28 + $0x364] ss:$16 sps:$4 sm:$0xff]   ;;  %v1627_v51 = vld [vmem:[%s1832_s28 + $0x360] ss:$16 sps:$4 sm:$0xff]   ;;  %v1685_v24 = vld [vmem:[%s1832_s28 + $0x28c] ss:$16 sps:$4 sm:$0xff]  }
  0x30   : > { %1120 = vmatprep.subr.bf16.mxu1 %v1594_v26  ;;  %v283_v47 = vld [vmem:[%s1827_s24] sm:$0xff]  ;;  %v1680_v25 = vld [vmem:[%s1832_s28 + $0x88] ss:$16 sps:$4 sm:$0xff]  }
  0x31   : > { %v1894_v48 = vcombine.high %v283_v47, %v283_v47  ;;  %v1628_v53 = vld [vmem:[%s1832_s28 + $0x184] ss:$16 sps:$4 sm:$0xff]   ;;  %v1632_v55 = vld [vmem:[%s1832_s28 + $0x180] ss:$16 sps:$4 sm:$0xff]   ;;  %v1918_v7 = vcombine.low %v283_v47, %v283_v47  ;;  %v1683_v26 = vld [vmem:[%s1832_s28 + $0x288] ss:$16 sps:$4 sm:$0xff]  }
  0x32   : > { %1080 = vmatpush1.bf16.msra.mxu0 %v1596_v27  ;;  %v1630_v54 = vld [vmem:[%s1832_s28 + $0x384] ss:$16 sps:$4 sm:$0xff]   ;;  %v1633_v56 = vld [vmem:[%s1832_s28 + $0x380] ss:$16 sps:$4 sm:$0xff]   ;;  %v1688_v27 = vld [vmem:[%s1832_s28 + $0xac] ss:$16 sps:$4 sm:$0xff]  }
  0x33   : > { %1121 = vmatpush1.bf16.msra.mxu1 %v1597_v28  ;;  %1081 = vmatprep.subr.bf16.mxu0 %v1598_v29  ;;  %v1634_v57 = vld [vmem:[%s1832_s28 + $0x1a4] ss:$16 sps:$4 sm:$0xff]   ;;  %v1638_v59 = vld [vmem:[%s1832_s28 + $0x1a0] ss:$16 sps:$4 sm:$0xff]   ;;  %v1691_v28 = vld [vmem:[%s1832_s28 + $0x2ac] ss:$16 sps:$4 sm:$0xff]  }
  0x34   : > { %1122 = vmatprep.subr.bf16.mxu1 %v1600_v30  ;;  %1099 = vmatprep.mubr.bf16.mxu0 %v1894_v48  ;;  %v1636_v58 = vld [vmem:[%s1832_s28 + $0x3a4] ss:$16 sps:$4 sm:$0xff]   ;;  %v1639_v60 = vld [vmem:[%s1832_s28 + $0x3a0] ss:$16 sps:$4 sm:$0xff]   ;;  %v1686_v29 = vld [vmem:[%s1832_s28 + $0xa8] ss:$16 sps:$4 sm:$0xff]  }
  0x35   : > { %v1640_v61 = vld [vmem:[%s1832_s28 + $0x1c4] ss:$16 sps:$4 sm:$0xff]   ;;  %v1644_v63 = vld [vmem:[%s1832_s28 + $0x1c0] ss:$16 sps:$4 sm:$0xff]   ;;  %v1689_v30 = vld [vmem:[%s1832_s28 + $0x2a8] ss:$16 sps:$4 sm:$0xff]  }
  0x36   : > { %1082 = vmatpush1.bf16.msra.mxu0 %v1602_v31  ;;  %v1642_v62 = vld [vmem:[%s1832_s28 + $0x3c4] ss:$16 sps:$4 sm:$0xff]   ;;  %v1645_v0 = vld [vmem:[%s1832_s28 + $0x3c0] ss:$16 sps:$4 sm:$0xff]   ;;  %v1694_v31 = vld [vmem:[%s1832_s28 + $0xcc] ss:$16 sps:$4 sm:$0xff]  }
  0x37   : > { %1123 = vmatpush1.bf16.msra.mxu1 %v1603_v32  ;;  %1083 = vmatprep.subr.bf16.mxu0 %v1604_v33  ;;  %v1646_v1 = vld [vmem:[%s1832_s28 + $0x1e4] ss:$16 sps:$4 sm:$0xff]   ;;  %v1650_v3 = vld [vmem:[%s1832_s28 + $0x1e0] ss:$16 sps:$4 sm:$0xff]   ;;  %v1697_v32 = vld [vmem:[%s1832_s28 + $0x2cc] ss:$16 sps:$4 sm:$0xff]  }
  0x38   : > { %1124 = vmatprep.subr.bf16.mxu1 %v1606_v34  ;;  %v1648_v2 = vld [vmem:[%s1832_s28 + $0x3e4] ss:$16 sps:$4 sm:$0xff]   ;;  %v1651_v4 = vld [vmem:[%s1832_s28 + $0x3e0] ss:$16 sps:$4 sm:$0xff]   ;;  %v1692_v33 = vld [vmem:[%s1832_s28 + $0xc8] ss:$16 sps:$4 sm:$0xff]  }
  0x39   : > { %v1695_v34 = vld [vmem:[%s1832_s28 + $0x2c8] ss:$16 sps:$4 sm:$0xff]   ;;  %v1718_v47 = vld [vmem:[%s1832_s28 + $0x14c] ss:$16 sps:$4 sm:$0xff]  }
  0x3a   : > { %1084 = vmatpush1.bf16.msra.mxu0 %v1608_v35  ;;  %v1700_v35 = vld [vmem:[%s1832_s28 + $0xec] ss:$16 sps:$4 sm:$0xff]  }
  0x3b   : > { %1125 = vmatpush1.bf16.msra.mxu1 %v1609_v36  ;;  %1085 = vmatprep.subr.bf16.mxu0 %v1610_v37  ;;  %v1703_v36 = vld [vmem:[%s1832_s28 + $0x2ec] ss:$16 sps:$4 sm:$0xff]   ;;  %v1698_v37 = vld [vmem:[%s1832_s28 + $0xe8] ss:$16 sps:$4 sm:$0xff]  }
  0x3c   : > { %1126 = vmatprep.subr.bf16.mxu1 %v1612_v38  ;;  %v1701_v38 = vld [vmem:[%s1832_s28 + $0x2e8] ss:$16 sps:$4 sm:$0xff]  }
  0x3e   : > { %1086 = vmatpush1.bf16.msra.mxu0 %v1614_v39  ;;  %v1706_v39 = vld [vmem:[%s1832_s28 + $0x10c] ss:$16 sps:$4 sm:$0xff]  }
  0x3f   : > { %1127 = vmatpush1.bf16.msra.mxu1 %v1615_v40  ;;  %1087 = vmatprep.subr.bf16.mxu0 %v1616_v41  ;;  %v1709_v40 = vld [vmem:[%s1832_s28 + $0x30c] ss:$16 sps:$4 sm:$0xff]   ;;  %v1704_v41 = vld [vmem:[%s1832_s28 + $0x108] ss:$16 sps:$4 sm:$0xff]  }
  0x40   : > { %1128 = vmatprep.subr.bf16.mxu1 %v1618_v42  ;;  %v1707_v42 = vld [vmem:[%s1832_s28 + $0x308] ss:$16 sps:$4 sm:$0xff]  }
  0x42   : > { %1088 = vmatpush1.bf16.msra.mxu0 %v1620_v43  ;;  %v1712_v43 = vld [vmem:[%s1832_s28 + $0x12c] ss:$16 sps:$4 sm:$0xff]  }
  0x43   : > { %1129 = vmatpush1.bf16.msra.mxu1 %v1621_v44  ;;  %1089 = vmatprep.subr.bf16.mxu0 %v1622_v45  ;;  %v1715_v44 = vld [vmem:[%s1832_s28 + $0x32c] ss:$16 sps:$4 sm:$0xff]   ;;  %v1710_v45 = vld [vmem:[%s1832_s28 + $0x128] ss:$16 sps:$4 sm:$0xff]  }
  0x44   : > { %1130 = vmatprep.subr.bf16.mxu1 %v1624_v46  ;;  %v1713_v46 = vld [vmem:[%s1832_s28 + $0x328] ss:$16 sps:$4 sm:$0xff]  }
  0x46   : > { %1090 = vmatpush1.bf16.msra.mxu0 %v1626_v50  ;;  %v1719_v50 = vld [vmem:[%s1832_s28 + $0x348] ss:$16 sps:$4 sm:$0xff]  }
  0x47   : > { %1131 = vmatpush1.bf16.msra.mxu1 %v1627_v51  ;;  %1091 = vmatprep.subr.bf16.mxu0 %v1628_v53  ;;  %v1724_v51 = vld [vmem:[%s1832_s28 + $0x16c] ss:$16 sps:$4 sm:$0xff]   ;;  %v1722_v53 = vld [vmem:[%s1832_s28 + $0x168] ss:$16 sps:$4 sm:$0xff]  }
  0x48   : > { %1132 = vmatprep.subr.bf16.mxu1 %v1630_v54  ;;  %v1725_v54 = vld [vmem:[%s1832_s28 + $0x368] ss:$16 sps:$4 sm:$0xff]  }
  0x4a   : > { %1092 = vmatpush1.bf16.msra.mxu0 %v1632_v55  ;;  %v1730_v55 = vld [vmem:[%s1832_s28 + $0x18c] ss:$16 sps:$4 sm:$0xff]  }
  0x4b   : > { %1133 = vmatpush1.bf16.msra.mxu1 %v1633_v56  ;;  %1093 = vmatprep.subr.bf16.mxu0 %v1634_v57  ;;  %v1733_v56 = vld [vmem:[%s1832_s28 + $0x38c] ss:$16 sps:$4 sm:$0xff]   ;;  %v1728_v57 = vld [vmem:[%s1832_s28 + $0x188] ss:$16 sps:$4 sm:$0xff]  }
  0x4c   : > { %1134 = vmatprep.subr.bf16.mxu1 %v1636_v58  ;;  %v1731_v58 = vld [vmem:[%s1832_s28 + $0x388] ss:$16 sps:$4 sm:$0xff]  }
  0x4e   : > { %1094 = vmatpush1.bf16.msra.mxu0 %v1638_v59  ;;  %v1736_v59 = vld [vmem:[%s1832_s28 + $0x1ac] ss:$16 sps:$4 sm:$0xff]  }
  0x4f   : > { %1135 = vmatpush1.bf16.msra.mxu1 %v1639_v60  ;;  %1095 = vmatprep.subr.bf16.mxu0 %v1640_v61  ;;  %v1739_v60 = vld [vmem:[%s1832_s28 + $0x3ac] ss:$16 sps:$4 sm:$0xff]   ;;  %v1734_v61 = vld [vmem:[%s1832_s28 + $0x1a8] ss:$16 sps:$4 sm:$0xff]  }
  0x50   : > { %1136 = vmatprep.subr.bf16.mxu1 %v1642_v62  ;;  %v1737_v62 = vld [vmem:[%s1832_s28 + $0x3a8] ss:$16 sps:$4 sm:$0xff]  }
  0x52   : > { %1096 = vmatpush1.bf16.msra.mxu0 %v1644_v63  ;;  %v1742_v63 = vld [vmem:[%s1832_s28 + $0x1cc] ss:$16 sps:$4 sm:$0xff]  }
  0x53   : > { %1137 = vmatpush1.bf16.msra.mxu1 %v1645_v0  ;;  %1097 = vmatprep.subr.bf16.mxu0 %v1646_v1  ;;  %v1745_v0 = vld [vmem:[%s1832_s28 + $0x3cc] ss:$16 sps:$4 sm:$0xff]   ;;  %v1740_v1 = vld [vmem:[%s1832_s28 + $0x1c8] ss:$16 sps:$4 sm:$0xff]  }
  0x54   : > { %1138 = vmatprep.subr.bf16.mxu1 %v1648_v2  ;;  %v1743_v2 = vld [vmem:[%s1832_s28 + $0x3c8] ss:$16 sps:$4 sm:$0xff]  }
  0x56   : > { %1098 = vmatpush1.bf16.msra.mxu0 %v1650_v3  ;;  %v1748_v3 = vld [vmem:[%s1832_s28 + $0x1ec] ss:$16 sps:$4 sm:$0xff]  }
  0x57   : > { %1139 = vmatpush1.bf16.msra.mxu1 %v1651_v4  ;;  %1149 = vmatprep.subr.bf16.mxu0 %v1658_v5  ;;  %v1751_v4 = vld [vmem:[%s1832_s28 + $0x3ec] ss:$16 sps:$4 sm:$0xff]   ;;  %v1746_v5 = vld [vmem:[%s1832_s28 + $0x1e8] ss:$16 sps:$4 sm:$0xff]  }
  0x58   : > { %1190 = vmatprep.subr.bf16.mxu1 %v1661_v6  ;;  %v1749_v6 = vld [vmem:[%s1832_s28 + $0x3e8] ss:$16 sps:$4 sm:$0xff]  }
  0x59   : > { %1100 = vmatmul.mubr.bf16.vlgmr.msra.gmra.mrb[0].mxu0 %v1918_v7 }
  0x5a   : > { %1141 = vmatmul.mubr.bf16.vlgmr.msra.gmra.mrb[0].mxu1 %v1920_v8  ;;  %1150 = vmatpush1.bf16.msra.mxu0 %v1656_v9 }
  0x5b   : > { %1191 = vmatpush1.bf16.msra.mxu1 %v1659_v10  ;;  %1151 = vmatprep.subr.bf16.mxu0 %v1664_v11  ;;  %v279_v10 = vld [vmem:[%s2066_s4] sm:$0xff] }
  0x5c   : > { %1192 = vmatprep.subr.bf16.mxu1 %v1667_v12  ;;  %1181 = vmatprep.mubr.bf16.mxu0 %v1894_v48  ;;  %v1721_v48 = vld [vmem:[%s1832_s28 + $0x34c] ss:$16 sps:$4 sm:$0xff]  }
  0x5d   : > { %1222 = vmatprep.mubr.bf16.mxu1 %v1397_v52  ;;  %v1727_v52 = vld [vmem:[%s1832_s28 + $0x36c] ss:$16 sps:$4 sm:$0xff]  }
  0x5e   : > { %1152 = vmatpush1.bf16.msra.mxu0 %v1662_v13 }
  0x5f   : > { %1193 = vmatpush1.bf16.msra.mxu1 %v1665_v14  ;;  %1153 = vmatprep.subr.bf16.mxu0 %v1670_v15  ;;  %v280_v14 = vld [vmem:[%s2066_s4 + $0x8] sm:$0xff] }
  0x60   : > { %1194 = vmatprep.subr.bf16.mxu1 %v1673_v16 }
  0x62   : > { %1154 = vmatpush1.bf16.msra.mxu0 %v1668_v17 }
  0x63   : > { %1195 = vmatpush1.bf16.msra.mxu1 %v1671_v18  ;;  %1155 = vmatprep.subr.bf16.mxu0 %v1676_v19 }
  0x64   : > { %1196 = vmatprep.subr.bf16.mxu1 %v1679_v20 }
  0x66   : > { %1156 = vmatpush1.bf16.msra.mxu0 %v1674_v21 }
  0x67   : > { %1197 = vmatpush1.bf16.msra.mxu1 %v1677_v22  ;;  %1157 = vmatprep.subr.bf16.mxu0 %v1682_v23  ;;  %v281_v22 = vld [vmem:[%s2066_s4 + $0x10] sm:$0xff] }
  0x68   : > { %1198 = vmatprep.subr.bf16.mxu1 %v1685_v24 }
  0x6a   : > { %1158 = vmatpush1.bf16.msra.mxu0 %v1680_v25 }
  0x6b   : > { %1199 = vmatpush1.bf16.msra.mxu1 %v1683_v26  ;;  %1159 = vmatprep.subr.bf16.mxu0 %v1688_v27  ;;  %v282_v26 = vld [vmem:[%s2066_s4 + $0x18] sm:$0xff] }
  0x6c   : > { %1200 = vmatprep.subr.bf16.mxu1 %v1691_v28 }
  0x6e   : > { %1160 = vmatpush1.bf16.msra.mxu0 %v1686_v29 }
  0x6f   : > { %1201 = vmatpush1.bf16.msra.mxu1 %v1689_v30  ;;  %1161 = vmatprep.subr.bf16.mxu0 %v1694_v31 }
  0x70   : > { %1202 = vmatprep.subr.bf16.mxu1 %v1697_v32 }
  0x72   : > { %1162 = vmatpush1.bf16.msra.mxu0 %v1692_v33 }
  0x73   : > { %1203 = vmatpush1.bf16.msra.mxu1 %v1695_v34  ;;  %1163 = vmatprep.subr.bf16.mxu0 %v1700_v35  ;;  %v1249_v35 = vlaneseq (!%p1526_p7) }
  0x74   : > { %1204 = vmatprep.subr.bf16.mxu1 %v1703_v36 }
  0x75   : > { %v1250_v36 = vshrl.u32 (!%p1526_p7), %v1249_v35, 7 }
  0x76   : > { %1164 = vmatpush1.bf16.msra.mxu0 %v1698_v37  ;;  %v1247_v37 = vld [vmem:[%s2064_s2] sm:$0xf] (!%p1526_p7) }
  0x77   : > { %1205 = vmatpush1.bf16.msra.mxu1 %v1701_v38  ;;  %1165 = vmatprep.subr.bf16.mxu0 %v1706_v39  ;;  %v1251_v39 = vsub.s32 (!%p1526_p7), 0, %v1250_v36 }
  0x78   : > { %1206 = vmatprep.subr.bf16.mxu1 %v1709_v40  ;;  %v1255_v40 = vsub.s32 (!%p1526_p7), 1, %v1250_v36 }
  0x7a   : > { %1166 = vmatpush1.bf16.msra.mxu0 %v1704_v41  ;;  %v1259_v41 = vsub.s32 (!%p1526_p7), 2, %v1250_v36 }
  0x7b   : > { %1207 = vmatpush1.bf16.msra.mxu1 %v1707_v42  ;;  %1167 = vmatprep.subr.bf16.mxu0 %v1712_v43  ;;  %v1263_v42 = vsub.s32 (!%p1526_p7), 3, %v1250_v36 }
  0x7c   : > { %1208 = vmatprep.subr.bf16.mxu1 %v1715_v44 }
  0x7e   : > { %1168 = vmatpush1.bf16.msra.mxu0 %v1710_v45 }
  0x7f   : > { %1209 = vmatpush1.bf16.msra.mxu1 %v1713_v46  ;;  %1169 = vmatprep.subr.bf16.mxu0 %v1718_v47  ;;  %v1252_v46 = vrot.slane (!%p1526_p7), %v1247_v37, %v1251_v39  ;;  %v1273_v47 = vld [vmem:[%s2065_s3] sm:$0xff] (!%p1526_p7) }
  0x80   : > { %1210 = vmatprep.subr.bf16.mxu1 %v1721_v48  ;;  %v1256_v48 = vrot.slane (!%p1526_p7), %v1247_v37, %v1255_v40 }
  0x82   : > { %1170 = vmatpush1.bf16.msra.mxu0 %v1716_v49  ;;  %v1260_v49 = vrot.slane (!%p1526_p7), %v1247_v37, %v1259_v41 }
  0x83   : > { %1211 = vmatpush1.bf16.msra.mxu1 %v1719_v50  ;;  %1171 = vmatprep.subr.bf16.mxu0 %v1724_v51  ;;  %v1264_v50 = vrot.slane (!%p1526_p7), %v1247_v37, %v1263_v42  ;;  %v1274_v51 = vld [vmem:[%s2065_s3 + $0x8] sm:$0xff] (!%p1526_p7) }
  0x84   : > { %1212 = vmatprep.subr.bf16.mxu1 %v1727_v52  ;;  %v1275_v52 = vld [vmem:[%s2065_s3 + $0x10] sm:$0xff] (!%p1526_p7) }
  0x86   : > { %1172 = vmatpush1.bf16.msra.mxu0 %v1722_v53  ;;  %v1276_v53 = vld [vmem:[%s2065_s3 + $0x18] sm:$0xff] (!%p1526_p7) }
  0x87   : > { %1213 = vmatpush1.bf16.msra.mxu1 %v1725_v54  ;;  %1173 = vmatprep.subr.bf16.mxu0 %v1730_v55 }
  0x88   : > { %1214 = vmatprep.subr.bf16.mxu1 %v1733_v56 }
  0x8a   : > { %1174 = vmatpush1.bf16.msra.mxu0 %v1728_v57 }
  0x8b   : > { %1215 = vmatpush1.bf16.msra.mxu1 %v1731_v58  ;;  %1175 = vmatprep.subr.bf16.mxu0 %v1736_v59 }
  0x8c   : > { %1216 = vmatprep.subr.bf16.mxu1 %v1739_v60 }
  0x8e   : > { %1176 = vmatpush1.bf16.msra.mxu0 %v1734_v61 }
  0x8f   : > { %1217 = vmatpush1.bf16.msra.mxu1 %v1737_v62  ;;  %1177 = vmatprep.subr.bf16.mxu0 %v1742_v63 }
  0x90   : > { %1218 = vmatprep.subr.bf16.mxu1 %v1745_v0 }
  0x92   : > { %1178 = vmatpush1.bf16.msra.mxu0 %v1740_v1 }
  0x93   : > { %1219 = vmatpush1.bf16.msra.mxu1 %v1743_v2  ;;  %1179 = vmatprep.subr.bf16.mxu0 %v1748_v3 }
  0x94   : > { %1220 = vmatprep.subr.bf16.mxu1 %v1751_v4 }
  0x96   : > { %1180 = vmatpush1.bf16.msra.mxu0 %v1746_v5 }
  0x97   : > { %1221 = vmatpush1.bf16.msra.mxu1 %v1749_v6 }
  0x99   : > { %1182 = vmatmul.mubr.bf16.vlgmr.msra.gmra.mrb[4].mxu0 %v1918_v7 }
  0x9a   : > { %1223 = vmatmul.mubr.bf16.vlgmr.msra.gmra.mrb[4].mxu1 %v1920_v8 }
 0x12c   : > { %v1101_v9 = vpop.f32.mrb[0].mxu0 }
 0x12d   : > { %v1142_v11 = vpop.f32.mrb[0].mxu1  ;;  %v1103_v13 = vpop.f32.mrb[1].mxu0 }
 0x12e   : > { %v1143_v12 = vadd.f32 %v1142_v11, %v1101_v9  ;;  %v1144_v15 = vpop.f32.mrb[1].mxu1  ;;  %v1105_v17 = vpop.f32.mrb[2].mxu0 }
 0x12f   : > { %v1145_v16 = vadd.f32 %v1144_v15, %v1103_v13  ;;  %v1146_v18 = vpop.f32.mrb[2].mxu1  ;;  %v1106_v7 = vpop.f32.mrb[3].mxu0 }
 0x130   : > { %v1231_v19 = vadd.f32 %v1143_v12, %v279_v10  ;;  %v1147_v20 = vpop.f32.mrb[3].mxu1 }
 0x131   : > { %v1232_v8 = vadd.f32 %v1145_v16, %v280_v14 }
 0x132   : > { %1235 = vst [vmem:[%s2066_s4] sm:$0xff] %v1231_v19 }
 0x133   : > { %1236 = vst [vmem:[%s2066_s4 + $0x8] sm:$0xff] %v1232_v8 }
 0x139   : > { %v1243_v38 = vld [vmem:[%s2066_s4] sm:$0xff] (!%p1526_p7) }
 0x13a   : > { %v1244_v43 = vld [vmem:[%s2066_s4 + $0x8] sm:$0xff] (!%p1526_p7)  ;;  %v1269_v54 = vadd.f32 (!%p1526_p7), %v1252_v46, %v1243_v38 }
 0x13b   : > { %v1270_v55 = vadd.f32 (!%p1526_p7), %v1256_v48, %v1244_v43 }
 0x13c   : > { %v1277_v58 = vadd.f32 (!%p1526_p7), %v1273_v47, %v1269_v54 }
 0x13d   : > { %v1278_v59 = vadd.f32 (!%p1526_p7), %v1274_v51, %v1270_v55 }
 0x13e   : > { %v1281_v62 = vmax.f32 (!%p1526_p7), %v1277_v58, 0.0 }
 0x13f   : > { %v1282_v63 = vmax.f32 (!%p1526_p7), %v1278_v59, 0.0 }
 0x140   : > { %1285 = vst [vmem:[%s2066_s4] sm:$0xff] (!%p1526_p7), %v1281_v62 }
 0x141   : > { %1286 = vst [vmem:[%s2066_s4 + $0x8] sm:$0xff] (!%p1526_p7), %v1282_v63 }
 0x16c   : > { %v1183_v21 = vpop.f32.mrb[4].mxu0 }
 0x16d   : > { %v1224_v23 = vpop.f32.mrb[4].mxu1  ;;  %v1185_v25 = vpop.f32.mrb[5].mxu0  ;;  %1242 = sbr.rel (%p1526_p7) target bundleno = 386 (0x182), region = 44 }
 0x16e   : > { %v1225_v24 = vadd.f32 %v1224_v23, %v1183_v21  ;;  %v1226_v27 = vpop.f32.mrb[5].mxu1  ;;  %v1187_v29 = vpop.f32.mrb[6].mxu0 }
 0x16f   : > { %v1227_v28 = vadd.f32 %v1226_v27, %v1185_v25  ;;  %v1228_v30 = vpop.f32.mrb[6].mxu1  ;;  %v1188_v32 = vpop.f32.mrb[7].mxu0 }
 0x170   : > { %v1233_v31 = vadd.f32 %v1225_v24, %v281_v22  ;;  %v1229_v33 = vpop.f32.mrb[7].mxu1 }
 0x171   : > { %v1234_v34 = vadd.f32 %v1227_v28, %v282_v26 }
 0x172   : > { %1237 = vst [vmem:[%s2066_s4 + $0x10] sm:$0xff] %v1233_v31 }
 0x173   : > { %1238 = vst [vmem:[%s2066_s4 + $0x18] sm:$0xff] %v1234_v34 }
 0x179   : > { %v1245_v44 = vld [vmem:[%s2066_s4 + $0x10] sm:$0xff] }
 0x17a   : > { %v1246_v45 = vld [vmem:[%s2066_s4 + $0x18] sm:$0xff]  ;;  %v1271_v56 = vadd.f32 %v1260_v49, %v1245_v44 }
 0x17b   : > { %v1272_v57 = vadd.f32 %v1264_v50, %v1246_v45 }
 0x17c   : > { %v1279_v60 = vadd.f32 %v1275_v52, %v1271_v56 }
 0x17d   : > { %v1280_v61 = vadd.f32 %v1276_v53, %v1272_v57 }
 0x17e   : > { %v1283_v0 = vmax.f32 %v1279_v60, 0.0 }
 0x17f   : > { %v1284_v1 = vmax.f32 %v1280_v61, 0.0 }
 0x180   : > { %1287 = vst [vmem:[%s2066_s4 + $0x10] sm:$0xff] %v1283_v0 }
 0x181   : > { %1288 = vst [vmem:[%s2066_s4 + $0x18] sm:$0xff] %v1284_v1 }
 0x182 PF: > { %s14_s17 = sadd.s32 1, %s1774_s17   ;;  %s2067_s15 = smov %s1770_s16 }
 0x183   : > { %p11_p8 = scmp.ge.s32.totalorder %s14_s17, 11   ;;  %s2068_s16 = smov %s2070_s18 }
 0x185   :  { %13 = sbr.rel (!%p11_p8) target bundleno = 2 (0x2), region = 80 }

// kernel: resnet34_forward.72
= control target key start
LH: loop header
LB: loop body
LE: loop exit
PB: predicated region body
PF: predicated region fallthrough
CT: control target
= control target key end

     0   :  { %s1726_s12 = smov 0   ;;  %s1728_s13 = smov 0   ;;  %s1974_s0 = inlined_call_operand.vmem [shape: bf16[8,4608], index: 0, kind: input, shape index: {}]   ;;  %s1975_s1 = inlined_call_operand.vmem [shape: bf16[4608,512], index: 1, kind: input, shape index: {}]   ;;  %s1976_s2 = inlined_call_operand.vmem [shape: f32[1,512], index: 2, kind: input, shape index: {}]   ;;  %s1977_s3 = inlined_call_operand.vmem [shape: f32[8,512], index: 3, kind: output, shape index: {}]  }
   0x1   :  { %s1730_s14 = smov 0  }
   0x2 LB: > { %s22_s15 = sadd.s32 1, %s1699_s13  ;;  %p1316_p0 = scmp.ge.s32.totalorder %s1703_s14, 1  ;;  %s1703_s14 = sphi %s1730_s14, %s13_s14   ;;  %s1699_s13 = sphi %s1728_s13, %s1979_s13   ;;  %s1695_s12 = sphi %s1726_s12, %s1978_s12  }
   0x3   : > { %p23_p1 = scmp.ge.s32.totalorder %s22_s15, 9  ;;  %p168_p2 = scmp.lt.s32.totalorder %s1703_s14, 10 }
   0x5   : > { %s1981_s15 = smov (%p23_p1, %s22_s15), 0  ;;  %p169_p3 = pnand %p1316_p0, %p168_p2 }
   0x6   : > { %s1317_s16 = sshll.u32 (!%p169_p3), %s1695_s12, 2  ;;  %s1319_s17 = sshll.u32 (!%p169_p3), %s1695_s12, 6 }
   0x7   : > { %172 = sbr.rel (%p169_p3) target bundleno = 384 (0x180), region = 32  ;;  %p205_p4 = scmp.lt.s32.totalorder (!%p169_p3), %s1317_s16, 35 }
   0x8   : > { %p213_p5 = scmp.lt.s32.totalorder (!%p169_p3), %s1319_s17, 575  ;;  %p1322_p6 = scmp.ne.s32.totalorder (!%p169_p3), %s1695_s12, 0 }
   0xe   : > { %s1983_s16 = smov (!%p205_p4, %s1317_s16), 35  ;;  %s1985_s17 = smov (!%p213_p5, %s1319_s17), 575 }
   0xf   : > { %s1318_s18 = sshll.u32 %s1983_s16, 2  ;;  %s1459_s22 = sshll.u32 %s1985_s17, 4  ;;  %v1705_v0 = vmov (!%p1322_p6), 0.0  }
  0x10   : > { %s1751_s21 = scalar_lea.vmem %s1974_s0, %s1318_s18  ;;  %s1756_s25 = scalar_lea.vmem %s1975_s1, %s1459_s22  ;;  %228 = vst [vmem:[%s1977_s3] sm:$0xff] (!%p1322_p6), %v1705_v0  ;;  %229 = vst [vmem:[%s1977_s3 + $0x8] sm:$0xff] (!%p1322_p6), %v1705_v0 }
  0x11   : > { %227 = sbr.rel (%p1322_p6) target bundleno = 24 (0x18), region = 36  ;;  %230 = vst [vmem:[%s1977_s3 + $0x10] sm:$0xff] (!%p1322_p6), %v1705_v0  ;;  %231 = vst [vmem:[%s1977_s3 + $0x18] sm:$0xff] (!%p1322_p6), %v1705_v0 }
  0x18 PF: > { %v1485_v1 = vld [vmem:[%s1756_s25 + $0x4] ss:$16 sps:$4 sm:$0xff]   ;;  %v1489_v3 = vld [vmem:[%s1756_s25] ss:$16 sps:$4 sm:$0xff]   ;;  %v237_v49 = vld [vmem:[%s1751_s21 + $0x8] sm:$0xff]  ;;  %p1455_p7 = scmp.ne.s32.totalorder %s1695_s12, 8 }
  0x19   : > { %v1487_v2 = vld [vmem:[%s1756_s25 + $0x204] ss:$16 sps:$4 sm:$0xff]   ;;  %1020 = vmatprep.subr.bf16.mxu0 %v1485_v1  ;;  %v1490_v4 = vld [vmem:[%s1756_s25 + $0x200] ss:$16 sps:$4 sm:$0xff]   ;;  %v1326_v52 = vcombine.high %v237_v49, %v237_v49 }
  0x1a   : > { %1061 = vmatprep.subr.bf16.mxu1 %v1487_v2  ;;  %v1491_v5 = vld [vmem:[%s1756_s25 + $0x24] ss:$16 sps:$4 sm:$0xff]   ;;  %1021 = vmatpush1.bf16.msra.mxu0 %v1489_v3  ;;  %v1495_v7 = vld [vmem:[%s1756_s25 + $0x20] ss:$16 sps:$4 sm:$0xff]  }
  0x1b   : > { %1062 = vmatpush1.bf16.msra.mxu1 %v1490_v4  ;;  %v1493_v6 = vld [vmem:[%s1756_s25 + $0x224] ss:$16 sps:$4 sm:$0xff]   ;;  %1022 = vmatprep.subr.bf16.mxu0 %v1491_v5  ;;  %v1496_v8 = vld [vmem:[%s1756_s25 + $0x220] ss:$16 sps:$4 sm:$0xff]   ;;  %v1587_v5 = vld [vmem:[%s1756_s25 + $0xc] ss:$16 sps:$4 sm:$0xff]  }
  0x1c   : > { %1063 = vmatprep.subr.bf16.mxu1 %v1493_v6  ;;  %v1497_v9 = vld [vmem:[%s1756_s25 + $0x44] ss:$16 sps:$4 sm:$0xff]   ;;  %v1501_v11 = vld [vmem:[%s1756_s25 + $0x40] ss:$16 sps:$4 sm:$0xff]   ;;  %1093 = vmatprep.mubr.bf16.mxu1 %v1326_v52  ;;  %v1590_v6 = vld [vmem:[%s1756_s25 + $0x20c] ss:$16 sps:$4 sm:$0xff]  }
  0x1d   : > { %v1499_v10 = vld [vmem:[%s1756_s25 + $0x244] ss:$16 sps:$4 sm:$0xff]   ;;  %v1502_v12 = vld [vmem:[%s1756_s25 + $0x240] ss:$16 sps:$4 sm:$0xff]  }
  0x1e   : > { %1023 = vmatpush1.bf16.msra.mxu0 %v1495_v7  ;;  %v1503_v13 = vld [vmem:[%s1756_s25 + $0x64] ss:$16 sps:$4 sm:$0xff]   ;;  %v1507_v15 = vld [vmem:[%s1756_s25 + $0x60] ss:$16 sps:$4 sm:$0xff]  }
  0x1f   : > { %1064 = vmatpush1.bf16.msra.mxu1 %v1496_v8  ;;  %1024 = vmatprep.subr.bf16.mxu0 %v1497_v9  ;;  %v1505_v14 = vld [vmem:[%s1756_s25 + $0x264] ss:$16 sps:$4 sm:$0xff]   ;;  %v1508_v16 = vld [vmem:[%s1756_s25 + $0x260] ss:$16 sps:$4 sm:$0xff]   ;;  %v1844_v8 = vcombine.low %v237_v49, %v237_v49  ;;  %v1585_v9 = vld [vmem:[%s1756_s25 + $0x8] ss:$16 sps:$4 sm:$0xff]  }
  0x20   : > { %1065 = vmatprep.subr.bf16.mxu1 %v1499_v10  ;;  %v1509_v17 = vld [vmem:[%s1756_s25 + $0x84] ss:$16 sps:$4 sm:$0xff]   ;;  %v1513_v19 = vld [vmem:[%s1756_s25 + $0x80] ss:$16 sps:$4 sm:$0xff]   ;;  %v1588_v10 = vld [vmem:[%s1756_s25 + $0x208] ss:$16 sps:$4 sm:$0xff]  }
  0x21   : > { %v1511_v18 = vld [vmem:[%s1756_s25 + $0x284] ss:$16 sps:$4 sm:$0xff]   ;;  %v1514_v20 = vld [vmem:[%s1756_s25 + $0x280] ss:$16 sps:$4 sm:$0xff]   ;;  %v1645_v49 = vld [vmem:[%s1756_s25 + $0x148] ss:$16 sps:$4 sm:$0xff]  }
  0x22   : > { %1025 = vmatpush1.bf16.msra.mxu0 %v1501_v11  ;;  %v1515_v21 = vld [vmem:[%s1756_s25 + $0xa4] ss:$16 sps:$4 sm:$0xff]   ;;  %v1519_v23 = vld [vmem:[%s1756_s25 + $0xa0] ss:$16 sps:$4 sm:$0xff]   ;;  %v1593_v11 = vld [vmem:[%s1756_s25 + $0x2c] ss:$16 sps:$4 sm:$0xff]  }
  0x23   : > { %1066 = vmatpush1.bf16.msra.mxu1 %v1502_v12  ;;  %1026 = vmatprep.subr.bf16.mxu0 %v1503_v13  ;;  %v1517_v22 = vld [vmem:[%s1756_s25 + $0x2a4] ss:$16 sps:$4 sm:$0xff]   ;;  %v1520_v24 = vld [vmem:[%s1756_s25 + $0x2a0] ss:$16 sps:$4 sm:$0xff]   ;;  %v1596_v12 = vld [vmem:[%s1756_s25 + $0x22c] ss:$16 sps:$4 sm:$0xff]  }
  0x24   : > { %1067 = vmatprep.subr.bf16.mxu1 %v1505_v14  ;;  %v1521_v25 = vld [vmem:[%s1756_s25 + $0xc4] ss:$16 sps:$4 sm:$0xff]   ;;  %v1525_v27 = vld [vmem:[%s1756_s25 + $0xc0] ss:$16 sps:$4 sm:$0xff]   ;;  %v1591_v13 = vld [vmem:[%s1756_s25 + $0x28] ss:$16 sps:$4 sm:$0xff]  }
  0x25   : > { %v1523_v26 = vld [vmem:[%s1756_s25 + $0x2c4] ss:$16 sps:$4 sm:$0xff]   ;;  %v1526_v28 = vld [vmem:[%s1756_s25 + $0x2c0] ss:$16 sps:$4 sm:$0xff]   ;;  %v1594_v14 = vld [vmem:[%s1756_s25 + $0x228] ss:$16 sps:$4 sm:$0xff]  }
  0x26   : > { %1027 = vmatpush1.bf16.msra.mxu0 %v1507_v15  ;;  %v1527_v29 = vld [vmem:[%s1756_s25 + $0xe4] ss:$16 sps:$4 sm:$0xff]   ;;  %v1531_v31 = vld [vmem:[%s1756_s25 + $0xe0] ss:$16 sps:$4 sm:$0xff]   ;;  %v1599_v15 = vld [vmem:[%s1756_s25 + $0x4c] ss:$16 sps:$4 sm:$0xff]  }
  0x27   : > { %1068 = vmatpush1.bf16.msra.mxu1 %v1508_v16  ;;  %1028 = vmatprep.subr.bf16.mxu0 %v1509_v17  ;;  %v1529_v30 = vld [vmem:[%s1756_s25 + $0x2e4] ss:$16 sps:$4 sm:$0xff]   ;;  %v1532_v32 = vld [vmem:[%s1756_s25 + $0x2e0] ss:$16 sps:$4 sm:$0xff]   ;;  %v1602_v16 = vld [vmem:[%s1756_s25 + $0x24c] ss:$16 sps:$4 sm:$0xff]  }
  0x28   : > { %1069 = vmatprep.subr.bf16.mxu1 %v1511_v18  ;;  %v1533_v33 = vld [vmem:[%s1756_s25 + $0x104] ss:$16 sps:$4 sm:$0xff]   ;;  %v1537_v35 = vld [vmem:[%s1756_s25 + $0x100] ss:$16 sps:$4 sm:$0xff]   ;;  %v1597_v17 = vld [vmem:[%s1756_s25 + $0x48] ss:$16 sps:$4 sm:$0xff]  }
  0x29   : > { %v1535_v34 = vld [vmem:[%s1756_s25 + $0x304] ss:$16 sps:$4 sm:$0xff]   ;;  %v1538_v36 = vld [vmem:[%s1756_s25 + $0x300] ss:$16 sps:$4 sm:$0xff]   ;;  %v1600_v18 = vld [vmem:[%s1756_s25 + $0x248] ss:$16 sps:$4 sm:$0xff]  }
  0x2a   : > { %1029 = vmatpush1.bf16.msra.mxu0 %v1513_v19  ;;  %v1539_v37 = vld [vmem:[%s1756_s25 + $0x124] ss:$16 sps:$4 sm:$0xff]   ;;  %v1543_v39 = vld [vmem:[%s1756_s25 + $0x120] ss:$16 sps:$4 sm:$0xff]   ;;  %v1605_v19 = vld [vmem:[%s1756_s25 + $0x6c] ss:$16 sps:$4 sm:$0xff]  }
  0x2b   : > { %1070 = vmatpush1.bf16.msra.mxu1 %v1514_v20  ;;  %1030 = vmatprep.subr.bf16.mxu0 %v1515_v21  ;;  %v1541_v38 = vld [vmem:[%s1756_s25 + $0x324] ss:$16 sps:$4 sm:$0xff]   ;;  %v1544_v40 = vld [vmem:[%s1756_s25 + $0x320] ss:$16 sps:$4 sm:$0xff]   ;;  %v1608_v20 = vld [vmem:[%s1756_s25 + $0x26c] ss:$16 sps:$4 sm:$0xff]  }
  0x2c   : > { %1071 = vmatprep.subr.bf16.mxu1 %v1517_v22  ;;  %v1545_v41 = vld [vmem:[%s1756_s25 + $0x144] ss:$16 sps:$4 sm:$0xff]   ;;  %v1549_v43 = vld [vmem:[%s1756_s25 + $0x140] ss:$16 sps:$4 sm:$0xff]   ;;  %v1603_v21 = vld [vmem:[%s1756_s25 + $0x68] ss:$16 sps:$4 sm:$0xff]  }
  0x2d   : > { %v1547_v42 = vld [vmem:[%s1756_s25 + $0x344] ss:$16 sps:$4 sm:$0xff]   ;;  %v1550_v44 = vld [vmem:[%s1756_s25 + $0x340] ss:$16 sps:$4 sm:$0xff]   ;;  %v1606_v22 = vld [vmem:[%s1756_s25 + $0x268] ss:$16 sps:$4 sm:$0xff]  }
  0x2e   : > { %1031 = vmatpush1.bf16.msra.mxu0 %v1519_v23  ;;  %v1551_v45 = vld [vmem:[%s1756_s25 + $0x164] ss:$16 sps:$4 sm:$0xff]   ;;  %v1555_v50 = vld [vmem:[%s1756_s25 + $0x160] ss:$16 sps:$4 sm:$0xff]   ;;  %v1611_v23 = vld [vmem:[%s1756_s25 + $0x8c] ss:$16 sps:$4 sm:$0xff]  }
  0x2f   : > { %1072 = vmatpush1.bf16.msra.mxu1 %v1520_v24  ;;  %1032 = vmatprep.subr.bf16.mxu0 %v1521_v25  ;;  %v1553_v46 = vld [vmem:[%s1756_s25 + $0x364] ss:$16 sps:$4 sm:$0xff]   ;;  %v1556_v51 = vld [vmem:[%s1756_s25 + $0x360] ss:$16 sps:$4 sm:$0xff]   ;;  %v1614_v24 = vld [vmem:[%s1756_s25 + $0x28c] ss:$16 sps:$4 sm:$0xff]  }
  0x30   : > { %1073 = vmatprep.subr.bf16.mxu1 %v1523_v26  ;;  %v236_v47 = vld [vmem:[%s1751_s21] sm:$0xff]  ;;  %v1609_v25 = vld [vmem:[%s1756_s25 + $0x88] ss:$16 sps:$4 sm:$0xff]  }
  0x31   : > { %v1818_v48 = vcombine.high %v236_v47, %v236_v47  ;;  %v1557_v53 = vld [vmem:[%s1756_s25 + $0x184] ss:$16 sps:$4 sm:$0xff]   ;;  %v1561_v55 = vld [vmem:[%s1756_s25 + $0x180] ss:$16 sps:$4 sm:$0xff]   ;;  %v1842_v7 = vcombine.low %v236_v47, %v236_v47  ;;  %v1612_v26 = vld [vmem:[%s1756_s25 + $0x288] ss:$16 sps:$4 sm:$0xff]  }
  0x32   : > { %1033 = vmatpush1.bf16.msra.mxu0 %v1525_v27  ;;  %v1559_v54 = vld [vmem:[%s1756_s25 + $0x384] ss:$16 sps:$4 sm:$0xff]   ;;  %v1562_v56 = vld [vmem:[%s1756_s25 + $0x380] ss:$16 sps:$4 sm:$0xff]   ;;  %v1617_v27 = vld [vmem:[%s1756_s25 + $0xac] ss:$16 sps:$4 sm:$0xff]  }
  0x33   : > { %1074 = vmatpush1.bf16.msra.mxu1 %v1526_v28  ;;  %1034 = vmatprep.subr.bf16.mxu0 %v1527_v29  ;;  %v1563_v57 = vld [vmem:[%s1756_s25 + $0x1a4] ss:$16 sps:$4 sm:$0xff]   ;;  %v1567_v59 = vld [vmem:[%s1756_s25 + $0x1a0] ss:$16 sps:$4 sm:$0xff]   ;;  %v1620_v28 = vld [vmem:[%s1756_s25 + $0x2ac] ss:$16 sps:$4 sm:$0xff]  }
  0x34   : > { %1075 = vmatprep.subr.bf16.mxu1 %v1529_v30  ;;  %1052 = vmatprep.mubr.bf16.mxu0 %v1818_v48  ;;  %v1565_v58 = vld [vmem:[%s1756_s25 + $0x3a4] ss:$16 sps:$4 sm:$0xff]   ;;  %v1568_v60 = vld [vmem:[%s1756_s25 + $0x3a0] ss:$16 sps:$4 sm:$0xff]   ;;  %v1615_v29 = vld [vmem:[%s1756_s25 + $0xa8] ss:$16 sps:$4 sm:$0xff]  }
  0x35   : > { %v1569_v61 = vld [vmem:[%s1756_s25 + $0x1c4] ss:$16 sps:$4 sm:$0xff]   ;;  %v1573_v63 = vld [vmem:[%s1756_s25 + $0x1c0] ss:$16 sps:$4 sm:$0xff]   ;;  %v1618_v30 = vld [vmem:[%s1756_s25 + $0x2a8] ss:$16 sps:$4 sm:$0xff]  }
  0x36   : > { %1035 = vmatpush1.bf16.msra.mxu0 %v1531_v31  ;;  %v1571_v62 = vld [vmem:[%s1756_s25 + $0x3c4] ss:$16 sps:$4 sm:$0xff]   ;;  %v1574_v0 = vld [vmem:[%s1756_s25 + $0x3c0] ss:$16 sps:$4 sm:$0xff]   ;;  %v1623_v31 = vld [vmem:[%s1756_s25 + $0xcc] ss:$16 sps:$4 sm:$0xff]  }
  0x37   : > { %1076 = vmatpush1.bf16.msra.mxu1 %v1532_v32  ;;  %1036 = vmatprep.subr.bf16.mxu0 %v1533_v33  ;;  %v1575_v1 = vld [vmem:[%s1756_s25 + $0x1e4] ss:$16 sps:$4 sm:$0xff]   ;;  %v1579_v3 = vld [vmem:[%s1756_s25 + $0x1e0] ss:$16 sps:$4 sm:$0xff]   ;;  %v1626_v32 = vld [vmem:[%s1756_s25 + $0x2cc] ss:$16 sps:$4 sm:$0xff]  }
  0x38   : > { %1077 = vmatprep.subr.bf16.mxu1 %v1535_v34  ;;  %v1577_v2 = vld [vmem:[%s1756_s25 + $0x3e4] ss:$16 sps:$4 sm:$0xff]   ;;  %v1580_v4 = vld [vmem:[%s1756_s25 + $0x3e0] ss:$16 sps:$4 sm:$0xff]   ;;  %v1621_v33 = vld [vmem:[%s1756_s25 + $0xc8] ss:$16 sps:$4 sm:$0xff]  }
  0x39   : > { %v1624_v34 = vld [vmem:[%s1756_s25 + $0x2c8] ss:$16 sps:$4 sm:$0xff]   ;;  %v1647_v47 = vld [vmem:[%s1756_s25 + $0x14c] ss:$16 sps:$4 sm:$0xff]  }
  0x3a   : > { %1037 = vmatpush1.bf16.msra.mxu0 %v1537_v35  ;;  %v1629_v35 = vld [vmem:[%s1756_s25 + $0xec] ss:$16 sps:$4 sm:$0xff]  }
  0x3b   : > { %1078 = vmatpush1.bf16.msra.mxu1 %v1538_v36  ;;  %1038 = vmatprep.subr.bf16.mxu0 %v1539_v37  ;;  %v1632_v36 = vld [vmem:[%s1756_s25 + $0x2ec] ss:$16 sps:$4 sm:$0xff]   ;;  %v1627_v37 = vld [vmem:[%s1756_s25 + $0xe8] ss:$16 sps:$4 sm:$0xff]  }
  0x3c   : > { %1079 = vmatprep.subr.bf16.mxu1 %v1541_v38  ;;  %v1630_v38 = vld [vmem:[%s1756_s25 + $0x2e8] ss:$16 sps:$4 sm:$0xff]  }
  0x3e   : > { %1039 = vmatpush1.bf16.msra.mxu0 %v1543_v39  ;;  %v1635_v39 = vld [vmem:[%s1756_s25 + $0x10c] ss:$16 sps:$4 sm:$0xff]  }
  0x3f   : > { %1080 = vmatpush1.bf16.msra.mxu1 %v1544_v40  ;;  %1040 = vmatprep.subr.bf16.mxu0 %v1545_v41  ;;  %v1638_v40 = vld [vmem:[%s1756_s25 + $0x30c] ss:$16 sps:$4 sm:$0xff]   ;;  %v1633_v41 = vld [vmem:[%s1756_s25 + $0x108] ss:$16 sps:$4 sm:$0xff]  }
  0x40   : > { %1081 = vmatprep.subr.bf16.mxu1 %v1547_v42  ;;  %v1636_v42 = vld [vmem:[%s1756_s25 + $0x308] ss:$16 sps:$4 sm:$0xff]  }
  0x42   : > { %1041 = vmatpush1.bf16.msra.mxu0 %v1549_v43  ;;  %v1641_v43 = vld [vmem:[%s1756_s25 + $0x12c] ss:$16 sps:$4 sm:$0xff]  }
  0x43   : > { %1082 = vmatpush1.bf16.msra.mxu1 %v1550_v44  ;;  %1042 = vmatprep.subr.bf16.mxu0 %v1551_v45  ;;  %v1644_v44 = vld [vmem:[%s1756_s25 + $0x32c] ss:$16 sps:$4 sm:$0xff]   ;;  %v1639_v45 = vld [vmem:[%s1756_s25 + $0x128] ss:$16 sps:$4 sm:$0xff]  }
  0x44   : > { %1083 = vmatprep.subr.bf16.mxu1 %v1553_v46  ;;  %v1642_v46 = vld [vmem:[%s1756_s25 + $0x328] ss:$16 sps:$4 sm:$0xff]  }
  0x46   : > { %1043 = vmatpush1.bf16.msra.mxu0 %v1555_v50  ;;  %v1648_v50 = vld [vmem:[%s1756_s25 + $0x348] ss:$16 sps:$4 sm:$0xff]  }
  0x47   : > { %1084 = vmatpush1.bf16.msra.mxu1 %v1556_v51  ;;  %1044 = vmatprep.subr.bf16.mxu0 %v1557_v53  ;;  %v1653_v51 = vld [vmem:[%s1756_s25 + $0x16c] ss:$16 sps:$4 sm:$0xff]   ;;  %v1651_v53 = vld [vmem:[%s1756_s25 + $0x168] ss:$16 sps:$4 sm:$0xff]  }
  0x48   : > { %1085 = vmatprep.subr.bf16.mxu1 %v1559_v54  ;;  %v1654_v54 = vld [vmem:[%s1756_s25 + $0x368] ss:$16 sps:$4 sm:$0xff]  }
  0x4a   : > { %1045 = vmatpush1.bf16.msra.mxu0 %v1561_v55  ;;  %v1659_v55 = vld [vmem:[%s1756_s25 + $0x18c] ss:$16 sps:$4 sm:$0xff]  }
  0x4b   : > { %1086 = vmatpush1.bf16.msra.mxu1 %v1562_v56  ;;  %1046 = vmatprep.subr.bf16.mxu0 %v1563_v57  ;;  %v1662_v56 = vld [vmem:[%s1756_s25 + $0x38c] ss:$16 sps:$4 sm:$0xff]   ;;  %v1657_v57 = vld [vmem:[%s1756_s25 + $0x188] ss:$16 sps:$4 sm:$0xff]  }
  0x4c   : > { %1087 = vmatprep.subr.bf16.mxu1 %v1565_v58  ;;  %v1660_v58 = vld [vmem:[%s1756_s25 + $0x388] ss:$16 sps:$4 sm:$0xff]  }
  0x4e   : > { %1047 = vmatpush1.bf16.msra.mxu0 %v1567_v59  ;;  %v1665_v59 = vld [vmem:[%s1756_s25 + $0x1ac] ss:$16 sps:$4 sm:$0xff]  }
  0x4f   : > { %1088 = vmatpush1.bf16.msra.mxu1 %v1568_v60  ;;  %1048 = vmatprep.subr.bf16.mxu0 %v1569_v61  ;;  %v1668_v60 = vld [vmem:[%s1756_s25 + $0x3ac] ss:$16 sps:$4 sm:$0xff]   ;;  %v1663_v61 = vld [vmem:[%s1756_s25 + $0x1a8] ss:$16 sps:$4 sm:$0xff]  }
  0x50   : > { %1089 = vmatprep.subr.bf16.mxu1 %v1571_v62  ;;  %v1666_v62 = vld [vmem:[%s1756_s25 + $0x3a8] ss:$16 sps:$4 sm:$0xff]  }
  0x52   : > { %1049 = vmatpush1.bf16.msra.mxu0 %v1573_v63  ;;  %v1671_v63 = vld [vmem:[%s1756_s25 + $0x1cc] ss:$16 sps:$4 sm:$0xff]  }
  0x53   : > { %1090 = vmatpush1.bf16.msra.mxu1 %v1574_v0  ;;  %1050 = vmatprep.subr.bf16.mxu0 %v1575_v1  ;;  %v1674_v0 = vld [vmem:[%s1756_s25 + $0x3cc] ss:$16 sps:$4 sm:$0xff]   ;;  %v1669_v1 = vld [vmem:[%s1756_s25 + $0x1c8] ss:$16 sps:$4 sm:$0xff]  }
  0x54   : > { %1091 = vmatprep.subr.bf16.mxu1 %v1577_v2  ;;  %v1672_v2 = vld [vmem:[%s1756_s25 + $0x3c8] ss:$16 sps:$4 sm:$0xff]  }
  0x56   : > { %1051 = vmatpush1.bf16.msra.mxu0 %v1579_v3  ;;  %v1677_v3 = vld [vmem:[%s1756_s25 + $0x1ec] ss:$16 sps:$4 sm:$0xff]  }
  0x57   : > { %1092 = vmatpush1.bf16.msra.mxu1 %v1580_v4  ;;  %1102 = vmatprep.subr.bf16.mxu0 %v1587_v5  ;;  %v1680_v4 = vld [vmem:[%s1756_s25 + $0x3ec] ss:$16 sps:$4 sm:$0xff]   ;;  %v1675_v5 = vld [vmem:[%s1756_s25 + $0x1e8] ss:$16 sps:$4 sm:$0xff]  }
  0x58   : > { %1143 = vmatprep.subr.bf16.mxu1 %v1590_v6  ;;  %v1678_v6 = vld [vmem:[%s1756_s25 + $0x3e8] ss:$16 sps:$4 sm:$0xff]  }
  0x59   : > { %1053 = vmatmul.mubr.bf16.vlgmr.msra.gmra.mrb[0].mxu0 %v1842_v7 }
  0x5a   : > { %1094 = vmatmul.mubr.bf16.vlgmr.msra.gmra.mrb[0].mxu1 %v1844_v8  ;;  %1103 = vmatpush1.bf16.msra.mxu0 %v1585_v9 }
  0x5b   : > { %1144 = vmatpush1.bf16.msra.mxu1 %v1588_v10  ;;  %1104 = vmatprep.subr.bf16.mxu0 %v1593_v11  ;;  %v232_v10 = vld [vmem:[%s1977_s3] sm:$0xff] }
  0x5c   : > { %1145 = vmatprep.subr.bf16.mxu1 %v1596_v12  ;;  %1134 = vmatprep.mubr.bf16.mxu0 %v1818_v48  ;;  %v1650_v48 = vld [vmem:[%s1756_s25 + $0x34c] ss:$16 sps:$4 sm:$0xff]  }
  0x5d   : > { %1175 = vmatprep.mubr.bf16.mxu1 %v1326_v52  ;;  %v1656_v52 = vld [vmem:[%s1756_s25 + $0x36c] ss:$16 sps:$4 sm:$0xff]  }
  0x5e   : > { %1105 = vmatpush1.bf16.msra.mxu0 %v1591_v13 }
  0x5f   : > { %1146 = vmatpush1.bf16.msra.mxu1 %v1594_v14  ;;  %1106 = vmatprep.subr.bf16.mxu0 %v1599_v15  ;;  %v233_v14 = vld [vmem:[%s1977_s3 + $0x8] sm:$0xff] }
  0x60   : > { %1147 = vmatprep.subr.bf16.mxu1 %v1602_v16 }
  0x62   : > { %1107 = vmatpush1.bf16.msra.mxu0 %v1597_v17 }
  0x63   : > { %1148 = vmatpush1.bf16.msra.mxu1 %v1600_v18  ;;  %1108 = vmatprep.subr.bf16.mxu0 %v1605_v19 }
  0x64   : > { %1149 = vmatprep.subr.bf16.mxu1 %v1608_v20 }
  0x66   : > { %1109 = vmatpush1.bf16.msra.mxu0 %v1603_v21 }
  0x67   : > { %1150 = vmatpush1.bf16.msra.mxu1 %v1606_v22  ;;  %1110 = vmatprep.subr.bf16.mxu0 %v1611_v23  ;;  %v234_v22 = vld [vmem:[%s1977_s3 + $0x10] sm:$0xff] }
  0x68   : > { %1151 = vmatprep.subr.bf16.mxu1 %v1614_v24 }
  0x6a   : > { %1111 = vmatpush1.bf16.msra.mxu0 %v1609_v25 }
  0x6b   : > { %1152 = vmatpush1.bf16.msra.mxu1 %v1612_v26  ;;  %1112 = vmatprep.subr.bf16.mxu0 %v1617_v27  ;;  %v235_v26 = vld [vmem:[%s1977_s3 + $0x18] sm:$0xff] }
  0x6c   : > { %1153 = vmatprep.subr.bf16.mxu1 %v1620_v28 }
  0x6e   : > { %1113 = vmatpush1.bf16.msra.mxu0 %v1615_v29 }
  0x6f   : > { %1154 = vmatpush1.bf16.msra.mxu1 %v1618_v30  ;;  %1114 = vmatprep.subr.bf16.mxu0 %v1623_v31 }
  0x70   : > { %1155 = vmatprep.subr.bf16.mxu1 %v1626_v32 }
  0x72   : > { %1115 = vmatpush1.bf16.msra.mxu0 %v1621_v33 }
  0x73   : > { %1156 = vmatpush1.bf16.msra.mxu1 %v1624_v34  ;;  %1116 = vmatprep.subr.bf16.mxu0 %v1629_v35  ;;  %v1202_v35 = vlaneseq (!%p1455_p7) }
  0x74   : > { %1157 = vmatprep.subr.bf16.mxu1 %v1632_v36 }
  0x75   : > { %v1203_v36 = vshrl.u32 (!%p1455_p7), %v1202_v35, 7 }
  0x76   : > { %1117 = vmatpush1.bf16.msra.mxu0 %v1627_v37  ;;  %v1200_v37 = vld [vmem:[%s1976_s2] sm:$0xf] (!%p1455_p7) }
  0x77   : > { %1158 = vmatpush1.bf16.msra.mxu1 %v1630_v38  ;;  %1118 = vmatprep.subr.bf16.mxu0 %v1635_v39  ;;  %v1204_v39 = vsub.s32 (!%p1455_p7), 0, %v1203_v36 }
  0x78   : > { %1159 = vmatprep.subr.bf16.mxu1 %v1638_v40  ;;  %v1208_v40 = vsub.s32 (!%p1455_p7), 1, %v1203_v36 }
  0x7a   : > { %1119 = vmatpush1.bf16.msra.mxu0 %v1633_v41  ;;  %v1212_v41 = vsub.s32 (!%p1455_p7), 2, %v1203_v36 }
  0x7b   : > { %1160 = vmatpush1.bf16.msra.mxu1 %v1636_v42  ;;  %1120 = vmatprep.subr.bf16.mxu0 %v1641_v43  ;;  %v1216_v42 = vsub.s32 (!%p1455_p7), 3, %v1203_v36 }
  0x7c   : > { %1161 = vmatprep.subr.bf16.mxu1 %v1644_v44 }
  0x7e   : > { %1121 = vmatpush1.bf16.msra.mxu0 %v1639_v45 }
  0x7f   : > { %1162 = vmatpush1.bf16.msra.mxu1 %v1642_v46  ;;  %1122 = vmatprep.subr.bf16.mxu0 %v1647_v47  ;;  %v1205_v46 = vrot.slane (!%p1455_p7), %v1200_v37, %v1204_v39  ;;  %v1209_v47 = vrot.slane (!%p1455_p7), %v1200_v37, %v1208_v40 }
  0x80   : > { %1163 = vmatprep.subr.bf16.mxu1 %v1650_v48  ;;  %v1213_v48 = vrot.slane (!%p1455_p7), %v1200_v37, %v1212_v41 }
  0x82   : > { %1123 = vmatpush1.bf16.msra.mxu0 %v1645_v49  ;;  %v1217_v49 = vrot.slane (!%p1455_p7), %v1200_v37, %v1216_v42 }
  0x83   : > { %1164 = vmatpush1.bf16.msra.mxu1 %v1648_v50  ;;  %1124 = vmatprep.subr.bf16.mxu0 %v1653_v51 }
  0x84   : > { %1165 = vmatprep.subr.bf16.mxu1 %v1656_v52 }
  0x86   : > { %1125 = vmatpush1.bf16.msra.mxu0 %v1651_v53 }
  0x87   : > { %1166 = vmatpush1.bf16.msra.mxu1 %v1654_v54  ;;  %1126 = vmatprep.subr.bf16.mxu0 %v1659_v55 }
  0x88   : > { %1167 = vmatprep.subr.bf16.mxu1 %v1662_v56 }
  0x8a   : > { %1127 = vmatpush1.bf16.msra.mxu0 %v1657_v57 }
  0x8b   : > { %1168 = vmatpush1.bf16.msra.mxu1 %v1660_v58  ;;  %1128 = vmatprep.subr.bf16.mxu0 %v1665_v59 }
  0x8c   : > { %1169 = vmatprep.subr.bf16.mxu1 %v1668_v60 }
  0x8e   : > { %1129 = vmatpush1.bf16.msra.mxu0 %v1663_v61 }
  0x8f   : > { %1170 = vmatpush1.bf16.msra.mxu1 %v1666_v62  ;;  %1130 = vmatprep.subr.bf16.mxu0 %v1671_v63 }
  0x90   : > { %1171 = vmatprep.subr.bf16.mxu1 %v1674_v0 }
  0x92   : > { %1131 = vmatpush1.bf16.msra.mxu0 %v1669_v1 }
  0x93   : > { %1172 = vmatpush1.bf16.msra.mxu1 %v1672_v2  ;;  %1132 = vmatprep.subr.bf16.mxu0 %v1677_v3 }
  0x94   : > { %1173 = vmatprep.subr.bf16.mxu1 %v1680_v4 }
  0x96   : > { %1133 = vmatpush1.bf16.msra.mxu0 %v1675_v5 }
  0x97   : > { %1174 = vmatpush1.bf16.msra.mxu1 %v1678_v6 }
  0x99   : > { %1135 = vmatmul.mubr.bf16.vlgmr.msra.gmra.mrb[4].mxu0 %v1842_v7 }
  0x9a   : > { %1176 = vmatmul.mubr.bf16.vlgmr.msra.gmra.mrb[4].mxu1 %v1844_v8 }
 0x12c   : > { %v1054_v9 = vpop.f32.mrb[0].mxu0 }
 0x12d   : > { %v1095_v11 = vpop.f32.mrb[0].mxu1  ;;  %v1056_v13 = vpop.f32.mrb[1].mxu0 }
 0x12e   : > { %v1096_v12 = vadd.f32 %v1095_v11, %v1054_v9  ;;  %v1097_v15 = vpop.f32.mrb[1].mxu1  ;;  %v1058_v17 = vpop.f32.mrb[2].mxu0 }
 0x12f   : > { %v1098_v16 = vadd.f32 %v1097_v15, %v1056_v13  ;;  %v1099_v18 = vpop.f32.mrb[2].mxu1  ;;  %v1059_v7 = vpop.f32.mrb[3].mxu0 }
 0x130   : > { %v1184_v19 = vadd.f32 %v1096_v12, %v232_v10  ;;  %v1100_v20 = vpop.f32.mrb[3].mxu1 }
 0x131   : > { %v1185_v8 = vadd.f32 %v1098_v16, %v233_v14 }
 0x132   : > { %1188 = vst [vmem:[%s1977_s3] sm:$0xff] %v1184_v19 }
 0x133   : > { %1189 = vst [vmem:[%s1977_s3 + $0x8] sm:$0xff] %v1185_v8 }
 0x139   : > { %v1196_v38 = vld [vmem:[%s1977_s3] sm:$0xff] (!%p1455_p7) }
 0x13a   : > { %v1197_v43 = vld [vmem:[%s1977_s3 + $0x8] sm:$0xff] (!%p1455_p7)  ;;  %v1222_v50 = vadd.f32 (!%p1455_p7), %v1205_v46, %v1196_v38 }
 0x13b   : > { %v1223_v51 = vadd.f32 (!%p1455_p7), %v1209_v47, %v1197_v43 }
 0x13c   : > { %v1226_v54 = vmax.f32 (!%p1455_p7), %v1222_v50, 0.0 }
 0x13d   : > { %v1227_v55 = vmax.f32 (!%p1455_p7), %v1223_v51, 0.0 }
 0x13e   : > { %1230 = vst [vmem:[%s1977_s3] sm:$0xff] (!%p1455_p7), %v1226_v54 }
 0x13f   : > { %1231 = vst [vmem:[%s1977_s3 + $0x8] sm:$0xff] (!%p1455_p7), %v1227_v55 }
 0x16c   : > { %v1136_v21 = vpop.f32.mrb[4].mxu0 }
 0x16d   : > { %v1177_v23 = vpop.f32.mrb[4].mxu1  ;;  %v1138_v25 = vpop.f32.mrb[5].mxu0  ;;  %1195 = sbr.rel (%p1455_p7) target bundleno = 384 (0x180), region = 40 }
 0x16e   : > { %v1178_v24 = vadd.f32 %v1177_v23, %v1136_v21  ;;  %v1179_v27 = vpop.f32.mrb[5].mxu1  ;;  %v1140_v29 = vpop.f32.mrb[6].mxu0 }
 0x16f   : > { %v1180_v28 = vadd.f32 %v1179_v27, %v1138_v25  ;;  %v1181_v30 = vpop.f32.mrb[6].mxu1  ;;  %v1141_v32 = vpop.f32.mrb[7].mxu0 }
 0x170   : > { %v1186_v31 = vadd.f32 %v1178_v24, %v234_v22  ;;  %v1182_v33 = vpop.f32.mrb[7].mxu1 }
 0x171   : > { %v1187_v34 = vadd.f32 %v1180_v28, %v235_v26 }
 0x172   : > { %1190 = vst [vmem:[%s1977_s3 + $0x10] sm:$0xff] %v1186_v31 }
 0x173   : > { %1191 = vst [vmem:[%s1977_s3 + $0x18] sm:$0xff] %v1187_v34 }
 0x179   : > { %v1198_v44 = vld [vmem:[%s1977_s3 + $0x10] sm:$0xff] }
 0x17a   : > { %v1199_v45 = vld [vmem:[%s1977_s3 + $0x18] sm:$0xff]  ;;  %v1224_v52 = vadd.f32 %v1213_v48, %v1198_v44 }
 0x17b   : > { %v1225_v53 = vadd.f32 %v1217_v49, %v1199_v45 }
 0x17c   : > { %v1228_v56 = vmax.f32 %v1224_v52, 0.0 }
 0x17d   : > { %v1229_v57 = vmax.f32 %v1225_v53, 0.0 }
 0x17e   : > { %1232 = vst [vmem:[%s1977_s3 + $0x10] sm:$0xff] %v1228_v56 }
 0x17f   : > { %1233 = vst [vmem:[%s1977_s3 + $0x18] sm:$0xff] %v1229_v57 }
 0x180 PF: > { %s13_s14 = sadd.s32 1, %s1703_s14   ;;  %s1978_s12 = smov %s1699_s13 }
 0x181   : > { %p10_p8 = scmp.ge.s32.totalorder %s13_s14, 11   ;;  %s1979_s13 = smov %s1981_s15 }
 0x183   :  { %12 = sbr.rel (!%p10_p8) target bundleno = 2 (0x2), region = 73 }

// kernel: resnet34_forward.76
= control target key start
LH: loop header
LB: loop body
LE: loop exit
PB: predicated region body
PF: predicated region fallthrough
CT: control target
= control target key end

     0   :  { %s46_s0 = inlined_call_operand.vmem [shape: f32[2,1,512], index: 0, kind: input, shape index: {}]   ;;  %s47_s1 = inlined_call_operand.vmem [shape: f32[2,512], index: 1, kind: output, shape index: {}]  }
   0x1   :  { %v29_v0 = vld [vmem:[%s46_s0] sm:$0xff]  }
   0x2   :  { %28 = vst.sshfl [vmem:[%s47_s1] sm:$0xff pattern:$0x75316420] %v29_v0 }

// kernel: resnet34_forward.74
= control target key start
LH: loop header
LB: loop body
LE: loop exit
PB: predicated region body
PF: predicated region fallthrough
CT: control target
= control target key end

     0   :  { %8 = vsyncpa [#allocation3], 0  ;;  %s2185_s0 = inlined_call_operand.vmem [shape: bf16[8,4608], index: 0, kind: input, shape index: {}]   ;;  %s2186_s1 = inlined_call_operand.hbm [shape: bf16[4608,512], index: 1, kind: input, shape index: {}]   ;;  %s2187_s2 = inlined_call_operand.vmem [shape: f32[1,512], index: 2, kind: input, shape index: {}]   ;;  %s2188_s3 = inlined_call_operand.vmem [shape: f32[8,512], index: 3, kind: output, shape index: {}]  }
   0x1   :  { %10 = vsyncpa [#allocation3 + $0x1], 0  ;;  %s1851_s12 = smov 0   ;;  %s1853_s13 = smov 0  }
   0x2   :  { %s1855_s14 = smov 0   ;;  %s1857_s15 = smov 0  }
   0x3   :  { %s1859_s16 = smov 0   ;;  %s1861_s17 = smov 0  }
   0x4 LB: > { %s1341_s18 = sadd.s32 4294967295, %s1825_s17   ;;  %s25_s19 = sadd.s32 1, %s1821_s16  ;;  %s1825_s17 = sphi %s1861_s17, %s16_s17   ;;  %s1821_s16 = sphi %s1859_s16, %s2196_s16   ;;  %s1817_s15 = sphi %s1857_s15, %s2195_s15   ;;  %s1813_s14 = sphi %s1855_s14, %s2194_s14   ;;  %s1809_s13 = sphi %s1853_s13, %s2193_s13   ;;  %s1805_s12 = sphi %s1851_s12, %s2192_s12  }
   0x5   : > { %p26_p0 = scmp.ge.s32.totalorder %s25_s19, 9  ;;  %s63_s20 = sadd.s32 1, %s1813_s14 }
   0x6   : > { %p70_p1 = scmp.ne.s32.totalorder %s1813_s14, %s1809_s13  ;;  %p71_p2 = scmp.eq.s32.totalorder %s1825_s17, 0 }
   0x7   : > { %s2198_s19 = smov (%p26_p0, %s25_s19), 0  ;;  %p76_p4 = scmp.ne.s32.totalorder %s1809_s13, %s1805_s12 }
   0x8   : > { %p1887_p3 = por %p71_p2, %p70_p1  ;;  %s60_s22 = ssub.s32 %s1821_s16, %s2198_s19 }
   0x9   : > { %p77_p5 = scmp.eq.s32.totalorder %s1341_s18, 0  ;;  %p61_p6 = scmp.eq.s32.totalorder %s60_s22, 0 }
   0xa   : > { %p1497_p8 = scmp.lt.s32.totalorder %s1825_s17, 9  ;;  %s163_s25 = sand.u32 1, %s1813_s14  }
   0xb   : > { %p1894_p7 = por %p77_p5, %p76_p4  ;;  %s1490_s26 = sshll.u32 %s1821_s16, 14 }
   0xc   : > { %s1900_s24 = scalar_select %p61_p6, %s1813_s14, %s63_s20  }
   0xd   : > { %s1344_s27 = sshll.u32 %s163_s25, 10  ;;  %s1907_s30 = scalar_lea.hbm %s2186_s1, %s1490_s26 }
   0xe   : > { %s167_s4 = scalar_lea.vmem [#allocation2], %s1344_s27  ;;  %p1911_p9 = pnand %p1497_p8, %p1887_p3 }
   0xf   : > { %s175_s5 = sshll.u32 %s167_s4, 4  ;;  %s1917_s7 = scalar_lea.sflag [#allocation3], %s163_s25  ;;  %s1915_s5 = int_to_ptr.vmem [resolvable:$true] %s175_s5 }
  0x10   : > { %s1745_s8 = scalar_lea.hbm %s1907_s30, 16384  ;;  %p1747_p11 = pneg %p1911_p9 }
  0x11   : > { %p1746_p10 = scmp.ne.s32.totalorder %s1907_s30, %s1745_s8  ;;  %s1750_s11 = scalar_lea.hbm %s2186_s1, 147456 }
  0x12   : > { %p1751_p0 = scmp.lt.u32.totalorder %s1907_s30, %s2186_s1  ;;  %p1752_p1 = scmp.lt.u32.totalorder %s1750_s11, %s1745_s8 }
  0x13   : > { %p1748_p12 = pnand %p1747_p11, %p1746_p10  ;;  %p1754_p3 = scmp.lt.u32.totalorder %s1745_s8, %s1907_s30 }
  0x14   : > { %p1753_p2 = por %p1752_p1, %p1751_p0 }
  0x15   : > { %p1749_p13 = pneg %p1748_p12 }
  0x16   : > { %p1755_p4 = por %p1754_p3, %p1753_p2 }
  0x18   : > { %p1756_p5 = pnand %p1755_p4, %p1749_p13 }
  0x1a   : > { %1759 = shalt.err (!%p1756_p5)
}
  0x1b   : > { %s1760_s20 = scalar_lea.vmem %s1915_s5, 16384  ;;  %s1827_s21 = smov [#allocation2]  }
  0x1c   : > { %p1761_p6 = scmp.ne.s32.totalorder %s1915_s5, %s1760_s20  ;;  %s1765_s22 = sshll.u32 %s1827_s21, 4  ;;  %s1766_s22 = int_to_ptr.vmem [resolvable:$false] %s1765_s22 }
  0x1d   : > { %s1767_s25 = scalar_lea.vmem %s1766_s22, 32768  ;;  %p1768_p12 = scmp.lt.s32.totalorder %s1915_s5, %s1766_s22 }
  0x1e   : > { %p1763_p8 = pnand %p1761_p6, %p1747_p11  ;;  %p1769_p0 = scmp.lt.s32.totalorder %s1767_s25, %s1760_s20 }
  0x20   : > { %p1764_p10 = pneg %p1763_p8  ;;  %p1770_p1 = por %p1769_p0, %p1768_p12 }
  0x22   : > { %p1771_p2 = pnand %p1770_p1, %p1764_p10 }
  0x24   : > { %1774 = shalt.err (!%p1771_p2)
}
  0x25   : > { %s1828_s26 = smov 256   ;;  %s1829_s27 = smov 16  }
  0x26   : > { %1496 = dma.hbm_to_vmem [thread:$0]  (!%p1911_p9), %s1907_s30, 16384, %s1915_s5, %s1917_s7, %s1828_s26, %s1828_s26, %s1829_s27  }
  0x27   : > { %p1348_p11 = scmp.ge.s32.totalorder %s1825_s17, 1  ;;  %p183_p13 = scmp.lt.s32.totalorder %s1825_s17, 10 }
  0x29   : > { %p184_p3 = pnand %p1348_p11, %p183_p13 }
  0x2a   : > { %s189_s28 = sand.u32 (!%p184_p3), 1, %s1809_s13  }
  0x2b   : > { %187 = sbr.rel (%p184_p3) target bundleno = 420 (0x1a4), region = 32  ;;  %s1349_s29 = sshll.u32 (!%p184_p3), %s189_s28, 10 }
  0x2c   : > { %s190_s4 = scalar_lea.sflag (!%p184_p3), [#allocation3], %s189_s28  ;;  %s1948_s8 = scalar_lea.vmem (!%p184_p3), [#allocation2], %s1349_s29 }
  0x32   : > { %1800 = dma.done.wait (%p1894_p7), %s190_s4, 16384  }
  0x33   : > { %1802 = vsyncadd (%p1894_p7), %s190_s4, 4294950912  ;;  %s1350_s9 = sshll.u32 %s1817_s15, 2  ;;  %p1352_p9 = scmp.ne.s32.totalorder %s1817_s15, 0 }
  0x34   : > { %p228_p4 = scmp.lt.s32.totalorder %s1350_s9, 35  ;;  %v1830_v0 = vmov (!%p1352_p9), 0.0  }
  0x35   : > { %244 = sbr.rel (%p1352_p9) target bundleno = 60 (0x3c), region = 40  ;;  %245 = vst [vmem:[%s2188_s3] sm:$0xff] (!%p1352_p9), %v1830_v0  ;;  %246 = vst [vmem:[%s2188_s3 + $0x8] sm:$0xff] (!%p1352_p9), %v1830_v0 }
  0x36   : > { %s2200_s9 = smov (!%p228_p4, %s1350_s9), 35  ;;  %247 = vst [vmem:[%s2188_s3 + $0x10] sm:$0xff] (!%p1352_p9), %v1830_v0  ;;  %248 = vst [vmem:[%s2188_s3 + $0x18] sm:$0xff] (!%p1352_p9), %v1830_v0 }
  0x37   : > { %s1351_s30 = sshll.u32 %s2200_s9, 2 }
  0x38   : > { %s1958_s7 = scalar_lea.vmem %s2185_s0, %s1351_s30 }
  0x3c PF: > { %v1549_v1 = vld [vmem:[%s1948_s8 + $0x4] ss:$16 sps:$4 sm:$0xff]   ;;  %v1553_v3 = vld [vmem:[%s1948_s8] ss:$16 sps:$4 sm:$0xff]   ;;  %v254_v49 = vld [vmem:[%s1958_s7 + $0x8] sm:$0xff]  ;;  %p1485_p7 = scmp.ne.s32.totalorder %s1817_s15, 8 }
  0x3d   : > { %v1551_v2 = vld [vmem:[%s1948_s8 + $0x204] ss:$16 sps:$4 sm:$0xff]   ;;  %1037 = vmatprep.subr.bf16.mxu0 %v1549_v1  ;;  %v1554_v4 = vld [vmem:[%s1948_s8 + $0x200] ss:$16 sps:$4 sm:$0xff]   ;;  %v1356_v52 = vcombine.high %v254_v49, %v254_v49 }
  0x3e   : > { %1078 = vmatprep.subr.bf16.mxu1 %v1551_v2  ;;  %v1555_v5 = vld [vmem:[%s1948_s8 + $0x24] ss:$16 sps:$4 sm:$0xff]   ;;  %1038 = vmatpush1.bf16.msra.mxu0 %v1553_v3  ;;  %v1559_v7 = vld [vmem:[%s1948_s8 + $0x20] ss:$16 sps:$4 sm:$0xff]  }
  0x3f   : > { %1079 = vmatpush1.bf16.msra.mxu1 %v1554_v4  ;;  %v1557_v6 = vld [vmem:[%s1948_s8 + $0x224] ss:$16 sps:$4 sm:$0xff]   ;;  %1039 = vmatprep.subr.bf16.mxu0 %v1555_v5  ;;  %v1560_v8 = vld [vmem:[%s1948_s8 + $0x220] ss:$16 sps:$4 sm:$0xff]   ;;  %v1651_v5 = vld [vmem:[%s1948_s8 + $0xc] ss:$16 sps:$4 sm:$0xff]  }
  0x40   : > { %1080 = vmatprep.subr.bf16.mxu1 %v1557_v6  ;;  %v1561_v9 = vld [vmem:[%s1948_s8 + $0x44] ss:$16 sps:$4 sm:$0xff]   ;;  %v1565_v11 = vld [vmem:[%s1948_s8 + $0x40] ss:$16 sps:$4 sm:$0xff]   ;;  %1110 = vmatprep.mubr.bf16.mxu1 %v1356_v52  ;;  %v1654_v6 = vld [vmem:[%s1948_s8 + $0x20c] ss:$16 sps:$4 sm:$0xff]  }
  0x41   : > { %v1563_v10 = vld [vmem:[%s1948_s8 + $0x244] ss:$16 sps:$4 sm:$0xff]   ;;  %v1566_v12 = vld [vmem:[%s1948_s8 + $0x240] ss:$16 sps:$4 sm:$0xff]  }
  0x42   : > { %1040 = vmatpush1.bf16.msra.mxu0 %v1559_v7  ;;  %v1567_v13 = vld [vmem:[%s1948_s8 + $0x64] ss:$16 sps:$4 sm:$0xff]   ;;  %v1571_v15 = vld [vmem:[%s1948_s8 + $0x60] ss:$16 sps:$4 sm:$0xff]  }
  0x43   : > { %1081 = vmatpush1.bf16.msra.mxu1 %v1560_v8  ;;  %1041 = vmatprep.subr.bf16.mxu0 %v1561_v9  ;;  %v1569_v14 = vld [vmem:[%s1948_s8 + $0x264] ss:$16 sps:$4 sm:$0xff]   ;;  %v1572_v16 = vld [vmem:[%s1948_s8 + $0x260] ss:$16 sps:$4 sm:$0xff]   ;;  %v2046_v8 = vcombine.low %v254_v49, %v254_v49  ;;  %v1649_v9 = vld [vmem:[%s1948_s8 + $0x8] ss:$16 sps:$4 sm:$0xff]  }
  0x44   : > { %1082 = vmatprep.subr.bf16.mxu1 %v1563_v10  ;;  %v1573_v17 = vld [vmem:[%s1948_s8 + $0x84] ss:$16 sps:$4 sm:$0xff]   ;;  %v1577_v19 = vld [vmem:[%s1948_s8 + $0x80] ss:$16 sps:$4 sm:$0xff]   ;;  %v1652_v10 = vld [vmem:[%s1948_s8 + $0x208] ss:$16 sps:$4 sm:$0xff]  }
  0x45   : > { %v1575_v18 = vld [vmem:[%s1948_s8 + $0x284] ss:$16 sps:$4 sm:$0xff]   ;;  %v1578_v20 = vld [vmem:[%s1948_s8 + $0x280] ss:$16 sps:$4 sm:$0xff]   ;;  %v1709_v49 = vld [vmem:[%s1948_s8 + $0x148] ss:$16 sps:$4 sm:$0xff]  }
  0x46   : > { %1042 = vmatpush1.bf16.msra.mxu0 %v1565_v11  ;;  %v1579_v21 = vld [vmem:[%s1948_s8 + $0xa4] ss:$16 sps:$4 sm:$0xff]   ;;  %v1583_v23 = vld [vmem:[%s1948_s8 + $0xa0] ss:$16 sps:$4 sm:$0xff]   ;;  %v1657_v11 = vld [vmem:[%s1948_s8 + $0x2c] ss:$16 sps:$4 sm:$0xff]  }
  0x47   : > { %1083 = vmatpush1.bf16.msra.mxu1 %v1566_v12  ;;  %1043 = vmatprep.subr.bf16.mxu0 %v1567_v13  ;;  %v1581_v22 = vld [vmem:[%s1948_s8 + $0x2a4] ss:$16 sps:$4 sm:$0xff]   ;;  %v1584_v24 = vld [vmem:[%s1948_s8 + $0x2a0] ss:$16 sps:$4 sm:$0xff]   ;;  %v1660_v12 = vld [vmem:[%s1948_s8 + $0x22c] ss:$16 sps:$4 sm:$0xff]  }
  0x48   : > { %1084 = vmatprep.subr.bf16.mxu1 %v1569_v14  ;;  %v1585_v25 = vld [vmem:[%s1948_s8 + $0xc4] ss:$16 sps:$4 sm:$0xff]   ;;  %v1589_v27 = vld [vmem:[%s1948_s8 + $0xc0] ss:$16 sps:$4 sm:$0xff]   ;;  %v1655_v13 = vld [vmem:[%s1948_s8 + $0x28] ss:$16 sps:$4 sm:$0xff]  }
  0x49   : > { %v1587_v26 = vld [vmem:[%s1948_s8 + $0x2c4] ss:$16 sps:$4 sm:$0xff]   ;;  %v1590_v28 = vld [vmem:[%s1948_s8 + $0x2c0] ss:$16 sps:$4 sm:$0xff]   ;;  %v1658_v14 = vld [vmem:[%s1948_s8 + $0x228] ss:$16 sps:$4 sm:$0xff]  }
  0x4a   : > { %1044 = vmatpush1.bf16.msra.mxu0 %v1571_v15  ;;  %v1591_v29 = vld [vmem:[%s1948_s8 + $0xe4] ss:$16 sps:$4 sm:$0xff]   ;;  %v1595_v31 = vld [vmem:[%s1948_s8 + $0xe0] ss:$16 sps:$4 sm:$0xff]   ;;  %v1663_v15 = vld [vmem:[%s1948_s8 + $0x4c] ss:$16 sps:$4 sm:$0xff]  }
  0x4b   : > { %1085 = vmatpush1.bf16.msra.mxu1 %v1572_v16  ;;  %1045 = vmatprep.subr.bf16.mxu0 %v1573_v17  ;;  %v1593_v30 = vld [vmem:[%s1948_s8 + $0x2e4] ss:$16 sps:$4 sm:$0xff]   ;;  %v1596_v32 = vld [vmem:[%s1948_s8 + $0x2e0] ss:$16 sps:$4 sm:$0xff]   ;;  %v1666_v16 = vld [vmem:[%s1948_s8 + $0x24c] ss:$16 sps:$4 sm:$0xff]  }
  0x4c   : > { %1086 = vmatprep.subr.bf16.mxu1 %v1575_v18  ;;  %v1597_v33 = vld [vmem:[%s1948_s8 + $0x104] ss:$16 sps:$4 sm:$0xff]   ;;  %v1601_v35 = vld [vmem:[%s1948_s8 + $0x100] ss:$16 sps:$4 sm:$0xff]   ;;  %v1661_v17 = vld [vmem:[%s1948_s8 + $0x48] ss:$16 sps:$4 sm:$0xff]  }
  0x4d   : > { %v1599_v34 = vld [vmem:[%s1948_s8 + $0x304] ss:$16 sps:$4 sm:$0xff]   ;;  %v1602_v36 = vld [vmem:[%s1948_s8 + $0x300] ss:$16 sps:$4 sm:$0xff]   ;;  %v1664_v18 = vld [vmem:[%s1948_s8 + $0x248] ss:$16 sps:$4 sm:$0xff]  }
  0x4e   : > { %1046 = vmatpush1.bf16.msra.mxu0 %v1577_v19  ;;  %v1603_v37 = vld [vmem:[%s1948_s8 + $0x124] ss:$16 sps:$4 sm:$0xff]   ;;  %v1607_v39 = vld [vmem:[%s1948_s8 + $0x120] ss:$16 sps:$4 sm:$0xff]   ;;  %v1669_v19 = vld [vmem:[%s1948_s8 + $0x6c] ss:$16 sps:$4 sm:$0xff]  }
  0x4f   : > { %1087 = vmatpush1.bf16.msra.mxu1 %v1578_v20  ;;  %1047 = vmatprep.subr.bf16.mxu0 %v1579_v21  ;;  %v1605_v38 = vld [vmem:[%s1948_s8 + $0x324] ss:$16 sps:$4 sm:$0xff]   ;;  %v1608_v40 = vld [vmem:[%s1948_s8 + $0x320] ss:$16 sps:$4 sm:$0xff]   ;;  %v1672_v20 = vld [vmem:[%s1948_s8 + $0x26c] ss:$16 sps:$4 sm:$0xff]  }
  0x50   : > { %1088 = vmatprep.subr.bf16.mxu1 %v1581_v22  ;;  %v1609_v41 = vld [vmem:[%s1948_s8 + $0x144] ss:$16 sps:$4 sm:$0xff]   ;;  %v1613_v43 = vld [vmem:[%s1948_s8 + $0x140] ss:$16 sps:$4 sm:$0xff]   ;;  %v1667_v21 = vld [vmem:[%s1948_s8 + $0x68] ss:$16 sps:$4 sm:$0xff]  }
  0x51   : > { %v1611_v42 = vld [vmem:[%s1948_s8 + $0x344] ss:$16 sps:$4 sm:$0xff]   ;;  %v1614_v44 = vld [vmem:[%s1948_s8 + $0x340] ss:$16 sps:$4 sm:$0xff]   ;;  %v1670_v22 = vld [vmem:[%s1948_s8 + $0x268] ss:$16 sps:$4 sm:$0xff]  }
  0x52   : > { %1048 = vmatpush1.bf16.msra.mxu0 %v1583_v23  ;;  %v1615_v45 = vld [vmem:[%s1948_s8 + $0x164] ss:$16 sps:$4 sm:$0xff]   ;;  %v1619_v50 = vld [vmem:[%s1948_s8 + $0x160] ss:$16 sps:$4 sm:$0xff]   ;;  %v1675_v23 = vld [vmem:[%s1948_s8 + $0x8c] ss:$16 sps:$4 sm:$0xff]  }
  0x53   : > { %1089 = vmatpush1.bf16.msra.mxu1 %v1584_v24  ;;  %1049 = vmatprep.subr.bf16.mxu0 %v1585_v25  ;;  %v1617_v46 = vld [vmem:[%s1948_s8 + $0x364] ss:$16 sps:$4 sm:$0xff]   ;;  %v1620_v51 = vld [vmem:[%s1948_s8 + $0x360] ss:$16 sps:$4 sm:$0xff]   ;;  %v1678_v24 = vld [vmem:[%s1948_s8 + $0x28c] ss:$16 sps:$4 sm:$0xff]  }
  0x54   : > { %1090 = vmatprep.subr.bf16.mxu1 %v1587_v26  ;;  %v253_v47 = vld [vmem:[%s1958_s7] sm:$0xff]  ;;  %v1673_v25 = vld [vmem:[%s1948_s8 + $0x88] ss:$16 sps:$4 sm:$0xff]  }
  0x55   : > { %v2020_v48 = vcombine.high %v253_v47, %v253_v47  ;;  %v1621_v53 = vld [vmem:[%s1948_s8 + $0x184] ss:$16 sps:$4 sm:$0xff]   ;;  %v1625_v55 = vld [vmem:[%s1948_s8 + $0x180] ss:$16 sps:$4 sm:$0xff]   ;;  %v2044_v7 = vcombine.low %v253_v47, %v253_v47  ;;  %v1676_v26 = vld [vmem:[%s1948_s8 + $0x288] ss:$16 sps:$4 sm:$0xff]  }
  0x56   : > { %1050 = vmatpush1.bf16.msra.mxu0 %v1589_v27  ;;  %v1623_v54 = vld [vmem:[%s1948_s8 + $0x384] ss:$16 sps:$4 sm:$0xff]   ;;  %v1626_v56 = vld [vmem:[%s1948_s8 + $0x380] ss:$16 sps:$4 sm:$0xff]   ;;  %v1681_v27 = vld [vmem:[%s1948_s8 + $0xac] ss:$16 sps:$4 sm:$0xff]  }
  0x57   : > { %1091 = vmatpush1.bf16.msra.mxu1 %v1590_v28  ;;  %1051 = vmatprep.subr.bf16.mxu0 %v1591_v29  ;;  %v1627_v57 = vld [vmem:[%s1948_s8 + $0x1a4] ss:$16 sps:$4 sm:$0xff]   ;;  %v1631_v59 = vld [vmem:[%s1948_s8 + $0x1a0] ss:$16 sps:$4 sm:$0xff]   ;;  %v1684_v28 = vld [vmem:[%s1948_s8 + $0x2ac] ss:$16 sps:$4 sm:$0xff]  }
  0x58   : > { %1092 = vmatprep.subr.bf16.mxu1 %v1593_v30  ;;  %1069 = vmatprep.mubr.bf16.mxu0 %v2020_v48  ;;  %v1629_v58 = vld [vmem:[%s1948_s8 + $0x3a4] ss:$16 sps:$4 sm:$0xff]   ;;  %v1632_v60 = vld [vmem:[%s1948_s8 + $0x3a0] ss:$16 sps:$4 sm:$0xff]   ;;  %v1679_v29 = vld [vmem:[%s1948_s8 + $0xa8] ss:$16 sps:$4 sm:$0xff]  }
  0x59   : > { %v1633_v61 = vld [vmem:[%s1948_s8 + $0x1c4] ss:$16 sps:$4 sm:$0xff]   ;;  %v1637_v63 = vld [vmem:[%s1948_s8 + $0x1c0] ss:$16 sps:$4 sm:$0xff]   ;;  %v1682_v30 = vld [vmem:[%s1948_s8 + $0x2a8] ss:$16 sps:$4 sm:$0xff]  }
  0x5a   : > { %1052 = vmatpush1.bf16.msra.mxu0 %v1595_v31  ;;  %v1635_v62 = vld [vmem:[%s1948_s8 + $0x3c4] ss:$16 sps:$4 sm:$0xff]   ;;  %v1638_v0 = vld [vmem:[%s1948_s8 + $0x3c0] ss:$16 sps:$4 sm:$0xff]   ;;  %v1687_v31 = vld [vmem:[%s1948_s8 + $0xcc] ss:$16 sps:$4 sm:$0xff]  }
  0x5b   : > { %1093 = vmatpush1.bf16.msra.mxu1 %v1596_v32  ;;  %1053 = vmatprep.subr.bf16.mxu0 %v1597_v33  ;;  %v1639_v1 = vld [vmem:[%s1948_s8 + $0x1e4] ss:$16 sps:$4 sm:$0xff]   ;;  %v1643_v3 = vld [vmem:[%s1948_s8 + $0x1e0] ss:$16 sps:$4 sm:$0xff]   ;;  %v1690_v32 = vld [vmem:[%s1948_s8 + $0x2cc] ss:$16 sps:$4 sm:$0xff]  }
  0x5c   : > { %1094 = vmatprep.subr.bf16.mxu1 %v1599_v34  ;;  %v1641_v2 = vld [vmem:[%s1948_s8 + $0x3e4] ss:$16 sps:$4 sm:$0xff]   ;;  %v1644_v4 = vld [vmem:[%s1948_s8 + $0x3e0] ss:$16 sps:$4 sm:$0xff]   ;;  %v1685_v33 = vld [vmem:[%s1948_s8 + $0xc8] ss:$16 sps:$4 sm:$0xff]  }
  0x5d   : > { %v1688_v34 = vld [vmem:[%s1948_s8 + $0x2c8] ss:$16 sps:$4 sm:$0xff]   ;;  %v1711_v47 = vld [vmem:[%s1948_s8 + $0x14c] ss:$16 sps:$4 sm:$0xff]  }
  0x5e   : > { %1054 = vmatpush1.bf16.msra.mxu0 %v1601_v35  ;;  %v1693_v35 = vld [vmem:[%s1948_s8 + $0xec] ss:$16 sps:$4 sm:$0xff]  }
  0x5f   : > { %1095 = vmatpush1.bf16.msra.mxu1 %v1602_v36  ;;  %1055 = vmatprep.subr.bf16.mxu0 %v1603_v37  ;;  %v1696_v36 = vld [vmem:[%s1948_s8 + $0x2ec] ss:$16 sps:$4 sm:$0xff]   ;;  %v1691_v37 = vld [vmem:[%s1948_s8 + $0xe8] ss:$16 sps:$4 sm:$0xff]  }
  0x60   : > { %1096 = vmatprep.subr.bf16.mxu1 %v1605_v38  ;;  %v1694_v38 = vld [vmem:[%s1948_s8 + $0x2e8] ss:$16 sps:$4 sm:$0xff]  }
  0x62   : > { %1056 = vmatpush1.bf16.msra.mxu0 %v1607_v39  ;;  %v1699_v39 = vld [vmem:[%s1948_s8 + $0x10c] ss:$16 sps:$4 sm:$0xff]  }
  0x63   : > { %1097 = vmatpush1.bf16.msra.mxu1 %v1608_v40  ;;  %1057 = vmatprep.subr.bf16.mxu0 %v1609_v41  ;;  %v1702_v40 = vld [vmem:[%s1948_s8 + $0x30c] ss:$16 sps:$4 sm:$0xff]   ;;  %v1697_v41 = vld [vmem:[%s1948_s8 + $0x108] ss:$16 sps:$4 sm:$0xff]  }
  0x64   : > { %1098 = vmatprep.subr.bf16.mxu1 %v1611_v42  ;;  %v1700_v42 = vld [vmem:[%s1948_s8 + $0x308] ss:$16 sps:$4 sm:$0xff]  }
  0x66   : > { %1058 = vmatpush1.bf16.msra.mxu0 %v1613_v43  ;;  %v1705_v43 = vld [vmem:[%s1948_s8 + $0x12c] ss:$16 sps:$4 sm:$0xff]  }
  0x67   : > { %1099 = vmatpush1.bf16.msra.mxu1 %v1614_v44  ;;  %1059 = vmatprep.subr.bf16.mxu0 %v1615_v45  ;;  %v1708_v44 = vld [vmem:[%s1948_s8 + $0x32c] ss:$16 sps:$4 sm:$0xff]   ;;  %v1703_v45 = vld [vmem:[%s1948_s8 + $0x128] ss:$16 sps:$4 sm:$0xff]  }
  0x68   : > { %1100 = vmatprep.subr.bf16.mxu1 %v1617_v46  ;;  %v1706_v46 = vld [vmem:[%s1948_s8 + $0x328] ss:$16 sps:$4 sm:$0xff]  }
  0x6a   : > { %1060 = vmatpush1.bf16.msra.mxu0 %v1619_v50  ;;  %v1712_v50 = vld [vmem:[%s1948_s8 + $0x348] ss:$16 sps:$4 sm:$0xff]  }
  0x6b   : > { %1101 = vmatpush1.bf16.msra.mxu1 %v1620_v51  ;;  %1061 = vmatprep.subr.bf16.mxu0 %v1621_v53  ;;  %v1717_v51 = vld [vmem:[%s1948_s8 + $0x16c] ss:$16 sps:$4 sm:$0xff]   ;;  %v1715_v53 = vld [vmem:[%s1948_s8 + $0x168] ss:$16 sps:$4 sm:$0xff]  }
  0x6c   : > { %1102 = vmatprep.subr.bf16.mxu1 %v1623_v54  ;;  %v1718_v54 = vld [vmem:[%s1948_s8 + $0x368] ss:$16 sps:$4 sm:$0xff]  }
  0x6e   : > { %1062 = vmatpush1.bf16.msra.mxu0 %v1625_v55  ;;  %v1723_v55 = vld [vmem:[%s1948_s8 + $0x18c] ss:$16 sps:$4 sm:$0xff]  }
  0x6f   : > { %1103 = vmatpush1.bf16.msra.mxu1 %v1626_v56  ;;  %1063 = vmatprep.subr.bf16.mxu0 %v1627_v57  ;;  %v1726_v56 = vld [vmem:[%s1948_s8 + $0x38c] ss:$16 sps:$4 sm:$0xff]   ;;  %v1721_v57 = vld [vmem:[%s1948_s8 + $0x188] ss:$16 sps:$4 sm:$0xff]  }
  0x70   : > { %1104 = vmatprep.subr.bf16.mxu1 %v1629_v58  ;;  %v1724_v58 = vld [vmem:[%s1948_s8 + $0x388] ss:$16 sps:$4 sm:$0xff]  }
  0x72   : > { %1064 = vmatpush1.bf16.msra.mxu0 %v1631_v59  ;;  %v1729_v59 = vld [vmem:[%s1948_s8 + $0x1ac] ss:$16 sps:$4 sm:$0xff]  }
  0x73   : > { %1105 = vmatpush1.bf16.msra.mxu1 %v1632_v60  ;;  %1065 = vmatprep.subr.bf16.mxu0 %v1633_v61  ;;  %v1732_v60 = vld [vmem:[%s1948_s8 + $0x3ac] ss:$16 sps:$4 sm:$0xff]   ;;  %v1727_v61 = vld [vmem:[%s1948_s8 + $0x1a8] ss:$16 sps:$4 sm:$0xff]  }
  0x74   : > { %1106 = vmatprep.subr.bf16.mxu1 %v1635_v62  ;;  %v1730_v62 = vld [vmem:[%s1948_s8 + $0x3a8] ss:$16 sps:$4 sm:$0xff]  }
  0x76   : > { %1066 = vmatpush1.bf16.msra.mxu0 %v1637_v63  ;;  %v1735_v63 = vld [vmem:[%s1948_s8 + $0x1cc] ss:$16 sps:$4 sm:$0xff]  }
  0x77   : > { %1107 = vmatpush1.bf16.msra.mxu1 %v1638_v0  ;;  %1067 = vmatprep.subr.bf16.mxu0 %v1639_v1  ;;  %v1738_v0 = vld [vmem:[%s1948_s8 + $0x3cc] ss:$16 sps:$4 sm:$0xff]   ;;  %v1733_v1 = vld [vmem:[%s1948_s8 + $0x1c8] ss:$16 sps:$4 sm:$0xff]  }
  0x78   : > { %1108 = vmatprep.subr.bf16.mxu1 %v1641_v2  ;;  %v1736_v2 = vld [vmem:[%s1948_s8 + $0x3c8] ss:$16 sps:$4 sm:$0xff]  }
  0x7a   : > { %1068 = vmatpush1.bf16.msra.mxu0 %v1643_v3  ;;  %v1741_v3 = vld [vmem:[%s1948_s8 + $0x1ec] ss:$16 sps:$4 sm:$0xff]  }
  0x7b   : > { %1109 = vmatpush1.bf16.msra.mxu1 %v1644_v4  ;;  %1119 = vmatprep.subr.bf16.mxu0 %v1651_v5  ;;  %v1744_v4 = vld [vmem:[%s1948_s8 + $0x3ec] ss:$16 sps:$4 sm:$0xff]   ;;  %v1739_v5 = vld [vmem:[%s1948_s8 + $0x1e8] ss:$16 sps:$4 sm:$0xff]  }
  0x7c   : > { %1160 = vmatprep.subr.bf16.mxu1 %v1654_v6  ;;  %v1742_v6 = vld [vmem:[%s1948_s8 + $0x3e8] ss:$16 sps:$4 sm:$0xff]  }
  0x7d   : > { %1070 = vmatmul.mubr.bf16.vlgmr.msra.gmra.mrb[0].mxu0 %v2044_v7 }
  0x7e   : > { %1111 = vmatmul.mubr.bf16.vlgmr.msra.gmra.mrb[0].mxu1 %v2046_v8  ;;  %1120 = vmatpush1.bf16.msra.mxu0 %v1649_v9 }
  0x7f   : > { %1161 = vmatpush1.bf16.msra.mxu1 %v1652_v10  ;;  %1121 = vmatprep.subr.bf16.mxu0 %v1657_v11  ;;  %v249_v10 = vld [vmem:[%s2188_s3] sm:$0xff] }
  0x80   : > { %1162 = vmatprep.subr.bf16.mxu1 %v1660_v12  ;;  %1151 = vmatprep.mubr.bf16.mxu0 %v2020_v48  ;;  %v1714_v48 = vld [vmem:[%s1948_s8 + $0x34c] ss:$16 sps:$4 sm:$0xff]  }
  0x81   : > { %1192 = vmatprep.mubr.bf16.mxu1 %v1356_v52  ;;  %v1720_v52 = vld [vmem:[%s1948_s8 + $0x36c] ss:$16 sps:$4 sm:$0xff]  }
  0x82   : > { %1122 = vmatpush1.bf16.msra.mxu0 %v1655_v13 }
  0x83   : > { %1163 = vmatpush1.bf16.msra.mxu1 %v1658_v14  ;;  %1123 = vmatprep.subr.bf16.mxu0 %v1663_v15  ;;  %v250_v14 = vld [vmem:[%s2188_s3 + $0x8] sm:$0xff] }
  0x84   : > { %1164 = vmatprep.subr.bf16.mxu1 %v1666_v16 }
  0x86   : > { %1124 = vmatpush1.bf16.msra.mxu0 %v1661_v17 }
  0x87   : > { %1165 = vmatpush1.bf16.msra.mxu1 %v1664_v18  ;;  %1125 = vmatprep.subr.bf16.mxu0 %v1669_v19 }
  0x88   : > { %1166 = vmatprep.subr.bf16.mxu1 %v1672_v20 }
  0x8a   : > { %1126 = vmatpush1.bf16.msra.mxu0 %v1667_v21 }
  0x8b   : > { %1167 = vmatpush1.bf16.msra.mxu1 %v1670_v22  ;;  %1127 = vmatprep.subr.bf16.mxu0 %v1675_v23  ;;  %v251_v22 = vld [vmem:[%s2188_s3 + $0x10] sm:$0xff] }
  0x8c   : > { %1168 = vmatprep.subr.bf16.mxu1 %v1678_v24 }
  0x8e   : > { %1128 = vmatpush1.bf16.msra.mxu0 %v1673_v25 }
  0x8f   : > { %1169 = vmatpush1.bf16.msra.mxu1 %v1676_v26  ;;  %1129 = vmatprep.subr.bf16.mxu0 %v1681_v27  ;;  %v252_v26 = vld [vmem:[%s2188_s3 + $0x18] sm:$0xff] }
  0x90   : > { %1170 = vmatprep.subr.bf16.mxu1 %v1684_v28 }
  0x92   : > { %1130 = vmatpush1.bf16.msra.mxu0 %v1679_v29 }
  0x93   : > { %1171 = vmatpush1.bf16.msra.mxu1 %v1682_v30  ;;  %1131 = vmatprep.subr.bf16.mxu0 %v1687_v31 }
  0x94   : > { %1172 = vmatprep.subr.bf16.mxu1 %v1690_v32 }
  0x96   : > { %1132 = vmatpush1.bf16.msra.mxu0 %v1685_v33 }
  0x97   : > { %1173 = vmatpush1.bf16.msra.mxu1 %v1688_v34  ;;  %1133 = vmatprep.subr.bf16.mxu0 %v1693_v35  ;;  %v1219_v35 = vlaneseq (!%p1485_p7) }
  0x98   : > { %1174 = vmatprep.subr.bf16.mxu1 %v1696_v36 }
  0x99   : > { %v1220_v36 = vshrl.u32 (!%p1485_p7), %v1219_v35, 7 }
  0x9a   : > { %1134 = vmatpush1.bf16.msra.mxu0 %v1691_v37  ;;  %v1217_v37 = vld [vmem:[%s2187_s2] sm:$0xf] (!%p1485_p7) }
  0x9b   : > { %1175 = vmatpush1.bf16.msra.mxu1 %v1694_v38  ;;  %1135 = vmatprep.subr.bf16.mxu0 %v1699_v39  ;;  %v1221_v39 = vsub.s32 (!%p1485_p7), 0, %v1220_v36 }
  0x9c   : > { %1176 = vmatprep.subr.bf16.mxu1 %v1702_v40  ;;  %v1225_v40 = vsub.s32 (!%p1485_p7), 1, %v1220_v36 }
  0x9e   : > { %1136 = vmatpush1.bf16.msra.mxu0 %v1697_v41  ;;  %v1229_v41 = vsub.s32 (!%p1485_p7), 2, %v1220_v36 }
  0x9f   : > { %1177 = vmatpush1.bf16.msra.mxu1 %v1700_v42  ;;  %1137 = vmatprep.subr.bf16.mxu0 %v1705_v43  ;;  %v1233_v42 = vsub.s32 (!%p1485_p7), 3, %v1220_v36 }
  0xa0   : > { %1178 = vmatprep.subr.bf16.mxu1 %v1708_v44 }
  0xa2   : > { %1138 = vmatpush1.bf16.msra.mxu0 %v1703_v45 }
  0xa3   : > { %1179 = vmatpush1.bf16.msra.mxu1 %v1706_v46  ;;  %1139 = vmatprep.subr.bf16.mxu0 %v1711_v47  ;;  %v1222_v46 = vrot.slane (!%p1485_p7), %v1217_v37, %v1221_v39  ;;  %v1226_v47 = vrot.slane (!%p1485_p7), %v1217_v37, %v1225_v40 }
  0xa4   : > { %1180 = vmatprep.subr.bf16.mxu1 %v1714_v48  ;;  %v1230_v48 = vrot.slane (!%p1485_p7), %v1217_v37, %v1229_v41 }
  0xa6   : > { %1140 = vmatpush1.bf16.msra.mxu0 %v1709_v49  ;;  %v1234_v49 = vrot.slane (!%p1485_p7), %v1217_v37, %v1233_v42 }
  0xa7   : > { %1181 = vmatpush1.bf16.msra.mxu1 %v1712_v50  ;;  %1141 = vmatprep.subr.bf16.mxu0 %v1717_v51 }
  0xa8   : > { %1182 = vmatprep.subr.bf16.mxu1 %v1720_v52 }
  0xaa   : > { %1142 = vmatpush1.bf16.msra.mxu0 %v1715_v53 }
  0xab   : > { %1183 = vmatpush1.bf16.msra.mxu1 %v1718_v54  ;;  %1143 = vmatprep.subr.bf16.mxu0 %v1723_v55 }
  0xac   : > { %1184 = vmatprep.subr.bf16.mxu1 %v1726_v56 }
  0xae   : > { %1144 = vmatpush1.bf16.msra.mxu0 %v1721_v57 }
  0xaf   : > { %1185 = vmatpush1.bf16.msra.mxu1 %v1724_v58  ;;  %1145 = vmatprep.subr.bf16.mxu0 %v1729_v59 }
  0xb0   : > { %1186 = vmatprep.subr.bf16.mxu1 %v1732_v60 }
  0xb2   : > { %1146 = vmatpush1.bf16.msra.mxu0 %v1727_v61 }
  0xb3   : > { %1187 = vmatpush1.bf16.msra.mxu1 %v1730_v62  ;;  %1147 = vmatprep.subr.bf16.mxu0 %v1735_v63 }
  0xb4   : > { %1188 = vmatprep.subr.bf16.mxu1 %v1738_v0 }
  0xb6   : > { %1148 = vmatpush1.bf16.msra.mxu0 %v1733_v1 }
  0xb7   : > { %1189 = vmatpush1.bf16.msra.mxu1 %v1736_v2  ;;  %1149 = vmatprep.subr.bf16.mxu0 %v1741_v3 }
  0xb8   : > { %1190 = vmatprep.subr.bf16.mxu1 %v1744_v4 }
  0xba   : > { %1150 = vmatpush1.bf16.msra.mxu0 %v1739_v5 }
  0xbb   : > { %1191 = vmatpush1.bf16.msra.mxu1 %v1742_v6 }
  0xbd   : > { %1152 = vmatmul.mubr.bf16.vlgmr.msra.gmra.mrb[4].mxu0 %v2044_v7 }
  0xbe   : > { %1193 = vmatmul.mubr.bf16.vlgmr.msra.gmra.mrb[4].mxu1 %v2046_v8 }
 0x150   : > { %v1071_v9 = vpop.f32.mrb[0].mxu0 }
 0x151   : > { %v1112_v11 = vpop.f32.mrb[0].mxu1  ;;  %v1073_v13 = vpop.f32.mrb[1].mxu0 }
 0x152   : > { %v1113_v12 = vadd.f32 %v1112_v11, %v1071_v9  ;;  %v1114_v15 = vpop.f32.mrb[1].mxu1  ;;  %v1075_v17 = vpop.f32.mrb[2].mxu0 }
 0x153   : > { %v1115_v16 = vadd.f32 %v1114_v15, %v1073_v13  ;;  %v1116_v18 = vpop.f32.mrb[2].mxu1  ;;  %v1076_v7 = vpop.f32.mrb[3].mxu0 }
 0x154   : > { %v1201_v19 = vadd.f32 %v1113_v12, %v249_v10  ;;  %v1117_v20 = vpop.f32.mrb[3].mxu1 }
 0x155   : > { %v1202_v8 = vadd.f32 %v1115_v16, %v250_v14 }
 0x156   : > { %1205 = vst [vmem:[%s2188_s3] sm:$0xff] %v1201_v19 }
 0x157   : > { %1206 = vst [vmem:[%s2188_s3 + $0x8] sm:$0xff] %v1202_v8 }
 0x15d   : > { %v1213_v38 = vld [vmem:[%s2188_s3] sm:$0xff] (!%p1485_p7) }
 0x15e   : > { %v1214_v43 = vld [vmem:[%s2188_s3 + $0x8] sm:$0xff] (!%p1485_p7)  ;;  %v1239_v50 = vadd.f32 (!%p1485_p7), %v1222_v46, %v1213_v38 }
 0x15f   : > { %v1240_v51 = vadd.f32 (!%p1485_p7), %v1226_v47, %v1214_v43 }
 0x160   : > { %v1243_v54 = vmax.f32 (!%p1485_p7), %v1239_v50, 0.0 }
 0x161   : > { %v1244_v55 = vmax.f32 (!%p1485_p7), %v1240_v51, 0.0 }
 0x162   : > { %1247 = vst [vmem:[%s2188_s3] sm:$0xff] (!%p1485_p7), %v1243_v54 }
 0x163   : > { %1248 = vst [vmem:[%s2188_s3 + $0x8] sm:$0xff] (!%p1485_p7), %v1244_v55 }
 0x190   : > { %v1153_v21 = vpop.f32.mrb[4].mxu0 }
 0x191   : > { %v1194_v23 = vpop.f32.mrb[4].mxu1  ;;  %v1155_v25 = vpop.f32.mrb[5].mxu0  ;;  %1212 = sbr.rel (%p1485_p7) target bundleno = 420 (0x1a4), region = 44 }
 0x192   : > { %v1195_v24 = vadd.f32 %v1194_v23, %v1153_v21  ;;  %v1196_v27 = vpop.f32.mrb[5].mxu1  ;;  %v1157_v29 = vpop.f32.mrb[6].mxu0 }
 0x193   : > { %v1197_v28 = vadd.f32 %v1196_v27, %v1155_v25  ;;  %v1198_v30 = vpop.f32.mrb[6].mxu1  ;;  %v1158_v32 = vpop.f32.mrb[7].mxu0 }
 0x194   : > { %v1203_v31 = vadd.f32 %v1195_v24, %v251_v22  ;;  %v1199_v33 = vpop.f32.mrb[7].mxu1 }
 0x195   : > { %v1204_v34 = vadd.f32 %v1197_v28, %v252_v26 }
 0x196   : > { %1207 = vst [vmem:[%s2188_s3 + $0x10] sm:$0xff] %v1203_v31 }
 0x197   : > { %1208 = vst [vmem:[%s2188_s3 + $0x18] sm:$0xff] %v1204_v34 }
 0x19d   : > { %v1215_v44 = vld [vmem:[%s2188_s3 + $0x10] sm:$0xff] }
 0x19e   : > { %v1216_v45 = vld [vmem:[%s2188_s3 + $0x18] sm:$0xff]  ;;  %v1241_v52 = vadd.f32 %v1230_v48, %v1215_v44 }
 0x19f   : > { %v1242_v53 = vadd.f32 %v1234_v49, %v1216_v45 }
 0x1a0   : > { %v1245_v56 = vmax.f32 %v1241_v52, 0.0 }
 0x1a1   : > { %v1246_v57 = vmax.f32 %v1242_v53, 0.0 }
 0x1a2   : > { %1249 = vst [vmem:[%s2188_s3 + $0x10] sm:$0xff] %v1245_v56 }
 0x1a3   : > { %1250 = vst [vmem:[%s2188_s3 + $0x18] sm:$0xff] %v1246_v57 }
 0x1a4 PF: > { %s16_s17 = sadd.s32 1, %s1825_s17   ;;  %s2192_s12 = smov %s1809_s13 }
 0x1a5   : > { %p13_p5 = scmp.ge.s32.totalorder %s16_s17, 11   ;;  %s2193_s13 = smov %s1813_s14 }
 0x1a6   : > { %s2194_s14 = smov %s1900_s24  ;;  %s2195_s15 = smov %s1821_s16 }
 0x1a7   : > { %s2196_s16 = smov %s2198_s19  ;;  %15 = sbr.rel (!%p13_p5) target bundleno = 4 (0x4), region = 83 }
 0x1ae   :  { %1272 = vsyncpa [#allocation3], 1 }
 0x1af   :  { %1274 = vsyncpa [#allocation3 + $0x1], 1 }

// kernel: resnet34_forward.77
= control target key start
LH: loop header
LB: loop body
LE: loop exit
PB: predicated region body
PF: predicated region fallthrough
CT: control target
= control target key end

     0   :  { %s929_s1 = inlined_call_operand.vmem [shape: bf16[512,256], index: 1, kind: input, shape index: {}]   ;;  %s930_s0 = inlined_call_operand.vmem [shape: bf16[8,512], index: 0, kind: input, shape index: {}]   ;;  %s931_s2 = inlined_call_operand.vmem [shape: f32[1,256], index: 2, kind: input, shape index: {}]   ;;  %s932_s3 = inlined_call_operand.vmem [shape: f32[8,256], index: 3, kind: output, shape index: {}]  }
   0x1   :  { %v602_v0 = vld [vmem:[%s929_s1 + $0x4] ss:$8 sps:$4 sm:$0xff]   ;;  %v606_v2 = vld [vmem:[%s929_s1] ss:$8 sps:$4 sm:$0xff]   ;;  %v608_v4 = vld [vmem:[%s929_s1 + $0x14] ss:$8 sps:$4 sm:$0xff]  }
   0x2   :  { %v604_v1 = vld [vmem:[%s929_s1 + $0x104] ss:$8 sps:$4 sm:$0xff]   ;;  %422 = vmatprep.subr.bf16.mxu0 %v602_v0  ;;  %v607_v3 = vld [vmem:[%s929_s1 + $0x100] ss:$8 sps:$4 sm:$0xff]   ;;  %v610_v5 = vld [vmem:[%s929_s1 + $0x114] ss:$8 sps:$4 sm:$0xff]  }
   0x3   :  { %463 = vmatprep.subr.bf16.mxu1 %v604_v1  ;;  %423 = vmatpush1.bf16.msra.mxu0 %v606_v2  ;;  %v612_v6 = vld [vmem:[%s929_s1 + $0x10] ss:$8 sps:$4 sm:$0xff]   ;;  %v614_v8 = vld [vmem:[%s929_s1 + $0x24] ss:$8 sps:$4 sm:$0xff]   ;;  %v618_v10 = vld [vmem:[%s929_s1 + $0x20] ss:$8 sps:$4 sm:$0xff]  }
   0x4   :  { %464 = vmatpush1.bf16.msra.mxu1 %v607_v3  ;;  %424 = vmatprep.subr.bf16.mxu0 %v608_v4  ;;  %v613_v7 = vld [vmem:[%s929_s1 + $0x110] ss:$8 sps:$4 sm:$0xff]   ;;  %v616_v9 = vld [vmem:[%s929_s1 + $0x124] ss:$8 sps:$4 sm:$0xff]   ;;  %v619_v11 = vld [vmem:[%s929_s1 + $0x120] ss:$8 sps:$4 sm:$0xff]  }
   0x5   :  { %465 = vmatprep.subr.bf16.mxu1 %v610_v5  ;;  %v620_v12 = vld [vmem:[%s929_s1 + $0x34] ss:$8 sps:$4 sm:$0xff]   ;;  %v624_v14 = vld [vmem:[%s929_s1 + $0x30] ss:$8 sps:$4 sm:$0xff]   ;;  %v626_v16 = vld [vmem:[%s929_s1 + $0x44] ss:$8 sps:$4 sm:$0xff]  }
   0x6   :  { %v622_v13 = vld [vmem:[%s929_s1 + $0x134] ss:$8 sps:$4 sm:$0xff]   ;;  %v625_v15 = vld [vmem:[%s929_s1 + $0x130] ss:$8 sps:$4 sm:$0xff]   ;;  %v628_v17 = vld [vmem:[%s929_s1 + $0x144] ss:$8 sps:$4 sm:$0xff]  }
   0x7   :  { %425 = vmatpush1.bf16.msra.mxu0 %v612_v6  ;;  %v630_v18 = vld [vmem:[%s929_s1 + $0x40] ss:$8 sps:$4 sm:$0xff]   ;;  %v632_v20 = vld [vmem:[%s929_s1 + $0x54] ss:$8 sps:$4 sm:$0xff]   ;;  %v636_v22 = vld [vmem:[%s929_s1 + $0x50] ss:$8 sps:$4 sm:$0xff]   ;;  %v515_v6 = vlaneseq }
   0x8   :  { %466 = vmatpush1.bf16.msra.mxu1 %v613_v7  ;;  %426 = vmatprep.subr.bf16.mxu0 %v614_v8  ;;  %v631_v19 = vld [vmem:[%s929_s1 + $0x140] ss:$8 sps:$4 sm:$0xff]   ;;  %v634_v21 = vld [vmem:[%s929_s1 + $0x154] ss:$8 sps:$4 sm:$0xff]   ;;  %v637_v23 = vld [vmem:[%s929_s1 + $0x150] ss:$8 sps:$4 sm:$0xff]  }
   0x9   :  { %467 = vmatprep.subr.bf16.mxu1 %v616_v9  ;;  %v638_v24 = vld [vmem:[%s929_s1 + $0x64] ss:$8 sps:$4 sm:$0xff]   ;;  %v642_v26 = vld [vmem:[%s929_s1 + $0x60] ss:$8 sps:$4 sm:$0xff]   ;;  %v644_v28 = vld [vmem:[%s929_s1 + $0x74] ss:$8 sps:$4 sm:$0xff]  }
   0xa   :  { %v640_v25 = vld [vmem:[%s929_s1 + $0x164] ss:$8 sps:$4 sm:$0xff]   ;;  %v643_v27 = vld [vmem:[%s929_s1 + $0x160] ss:$8 sps:$4 sm:$0xff]   ;;  %v646_v29 = vld [vmem:[%s929_s1 + $0x174] ss:$8 sps:$4 sm:$0xff]  }
   0xb   :  { %427 = vmatpush1.bf16.msra.mxu0 %v618_v10  ;;  %v648_v30 = vld [vmem:[%s929_s1 + $0x70] ss:$8 sps:$4 sm:$0xff]   ;;  %v650_v32 = vld [vmem:[%s929_s1 + $0x84] ss:$8 sps:$4 sm:$0xff]   ;;  %v654_v34 = vld [vmem:[%s929_s1 + $0x80] ss:$8 sps:$4 sm:$0xff]  }
   0xc   :  { %468 = vmatpush1.bf16.msra.mxu1 %v619_v11  ;;  %428 = vmatprep.subr.bf16.mxu0 %v620_v12  ;;  %v649_v31 = vld [vmem:[%s929_s1 + $0x170] ss:$8 sps:$4 sm:$0xff]   ;;  %v652_v33 = vld [vmem:[%s929_s1 + $0x184] ss:$8 sps:$4 sm:$0xff]   ;;  %v655_v35 = vld [vmem:[%s929_s1 + $0x180] ss:$8 sps:$4 sm:$0xff]  }
   0xd   :  { %469 = vmatprep.subr.bf16.mxu1 %v622_v13  ;;  %v656_v36 = vld [vmem:[%s929_s1 + $0x94] ss:$8 sps:$4 sm:$0xff]   ;;  %v660_v38 = vld [vmem:[%s929_s1 + $0x90] ss:$8 sps:$4 sm:$0xff]   ;;  %v662_v40 = vld [vmem:[%s929_s1 + $0xa4] ss:$8 sps:$4 sm:$0xff]  }
   0xe   :  { %v658_v37 = vld [vmem:[%s929_s1 + $0x194] ss:$8 sps:$4 sm:$0xff]   ;;  %v661_v39 = vld [vmem:[%s929_s1 + $0x190] ss:$8 sps:$4 sm:$0xff]   ;;  %v664_v41 = vld [vmem:[%s929_s1 + $0x1a4] ss:$8 sps:$4 sm:$0xff]  }
   0xf   :  { %429 = vmatpush1.bf16.msra.mxu0 %v624_v14  ;;  %v666_v42 = vld [vmem:[%s929_s1 + $0xa0] ss:$8 sps:$4 sm:$0xff]   ;;  %v668_v44 = vld [vmem:[%s929_s1 + $0xb4] ss:$8 sps:$4 sm:$0xff]   ;;  %v672_v49 = vld [vmem:[%s929_s1 + $0xb0] ss:$8 sps:$4 sm:$0xff]  }
  0x10   :  { %470 = vmatpush1.bf16.msra.mxu1 %v625_v15  ;;  %430 = vmatprep.subr.bf16.mxu0 %v626_v16  ;;  %v667_v43 = vld [vmem:[%s929_s1 + $0x1a0] ss:$8 sps:$4 sm:$0xff]   ;;  %v670_v45 = vld [vmem:[%s929_s1 + $0x1b4] ss:$8 sps:$4 sm:$0xff]   ;;  %v673_v50 = vld [vmem:[%s929_s1 + $0x1b0] ss:$8 sps:$4 sm:$0xff]  }
  0x11   :  { %471 = vmatprep.subr.bf16.mxu1 %v628_v17  ;;  %v22_v46 = vld [vmem:[%s930_s0] sm:$0xff]  ;;  %v23_v48 = vld [vmem:[%s930_s0 + $0x8] sm:$0xff]  ;;  %v680_v56 = vld [vmem:[%s929_s1 + $0xd4] ss:$8 sps:$4 sm:$0xff]   ;;  %v516_v7 = vshrl.u32 %v515_v6, 7 }
  0x12   :  { %v534_v47 = vcombine.high %v22_v46, %v22_v46  ;;  %v536_v51 = vcombine.high %v23_v48, %v23_v48  ;;  %v674_v52 = vld [vmem:[%s929_s1 + $0xc4] ss:$8 sps:$4 sm:$0xff]   ;;  %v678_v54 = vld [vmem:[%s929_s1 + $0xc0] ss:$8 sps:$4 sm:$0xff]   ;;  %v682_v57 = vld [vmem:[%s929_s1 + $0x1d4] ss:$8 sps:$4 sm:$0xff]   ;;  %v533_v4 = vcombine.low %v22_v46, %v22_v46  ;;  %v535_v5 = vcombine.low %v23_v48, %v23_v48 }
  0x13   :  { %431 = vmatpush1.bf16.msra.mxu0 %v630_v18  ;;  %v676_v53 = vld [vmem:[%s929_s1 + $0x1c4] ss:$8 sps:$4 sm:$0xff]   ;;  %v679_v55 = vld [vmem:[%s929_s1 + $0x1c0] ss:$8 sps:$4 sm:$0xff]   ;;  %v684_v58 = vld [vmem:[%s929_s1 + $0xd0] ss:$8 sps:$4 sm:$0xff]  }
  0x14   :  { %472 = vmatpush1.bf16.msra.mxu1 %v631_v19  ;;  %432 = vmatprep.subr.bf16.mxu0 %v632_v20  ;;  %v685_v59 = vld [vmem:[%s929_s1 + $0x1d0] ss:$8 sps:$4 sm:$0xff]   ;;  %v686_v60 = vld [vmem:[%s929_s1 + $0xe4] ss:$8 sps:$4 sm:$0xff]   ;;  %v690_v62 = vld [vmem:[%s929_s1 + $0xe0] ss:$8 sps:$4 sm:$0xff]  }
  0x15   :  { %473 = vmatprep.subr.bf16.mxu1 %v634_v21  ;;  %454 = vmatprep.mubr.bf16.mxu0 %v534_v47  ;;  %v688_v61 = vld [vmem:[%s929_s1 + $0x1e4] ss:$8 sps:$4 sm:$0xff]   ;;  %v691_v63 = vld [vmem:[%s929_s1 + $0x1e0] ss:$8 sps:$4 sm:$0xff]   ;;  %v692_v0 = vld [vmem:[%s929_s1 + $0xf4] ss:$8 sps:$4 sm:$0xff]  }
  0x16   :  { %495 = vmatprep.mubr.bf16.mxu1 %v536_v51  ;;  %v694_v1 = vld [vmem:[%s929_s1 + $0x1f4] ss:$8 sps:$4 sm:$0xff]   ;;  %v696_v2 = vld [vmem:[%s929_s1 + $0xf0] ss:$8 sps:$4 sm:$0xff]   ;;  %v517_v8 = vsub.s32 0, %v516_v7  ;;  %v521_v10 = vsub.s32 1, %v516_v7 }
  0x17   :  { %433 = vmatpush1.bf16.msra.mxu0 %v636_v22  ;;  %v697_v3 = vld [vmem:[%s929_s1 + $0x1f0] ss:$8 sps:$4 sm:$0xff]   ;;  %v513_v9 = vld [vmem:[%s931_s2] sm:$0x3] }
  0x18   :  { %474 = vmatpush1.bf16.msra.mxu1 %v637_v23  ;;  %434 = vmatprep.subr.bf16.mxu0 %v638_v24  ;;  %v518_v14 = vrot.slane %v513_v9, %v517_v8  ;;  %v522_v18 = vrot.slane %v513_v9, %v521_v10 }
  0x19   :  { %475 = vmatprep.subr.bf16.mxu1 %v640_v25 }
  0x1b   :  { %435 = vmatpush1.bf16.msra.mxu0 %v642_v26 }
  0x1c   :  { %476 = vmatpush1.bf16.msra.mxu1 %v643_v27  ;;  %436 = vmatprep.subr.bf16.mxu0 %v644_v28 }
  0x1d   :  { %477 = vmatprep.subr.bf16.mxu1 %v646_v29 }
  0x1f   :  { %437 = vmatpush1.bf16.msra.mxu0 %v648_v30 }
  0x20   :  { %478 = vmatpush1.bf16.msra.mxu1 %v649_v31  ;;  %438 = vmatprep.subr.bf16.mxu0 %v650_v32 }
  0x21   :  { %479 = vmatprep.subr.bf16.mxu1 %v652_v33 }
  0x23   :  { %439 = vmatpush1.bf16.msra.mxu0 %v654_v34 }
  0x24   :  { %480 = vmatpush1.bf16.msra.mxu1 %v655_v35  ;;  %440 = vmatprep.subr.bf16.mxu0 %v656_v36 }
  0x25   :  { %481 = vmatprep.subr.bf16.mxu1 %v658_v37 }
  0x27   :  { %441 = vmatpush1.bf16.msra.mxu0 %v660_v38 }
  0x28   :  { %482 = vmatpush1.bf16.msra.mxu1 %v661_v39  ;;  %442 = vmatprep.subr.bf16.mxu0 %v662_v40 }
  0x29   :  { %483 = vmatprep.subr.bf16.mxu1 %v664_v41 }
  0x2b   :  { %443 = vmatpush1.bf16.msra.mxu0 %v666_v42 }
  0x2c   :  { %484 = vmatpush1.bf16.msra.mxu1 %v667_v43  ;;  %444 = vmatprep.subr.bf16.mxu0 %v668_v44 }
  0x2d   :  { %485 = vmatprep.subr.bf16.mxu1 %v670_v45 }
  0x2f   :  { %445 = vmatpush1.bf16.msra.mxu0 %v672_v49 }
  0x30   :  { %486 = vmatpush1.bf16.msra.mxu1 %v673_v50  ;;  %446 = vmatprep.subr.bf16.mxu0 %v674_v52 }
  0x31   :  { %487 = vmatprep.subr.bf16.mxu1 %v676_v53 }
  0x33   :  { %447 = vmatpush1.bf16.msra.mxu0 %v678_v54 }
  0x34   :  { %488 = vmatpush1.bf16.msra.mxu1 %v679_v55  ;;  %448 = vmatprep.subr.bf16.mxu0 %v680_v56 }
  0x35   :  { %489 = vmatprep.subr.bf16.mxu1 %v682_v57 }
  0x37   :  { %449 = vmatpush1.bf16.msra.mxu0 %v684_v58 }
  0x38   :  { %490 = vmatpush1.bf16.msra.mxu1 %v685_v59  ;;  %450 = vmatprep.subr.bf16.mxu0 %v686_v60 }
  0x39   :  { %491 = vmatprep.subr.bf16.mxu1 %v688_v61 }
  0x3b   :  { %451 = vmatpush1.bf16.msra.mxu0 %v690_v62 }
  0x3c   :  { %492 = vmatpush1.bf16.msra.mxu1 %v691_v63  ;;  %452 = vmatprep.subr.bf16.mxu0 %v692_v0 }
  0x3d   :  { %493 = vmatprep.subr.bf16.mxu1 %v694_v1 }
  0x3f   :  { %453 = vmatpush1.bf16.msra.mxu0 %v696_v2 }
  0x40   :  { %494 = vmatpush1.bf16.msra.mxu1 %v697_v3 }
  0x42   :  { %455 = vmatmul.mubr.bf16.vlgmr.msra.gmra.mrb[0].mxu0 %v533_v4 }
  0x43   :  { %496 = vmatmul.mubr.bf16.vlgmr.msra.gmra.mrb[0].mxu1 %v535_v5 }
 0x115   :  { %v456_v11 = vpop.f32.mrb[0].mxu0 }
 0x116   :  { %v497_v12 = vpop.f32.mrb[0].mxu1  ;;  %v458_v15 = vpop.f32.mrb[1].mxu0 }
 0x117   :  { %v498_v13 = vadd.f32 %v497_v12, %v456_v11  ;;  %v499_v16 = vpop.f32.mrb[1].mxu1  ;;  %v460_v19 = vpop.f32.mrb[2].mxu0 }
 0x118   :  { %v500_v17 = vadd.f32 %v499_v16, %v458_v15  ;;  %v501_v20 = vpop.f32.mrb[2].mxu1  ;;  %v461_v21 = vpop.f32.mrb[3].mxu0 }
 0x119   :  { %v502_v22 = vpop.f32.mrb[3].mxu1  ;;  %v525_v23 = vadd.f32 %v518_v14, %v498_v13 }
 0x11a   :  { %v526_v24 = vadd.f32 %v522_v18, %v500_v17 }
 0x11b   :  { %527 = vst [vmem:[%s932_s3] sm:$0xff] %v525_v23 }
 0x11c   :  { %528 = vst [vmem:[%s932_s3 + $0x8] sm:$0xff] %v526_v24 }

</bundles_post_ra>
